<compile_context>
chip_gen: v7x
topology: tpu7x:2x2x1
jax: 0.10.0
libtpu: 0.0.40
codegen_flags: <defaults>
</compile_context>

<pallas_src>
import functools

import jax
import jax.numpy as jnp
from jax.experimental import pallas as pl
from jax.experimental.pallas import tpu as pltpu


def _ceil_to(x, m):
    return (x + m - 1) // m * m


# ---- static problem sizes implied by the torch module -----------------------
# Linear(272322 = 18*123*123, 500)  =>  510x510 RGB input.
CIN, H_IN, W_IN = 3, 510, 510
COUT1, COUT2 = 9, 18
KH = KW = 8
STRIDE = 2
K1 = CIN * KH * KW                  # 192
K2 = COUT1 * KH * KW                # 576
OH2 = OW2 = 123
K3 = COUT2 * OH2 * OW2              # 272322
N3, N4 = 500, 13

# ---- tiling ------------------------------------------------------------------
COUT1_P = 16            # conv1 out-channels padded to a bf16 sublane tile
COUT2_P = 32            # conv2 out-channels padded to a FULL bf16 sublane tile
CONV1_TN = 2048         # lane tile for conv1 matmul (spatial dim)
CONV2_TN = 2048         # lane tile for conv2 matmul
FC1_TK = 9728           # 28 * 9728 = 272384 -> only 62 zero rows of K padding
FC1_TN = 256            # 2 N blocks -> FC1 N axis can shard across v7x's 2 TCs
KP3 = _ceil_to(K3, FC1_TK)      # 272384
N3P = _ceil_to(N3, FC1_TN)      # 512
K4P = N3P                        # 512
N4P = 128


# ------------------------------ Pallas kernels --------------------------------


def _conv_mm_kernel(w_ref, p_ref, b_ref, o_ref):
    # (Cout_pad, K) @ (K, tn): full K in a single block -> no accumulator,
    # no k-loop; bias + ReLU fused; lane-dense output stores.
    acc = jnp.dot(w_ref[...], p_ref[...], preferred_element_type=jnp.float32)
    acc = acc + b_ref[...]
    o_ref[...] = jnp.maximum(acc, 0.0).astype(o_ref.dtype)


def conv_matmul_relu(w_t, patches_t, bias_col, *, tn):
    """ReLU((Cout_pad,K) @ (K,Mp) + b) with the big spatial dim on lanes."""
    cout_p, K = w_t.shape
    K2_, Mp = patches_t.shape
    assert K == K2_ and Mp % tn == 0
    return pl.pallas_call(
        _conv_mm_kernel,
        out_shape=jax.ShapeDtypeStruct((cout_p, Mp), patches_t.dtype),
        grid_spec=pltpu.PrefetchScalarGridSpec(
            num_scalar_prefetch=0,
            grid=(Mp // tn,),
            in_specs=[
                pl.BlockSpec((cout_p, K), lambda n: (0, 0)),   # resident weight
                pl.BlockSpec((K, tn), lambda n: (0, n)),
                pl.BlockSpec((cout_p, 1), lambda n: (0, 0)),
            ],
            out_specs=pl.BlockSpec((cout_p, tn), lambda n: (0, n)),
        ),
        compiler_params=pltpu.CompilerParams(
            dimension_semantics=("parallel",)),
    )(w_t, patches_t, bias_col)


def _matmul_bias_kernel(a_ref, w_ref, b_ref, o_ref, acc_ref, *, relu):
    k = pl.program_id(2)

    @pl.when(k == 0)
    def _():
        acc_ref[...] = jnp.zeros_like(acc_ref)

    acc_ref[...] += jnp.dot(a_ref[...], w_ref[...],
                            preferred_element_type=jnp.float32)

    @pl.when(k == pl.num_programs(2) - 1)
    def _():
        out = acc_ref[...] + b_ref[...]
        if relu:
            out = jnp.maximum(out, 0.0)
        o_ref[...] = out.astype(o_ref.dtype)


def matmul_bias_relu(a_p, w_p, b_p, *, tm, tk, tn, relu=True,
                     out_dtype=jnp.float32):
    """Tiled (Mp,Kp)@(Kp,Np)+b (+ReLU); operands are already padded/laid out."""
    Mp, Kp = a_p.shape
    Kp2, Np = w_p.shape
    assert Kp == Kp2 and Mp % tm == 0 and Kp % tk == 0 and Np % tn == 0
    return pl.pallas_call(
        functools.partial(_matmul_bias_kernel, relu=relu),
        out_shape=jax.ShapeDtypeStruct((Mp, Np), out_dtype),
        grid_spec=pltpu.PrefetchScalarGridSpec(
            num_scalar_prefetch=0,
            grid=(Mp // tm, Np // tn, Kp // tk),
            in_specs=[
                pl.BlockSpec((tm, tk), lambda i, j, k: (i, k)),
                pl.BlockSpec((tk, tn), lambda i, j, k: (k, j)),
                pl.BlockSpec((1, tn), lambda i, j, k: (0, j)),
            ],
            out_specs=pl.BlockSpec((tm, tn), lambda i, j, k: (i, j)),
            scratch_shapes=[pltpu.VMEM((tm, tn), jnp.float32)],
        ),
        compiler_params=pltpu.CompilerParams(
            dimension_semantics=("parallel", "parallel", "arbitrary")),
    )(a_p, w_p, b_p)


def _linear_relu_softmax_kernel(a_ref, w_ref, b_ref, o_ref, *, n_valid):
    logits = jnp.dot(a_ref[...], w_ref[...],
                     preferred_element_type=jnp.float32) + b_ref[...]
    logits = jnp.maximum(logits, 0.0)                      # ReLU
    lane = jax.lax.broadcasted_iota(jnp.int32, logits.shape, 1)
    masked = jnp.where(lane < n_valid, logits, -jnp.inf)   # ignore padded lanes
    m = jnp.max(masked, axis=-1, keepdims=True)
    e = jnp.exp(masked - m)
    s = jnp.sum(e, axis=-1, keepdims=True)
    o_ref[...] = (e / s).astype(o_ref.dtype)


def linear_relu_softmax(a_p, w_p, b_p, n_valid):
    """Fused Linear + ReLU + Softmax(dim=1); everything fits one VMEM block."""
    Mp, _ = a_p.shape
    _, Np = w_p.shape
    return pl.pallas_call(
        functools.partial(_linear_relu_softmax_kernel, n_valid=n_valid),
        out_shape=jax.ShapeDtypeStruct((Mp, Np), jnp.float32),
    )(a_p, w_p, b_p)


# -------------------------------- JAX glue ------------------------------------


def _im2col_kbym(x_cbhw, kh, kw, stride, m_multiple):
    """Patch matrix in (K, M) layout from a channel-major (C, B, H, W) input.

    Rows k = (c, kh, kw) in torch weight.reshape(Cout, Cin*KH*KW) order,
    cols m = (b, oh, ow).  Because the input is already channel-major, the
    stack + reshape is layout-preserving: the big patch tensor is produced by
    one XLA gather fusion with NO transpose, and the trailing lane pad fuses
    into the same fusion (perf review item #2).
    """
    # TODO(synk): fully fusing this gather into the Pallas conv kernel (review
    # item #1) needs a per-K-row VMEM scatter that is sublane-sparse on TPU;
    # kept as an XLA fusion feeding the lane-dense Pallas matmul instead.
    C, B, H, W = x_cbhw.shape
    oh = (H - kh) // stride + 1
    ow = (W - kw) // stride + 1
    cols = []
    for i in range(kh):
        for j in range(kw):
            cols.append(
                x_cbhw[:, :, i:i + stride * oh:stride, j:j + stride * ow:stride])
    p = jnp.stack(cols, axis=1)                 # (C, KH*KW, B, oh, ow)
    p = p.reshape(C * kh * kw, B * oh * ow)     # (K, M) -- contiguous reshape
    m = B * oh * ow
    mp = _ceil_to(m, m_multiple)
    p = jnp.pad(p, ((0, 0), (0, mp - m)))
    return p, oh, ow, m


def cnn_forward(x, params):
    w1t, b1c, w2t, b2c, w3p, b3p, w4p, b4p = params
    B = x.shape[0]
    cdt = w1t.dtype   # bf16

    # Keep activations channel-major (C, B, H, W) end to end so neither conv's
    # patch tensor ever needs a transpose; only the ~3 MB input is transposed.
    x_cb = x.astype(cdt).transpose(1, 0, 2, 3)                   # (3, B, 510, 510)

    # Conv2d(3, 9, 8, stride=2) + ReLU   ->  (Cout_pad, K) @ (K, M)
    p1, oh1, ow1, m1 = _im2col_kbym(x_cb, KH, KW, STRIDE, CONV1_TN)
    y1 = conv_matmul_relu(w1t, p1, b1c, tn=CONV1_TN)             # (16, Mp1) bf16
    y1 = y1[:COUT1, :m1].reshape(COUT1, B, oh1, ow1)             # channel-major

    # Conv2d(9, 18, 8, stride=2) + ReLU
    p2, oh2, ow2, m2 = _im2col_kbym(y1, KH, KW, STRIDE, CONV2_TN)
    y2 = conv_matmul_relu(w2t, p2, b2c, tn=CONV2_TN)             # (32, Mp2) bf16

    # Flatten in torch (per-batch channel-major) order -> (B, 272322); this
    # ~1 MB tensor is the only thing transposed.  K pads by just 62 zero cols.
    flat = (y2[:COUT2, :m2].reshape(COUT2, B, oh2, ow2)
            .transpose(1, 0, 2, 3).reshape(B, COUT2 * oh2 * ow2))
    flat_p = jnp.pad(flat, ((0, 0), (0, KP3 - flat.shape[1])))   # (B, 272384)

    # Linear(272322, 500) + ReLU : bf16 operands, f32 accumulation on the MXU.
    # grid = (1, 2, 28); the N axis (2 blocks of 256) stays "parallel" so v7x
    # splits the 279 MB weight stream across both TensorCores.
    h = matmul_bias_relu(flat_p, w3p, b3p, tm=B, tk=FC1_TK, tn=FC1_TN,
                         relu=True, out_dtype=cdt)               # (B, 512) bf16

    # Linear(500, 13) + ReLU + Softmax(dim=1)  (single fused bf16-MXU kernel)
    out = linear_relu_softmax(h, w4p, b4p, n_valid=N4)           # (B, 128) f32
    return out[:, :N4]


def init_params(key, dtype=jnp.bfloat16):
    """Weights stored pre-laid-out / pre-padded / pre-cast so the jitted
    forward never pads, casts or transposes a weight.

    Mapping to the torch module (values random, layout exact):
      conv1.weight (9,3,8,8)    -> w1t (16, 192)     rows=Cout(pad0), cols=(Cin,KH,KW)
      conv1.bias   (9,)         -> b1c (16, 1)       f32
      conv2.weight (18,9,8,8)   -> w2t (32, 576)     bf16
      conv2.bias   (18,)        -> b2c (32, 1)       f32
      fc1.weight   (500,272322) -> w3p (272384, 512) = pad(weight.T), bf16
      fc1.bias     (500,)       -> b3p (1, 512)      f32
      fc2.weight   (13,500)     -> w4p (512, 128)    = pad(weight.T), bf16
      fc2.bias     (13,)        -> b4p (1, 128)      f32
    """
    ks = jax.random.split(key, 8)

    def u(k, shape, fan_in):
        bound = 1.0 / jnp.sqrt(jnp.float32(fan_in))
        return jax.random.uniform(k, shape, jnp.float32, -bound, bound)

    def pad2(a, r, c):
        return jnp.pad(a, ((0, r - a.shape[0]), (0, c - a.shape[1])))

    w1t = pad2(u(ks[0], (COUT1, K1), K1), COUT1_P, K1).astype(dtype)
    b1c = pad2(u(ks[1], (COUT1, 1), K1), COUT1_P, 1)               # f32
    w2t = pad2(u(ks[2], (COUT2, K2), K2), COUT2_P, K2).astype(dtype)
    b2c = pad2(u(ks[3], (COUT2, 1), K2), COUT2_P, 1)               # f32

    w3 = u(ks[4], (K3, N3), K3)                 # == torch fc1.weight.T
    w3p = pad2(w3, KP3, N3P).astype(dtype)      # pad + bf16 done ONCE here
    b3p = jnp.pad(u(ks[5], (N3,), K3), (0, N3P - N3)).reshape(1, N3P)

    w4 = u(ks[6], (N3, N4), N3)                 # == torch fc2.weight.T
    w4p = pad2(w4, K4P, N4P).astype(dtype)      # bf16
    b4p = jnp.pad(u(ks[7], (N4,), N3), (0, N4P - N4)).reshape(1, N4P)
    return (w1t, b1c, w2t, b2c, w3p, b3p, w4p, b4p)


if __name__ == "__main__":
    key = jax.random.PRNGKey(0)
    kx, kp = jax.random.split(key)
    # Input size implied by the module: Linear(272322 = 18*123*123) => 510x510 RGB.
    x = jax.random.normal(kx, (2, 3, 510, 510), jnp.float32)
    params = init_params(kp)

    out = jax.jit(cnn_forward)(x, params)
    out = jax.block_until_ready(out)

    assert out.shape == (2, 13), out.shape
    assert bool(jnp.all(jnp.abs(jnp.sum(out, axis=1) - 1.0) < 1e-4))
    print("KERNEL_OK")
</pallas_src>

<mosaic_0001>
module attributes {stable_mosaic.version = 11 : i64} {
  func.func private @main(%arg0: i32) attributes {dimension_semantics = [#tpu.dimension_semantics<core_parallel>], iteration_bounds = array<i64: 2>, tpu.core_type = #tpu.core_type<sc_scalar_subcore>, window_params = []} {
    return
  }
}

module attributes {stable_mosaic.version = 11 : i64} {
  func.func private @main(%arg0: i32) attributes {dimension_semantics = [#tpu.dimension_semantics<core_parallel>], iteration_bounds = array<i64: 2>, tpu.core_type = #tpu.core_type<sc_scalar_subcore>, window_params = []} {
    return
  }
}

module attributes {stable_mosaic.version = 11 : i64} {
  func.func @_conv_mm_kernel(%arg0: i32, %arg1: memref<16x192xbf16, #tpu.memory_space<vmem>>, %arg2: memref<192x2048xbf16, #tpu.memory_space<vmem>>, %arg3: memref<16x1xf32, #tpu.memory_space<vmem>>, %arg4: memref<16x2048xbf16, #tpu.memory_space<vmem>>) attributes {dimension_semantics = [#tpu.dimension_semantics<parallel>], iteration_bounds = array<i64: 63>, scalar_prefetch = 0 : i64, scratch_operands = 0 : i64, tpu.core_type = #tpu.core_type<tc>, window_params = [{pipeline_mode = #tpu.pipeline_mode<synchronous>, transform_indices = @transform_0, window_bounds = array<i64: 16, 192>}, {transform_indices = @transform_1, window_bounds = array<i64: 192, 2048>}, {pipeline_mode = #tpu.pipeline_mode<synchronous>, transform_indices = @transform_2, window_bounds = array<i64: 16, 1>}, {transform_indices = @transform_3, window_bounds = array<i64: 16, 2048>}]} {
    %c0 = arith.constant 0 : index
    %c0_0 = arith.constant 0 : index
    %0 = vector.load %arg1[%c0, %c0_0] : memref<16x192xbf16, #tpu.memory_space<vmem>>, vector<16x192xbf16>
    %c0_1 = arith.constant 0 : index
    %c0_2 = arith.constant 0 : index
    %1 = vector.load %arg2[%c0_1, %c0_2] : memref<192x2048xbf16, #tpu.memory_space<vmem>>, vector<192x2048xbf16>
    %cst = arith.constant dense<0.000000e+00> : vector<16x2048xf32>
    %2 = tpu.matmul %0, %1, %cst {dimension_numbers = #tpu.dot_dimension_numbers<[1], [0], [0], [1], [0, 0, 1, 1], [], []>} : vector<16x192xbf16>, vector<192x2048xbf16>, vector<16x2048xf32> -> vector<16x2048xf32>
    %c0_3 = arith.constant 0 : index
    %c0_4 = arith.constant 0 : index
    %3 = vector.load %arg3[%c0_3, %c0_4] : memref<16x1xf32, #tpu.memory_space<vmem>>, vector<16x1xf32>
    %4 = vector.broadcast %3 : vector<16x1xf32> to vector<16x2048xf32>
    %5 = arith.addf %2, %4 : vector<16x2048xf32>
    %cst_5 = arith.constant 0.000000e+00 : f32
    %6 = vector.broadcast %cst_5 : f32 to vector<16x2048xf32>
    %7 = arith.maximumf %5, %6 : vector<16x2048xf32>
    %8 = arith.truncf %7 : vector<16x2048xf32> to vector<16x2048xbf16>
    %c0_6 = arith.constant 0 : index
    %c0_7 = arith.constant 0 : index
    %9 = vector.load %arg4[%c0_6, %c0_7] : memref<16x2048xbf16, #tpu.memory_space<vmem>>, vector<16x2048xbf16>
    tpu.vector_store %arg4[%c0_6, %c0_7], %8 {strides = array<i32>} : memref<16x2048xbf16, #tpu.memory_space<vmem>>, vector<16x2048xbf16>,
    return
  }
  func.func @transform_0(%arg0: i32) -> (i32, i32) {
    %c0_i32 = arith.constant 0 : i32
    %c0_i32_0 = arith.constant 0 : i32
    %c0_i32_1 = arith.constant 0 : i32
    return %c0_i32, %c0_i32_0 : i32, i32
  }
  func.func @transform_1(%arg0: i32) -> (i32, i32) {
    %c0_i32 = arith.constant 0 : i32
    %c0_i32_0 = arith.constant 0 : i32
    return %c0_i32, %arg0 : i32, i32
  }
  func.func @transform_2(%arg0: i32) -> (i32, i32) {
    %c0_i32 = arith.constant 0 : i32
    %c0_i32_0 = arith.constant 0 : i32
    %c0_i32_1 = arith.constant 0 : i32
    return %c0_i32, %c0_i32_0 : i32, i32
  }
  func.func @transform_3(%arg0: i32) -> (i32, i32) {
    %c0_i32 = arith.constant 0 : i32
    %c0_i32_0 = arith.constant 0 : i32
    return %c0_i32, %arg0 : i32, i32
  }
}

module attributes {stable_mosaic.version = 11 : i64} {
  func.func @_conv_mm_kernel(%arg0: i32, %arg1: memref<32x576xbf16, #tpu.memory_space<vmem>>, %arg2: memref<576x2048xbf16, #tpu.memory_space<vmem>>, %arg3: memref<32x1xf32, #tpu.memory_space<vmem>>, %arg4: memref<32x2048xbf16, #tpu.memory_space<vmem>>) attributes {dimension_semantics = [#tpu.dimension_semantics<parallel>], iteration_bounds = array<i64: 15>, scalar_prefetch = 0 : i64, scratch_operands = 0 : i64, tpu.core_type = #tpu.core_type<tc>, window_params = [{pipeline_mode = #tpu.pipeline_mode<synchronous>, transform_indices = @transform_0, window_bounds = array<i64: 32, 576>}, {transform_indices = @transform_1, window_bounds = array<i64: 576, 2048>}, {pipeline_mode = #tpu.pipeline_mode<synchronous>, transform_indices = @transform_2, window_bounds = array<i64: 32, 1>}, {transform_indices = @transform_3, window_bounds = array<i64: 32, 2048>}]} {
    %c0 = arith.constant 0 : index
    %c0_0 = arith.constant 0 : index
    %0 = vector.load %arg1[%c0, %c0_0] : memref<32x576xbf16, #tpu.memory_space<vmem>>, vector<32x576xbf16>
    %c0_1 = arith.constant 0 : index
    %c0_2 = arith.constant 0 : index
    %1 = vector.load %arg2[%c0_1, %c0_2] : memref<576x2048xbf16, #tpu.memory_space<vmem>>, vector<576x2048xbf16>
    %cst = arith.constant dense<0.000000e+00> : vector<32x2048xf32>
    %2 = tpu.matmul %0, %1, %cst {dimension_numbers = #tpu.dot_dimension_numbers<[1], [0], [0], [1], [0, 0, 1, 1], [], []>} : vector<32x576xbf16>, vector<576x2048xbf16>, vector<32x2048xf32> -> vector<32x2048xf32>
    %c0_3 = arith.constant 0 : index
    %c0_4 = arith.constant 0 : index
    %3 = vector.load %arg3[%c0_3, %c0_4] : memref<32x1xf32, #tpu.memory_space<vmem>>, vector<32x1xf32>
    %4 = vector.broadcast %3 : vector<32x1xf32> to vector<32x2048xf32>
    %5 = arith.addf %2, %4 : vector<32x2048xf32>
    %cst_5 = arith.constant 0.000000e+00 : f32
    %6 = vector.broadcast %cst_5 : f32 to vector<32x2048xf32>
    %7 = arith.maximumf %5, %6 : vector<32x2048xf32>
    %8 = arith.truncf %7 : vector<32x2048xf32> to vector<32x2048xbf16>
    %c0_6 = arith.constant 0 : index
    %c0_7 = arith.constant 0 : index
    %9 = vector.load %arg4[%c0_6, %c0_7] : memref<32x2048xbf16, #tpu.memory_space<vmem>>, vector<32x2048xbf16>
    tpu.vector_store %arg4[%c0_6, %c0_7], %8 {strides = array<i32>} : memref<32x2048xbf16, #tpu.memory_space<vmem>>, vector<32x2048xbf16>,
    return
  }
  func.func @transform_0(%arg0: i32) -> (i32, i32) {
    %c0_i32 = arith.constant 0 : i32
    %c0_i32_0 = arith.constant 0 : i32
    %c0_i32_1 = arith.constant 0 : i32
    return %c0_i32, %c0_i32_0 : i32, i32
  }
  func.func @transform_1(%arg0: i32) -> (i32, i32) {
    %c0_i32 = arith.constant 0 : i32
    %c0_i32_0 = arith.constant 0 : i32
    return %c0_i32, %arg0 : i32, i32
  }
  func.func @transform_2(%arg0: i32) -> (i32, i32) {
    %c0_i32 = arith.constant 0 : i32
    %c0_i32_0 = arith.constant 0 : i32
    %c0_i32_1 = arith.constant 0 : i32
    return %c0_i32, %c0_i32_0 : i32, i32
  }
  func.func @transform_3(%arg0: i32) -> (i32, i32) {
    %c0_i32 = arith.constant 0 : i32
    %c0_i32_0 = arith.constant 0 : i32
    return %c0_i32, %arg0 : i32, i32
  }
}

module attributes {stable_mosaic.version = 11 : i64} {
  func.func @_matmul_bias_kernel(%arg0: i32, %arg1: i32, %arg2: i32, %arg3: memref<2x9728xbf16, #tpu.memory_space<vmem>>, %arg4: memref<9728x256xbf16, #tpu.memory_space<vmem>>, %arg5: memref<1x256xf32, #tpu.memory_space<vmem>>, %arg6: memref<2x256xbf16, #tpu.memory_space<vmem>>, %arg7: memref<2x256xf32, #tpu.memory_space<vmem>>) attributes {dimension_semantics = [#tpu.dimension_semantics<parallel>, #tpu.dimension_semantics<parallel>, #tpu.dimension_semantics<arbitrary>], iteration_bounds = array<i64: 1, 2, 28>, scalar_prefetch = 0 : i64, scratch_operands = 1 : i64, tpu.core_type = #tpu.core_type<tc>, window_params = [{transform_indices = @transform_0, window_bounds = array<i64: 2, 9728>}, {transform_indices = @transform_1, window_bounds = array<i64: 9728, 256>}, {transform_indices = @transform_2, window_bounds = array<i64: 1, 256>}, {transform_indices = @transform_3, window_bounds = array<i64: 2, 256>}]} {
    %c0_i32 = arith.constant 0 : i32
    %0 = arith.cmpi eq, %arg2, %c0_i32 : i32
    %1 = arith.extui %0 : i1 to i32
    %c0_i32_0 = arith.constant 0 : i32
    %2 = arith.cmpi ne, %1, %c0_i32_0 : i32
    scf.if %2 {
      %cst_9 = arith.constant 0.000000e+00 : f32
      %12 = vector.broadcast %cst_9 : f32 to vector<2x256xf32>
      %c0_10 = arith.constant 0 : index
      %c0_11 = arith.constant 0 : index
      %13 = vector.load %arg7[%c0_10, %c0_11] : memref<2x256xf32, #tpu.memory_space<vmem>>, vector<2x256xf32>
      tpu.vector_store %arg7[%c0_10, %c0_11], %12 {strides = array<i32>} : memref<2x256xf32, #tpu.memory_space<vmem>>, vector<2x256xf32>,
    } else {
    }
    %c0 = arith.constant 0 : index
    %c0_1 = arith.constant 0 : index
    %3 = vector.load %arg7[%c0, %c0_1] : memref<2x256xf32, #tpu.memory_space<vmem>>, vector<2x256xf32>
    %c0_2 = arith.constant 0 : index
    %c0_3 = arith.constant 0 : index
    %4 = vector.load %arg3[%c0_2, %c0_3] : memref<2x9728xbf16, #tpu.memory_space<vmem>>, vector<2x9728xbf16>
    %c0_4 = arith.constant 0 : index
    %c0_5 = arith.constant 0 : index
    %5 = vector.load %arg4[%c0_4, %c0_5] : memref<9728x256xbf16, #tpu.memory_space<vmem>>, vector<9728x256xbf16>
    %cst = arith.constant dense<0.000000e+00> : vector<2x256xf32>
    %6 = tpu.matmul %4, %5, %cst {dimension_numbers = #tpu.dot_dimension_numbers<[1], [0], [0], [1], [0, 0, 1, 1], [], []>} : vector<2x9728xbf16>, vector<9728x256xbf16>, vector<2x256xf32> -> vector<2x256xf32>
    %7 = arith.addf %3, %6 : vector<2x256xf32>
    %c0_6 = arith.constant 0 : index
    %c0_7 = arith.constant 0 : index
    %8 = vector.load %arg7[%c0_6, %c0_7] : memref<2x256xf32, #tpu.memory_space<vmem>>, vector<2x256xf32>
    tpu.vector_store %arg7[%c0_6, %c0_7], %7 {strides = array<i32>} : memref<2x256xf32, #tpu.memory_space<vmem>>, vector<2x256xf32>,
    %c27_i32 = arith.constant 27 : i32
    %9 = arith.cmpi eq, %arg2, %c27_i32 : i32
    %10 = arith.extui %9 : i1 to i32
    %c0_i32_8 = arith.constant 0 : i32
    %11 = arith.cmpi ne, %10, %c0_i32_8 : i32
    scf.if %11 {
      %c0_9 = arith.constant 0 : index
      %c0_10 = arith.constant 0 : index
      %12 = vector.load %arg7[%c0_9, %c0_10] : memref<2x256xf32, #tpu.memory_space<vmem>>, vector<2x256xf32>
      %c0_11 = arith.constant 0 : index
      %c0_12 = arith.constant 0 : index
      %13 = vector.load %arg5[%c0_11, %c0_12] : memref<1x256xf32, #tpu.memory_space<vmem>>, vector<1x256xf32>
      %14 = vector.broadcast %13 : vector<1x256xf32> to vector<2x256xf32>
      %15 = arith.addf %12, %14 : vector<2x256xf32>
      %cst_13 = arith.constant 0.000000e+00 : f32
      %16 = vector.broadcast %cst_13 : f32 to vector<2x256xf32>
      %17 = arith.maximumf %15, %16 : vector<2x256xf32>
      %18 = arith.truncf %17 : vector<2x256xf32> to vector<2x256xbf16>
      %c0_14 = arith.constant 0 : index
      %c0_15 = arith.constant 0 : index
      %19 = vector.load %arg6[%c0_14, %c0_15] : memref<2x256xbf16, #tpu.memory_space<vmem>>, vector<2x256xbf16>
      tpu.vector_store %arg6[%c0_14, %c0_15], %18 {strides = array<i32>} : memref<2x256xbf16, #tpu.memory_space<vmem>>, vector<2x256xbf16>,
    } else {
    }
    return
  }
  func.func @transform_0(%arg0: i32, %arg1: i32, %arg2: i32) -> (i32, i32) {
    %c0_i32 = arith.constant 0 : i32
    return %arg0, %arg2 : i32, i32
  }
  func.func @transform_1(%arg0: i32, %arg1: i32, %arg2: i32) -> (i32, i32) {
    %c0_i32 = arith.constant 0 : i32
    return %arg2, %arg1 : i32, i32
  }
  func.func @transform_2(%arg0: i32, %arg1: i32, %arg2: i32) -> (i32, i32) {
    %c0_i32 = arith.constant 0 : i32
    %c0_i32_0 = arith.constant 0 : i32
    return %c0_i32, %arg1 : i32, i32
  }
  func.func @transform_3(%arg0: i32, %arg1: i32, %arg2: i32) -> (i32, i32) {
    %c0_i32 = arith.constant 0 : i32
    return %arg0, %arg1 : i32, i32
  }
}

module attributes {stable_mosaic.version = 11 : i64} {
  func.func @_linear_relu_softmax_kernel(%arg0: memref<2x512xbf16, #tpu.memory_space<vmem>>, %arg1: memref<512x128xbf16, #tpu.memory_space<vmem>>, %arg2: memref<1x128xf32, #tpu.memory_space<vmem>>, %arg3: memref<2x128xf32, #tpu.memory_space<vmem>>) attributes {dimension_semantics = [], scalar_prefetch = 0 : i64, scratch_operands = 0 : i64, tpu.core_type = #tpu.core_type<tc>} {
    %c0 = arith.constant 0 : index
    %c0_0 = arith.constant 0 : index
    %0 = vector.load %arg0[%c0, %c0_0] : memref<2x512xbf16, #tpu.memory_space<vmem>>, vector<2x512xbf16>
    %c0_1 = arith.constant 0 : index
    %c0_2 = arith.constant 0 : index
    %1 = vector.load %arg1[%c0_1, %c0_2] : memref<512x128xbf16, #tpu.memory_space<vmem>>, vector<512x128xbf16>
    %cst = arith.constant dense<0.000000e+00> : vector<2x128xf32>
    %2 = tpu.matmul %0, %1, %cst {dimension_numbers = #tpu.dot_dimension_numbers<[1], [0], [0], [1], [0, 0, 1, 1], [], []>} : vector<2x512xbf16>, vector<512x128xbf16>, vector<2x128xf32> -> vector<2x128xf32>
    %c0_3 = arith.constant 0 : index
    %c0_4 = arith.constant 0 : index
    %3 = vector.load %arg2[%c0_3, %c0_4] : memref<1x128xf32, #tpu.memory_space<vmem>>, vector<1x128xf32>
    %4 = vector.broadcast %3 : vector<1x128xf32> to vector<2x128xf32>
    %5 = arith.addf %2, %4 : vector<2x128xf32>
    %cst_5 = arith.constant 0.000000e+00 : f32
    %6 = vector.broadcast %cst_5 : f32 to vector<2x128xf32>
    %7 = arith.maximumf %5, %6 : vector<2x128xf32>
    %8 = tpu.iota {dimensions = array<i32: 1>} : vector<2x128xi32>
    %c13_i32 = arith.constant 13 : i32
    %9 = vector.broadcast %c13_i32 : i32 to vector<2x128xi32>
    %10 = arith.cmpi slt, %8, %9 : vector<2x128xi32>
    %cst_6 = arith.constant 0xFF800000 : f32
    %11 = vector.broadcast %cst_6 : f32 to vector<2x128xf32>
    %12 = arith.select %10, %7, %11 : vector<2x128xi1>, vector<2x128xf32>
    %cst_7 = arith.constant dense<0xFF800000> : vector<2xf32>
    %13 = vector.multi_reduction <maximumf>, %12, %cst_7 [1] : vector<2x128xf32> to vector<2xf32>
    %14 = vector.shape_cast %13 : vector<2xf32> to vector<2x1xf32>
    %15 = vector.broadcast %14 : vector<2x1xf32> to vector<2x128xf32>
    %16 = arith.subf %12, %15 : vector<2x128xf32>
    %17 = math.exp %16 : vector<2x128xf32>
    %cst_8 = arith.constant dense<0.000000e+00> : vector<2xf32>
    %18 = vector.multi_reduction <add>, %17, %cst_8 [1] : vector<2x128xf32> to vector<2xf32>
    %19 = vector.shape_cast %18 : vector<2xf32> to vector<2x1xf32>
    %20 = vector.broadcast %19 : vector<2x1xf32> to vector<2x128xf32>
    %21 = arith.divf %17, %20 : vector<2x128xf32>
    %c0_9 = arith.constant 0 : index
    %c0_10 = arith.constant 0 : index
    %22 = vector.load %arg3[%c0_9, %c0_10] : memref<2x128xf32, #tpu.memory_space<vmem>>, vector<2x128xf32>
    tpu.vector_store %arg3[%c0_9, %c0_10], %21 {strides = array<i32>} : memref<2x128xf32, #tpu.memory_space<vmem>>, vector<2x128xf32>,
    return
  }
}

</mosaic_0001>

<bundles_post_ra>
// kernel: cnn_forward.4
= control target key start
LH: loop header
LB: loop body
LE: loop exit
PB: predicated region body
PF: predicated region fallthrough
CT: control target
= control target key end

     0   :  { %8 = vsyncpa [#allocation3], 0  ;;  %s2783_s0 = inlined_call_operand.vmem [shape: bf16[16,192], index: 0, kind: input, shape index: {}]   ;;  %s2784_s1 = inlined_call_operand.hbm [shape: bf16[192,129024], index: 1, kind: input, shape index: {}]   ;;  %s2785_s2 = inlined_call_operand.vmem [shape: f32[16,1], index: 2, kind: input, shape index: {}]   ;;  %s2786_s3 = inlined_call_operand.vmem [shape: bf16[16,129024], index: 3, kind: output, shape index: {}]  }
   0x1   :  { %10 = vsyncpa [#allocation3 + $0x1], 0  ;;  %s2362_s12 = smov 0   ;;  %s2364_s13 = smov 0  }
   0x2   :  { %s2366_s14 = smov 0   ;;  %s2368_s15 = smov 0  }
   0x3 LB: > { %s2381_s16 = sadd.s32 4294967295, %s2335_s15   ;;  %s2384_s17 = sadd.s32 1, %s2335_s15   ;;  %s2335_s15 = sphi %s2368_s15, %s2794_s15   ;;  %s2331_s14 = sphi %s2366_s14, %s2793_s14   ;;  %s2327_s13 = sphi %s2364_s13, %s2792_s13   ;;  %s2323_s12 = sphi %s2362_s12, %s2791_s12  }
   0x4   : > { %s41_s18 = ssub.s32 %s2335_s15, %s2384_s17  ;;  %s44_s19 = sadd.s32 1, %s2331_s14 }
   0x5   : > { %p42_p0 = scmp.eq.s32.totalorder %s41_s18, 0  ;;  %p51_p1 = scmp.ne.s32.totalorder %s2331_s14, %s2327_s13 }
   0x6   : > { %p52_p2 = scmp.eq.s32.totalorder %s2335_s15, 0  ;;  %p57_p3 = scmp.ne.s32.totalorder %s2327_s13, %s2323_s12 }
   0x7   : > { %s2394_s20 = scalar_select %p42_p0, %s2331_s14, %s44_s19  }
   0x8   : > { %p53_p4 = por %p52_p2, %p51_p1  ;;  %p58_p5 = scmp.eq.s32.totalorder %s2381_s16, 0 }
   0x9   : > { %p102_p6 = scmp.eq.s32.totalorder %s2381_s16, 62  ;;  %p2230_p8 = scmp.lt.s32.totalorder %s2335_s15, 63 }
   0xa   : > { %p2398_p7 = por %p58_p5, %p57_p3  ;;  %s134_s23 = sand.u32 1, %s2331_s14  }
   0xb   : > { %p2403_p9 = por %p102_p6, %p51_p1  ;;  %s2222_s24 = smul.u32 1536, %s134_s23 }
   0xc   : > { %s2204_s25 = sshll.u32 %s2335_s15, 10  ;;  %p2409_p10 = pnand %p2230_p8, %p53_p4 }
   0xd   : > { %s2788_s22 = scalar_select %p2403_p9, 1, 0 }
   0xe   : > { %s2416_s29 = scalar_lea.hbm %s2784_s1, %s2204_s25  ;;  %s138_s30 = scalar_lea.vmem [#allocation2], %s2222_s24 }
   0xf   : > { %s145_s4 = sshll.u32 %s138_s30, 4  ;;  %s2420_s5 = scalar_lea.sflag [#allocation3], %s134_s23  ;;  %s2418_s4 = int_to_ptr.vmem [resolvable:$true] %s145_s4 }
  0x10   : > { %s2271_s6 = scalar_lea.hbm %s2416_s29, 24576  ;;  %p2273_p12 = pneg %p2409_p10 }
  0x11   : > { %p2272_p11 = scmp.ne.s32.totalorder %s2416_s29, %s2271_s6  ;;  %s2276_s9 = scalar_lea.hbm %s2784_s1, 1548288 }
  0x12   : > { %p2277_p1 = scmp.lt.u32.totalorder %s2416_s29, %s2784_s1  ;;  %p2278_p2 = scmp.lt.u32.totalorder %s2276_s9, %s2271_s6 }
  0x13   : > { %p2274_p13 = pnand %p2273_p12, %p2272_p11  ;;  %p2280_p4 = scmp.lt.u32.totalorder %s2271_s6, %s2416_s29 }
  0x14   : > { %p2279_p3 = por %p2278_p2, %p2277_p1 }
  0x15   : > { %p2275_p0 = pneg %p2274_p13 }
  0x16   : > { %p2281_p5 = por %p2280_p4, %p2279_p3 }
  0x18   : > { %p2282_p6 = pnand %p2281_p5, %p2275_p0 }
  0x1a   : > { %2285 = shalt.err (!%p2282_p6)
}
  0x1b   : > { %s2286_s12 = scalar_lea.vmem %s2418_s4, 24576  ;;  %s2337_s18 = smov [#allocation2]  }
  0x1c   : > { %p2287_p8 = scmp.ne.s32.totalorder %s2418_s4, %s2286_s12  ;;  %s2291_s19 = sshll.u32 %s2337_s18, 4  ;;  %s2292_s19 = int_to_ptr.vmem [resolvable:$false] %s2291_s19 }
  0x1d   : > { %s2293_s23 = scalar_lea.vmem %s2292_s19, 49152  ;;  %p2294_p9 = scmp.lt.s32.totalorder %s2418_s4, %s2292_s19 }
  0x1e   : > { %p2289_p11 = pnand %p2287_p8, %p2273_p12  ;;  %p2295_p1 = scmp.lt.s32.totalorder %s2293_s23, %s2286_s12 }
  0x20   : > { %p2290_p13 = pneg %p2289_p11  ;;  %p2296_p2 = por %p2295_p1, %p2294_p9 }
  0x22   : > { %p2297_p3 = pnand %p2296_p2, %p2290_p13 }
  0x24   : > { %2300 = shalt.err (!%p2297_p3)
}
  0x25   : > { %s2338_s24 = smov 64512   ;;  %s2339_s25 = smov 1024  }
  0x26   : > { %s2340_s27 = smov 64   ;;  %p1979_p12 = scmp.ge.s32.totalorder %s2335_s15, 1 }
  0x27   : > { %2229 = dma.hbm_to_vmem [thread:$0]  (!%p2409_p10), %s2416_s29, 24576, %s2418_s4, %s2420_s5, %s2338_s24, %s2339_s25, %s2340_s27  }
  0x28   : > { %p153_p0 = scmp.lt.s32.totalorder %s2335_s15, 64 }
  0x2a   : > { %p154_p4 = pnand %p1979_p12, %p153_p0 }
  0x2b   : > { %s2451_s28 = sand.u32 (!%p154_p4), 1, %s2327_s13  }
  0x2c   : > { %157 = sbr.rel (%p154_p4) target bundleno = 478 (0x1de), region = 32  ;;  %s160_s6 = scalar_lea.sflag (!%p154_p4), [#allocation3], %s2451_s28 }
  0x2d   : > { %s2223_s30 = smul.u32 (!%p154_p4), 1536, %s2451_s28 }
  0x2f   : > { %s2455_s7 = scalar_lea.vmem (!%p154_p4), [#allocation2], %s2223_s30 }
  0x33   : > { %2318 = dma.done.wait (%p2398_p7), %s160_s6, 24576  }
  0x34   : > { %2320 = vsyncadd (%p2398_p7), %s160_s6, 4294942720  ;;  %v190_v0 = vld [vmem:[%s2455_s7] sm:$0xff]  ;;  %v191_v2 = vld [vmem:[%s2455_s7 + $0x8] sm:$0xff]  ;;  %v2341_v26 = vmov 0   ;;  %vm1363_vm0 = vcmask 523264   ;;  %s1980_s10 = sshll.u32 %s2451_s28, 7 }
  0x35   : > { %v198_v1 = vld [vmem:[%s2455_s7 + $0x40] sm:$0xff]  ;;  %v199_v4 = vld [vmem:[%s2455_s7 + $0x48] sm:$0xff]  ;;  %2267 = vset.pattern.permute.xlu0 %v2341_v26  ;;  %s2706_s11 = scalar_lea.vmem [#allocation4], %s1980_s10  ;;  %p2790_p7 = scmp.ne.s32.totalorder %s2788_s22, 0 }
  0x36   : > { %v1984_v3 = vcombine.high %v190_v0, %v198_v1  ;;  %v1983_v5 = vcombine.low %v190_v0, %v198_v1  ;;  %v206_v6 = vld [vmem:[%s2455_s7 + $0x80] sm:$0xff]  ;;  %v1986_v8 = vcombine.high %v191_v2, %v199_v4  ;;  %v1985_v9 = vcombine.low %v191_v2, %v199_v4  ;;  %v207_v11 = vld [vmem:[%s2455_s7 + $0x88] sm:$0xff]  ;;  %s2221_s12 = sshll.u32 (%p2790_p7), %s2381_s16, 6 }
  0x37   : > { %v214_v7 = vld [vmem:[%s2455_s7 + $0xc0] sm:$0xff]  ;;  %v215_v12 = vld [vmem:[%s2455_s7 + $0xc8] sm:$0xff]  ;;  %s1864_s23 = scalar_lea.vmem (%p2790_p7), %s2786_s3, %s2221_s12 }
  0x38   : > { %v2000_v10 = vcombine.high %v206_v6, %v214_v7  ;;  %v222_v13 = vld [vmem:[%s2455_s7 + $0x100] sm:$0xff]  ;;  %1367 = vmatprep.subr.bf16.mxu0 %v1984_v3  ;;  %v2002_v14 = vcombine.high %v207_v11, %v215_v12  ;;  %v223_v16 = vld [vmem:[%s2455_s7 + $0x108] sm:$0xff]  ;;  %1410 = vmatprep.subr.bf16.mxu1 %v1986_v8  ;;  %v1999_v18 = vcombine.low %v206_v6, %v214_v7 }
  0x39   : > { %v230_v15 = vld [vmem:[%s2455_s7 + $0x140] sm:$0xff]  ;;  %v231_v17 = vld [vmem:[%s2455_s7 + $0x148] sm:$0xff]  ;;  %1368 = vmatpush1.bf16.msra.mxu0 %v1983_v5  ;;  %1411 = vmatpush1.bf16.msra.mxu1 %v1985_v9  ;;  %v2001_v19 = vcombine.low %v207_v11, %v215_v12 }
  0x3a   : > { %1369 = vmatprep.subr.bf16.mxu0 %v2000_v10  ;;  %v2016_v20 = vcombine.high %v222_v13, %v230_v15  ;;  %1412 = vmatprep.subr.bf16.mxu1 %v2002_v14  ;;  %v2018_v21 = vcombine.high %v223_v16, %v231_v17  ;;  %v238_v22 = vld [vmem:[%s2455_s7 + $0x180] sm:$0xff]  ;;  %v239_v24 = vld [vmem:[%s2455_s7 + $0x188] sm:$0xff]  ;;  %v2015_v27 = vcombine.low %v222_v13, %v230_v15 }
  0x3b   : > { %v246_v23 = vld [vmem:[%s2455_s7 + $0x1c0] sm:$0xff]  ;;  %v247_v25 = vld [vmem:[%s2455_s7 + $0x1c8] sm:$0xff]  ;;  %v2017_v28 = vcombine.low %v223_v16, %v231_v17 }
  0x3c   : > { %v2032_v29 = vcombine.high %v238_v22, %v246_v23  ;;  %v2034_v30 = vcombine.high %v239_v24, %v247_v25  ;;  %v254_v31 = vld [vmem:[%s2455_s7 + $0x200] sm:$0xff]  ;;  %v255_v33 = vld [vmem:[%s2455_s7 + $0x208] sm:$0xff]  ;;  %v2031_v35 = vcombine.low %v238_v22, %v246_v23  ;;  %v2033_v36 = vcombine.low %v239_v24, %v247_v25 }
  0x3d   : > { %1370 = vmatpush1.bf16.msra.mxu0 %v1999_v18  ;;  %1413 = vmatpush1.bf16.msra.mxu1 %v2001_v19  ;;  %v262_v32 = vld [vmem:[%s2455_s7 + $0x240] sm:$0xff]  ;;  %v263_v34 = vld [vmem:[%s2455_s7 + $0x248] sm:$0xff] }
  0x3e   : > { %1371 = vmatprep.subr.bf16.mxu0 %v2016_v20  ;;  %1414 = vmatprep.subr.bf16.mxu1 %v2018_v21  ;;  %v2048_v37 = vcombine.high %v254_v31, %v262_v32  ;;  %v2050_v38 = vcombine.high %v255_v33, %v263_v34  ;;  %v270_v39 = vld [vmem:[%s2455_s7 + $0x280] sm:$0xff]  ;;  %v271_v41 = vld [vmem:[%s2455_s7 + $0x288] sm:$0xff]  ;;  %v2047_v43 = vcombine.low %v254_v31, %v262_v32  ;;  %v192_v32 = vld [vmem:[%s2455_s7 + $0x10] sm:$0xff] }
  0x3f   : > { %v278_v40 = vld [vmem:[%s2455_s7 + $0x2c0] sm:$0xff]  ;;  %v279_v42 = vld [vmem:[%s2455_s7 + $0x2c8] sm:$0xff]  ;;  %v2049_v45 = vcombine.low %v255_v33, %v263_v34  ;;  %v200_v33 = vld [vmem:[%s2455_s7 + $0x50] sm:$0xff] }
  0x40   : > { %v2488_v44 = vld [vmem:[%s2783_s0 + $0x4] ss:$8 sps:$4 sm:$0xff]   ;;  %v2064_v46 = vcombine.high %v270_v39, %v278_v40  ;;  %v2066_v47 = vcombine.high %v271_v41, %v279_v42  ;;  %v2063_v52 = vcombine.low %v270_v39, %v278_v40  ;;  %v2065_v53 = vcombine.low %v271_v41, %v279_v42  ;;  %v193_v34 = vld [vmem:[%s2455_s7 + $0x18] sm:$0xff]  ;;  %v2528_v40 = vld [vmem:[%s2783_s0] ss:$8 sps:$4 sm:$0xff]  }
  0x41   : > { %1372 = vmatpush1.bf16.msra.mxu0 %v2015_v27  ;;  %1415 = vmatpush1.bf16.msra.mxu1 %v2017_v28  ;;  %v286_v48 = vld [vmem:[%s2455_s7 + $0x300] sm:$0xff]  ;;  %v287_v50 = vld [vmem:[%s2455_s7 + $0x308] sm:$0xff]  ;;  %v208_v42 = vld [vmem:[%s2455_s7 + $0x90] sm:$0xff] }
  0x42   : > { %1373 = vmatprep.subr.bf16.mxu0 %v2032_v29  ;;  %1416 = vmatprep.subr.bf16.mxu1 %v2034_v30  ;;  %v294_v49 = vld [vmem:[%s2455_s7 + $0x340] sm:$0xff]  ;;  %v295_v51 = vld [vmem:[%s2455_s7 + $0x348] sm:$0xff] }
  0x43   : > { %2175 = vmatprep.mubr.msk.bf16.mxu0 %vm1363_vm0, %v2488_v44  ;;  %2176 = vmatprep.mubr.msk.bf16.mxu1 %vm1363_vm0, %v2488_v44  ;;  %v2080_v54 = vcombine.high %v286_v48, %v294_v49  ;;  %v2082_v55 = vcombine.high %v287_v50, %v295_v51  ;;  %v302_v56 = vld [vmem:[%s2455_s7 + $0x380] sm:$0xff]  ;;  %v303_v58 = vld [vmem:[%s2455_s7 + $0x388] sm:$0xff]  ;;  %v2079_v60 = vcombine.low %v286_v48, %v294_v49 }
  0x44   : > { %v310_v57 = vld [vmem:[%s2455_s7 + $0x3c0] sm:$0xff]  ;;  %v311_v59 = vld [vmem:[%s2455_s7 + $0x3c8] sm:$0xff]  ;;  %v2081_v61 = vcombine.low %v287_v50, %v295_v51  ;;  %v1987_v48 = vcombine.low %v192_v32, %v200_v33 }
  0x45   : > { %1374 = vmatpush1.bf16.msra.mxu0 %v2031_v35  ;;  %1417 = vmatpush1.bf16.msra.mxu1 %v2033_v36  ;;  %v2096_v62 = vcombine.high %v302_v56, %v310_v57  ;;  %v2098_v63 = vcombine.high %v303_v58, %v311_v59  ;;  %v318_v0 = vld [vmem:[%s2455_s7 + $0x400] sm:$0xff]  ;;  %v319_v2 = vld [vmem:[%s2455_s7 + $0x408] sm:$0xff]  ;;  %v2095_v4 = vcombine.low %v302_v56, %v310_v57  ;;  %v201_v35 = vld [vmem:[%s2455_s7 + $0x58] sm:$0xff] }
  0x46   : > { %1375 = vmatprep.subr.bf16.mxu0 %v2048_v37  ;;  %1418 = vmatprep.subr.bf16.mxu1 %v2050_v38  ;;  %v326_v1 = vld [vmem:[%s2455_s7 + $0x440] sm:$0xff]  ;;  %v327_v3 = vld [vmem:[%s2455_s7 + $0x448] sm:$0xff]  ;;  %v2097_v5 = vcombine.low %v303_v58, %v311_v59  ;;  %v1988_v38 = vcombine.high %v192_v32, %v200_v33  ;;  %v1990_v41 = vcombine.high %v193_v34, %v201_v35 }
  0x47   : > { %v2112_v6 = vcombine.high %v318_v0, %v326_v1  ;;  %v2114_v7 = vcombine.high %v319_v2, %v327_v3  ;;  %v334_v8 = vld [vmem:[%s2455_s7 + $0x480] sm:$0xff]  ;;  %v335_v10 = vld [vmem:[%s2455_s7 + $0x488] sm:$0xff]  ;;  %v2111_v12 = vcombine.low %v318_v0, %v326_v1  ;;  %v2113_v13 = vcombine.low %v319_v2, %v327_v3 }
  0x48   : > { %v342_v9 = vld [vmem:[%s2455_s7 + $0x4c0] sm:$0xff]  ;;  %v343_v11 = vld [vmem:[%s2455_s7 + $0x4c8] sm:$0xff]  ;;  %v1989_v49 = vcombine.low %v193_v34, %v201_v35 }
  0x49   : > { %1376 = vmatpush1.bf16.msra.mxu0 %v2047_v43  ;;  %1419 = vmatpush1.bf16.msra.mxu1 %v2049_v45  ;;  %v2128_v14 = vcombine.high %v334_v8, %v342_v9  ;;  %v2130_v15 = vcombine.high %v335_v10, %v343_v11  ;;  %v350_v16 = vld [vmem:[%s2455_s7 + $0x500] sm:$0xff]  ;;  %v351_v18 = vld [vmem:[%s2455_s7 + $0x508] sm:$0xff]  ;;  %v2127_v20 = vcombine.low %v334_v8, %v342_v9  ;;  %v216_v43 = vld [vmem:[%s2455_s7 + $0xd0] sm:$0xff] }
  0x4a   : > { %1377 = vmatprep.subr.bf16.mxu0 %v2064_v46  ;;  %1420 = vmatprep.subr.bf16.mxu1 %v2066_v47  ;;  %v358_v17 = vld [vmem:[%s2455_s7 + $0x540] sm:$0xff]  ;;  %v359_v19 = vld [vmem:[%s2455_s7 + $0x548] sm:$0xff]  ;;  %v2129_v21 = vcombine.low %v335_v10, %v343_v11  ;;  %v209_v45 = vld [vmem:[%s2455_s7 + $0x98] sm:$0xff]  ;;  %v2004_v50 = vcombine.high %v208_v42, %v216_v43  ;;  %v2003_v56 = vcombine.low %v208_v42, %v216_v43 }
  0x4b   : > { %v2144_v22 = vcombine.high %v350_v16, %v358_v17  ;;  %v2146_v23 = vcombine.high %v351_v18, %v359_v19  ;;  %v366_v24 = vld [vmem:[%s2455_s7 + $0x580] sm:$0xff]  ;;  %v367_v26 = vld [vmem:[%s2455_s7 + $0x588] sm:$0xff]  ;;  %v2143_v28 = vcombine.low %v350_v16, %v358_v17  ;;  %v2145_v29 = vcombine.low %v351_v18, %v359_v19  ;;  %v217_v46 = vld [vmem:[%s2455_s7 + $0xd8] sm:$0xff] }
  0x4c   : > { %v374_v25 = vld [vmem:[%s2455_s7 + $0x5c0] sm:$0xff]  ;;  %v375_v27 = vld [vmem:[%s2455_s7 + $0x5c8] sm:$0xff]  ;;  %v2006_v51 = vcombine.high %v209_v45, %v217_v46  ;;  %v2005_v57 = vcombine.low %v209_v45, %v217_v46  ;;  %v336_v46 = vld [vmem:[%s2455_s7 + $0x490] sm:$0xff] }
  0x4d   : > { %1378 = vmatpush1.bf16.msra.mxu0 %v2063_v52  ;;  %1421 = vmatpush1.bf16.msra.mxu1 %v2065_v53  ;;  %v2160_v30 = vcombine.high %v366_v24, %v374_v25  ;;  %v2162_v31 = vcombine.high %v367_v26, %v375_v27  ;;  %v2159_v36 = vcombine.low %v366_v24, %v374_v25  ;;  %v382_v39 = vld [vmem:[%s2785_s2] sm:$0xff]  ;;  %v383_v47 = vld [vmem:[%s2785_s2 + $0x8] sm:$0xff]  ;;  %v224_v52 = vld [vmem:[%s2455_s7 + $0x110] sm:$0xff] }
  0x4e   : > { %1379 = vmatprep.subr.bf16.mxu0 %v2080_v54  ;;  %1422 = vmatprep.subr.bf16.mxu1 %v2082_v55  ;;  %v2161_v37 = vcombine.low %v367_v26, %v375_v27  ;;  %v232_v53 = vld [vmem:[%s2455_s7 + $0x150] sm:$0xff]  ;;  %v225_v54 = vld [vmem:[%s2455_s7 + $0x118] sm:$0xff] }
  0x4f   : > { %386 = vperm.xlu0 %2267, %v382_v39   ;;  %v233_v55 = vld [vmem:[%s2455_s7 + $0x158] sm:$0xff]  ;;  %v2020_v58 = vcombine.high %v224_v52, %v232_v53  ;;  %v2019_v0 = vcombine.low %v224_v52, %v232_v53 }
  0x50   : > { %v2022_v59 = vcombine.high %v225_v54, %v233_v55  ;;  %v2021_v1 = vcombine.low %v225_v54, %v233_v55  ;;  %v329_v39 = vld [vmem:[%s2455_s7 + $0x458] sm:$0xff]  ;;  %v352_v54 = vld [vmem:[%s2455_s7 + $0x510] sm:$0xff] }
  0x51   : > { %1380 = vmatpush1.bf16.msra.mxu0 %v2079_v60  ;;  %1423 = vmatpush1.bf16.msra.mxu1 %v2081_v61  ;;  %v240_v60 = vld [vmem:[%s2455_s7 + $0x190] sm:$0xff] }
  0x52   : > { %1381 = vmatprep.subr.bf16.mxu0 %v2096_v62  ;;  %1424 = vmatprep.subr.bf16.mxu1 %v2098_v63  ;;  %v248_v61 = vld [vmem:[%s2455_s7 + $0x1d0] sm:$0xff]  ;;  %v241_v62 = vld [vmem:[%s2455_s7 + $0x198] sm:$0xff] }
  0x53   : > { %391 = vperm.xlu0 %2267, %v383_v47   ;;  %v249_v63 = vld [vmem:[%s2455_s7 + $0x1d8] sm:$0xff]  ;;  %v2036_v2 = vcombine.high %v240_v60, %v248_v61  ;;  %v2035_v8 = vcombine.low %v240_v60, %v248_v61  ;;  %v344_v47 = vld [vmem:[%s2455_s7 + $0x4d0] sm:$0xff] }
  0x54   : > { %v2038_v3 = vcombine.high %v241_v62, %v249_v63  ;;  %v2037_v9 = vcombine.low %v241_v62, %v249_v63  ;;  %v2132_v52 = vcombine.high %v336_v46, %v344_v47  ;;  %v360_v55 = vld [vmem:[%s2455_s7 + $0x550] sm:$0xff] }
  0x55   : > { %1382 = vmatpush1.bf16.msra.mxu0 %v2095_v4  ;;  %1425 = vmatpush1.bf16.msra.mxu1 %v2097_v5  ;;  %v256_v4 = vld [vmem:[%s2455_s7 + $0x210] sm:$0xff]  ;;  %v2148_v60 = vcombine.high %v352_v54, %v360_v55 }
  0x56   : > { %1383 = vmatprep.subr.bf16.mxu0 %v2112_v6  ;;  %1426 = vmatprep.subr.bf16.mxu1 %v2114_v7  ;;  %v264_v5 = vld [vmem:[%s2455_s7 + $0x250] sm:$0xff]  ;;  %v257_v6 = vld [vmem:[%s2455_s7 + $0x218] sm:$0xff] }
  0x57   : > { %v265_v7 = vld [vmem:[%s2455_s7 + $0x258] sm:$0xff]  ;;  %v2052_v10 = vcombine.high %v256_v4, %v264_v5  ;;  %v2051_v16 = vcombine.low %v256_v4, %v264_v5  ;;  %v368_v62 = vld [vmem:[%s2455_s7 + $0x590] sm:$0xff] }
  0x58   : > { %v2054_v11 = vcombine.high %v257_v6, %v265_v7  ;;  %v2053_v17 = vcombine.low %v257_v6, %v265_v7  ;;  %v376_v63 = vld [vmem:[%s2455_s7 + $0x5d0] sm:$0xff]  ;;  %v194_v6 = vld [vmem:[%s2455_s7 + $0x20] sm:$0xff] }
  0x59   : > { %1384 = vmatpush1.bf16.msra.mxu0 %v2111_v12  ;;  %1427 = vmatpush1.bf16.msra.mxu1 %v2113_v13  ;;  %v272_v12 = vld [vmem:[%s2455_s7 + $0x290] sm:$0xff]  ;;  %v2164_v4 = vcombine.high %v368_v62, %v376_v63  ;;  %v202_v7 = vld [vmem:[%s2455_s7 + $0x60] sm:$0xff] }
  0x5a   : > { %1385 = vmatprep.subr.bf16.mxu0 %v2128_v14  ;;  %1428 = vmatprep.subr.bf16.mxu1 %v2130_v15  ;;  %v280_v13 = vld [vmem:[%s2455_s7 + $0x2d0] sm:$0xff]  ;;  %v273_v14 = vld [vmem:[%s2455_s7 + $0x298] sm:$0xff] }
  0x5b   : > { %v281_v15 = vld [vmem:[%s2455_s7 + $0x2d8] sm:$0xff]  ;;  %v2068_v18 = vcombine.high %v272_v12, %v280_v13  ;;  %v2067_v24 = vcombine.low %v272_v12, %v280_v13  ;;  %v1992_v12 = vcombine.high %v194_v6, %v202_v7 }
  0x5c   : > { %v2070_v19 = vcombine.high %v273_v14, %v281_v15  ;;  %v2069_v25 = vcombine.low %v273_v14, %v281_v15  ;;  %v210_v14 = vld [vmem:[%s2455_s7 + $0xa0] sm:$0xff] }
  0x5d   : > { %1386 = vmatpush1.bf16.msra.mxu0 %v2127_v20  ;;  %1429 = vmatpush1.bf16.msra.mxu1 %v2129_v21  ;;  %v288_v20 = vld [vmem:[%s2455_s7 + $0x310] sm:$0xff]  ;;  %v218_v15 = vld [vmem:[%s2455_s7 + $0xe0] sm:$0xff] }
  0x5e   : > { %1387 = vmatprep.subr.bf16.mxu0 %v2144_v22  ;;  %1430 = vmatprep.subr.bf16.mxu1 %v2146_v23  ;;  %v296_v21 = vld [vmem:[%s2455_s7 + $0x350] sm:$0xff]  ;;  %v289_v22 = vld [vmem:[%s2455_s7 + $0x318] sm:$0xff] }
  0x5f   : > { %v297_v23 = vld [vmem:[%s2455_s7 + $0x358] sm:$0xff]  ;;  %v2084_v26 = vcombine.high %v288_v20, %v296_v21  ;;  %v2083_v32 = vcombine.low %v288_v20, %v296_v21  ;;  %v2008_v20 = vcombine.high %v210_v14, %v218_v15 }
  0x60   : > { %v2086_v27 = vcombine.high %v289_v22, %v297_v23  ;;  %v2085_v33 = vcombine.low %v289_v22, %v297_v23  ;;  %v226_v22 = vld [vmem:[%s2455_s7 + $0x120] sm:$0xff] }
  0x61   : > { %1388 = vmatpush1.bf16.msra.mxu0 %v2143_v28  ;;  %1431 = vmatpush1.bf16.msra.mxu1 %v2145_v29  ;;  %v304_v28 = vld [vmem:[%s2455_s7 + $0x390] sm:$0xff]  ;;  %v234_v23 = vld [vmem:[%s2455_s7 + $0x160] sm:$0xff] }
  0x62   : > { %1389 = vmatprep.subr.bf16.mxu0 %v2160_v30  ;;  %1432 = vmatprep.subr.bf16.mxu1 %v2162_v31  ;;  %v312_v29 = vld [vmem:[%s2455_s7 + $0x3d0] sm:$0xff]  ;;  %v305_v30 = vld [vmem:[%s2455_s7 + $0x398] sm:$0xff] }
  0x63   : > { %v313_v31 = vld [vmem:[%s2455_s7 + $0x3d8] sm:$0xff]  ;;  %v2100_v34 = vcombine.high %v304_v28, %v312_v29 }
  0x64   : > { %v2102_v35 = vcombine.high %v305_v30, %v313_v31  ;;  %v2101_v42 = vcombine.low %v305_v30, %v313_v31  ;;  %v242_v30 = vld [vmem:[%s2455_s7 + $0x1a0] sm:$0xff] }
  0x65   : > { %1390 = vmatpush1.bf16.msra.mxu0 %v2159_v36  ;;  %1433 = vmatpush1.bf16.msra.mxu1 %v2161_v37  ;;  %v320_v36 = vld [vmem:[%s2455_s7 + $0x410] sm:$0xff]  ;;  %v250_v31 = vld [vmem:[%s2455_s7 + $0x1e0] sm:$0xff] }
  0x66   : > { %1453 = vmatprep.subr.bf16.mxu0 %v1988_v38  ;;  %1496 = vmatprep.subr.bf16.mxu1 %v1990_v41  ;;  %v328_v37 = vld [vmem:[%s2455_s7 + $0x450] sm:$0xff]  ;;  %v321_v38 = vld [vmem:[%s2455_s7 + $0x418] sm:$0xff]  ;;  %v2099_v41 = vcombine.low %v304_v28, %v312_v29  ;;  %v2024_v28 = vcombine.high %v226_v22, %v234_v23 }
  0x67   : > { %v2116_v43 = vcombine.high %v320_v36, %v328_v37  ;;  %v2118_v45 = vcombine.high %v321_v38, %v329_v39 }
  0x68   : > { %1400 = vmatmul.mubr.bf16.vlgmr.msra.gmra.mrb[0].mxu0 %v2528_v40  ;;  %1443 = vmatmul.mubr.bf16.vlgmr.msra.gmra.mrb[0].mxu1 %v2528_v40 }
  0x69   : > { %1454 = vmatpush1.bf16.msra.mxu0 %v1987_v48  ;;  %1497 = vmatpush1.bf16.msra.mxu1 %v1989_v49  ;;  %v337_v48 = vld [vmem:[%s2455_s7 + $0x498] sm:$0xff] }
  0x6a   : > { %1455 = vmatprep.subr.bf16.mxu0 %v2004_v50  ;;  %1498 = vmatprep.subr.bf16.mxu1 %v2006_v51  ;;  %v345_v49 = vld [vmem:[%s2455_s7 + $0x4d8] sm:$0xff]  ;;  %v2115_v50 = vcombine.low %v320_v36, %v328_v37  ;;  %v2117_v51 = vcombine.low %v321_v38, %v329_v39  ;;  %v2040_v36 = vcombine.high %v242_v30, %v250_v31  ;;  %v258_v38 = vld [vmem:[%s2455_s7 + $0x220] sm:$0xff] }
  0x6b   : > { %2177 = vmatprep.mubr.msk.bf16.mxu0 %vm1363_vm0, %v2488_v44  ;;  %2178 = vmatprep.mubr.msk.bf16.mxu1 %vm1363_vm0, %v2488_v44  ;;  %v2134_v53 = vcombine.high %v337_v48, %v345_v49  ;;  %v266_v39 = vld [vmem:[%s2455_s7 + $0x260] sm:$0xff] }
  0x6d   : > { %1456 = vmatpush1.bf16.msra.mxu0 %v2003_v56  ;;  %1499 = vmatpush1.bf16.msra.mxu1 %v2005_v57  ;;  %v353_v56 = vld [vmem:[%s2455_s7 + $0x518] sm:$0xff] }
  0x6e   : > { %1457 = vmatprep.subr.bf16.mxu0 %v2020_v58  ;;  %1500 = vmatprep.subr.bf16.mxu1 %v2022_v59  ;;  %v361_v57 = vld [vmem:[%s2455_s7 + $0x558] sm:$0xff]  ;;  %v2131_v58 = vcombine.low %v336_v46, %v344_v47  ;;  %v2133_v59 = vcombine.low %v337_v48, %v345_v49  ;;  %v2056_v46 = vcombine.high %v258_v38, %v266_v39  ;;  %v274_v48 = vld [vmem:[%s2455_s7 + $0x2a0] sm:$0xff] }
  0x6f   : > { %v2150_v61 = vcombine.high %v353_v56, %v361_v57  ;;  %v282_v49 = vld [vmem:[%s2455_s7 + $0x2e0] sm:$0xff] }
  0x71   : > { %1458 = vmatpush1.bf16.msra.mxu0 %v2019_v0  ;;  %1501 = vmatpush1.bf16.msra.mxu1 %v2021_v1  ;;  %v369_v0 = vld [vmem:[%s2455_s7 + $0x598] sm:$0xff] }
  0x72   : > { %1459 = vmatprep.subr.bf16.mxu0 %v2036_v2  ;;  %1502 = vmatprep.subr.bf16.mxu1 %v2038_v3  ;;  %v377_v1 = vld [vmem:[%s2455_s7 + $0x5d8] sm:$0xff]  ;;  %v2147_v2 = vcombine.low %v352_v54, %v360_v55  ;;  %v2149_v3 = vcombine.low %v353_v56, %v361_v57  ;;  %v2072_v54 = vcombine.high %v274_v48, %v282_v49  ;;  %v290_v56 = vld [vmem:[%s2455_s7 + $0x320] sm:$0xff] }
  0x73   : > { %v2166_v5 = vcombine.high %v369_v0, %v377_v1  ;;  %v298_v57 = vld [vmem:[%s2455_s7 + $0x360] sm:$0xff] }
  0x75   : > { %1460 = vmatpush1.bf16.msra.mxu0 %v2035_v8  ;;  %1503 = vmatpush1.bf16.msra.mxu1 %v2037_v9  ;;  %v195_v8 = vld [vmem:[%s2455_s7 + $0x28] sm:$0xff] }
  0x76   : > { %1461 = vmatprep.subr.bf16.mxu0 %v2052_v10  ;;  %1504 = vmatprep.subr.bf16.mxu1 %v2054_v11  ;;  %v203_v9 = vld [vmem:[%s2455_s7 + $0x68] sm:$0xff]  ;;  %v2163_v10 = vcombine.low %v368_v62, %v376_v63  ;;  %v2165_v11 = vcombine.low %v369_v0, %v377_v1  ;;  %v2088_v62 = vcombine.high %v290_v56, %v298_v57  ;;  %v306_v0 = vld [vmem:[%s2455_s7 + $0x3a0] sm:$0xff] }
  0x77   : > { %v1994_v13 = vcombine.high %v195_v8, %v203_v9  ;;  %v314_v1 = vld [vmem:[%s2455_s7 + $0x3e0] sm:$0xff] }
  0x79   : > { %1462 = vmatpush1.bf16.msra.mxu0 %v2051_v16  ;;  %1505 = vmatpush1.bf16.msra.mxu1 %v2053_v17  ;;  %v211_v16 = vld [vmem:[%s2455_s7 + $0xa8] sm:$0xff] }
  0x7a   : > { %1463 = vmatprep.subr.bf16.mxu0 %v2068_v18  ;;  %1506 = vmatprep.subr.bf16.mxu1 %v2070_v19  ;;  %v219_v17 = vld [vmem:[%s2455_s7 + $0xe8] sm:$0xff]  ;;  %v1991_v18 = vcombine.low %v194_v6, %v202_v7  ;;  %v1993_v19 = vcombine.low %v195_v8, %v203_v9  ;;  %v2104_v6 = vcombine.high %v306_v0, %v314_v1  ;;  %v322_v8 = vld [vmem:[%s2455_s7 + $0x420] sm:$0xff] }
  0x7b   : > { %v2010_v21 = vcombine.high %v211_v16, %v219_v17  ;;  %v330_v9 = vld [vmem:[%s2455_s7 + $0x460] sm:$0xff] }
  0x7d   : > { %1464 = vmatpush1.bf16.msra.mxu0 %v2067_v24  ;;  %1507 = vmatpush1.bf16.msra.mxu1 %v2069_v25  ;;  %v227_v24 = vld [vmem:[%s2455_s7 + $0x128] sm:$0xff] }
  0x7e   : > { %1465 = vmatprep.subr.bf16.mxu0 %v2084_v26  ;;  %1508 = vmatprep.subr.bf16.mxu1 %v2086_v27  ;;  %v235_v25 = vld [vmem:[%s2455_s7 + $0x168] sm:$0xff]  ;;  %v2007_v26 = vcombine.low %v210_v14, %v218_v15  ;;  %v2009_v27 = vcombine.low %v211_v16, %v219_v17  ;;  %v2120_v14 = vcombine.high %v322_v8, %v330_v9  ;;  %v338_v16 = vld [vmem:[%s2455_s7 + $0x4a0] sm:$0xff] }
  0x7f   : > { %v2026_v29 = vcombine.high %v227_v24, %v235_v25  ;;  %v346_v17 = vld [vmem:[%s2455_s7 + $0x4e0] sm:$0xff] }
  0x81   : > { %1466 = vmatpush1.bf16.msra.mxu0 %v2083_v32  ;;  %1509 = vmatpush1.bf16.msra.mxu1 %v2085_v33  ;;  %v243_v32 = vld [vmem:[%s2455_s7 + $0x1a8] sm:$0xff] }
  0x82   : > { %1467 = vmatprep.subr.bf16.mxu0 %v2100_v34  ;;  %1510 = vmatprep.subr.bf16.mxu1 %v2102_v35  ;;  %v251_v33 = vld [vmem:[%s2455_s7 + $0x1e8] sm:$0xff]  ;;  %v2023_v34 = vcombine.low %v226_v22, %v234_v23  ;;  %v2025_v35 = vcombine.low %v227_v24, %v235_v25  ;;  %v2136_v22 = vcombine.high %v338_v16, %v346_v17  ;;  %v354_v24 = vld [vmem:[%s2455_s7 + $0x520] sm:$0xff] }
  0x83   : > { %v2042_v37 = vcombine.high %v243_v32, %v251_v33  ;;  %v362_v25 = vld [vmem:[%s2455_s7 + $0x560] sm:$0xff] }
  0x85   : > { %1468 = vmatpush1.bf16.msra.mxu0 %v2099_v41  ;;  %1511 = vmatpush1.bf16.msra.mxu1 %v2101_v42  ;;  %v259_v41 = vld [vmem:[%s2455_s7 + $0x228] sm:$0xff] }
  0x86   : > { %1469 = vmatprep.subr.bf16.mxu0 %v2116_v43  ;;  %1512 = vmatprep.subr.bf16.mxu1 %v2118_v45  ;;  %v267_v42 = vld [vmem:[%s2455_s7 + $0x268] sm:$0xff]  ;;  %v2039_v43 = vcombine.low %v242_v30, %v250_v31  ;;  %v2041_v45 = vcombine.low %v243_v32, %v251_v33  ;;  %v2152_v30 = vcombine.high %v354_v24, %v362_v25  ;;  %v370_v32 = vld [vmem:[%s2455_s7 + $0x5a0] sm:$0xff] }
  0x87   : > { %v2058_v47 = vcombine.high %v259_v41, %v267_v42  ;;  %v378_v33 = vld [vmem:[%s2455_s7 + $0x5e0] sm:$0xff] }
  0x89   : > { %1470 = vmatpush1.bf16.msra.mxu0 %v2115_v50  ;;  %1513 = vmatpush1.bf16.msra.mxu1 %v2117_v51  ;;  %v275_v50 = vld [vmem:[%s2455_s7 + $0x2a8] sm:$0xff] }
  0x8a   : > { %1471 = vmatprep.subr.bf16.mxu0 %v2132_v52  ;;  %1514 = vmatprep.subr.bf16.mxu1 %v2134_v53  ;;  %v283_v51 = vld [vmem:[%s2455_s7 + $0x2e8] sm:$0xff]  ;;  %v2055_v52 = vcombine.low %v258_v38, %v266_v39  ;;  %v2057_v53 = vcombine.low %v259_v41, %v267_v42  ;;  %v2168_v38 = vcombine.high %v370_v32, %v378_v33  ;;  %v196_v41 = vld [vmem:[%s2455_s7 + $0x30] sm:$0xff] }
  0x8b   : > { %v2074_v55 = vcombine.high %v275_v50, %v283_v51  ;;  %v204_v42 = vld [vmem:[%s2455_s7 + $0x70] sm:$0xff] }
  0x8d   : > { %1472 = vmatpush1.bf16.msra.mxu0 %v2131_v58  ;;  %1515 = vmatpush1.bf16.msra.mxu1 %v2133_v59  ;;  %v291_v58 = vld [vmem:[%s2455_s7 + $0x328] sm:$0xff] }
  0x8e   : > { %1473 = vmatprep.subr.bf16.mxu0 %v2148_v60  ;;  %1516 = vmatprep.subr.bf16.mxu1 %v2150_v61  ;;  %v299_v59 = vld [vmem:[%s2455_s7 + $0x368] sm:$0xff]  ;;  %v2071_v60 = vcombine.low %v274_v48, %v282_v49  ;;  %v2073_v61 = vcombine.low %v275_v50, %v283_v51  ;;  %v1996_v48 = vcombine.high %v196_v41, %v204_v42  ;;  %v212_v50 = vld [vmem:[%s2455_s7 + $0xb0] sm:$0xff] }
  0x8f   : > { %v2090_v63 = vcombine.high %v291_v58, %v299_v59  ;;  %v220_v51 = vld [vmem:[%s2455_s7 + $0xf0] sm:$0xff] }
  0x91   : > { %1474 = vmatpush1.bf16.msra.mxu0 %v2147_v2  ;;  %1517 = vmatpush1.bf16.msra.mxu1 %v2149_v3  ;;  %v307_v2 = vld [vmem:[%s2455_s7 + $0x3a8] sm:$0xff] }
  0x92   : > { %1475 = vmatprep.subr.bf16.mxu0 %v2164_v4  ;;  %1518 = vmatprep.subr.bf16.mxu1 %v2166_v5  ;;  %v315_v3 = vld [vmem:[%s2455_s7 + $0x3e8] sm:$0xff]  ;;  %v2087_v4 = vcombine.low %v290_v56, %v298_v57  ;;  %v2089_v5 = vcombine.low %v291_v58, %v299_v59  ;;  %v2012_v56 = vcombine.high %v212_v50, %v220_v51  ;;  %v228_v58 = vld [vmem:[%s2455_s7 + $0x130] sm:$0xff] }
  0x93   : > { %v2106_v7 = vcombine.high %v307_v2, %v315_v3  ;;  %v236_v59 = vld [vmem:[%s2455_s7 + $0x170] sm:$0xff] }
  0x95   : > { %1476 = vmatpush1.bf16.msra.mxu0 %v2163_v10  ;;  %1519 = vmatpush1.bf16.msra.mxu1 %v2165_v11  ;;  %v323_v10 = vld [vmem:[%s2455_s7 + $0x428] sm:$0xff] }
  0x96   : > { %1539 = vmatprep.subr.bf16.mxu0 %v1992_v12  ;;  %1582 = vmatprep.subr.bf16.mxu1 %v1994_v13  ;;  %v331_v11 = vld [vmem:[%s2455_s7 + $0x468] sm:$0xff]  ;;  %v2103_v12 = vcombine.low %v306_v0, %v314_v1  ;;  %v2105_v13 = vcombine.low %v307_v2, %v315_v3  ;;  %v2028_v0 = vcombine.high %v228_v58, %v236_v59  ;;  %v244_v2 = vld [vmem:[%s2455_s7 + $0x1b0] sm:$0xff] }
  0x97   : > { %v2122_v15 = vcombine.high %v323_v10, %v331_v11  ;;  %v252_v3 = vld [vmem:[%s2455_s7 + $0x1f0] sm:$0xff] }
  0x98   : > { %1486 = vmatmul.mubr.bf16.vlgmr.msra.gmra.mrb[4].mxu0 %v2528_v40  ;;  %1529 = vmatmul.mubr.bf16.vlgmr.msra.gmra.mrb[4].mxu1 %v2528_v40 }
  0x99   : > { %1540 = vmatpush1.bf16.msra.mxu0 %v1991_v18  ;;  %1583 = vmatpush1.bf16.msra.mxu1 %v1993_v19  ;;  %v339_v18 = vld [vmem:[%s2455_s7 + $0x4a8] sm:$0xff] }
  0x9a   : > { %1541 = vmatprep.subr.bf16.mxu0 %v2008_v20  ;;  %1584 = vmatprep.subr.bf16.mxu1 %v2010_v21  ;;  %v347_v19 = vld [vmem:[%s2455_s7 + $0x4e8] sm:$0xff]  ;;  %v2119_v20 = vcombine.low %v322_v8, %v330_v9  ;;  %v2121_v21 = vcombine.low %v323_v10, %v331_v11  ;;  %v2044_v8 = vcombine.high %v244_v2, %v252_v3  ;;  %v260_v10 = vld [vmem:[%s2455_s7 + $0x230] sm:$0xff] }
  0x9b   : > { %2179 = vmatprep.mubr.msk.bf16.mxu0 %vm1363_vm0, %v2488_v44  ;;  %2180 = vmatprep.mubr.msk.bf16.mxu1 %vm1363_vm0, %v2488_v44  ;;  %v2138_v23 = vcombine.high %v339_v18, %v347_v19  ;;  %v268_v11 = vld [vmem:[%s2455_s7 + $0x270] sm:$0xff] }
  0x9d   : > { %1542 = vmatpush1.bf16.msra.mxu0 %v2007_v26  ;;  %1585 = vmatpush1.bf16.msra.mxu1 %v2009_v27  ;;  %v355_v26 = vld [vmem:[%s2455_s7 + $0x528] sm:$0xff] }
  0x9e   : > { %1543 = vmatprep.subr.bf16.mxu0 %v2024_v28  ;;  %1586 = vmatprep.subr.bf16.mxu1 %v2026_v29  ;;  %v363_v27 = vld [vmem:[%s2455_s7 + $0x568] sm:$0xff]  ;;  %v2135_v28 = vcombine.low %v338_v16, %v346_v17  ;;  %v2137_v29 = vcombine.low %v339_v18, %v347_v19  ;;  %v276_v17 = vld [vmem:[%s2455_s7 + $0x2b0] sm:$0xff]  ;;  %v277_v19 = vld [vmem:[%s2455_s7 + $0x2b8] sm:$0xff] }
  0x9f   : > { %v2154_v31 = vcombine.high %v355_v26, %v363_v27  ;;  %v284_v18 = vld [vmem:[%s2455_s7 + $0x2f0] sm:$0xff] }
  0xa1   : > { %1544 = vmatpush1.bf16.msra.mxu0 %v2023_v34  ;;  %1587 = vmatpush1.bf16.msra.mxu1 %v2025_v35  ;;  %v371_v34 = vld [vmem:[%s2455_s7 + $0x5a8] sm:$0xff] }
  0xa2   : > { %1545 = vmatprep.subr.bf16.mxu0 %v2040_v36  ;;  %1588 = vmatprep.subr.bf16.mxu1 %v2042_v37  ;;  %v379_v35 = vld [vmem:[%s2455_s7 + $0x5e8] sm:$0xff]  ;;  %v2151_v36 = vcombine.low %v354_v24, %v362_v25  ;;  %v2153_v37 = vcombine.low %v355_v26, %v363_v27  ;;  %v292_v25 = vld [vmem:[%s2455_s7 + $0x330] sm:$0xff]  ;;  %v293_v27 = vld [vmem:[%s2455_s7 + $0x338] sm:$0xff] }
  0xa3   : > { %v2170_v39 = vcombine.high %v371_v34, %v379_v35  ;;  %v300_v26 = vld [vmem:[%s2455_s7 + $0x370] sm:$0xff] }
  0xa5   : > { %1546 = vmatpush1.bf16.msra.mxu0 %v2039_v43  ;;  %1589 = vmatpush1.bf16.msra.mxu1 %v2041_v45  ;;  %v197_v43 = vld [vmem:[%s2455_s7 + $0x38] sm:$0xff] }
  0xa6   : > { %1547 = vmatprep.subr.bf16.mxu0 %v2056_v46  ;;  %1590 = vmatprep.subr.bf16.mxu1 %v2058_v47  ;;  %v205_v45 = vld [vmem:[%s2455_s7 + $0x78] sm:$0xff]  ;;  %v2167_v46 = vcombine.low %v370_v32, %v378_v33  ;;  %v2169_v47 = vcombine.low %v371_v34, %v379_v35  ;;  %v308_v33 = vld [vmem:[%s2455_s7 + $0x3b0] sm:$0xff] }
  0xa7   : > { %v1998_v49 = vcombine.high %v197_v43, %v205_v45  ;;  %v316_v34 = vld [vmem:[%s2455_s7 + $0x3f0] sm:$0xff]  ;;  %v309_v35 = vld [vmem:[%s2455_s7 + $0x3b8] sm:$0xff] }
  0xa9   : > { %1548 = vmatpush1.bf16.msra.mxu0 %v2055_v52  ;;  %1591 = vmatpush1.bf16.msra.mxu1 %v2057_v53  ;;  %v213_v52 = vld [vmem:[%s2455_s7 + $0xb8] sm:$0xff] }
  0xaa   : > { %1549 = vmatprep.subr.bf16.mxu0 %v2072_v54  ;;  %1592 = vmatprep.subr.bf16.mxu1 %v2074_v55  ;;  %v221_v53 = vld [vmem:[%s2455_s7 + $0xf8] sm:$0xff]  ;;  %v1995_v54 = vcombine.low %v196_v41, %v204_v42  ;;  %v1997_v55 = vcombine.low %v197_v43, %v205_v45  ;;  %v324_v42 = vld [vmem:[%s2455_s7 + $0x430] sm:$0xff] }
  0xab   : > { %v2014_v57 = vcombine.high %v213_v52, %v221_v53  ;;  %v332_v43 = vld [vmem:[%s2455_s7 + $0x470] sm:$0xff]  ;;  %v325_v45 = vld [vmem:[%s2455_s7 + $0x438] sm:$0xff] }
  0xad   : > { %1550 = vmatpush1.bf16.msra.mxu0 %v2071_v60  ;;  %1593 = vmatpush1.bf16.msra.mxu1 %v2073_v61  ;;  %v229_v60 = vld [vmem:[%s2455_s7 + $0x138] sm:$0xff] }
  0xae   : > { %1551 = vmatprep.subr.bf16.mxu0 %v2088_v62  ;;  %1594 = vmatprep.subr.bf16.mxu1 %v2090_v63  ;;  %v237_v61 = vld [vmem:[%s2455_s7 + $0x178] sm:$0xff]  ;;  %v2011_v62 = vcombine.low %v212_v50, %v220_v51  ;;  %v2013_v63 = vcombine.low %v213_v52, %v221_v53  ;;  %v340_v51 = vld [vmem:[%s2455_s7 + $0x4b0] sm:$0xff] }
  0xaf   : > { %v2030_v1 = vcombine.high %v229_v60, %v237_v61  ;;  %v348_v52 = vld [vmem:[%s2455_s7 + $0x4f0] sm:$0xff]  ;;  %v341_v53 = vld [vmem:[%s2455_s7 + $0x4b8] sm:$0xff] }
  0xb1   : > { %1552 = vmatpush1.bf16.msra.mxu0 %v2087_v4  ;;  %1595 = vmatpush1.bf16.msra.mxu1 %v2089_v5  ;;  %v245_v4 = vld [vmem:[%s2455_s7 + $0x1b8] sm:$0xff] }
  0xb2   : > { %1553 = vmatprep.subr.bf16.mxu0 %v2104_v6  ;;  %1596 = vmatprep.subr.bf16.mxu1 %v2106_v7  ;;  %v253_v5 = vld [vmem:[%s2455_s7 + $0x1f8] sm:$0xff]  ;;  %v2027_v6 = vcombine.low %v228_v58, %v236_v59  ;;  %v2029_v7 = vcombine.low %v229_v60, %v237_v61  ;;  %v356_v59 = vld [vmem:[%s2455_s7 + $0x530] sm:$0xff] }
  0xb3   : > { %v2046_v9 = vcombine.high %v245_v4, %v253_v5  ;;  %v364_v60 = vld [vmem:[%s2455_s7 + $0x570] sm:$0xff]  ;;  %v357_v61 = vld [vmem:[%s2455_s7 + $0x538] sm:$0xff] }
  0xb5   : > { %1554 = vmatpush1.bf16.msra.mxu0 %v2103_v12  ;;  %1597 = vmatpush1.bf16.msra.mxu1 %v2105_v13  ;;  %v261_v12 = vld [vmem:[%s2455_s7 + $0x238] sm:$0xff] }
  0xb6   : > { %1555 = vmatprep.subr.bf16.mxu0 %v2120_v14  ;;  %1598 = vmatprep.subr.bf16.mxu1 %v2122_v15  ;;  %v269_v13 = vld [vmem:[%s2455_s7 + $0x278] sm:$0xff]  ;;  %v2043_v14 = vcombine.low %v244_v2, %v252_v3  ;;  %v2060_v15 = vcombine.high %v260_v10, %v268_v11  ;;  %v372_v3 = vld [vmem:[%s2455_s7 + $0x5b0] sm:$0xff] }
  0xb7   : > { %v2062_v16 = vcombine.high %v261_v12, %v269_v13 }
  0xb9   : > { %1556 = vmatpush1.bf16.msra.mxu0 %v2119_v20  ;;  %1599 = vmatpush1.bf16.msra.mxu1 %v2121_v21  ;;  %v285_v20 = vld [vmem:[%s2455_s7 + $0x2f8] sm:$0xff]  ;;  %v2059_v21 = vcombine.low %v260_v10, %v268_v11 }
  0xba   : > { %1557 = vmatprep.subr.bf16.mxu0 %v2136_v22  ;;  %1600 = vmatprep.subr.bf16.mxu1 %v2138_v23  ;;  %v2061_v22 = vcombine.low %v261_v12, %v269_v13  ;;  %v2076_v23 = vcombine.high %v276_v17, %v284_v18  ;;  %v2078_v24 = vcombine.high %v277_v19, %v285_v20 }
  0xbd   : > { %1558 = vmatpush1.bf16.msra.mxu0 %v2135_v28  ;;  %1601 = vmatpush1.bf16.msra.mxu1 %v2137_v29  ;;  %v301_v28 = vld [vmem:[%s2455_s7 + $0x378] sm:$0xff]  ;;  %v2075_v29 = vcombine.low %v276_v17, %v284_v18 }
  0xbe   : > { %1559 = vmatprep.subr.bf16.mxu0 %v2152_v30  ;;  %1602 = vmatprep.subr.bf16.mxu1 %v2154_v31  ;;  %v2077_v30 = vcombine.low %v277_v19, %v285_v20  ;;  %v2092_v31 = vcombine.high %v292_v25, %v300_v26  ;;  %v2094_v32 = vcombine.high %v293_v27, %v301_v28 }
  0xc1   : > { %1560 = vmatpush1.bf16.msra.mxu0 %v2151_v36  ;;  %1603 = vmatpush1.bf16.msra.mxu1 %v2153_v37  ;;  %v317_v36 = vld [vmem:[%s2455_s7 + $0x3f8] sm:$0xff]  ;;  %v2091_v37 = vcombine.low %v292_v25, %v300_v26 }
  0xc2   : > { %1561 = vmatprep.subr.bf16.mxu0 %v2168_v38  ;;  %1604 = vmatprep.subr.bf16.mxu1 %v2170_v39  ;;  %v2093_v38 = vcombine.low %v293_v27, %v301_v28  ;;  %v2108_v39 = vcombine.high %v308_v33, %v316_v34  ;;  %v2110_v41 = vcombine.high %v309_v35, %v317_v36 }
  0xc5   : > { %1562 = vmatpush1.bf16.msra.mxu0 %v2167_v46  ;;  %1605 = vmatpush1.bf16.msra.mxu1 %v2169_v47  ;;  %v333_v46 = vld [vmem:[%s2455_s7 + $0x478] sm:$0xff]  ;;  %v2107_v47 = vcombine.low %v308_v33, %v316_v34 }
  0xc6   : > { %1625 = vmatprep.subr.bf16.mxu0 %v1996_v48  ;;  %1668 = vmatprep.subr.bf16.mxu1 %v1998_v49  ;;  %v2109_v48 = vcombine.low %v309_v35, %v317_v36  ;;  %v2124_v49 = vcombine.high %v324_v42, %v332_v43  ;;  %v2126_v50 = vcombine.high %v325_v45, %v333_v46 }
  0xc8   : > { %1572 = vmatmul.mubr.bf16.vlgmr.msra.gmra.mrb[8].mxu0 %v2528_v40  ;;  %1615 = vmatmul.mubr.bf16.vlgmr.msra.gmra.mrb[8].mxu1 %v2528_v40 }
  0xc9   : > { %1626 = vmatpush1.bf16.msra.mxu0 %v1995_v54  ;;  %1669 = vmatpush1.bf16.msra.mxu1 %v1997_v55  ;;  %v349_v54 = vld [vmem:[%s2455_s7 + $0x4f8] sm:$0xff]  ;;  %v2123_v55 = vcombine.low %v324_v42, %v332_v43 }
  0xca   : > { %1627 = vmatprep.subr.bf16.mxu0 %v2012_v56  ;;  %1670 = vmatprep.subr.bf16.mxu1 %v2014_v57  ;;  %v2125_v56 = vcombine.low %v325_v45, %v333_v46  ;;  %v2140_v57 = vcombine.high %v340_v51, %v348_v52  ;;  %v2142_v58 = vcombine.high %v341_v53, %v349_v54 }
  0xcb   : > { %2181 = vmatprep.mubr.msk.bf16.mxu0 %vm1363_vm0, %v2488_v44  ;;  %2182 = vmatprep.mubr.msk.bf16.mxu1 %vm1363_vm0, %v2488_v44  ;;  %v2045_v44 = vcombine.low %v245_v4, %v253_v5  ;;  %v380_v4 = vld [vmem:[%s2455_s7 + $0x5f0] sm:$0xff]  ;;  %v373_v5 = vld [vmem:[%s2455_s7 + $0x5b8] sm:$0xff] }
  0xcc   : > { %v2171_v11 = vcombine.low %v372_v3, %v380_v4 }
  0xcd   : > { %1628 = vmatpush1.bf16.msra.mxu0 %v2011_v62  ;;  %1671 = vmatpush1.bf16.msra.mxu1 %v2013_v63  ;;  %v365_v62 = vld [vmem:[%s2455_s7 + $0x578] sm:$0xff]  ;;  %v2139_v63 = vcombine.low %v340_v51, %v348_v52 }
  0xce   : > { %1629 = vmatprep.subr.bf16.mxu0 %v2028_v0  ;;  %1672 = vmatprep.subr.bf16.mxu1 %v2030_v1  ;;  %v2141_v0 = vcombine.low %v341_v53, %v349_v54  ;;  %v2156_v1 = vcombine.high %v356_v59, %v364_v60  ;;  %v2158_v2 = vcombine.high %v357_v61, %v365_v62  ;;  %v2693_v13 = vpop.permute.xlu0 %386 }
  0xd1   : > { %1630 = vmatpush1.bf16.msra.mxu0 %v2027_v6  ;;  %1673 = vmatpush1.bf16.msra.mxu1 %v2029_v7  ;;  %v381_v6 = vld [vmem:[%s2455_s7 + $0x5f8] sm:$0xff]  ;;  %v2155_v7 = vcombine.low %v356_v59, %v364_v60 }
  0xd2   : > { %1631 = vmatprep.subr.bf16.mxu0 %v2044_v8  ;;  %1674 = vmatprep.subr.bf16.mxu1 %v2046_v9  ;;  %v2157_v8 = vcombine.low %v357_v61, %v365_v62  ;;  %v2172_v9 = vcombine.high %v372_v3, %v380_v4  ;;  %v2174_v10 = vcombine.high %v373_v5, %v381_v6 }
  0xd3   : > { %v2173_v12 = vcombine.low %v373_v5, %v381_v6 }
  0xd5   : > { %1632 = vmatpush1.bf16.msra.mxu0 %v2043_v14  ;;  %1675 = vmatpush1.bf16.msra.mxu1 %v2045_v44  ;;  %v2695_v44 = vpop.permute.xlu0 %391 }
  0xd6   : > { %1633 = vmatprep.subr.bf16.mxu0 %v2060_v15  ;;  %1676 = vmatprep.subr.bf16.mxu1 %v2062_v16 }
  0xd9   : > { %1634 = vmatpush1.bf16.msra.mxu0 %v2059_v21  ;;  %1677 = vmatpush1.bf16.msra.mxu1 %v2061_v22 }
  0xda   : > { %1635 = vmatprep.subr.bf16.mxu0 %v2076_v23  ;;  %1678 = vmatprep.subr.bf16.mxu1 %v2078_v24 }
  0xdd   : > { %1636 = vmatpush1.bf16.msra.mxu0 %v2075_v29  ;;  %1679 = vmatpush1.bf16.msra.mxu1 %v2077_v30 }
  0xde   : > { %1637 = vmatprep.subr.bf16.mxu0 %v2092_v31  ;;  %1680 = vmatprep.subr.bf16.mxu1 %v2094_v32 }
  0xe1   : > { %1638 = vmatpush1.bf16.msra.mxu0 %v2091_v37  ;;  %1681 = vmatpush1.bf16.msra.mxu1 %v2093_v38 }
  0xe2   : > { %1639 = vmatprep.subr.bf16.mxu0 %v2108_v39  ;;  %1682 = vmatprep.subr.bf16.mxu1 %v2110_v41 }
  0xe5   : > { %1640 = vmatpush1.bf16.msra.mxu0 %v2107_v47  ;;  %1683 = vmatpush1.bf16.msra.mxu1 %v2109_v48 }
  0xe6   : > { %1641 = vmatprep.subr.bf16.mxu0 %v2124_v49  ;;  %1684 = vmatprep.subr.bf16.mxu1 %v2126_v50 }
  0xe9   : > { %1642 = vmatpush1.bf16.msra.mxu0 %v2123_v55  ;;  %1685 = vmatpush1.bf16.msra.mxu1 %v2125_v56 }
  0xea   : > { %1643 = vmatprep.subr.bf16.mxu0 %v2140_v57  ;;  %1686 = vmatprep.subr.bf16.mxu1 %v2142_v58 }
  0xed   : > { %1644 = vmatpush1.bf16.msra.mxu0 %v2139_v63  ;;  %1687 = vmatpush1.bf16.msra.mxu1 %v2141_v0 }
  0xee   : > { %1645 = vmatprep.subr.bf16.mxu0 %v2156_v1  ;;  %1688 = vmatprep.subr.bf16.mxu1 %v2158_v2 }
  0xf1   : > { %1646 = vmatpush1.bf16.msra.mxu0 %v2155_v7  ;;  %1689 = vmatpush1.bf16.msra.mxu1 %v2157_v8 }
  0xf2   : > { %1647 = vmatprep.subr.bf16.mxu0 %v2172_v9  ;;  %1690 = vmatprep.subr.bf16.mxu1 %v2174_v10 }
  0xf5   : > { %1648 = vmatpush1.bf16.msra.mxu0 %v2171_v11  ;;  %1691 = vmatpush1.bf16.msra.mxu1 %v2173_v12 }
  0xf8   : > { %1658 = vmatmul.mubr.bf16.vlgmr.msra.gmra.mrb[12].mxu0 %v2528_v40  ;;  %1701 = vmatmul.mubr.bf16.vlgmr.msra.gmra.mrb[12].mxu1 %v2528_v40 }
 0x13b   : > { %v1401_v14 = vpop.f32.mrb[0].mxu0  ;;  %v1444_v16 = vpop.f32.mrb[0].mxu1 }
 0x13c   : > { %v1402_v15 = vadd.f32 %v1401_v14, %v2693_v13  ;;  %v1403_v17 = vpop.f32.mrb[1].mxu0  ;;  %v1445_v18 = vadd.f32 %v1444_v16, %v2693_v13  ;;  %v1446_v20 = vpop.f32.mrb[1].mxu1 }
 0x13d   : > { %v1404_v19 = vadd.f32 %v1403_v17, %v2693_v13  ;;  %v1405_v21 = vpop.f32.mrb[2].mxu0  ;;  %v1447_v23 = vadd.f32 %v1446_v20, %v2693_v13  ;;  %v1448_v24 = vpop.f32.mrb[2].mxu1 }
 0x13e   : > { %v1711_v22 = vmax.f32 %v1402_v15, 0.0  ;;  %v1406_v40 = vadd.f32 %v1405_v21, %v2695_v44  ;;  %v1407_v25 = vpop.f32.mrb[3].mxu0  ;;  %v1713_v26 = vmax.f32 %v1445_v18, 0.0  ;;  %v1449_v28 = vadd.f32 %v1448_v24, %v2695_v44  ;;  %v1450_v30 = vpop.f32.mrb[3].mxu1 }
 0x13f   : > { %v1712_v27 = vmax.f32 %v1404_v19, 0.0  ;;  %v1408_v29 = vadd.f32 %v1407_v25, %v2695_v44  ;;  %v1714_v31 = vmax.f32 %v1447_v23, 0.0  ;;  %v1451_v33 = vadd.f32 %v1450_v30, %v2695_v44 }
 0x140   : > { %v1727_v32 = vmax.f32 %v1406_v40, 0.0  ;;  %v1729_v35 = vmax.f32 %v1449_v28, 0.0 }
 0x141   : > { %v2205_v34 = vpack.c.bf16 %v1712_v27, %v1711_v22  ;;  %v1728_v36 = vmax.f32 %v1408_v29, 0.0  ;;  %v2206_v37 = vpack.c.bf16 %v1714_v31, %v1713_v26  ;;  %v1730_v38 = vmax.f32 %v1451_v33, 0.0 }
 0x143   : > { %1839 = vst [vmem:[%s2706_s11] sm:$0xff] %v2205_v34  ;;  %v2213_v39 = vpack.c.bf16 %v1728_v36, %v1727_v32  ;;  %1840 = vst [vmem:[%s2706_s11 + $0x8] sm:$0xff] %v2206_v37  ;;  %v2214_v41 = vpack.c.bf16 %v1730_v38, %v1729_v35 }
 0x145   : > { %1847 = vst [vmem:[%s2706_s11 + $0x40] sm:$0xff] %v2213_v39  ;;  %1848 = vst [vmem:[%s2706_s11 + $0x48] sm:$0xff] %v2214_v41 }
 0x16b   : > { %v1487_v42 = vpop.f32.mrb[4].mxu0  ;;  %v1530_v45 = vpop.f32.mrb[4].mxu1 }
 0x16c   : > { %v1488_v43 = vadd.f32 %v1487_v42, %v2693_v13  ;;  %v1489_v46 = vpop.f32.mrb[5].mxu0  ;;  %v1531_v47 = vadd.f32 %v1530_v45, %v2693_v13  ;;  %v1532_v49 = vpop.f32.mrb[5].mxu1 }
 0x16d   : > { %v1490_v48 = vadd.f32 %v1489_v46, %v2693_v13  ;;  %v1491_v50 = vpop.f32.mrb[6].mxu0  ;;  %v1533_v52 = vadd.f32 %v1532_v49, %v2693_v13  ;;  %v1534_v54 = vpop.f32.mrb[6].mxu1 }
 0x16e   : > { %v1715_v51 = vmax.f32 %v1488_v43, 0.0  ;;  %v1492_v53 = vadd.f32 %v1491_v50, %v2695_v44  ;;  %v1493_v55 = vpop.f32.mrb[7].mxu0  ;;  %v1717_v56 = vmax.f32 %v1531_v47, 0.0  ;;  %v1535_v58 = vadd.f32 %v1534_v54, %v2695_v44  ;;  %v1536_v60 = vpop.f32.mrb[7].mxu1 }
 0x16f   : > { %v1716_v57 = vmax.f32 %v1490_v48, 0.0  ;;  %v1494_v59 = vadd.f32 %v1493_v55, %v2695_v44  ;;  %v1718_v61 = vmax.f32 %v1533_v52, 0.0  ;;  %v1537_v63 = vadd.f32 %v1536_v60, %v2695_v44 }
 0x170   : > { %v1731_v62 = vmax.f32 %v1492_v53, 0.0  ;;  %v1733_v1 = vmax.f32 %v1535_v58, 0.0 }
 0x171   : > { %v2207_v0 = vpack.c.bf16 %v1716_v57, %v1715_v51  ;;  %v1732_v2 = vmax.f32 %v1494_v59, 0.0  ;;  %v2208_v3 = vpack.c.bf16 %v1718_v61, %v1717_v56  ;;  %v1734_v4 = vmax.f32 %v1537_v63, 0.0 }
 0x173   : > { %1841 = vst [vmem:[%s2706_s11 + $0x10] sm:$0xff] %v2207_v0  ;;  %v2215_v5 = vpack.c.bf16 %v1732_v2, %v1731_v62  ;;  %1842 = vst [vmem:[%s2706_s11 + $0x18] sm:$0xff] %v2208_v3  ;;  %v2216_v6 = vpack.c.bf16 %v1734_v4, %v1733_v1  ;;  %v1879_v0 = vld [vmem:[%s2706_s11 + $0x8] sm:$0xff] (%p2790_p7) }
 0x174   : > { %1880 = vst [vmem:[%s1864_s23 + $0x8] sm:$0xff] (%p2790_p7), %v1879_v0 }
 0x175   : > { %1849 = vst [vmem:[%s2706_s11 + $0x50] sm:$0xff] %v2215_v5  ;;  %1850 = vst [vmem:[%s2706_s11 + $0x58] sm:$0xff] %v2216_v6 }
 0x17a   : > { %v1881_v1 = vld [vmem:[%s2706_s11 + $0x10] sm:$0xff] (%p2790_p7)  ;;  %v1883_v2 = vld [vmem:[%s2706_s11 + $0x18] sm:$0xff] (%p2790_p7) }
 0x17b   : > { %1882 = vst [vmem:[%s1864_s23 + $0x10] sm:$0xff] (%p2790_p7), %v1881_v1  ;;  %1884 = vst [vmem:[%s1864_s23 + $0x18] sm:$0xff] (%p2790_p7), %v1883_v2 }
 0x19b   : > { %v1573_v7 = vpop.f32.mrb[8].mxu0  ;;  %v1616_v9 = vpop.f32.mrb[8].mxu1 }
 0x19c   : > { %v1574_v8 = vadd.f32 %v1573_v7, %v2693_v13  ;;  %v1575_v10 = vpop.f32.mrb[9].mxu0  ;;  %v1617_v11 = vadd.f32 %v1616_v9, %v2693_v13  ;;  %v1618_v14 = vpop.f32.mrb[9].mxu1  ;;  %v1893_v7 = vld [vmem:[%s2706_s11 + $0x40] sm:$0xff] (%p2790_p7)  ;;  %v1897_v9 = vld [vmem:[%s2706_s11 + $0x50] sm:$0xff] (%p2790_p7) }
 0x19d   : > { %v1576_v12 = vadd.f32 %v1575_v10, %v2693_v13  ;;  %v1577_v15 = vpop.f32.mrb[10].mxu0  ;;  %v1619_v17 = vadd.f32 %v1618_v14, %v2693_v13  ;;  %v1620_v19 = vpop.f32.mrb[10].mxu1  ;;  %1894 = vst [vmem:[%s1864_s23 + $0xfc0] sm:$0xff] (%p2790_p7), %v1893_v7  ;;  %v1899_v10 = vld [vmem:[%s2706_s11 + $0x58] sm:$0xff] (%p2790_p7)  ;;  %1898 = vst [vmem:[%s1864_s23 + $0xfd0] sm:$0xff] (%p2790_p7), %v1897_v9 }
 0x19e   : > { %v1719_v16 = vmax.f32 %v1574_v8, 0.0  ;;  %v1578_v18 = vadd.f32 %v1577_v15, %v2695_v44  ;;  %v1579_v20 = vpop.f32.mrb[11].mxu0  ;;  %v1721_v21 = vmax.f32 %v1617_v11, 0.0  ;;  %v1621_v23 = vadd.f32 %v1620_v19, %v2695_v44  ;;  %v1622_v24 = vpop.f32.mrb[11].mxu1  ;;  %v1895_v8 = vld [vmem:[%s2706_s11 + $0x48] sm:$0xff] (%p2790_p7)  ;;  %1900 = vst [vmem:[%s1864_s23 + $0xfd8] sm:$0xff] (%p2790_p7), %v1899_v10 }
 0x19f   : > { %v1720_v22 = vmax.f32 %v1576_v12, 0.0  ;;  %v1580_v40 = vadd.f32 %v1579_v20, %v2695_v44  ;;  %v1722_v25 = vmax.f32 %v1619_v17, 0.0  ;;  %v1623_v27 = vadd.f32 %v1622_v24, %v2695_v44  ;;  %1896 = vst [vmem:[%s1864_s23 + $0xfc8] sm:$0xff] (%p2790_p7), %v1895_v8 }
 0x1a0   : > { %v1735_v26 = vmax.f32 %v1578_v18, 0.0  ;;  %v1737_v29 = vmax.f32 %v1621_v23, 0.0 }
 0x1a1   : > { %v2209_v28 = vpack.c.bf16 %v1720_v22, %v1719_v16  ;;  %v1736_v30 = vmax.f32 %v1580_v40, 0.0  ;;  %v2210_v31 = vpack.c.bf16 %v1722_v25, %v1721_v21  ;;  %v1738_v32 = vmax.f32 %v1623_v27, 0.0 }
 0x1a3   : > { %1843 = vst [vmem:[%s2706_s11 + $0x20] sm:$0xff] %v2209_v28  ;;  %v2217_v33 = vpack.c.bf16 %v1736_v30, %v1735_v26  ;;  %1844 = vst [vmem:[%s2706_s11 + $0x28] sm:$0xff] %v2210_v31  ;;  %v2218_v34 = vpack.c.bf16 %v1738_v32, %v1737_v29 }
 0x1a5   : > { %1851 = vst [vmem:[%s2706_s11 + $0x60] sm:$0xff] %v2217_v33  ;;  %1852 = vst [vmem:[%s2706_s11 + $0x68] sm:$0xff] %v2218_v34 }
 0x1aa   : > { %v1885_v3 = vld [vmem:[%s2706_s11 + $0x20] sm:$0xff] (%p2790_p7)  ;;  %v1887_v4 = vld [vmem:[%s2706_s11 + $0x28] sm:$0xff] (%p2790_p7) }
 0x1ab   : > { %1886 = vst [vmem:[%s1864_s23 + $0x20] sm:$0xff] (%p2790_p7), %v1885_v3  ;;  %1888 = vst [vmem:[%s1864_s23 + $0x28] sm:$0xff] (%p2790_p7), %v1887_v4 }
 0x1ac   : > { %v1901_v11 = vld [vmem:[%s2706_s11 + $0x60] sm:$0xff] (%p2790_p7)  ;;  %v1903_v12 = vld [vmem:[%s2706_s11 + $0x68] sm:$0xff] (%p2790_p7) }
 0x1ad   : > { %1902 = vst [vmem:[%s1864_s23 + $0xfe0] sm:$0xff] (%p2790_p7), %v1901_v11  ;;  %1904 = vst [vmem:[%s1864_s23 + $0xfe8] sm:$0xff] (%p2790_p7), %v1903_v12 }
 0x1cb   : > { %v1659_v35 = vpop.f32.mrb[12].mxu0  ;;  %v1702_v37 = vpop.f32.mrb[12].mxu1 }
 0x1cc   : > { %v1660_v36 = vadd.f32 %v1659_v35, %v2693_v13  ;;  %v1661_v38 = vpop.f32.mrb[13].mxu0  ;;  %v1703_v39 = vadd.f32 %v1702_v37, %v2693_v13  ;;  %v1704_v42 = vpop.f32.mrb[13].mxu1 }
 0x1cd   : > { %v1662_v41 = vadd.f32 %v1661_v38, %v2693_v13  ;;  %v1663_v43 = vpop.f32.mrb[14].mxu0  ;;  %v1705_v46 = vadd.f32 %v1704_v42, %v2693_v13  ;;  %v1706_v48 = vpop.f32.mrb[14].mxu1 }
 0x1ce   : > { %v1723_v45 = vmax.f32 %v1660_v36, 0.0  ;;  %v1664_v47 = vadd.f32 %v1663_v43, %v2695_v44  ;;  %v1665_v49 = vpop.f32.mrb[15].mxu0  ;;  %v1725_v50 = vmax.f32 %v1703_v39, 0.0  ;;  %v1707_v52 = vadd.f32 %v1706_v48, %v2695_v44  ;;  %v1708_v54 = vpop.f32.mrb[15].mxu1 }
 0x1cf   : > { %v1724_v51 = vmax.f32 %v1662_v41, 0.0  ;;  %v1666_v53 = vadd.f32 %v1665_v49, %v2695_v44  ;;  %v1726_v55 = vmax.f32 %v1705_v46, 0.0  ;;  %v1709_v57 = vadd.f32 %v1708_v54, %v2695_v44  ;;  %1861 = sbr.rel (!%p2790_p7) target bundleno = 478 (0x1de), region = 40  ;;  %v1877_v44 = vld [vmem:[%s2706_s11] sm:$0xff] (%p2790_p7) }
 0x1d0   : > { %v1739_v56 = vmax.f32 %v1664_v47, 0.0  ;;  %v1741_v58 = vmax.f32 %v1707_v52, 0.0  ;;  %1878 = vst [vmem:[%s1864_s23] sm:$0xff] (%p2790_p7), %v1877_v44 }
 0x1d1   : > { %v2211_v13 = vpack.c.bf16 %v1724_v51, %v1723_v45  ;;  %v1740_v59 = vmax.f32 %v1666_v53, 0.0  ;;  %v2212_v60 = vpack.c.bf16 %v1726_v55, %v1725_v50  ;;  %v1742_v61 = vmax.f32 %v1709_v57, 0.0 }
 0x1d3   : > { %1845 = vst [vmem:[%s2706_s11 + $0x30] sm:$0xff] %v2211_v13  ;;  %v2219_v62 = vpack.c.bf16 %v1740_v59, %v1739_v56  ;;  %1846 = vst [vmem:[%s2706_s11 + $0x38] sm:$0xff] %v2212_v60  ;;  %v2220_v63 = vpack.c.bf16 %v1742_v61, %v1741_v58 }
 0x1d5   : > { %1853 = vst [vmem:[%s2706_s11 + $0x70] sm:$0xff] %v2219_v62  ;;  %1854 = vst [vmem:[%s2706_s11 + $0x78] sm:$0xff] %v2220_v63 }
 0x1da   : > { %v1889_v5 = vld [vmem:[%s2706_s11 + $0x30] sm:$0xff]  ;;  %v1891_v6 = vld [vmem:[%s2706_s11 + $0x38] sm:$0xff] }
 0x1db   : > { %1890 = vst [vmem:[%s1864_s23 + $0x30] sm:$0xff] %v1889_v5  ;;  %1892 = vst [vmem:[%s1864_s23 + $0x38] sm:$0xff] %v1891_v6 }
 0x1dc   : > { %v1905_v14 = vld [vmem:[%s2706_s11 + $0x70] sm:$0xff]  ;;  %v1907_v15 = vld [vmem:[%s2706_s11 + $0x78] sm:$0xff] }
 0x1dd   : > { %1906 = vst [vmem:[%s1864_s23 + $0xff0] sm:$0xff] %v1905_v14  ;;  %1908 = vst [vmem:[%s1864_s23 + $0xff8] sm:$0xff] %v1907_v15 }
 0x1de PF: > { %p13_p9 = scmp.ge.s32.totalorder %s2384_s17, 65   ;;  %s2791_s12 = smov %s2327_s13 }
 0x1df   : > { %s2792_s13 = smov %s2331_s14  ;;  %s2793_s14 = smov %s2394_s20 }
 0x1e0   : > { %s2794_s15 = smov %s2384_s17  ;;  %15 = sbr.rel (!%p13_p9) target bundleno = 3 (0x3), region = 95 }
 0x1e7   :  { %1924 = vsyncpa [#allocation3], 1 }
 0x1e8   :  { %1926 = vsyncpa [#allocation3 + $0x1], 1 }

// kernel: cnn_forward.5
= control target key start
LH: loop header
LB: loop body
LE: loop exit
PB: predicated region body
PF: predicated region fallthrough
CT: control target
= control target key end

     0   :  { %8 = vsyncpa [#allocation3], 0  ;;  %s7669_s0 = inlined_call_operand.vmem [shape: bf16[32,576], index: 0, kind: input, shape index: {}]   ;;  %s7670_s1 = inlined_call_operand.hbm [shape: bf16[576,30720], index: 1, kind: input, shape index: {}]   ;;  %s7671_s2 = inlined_call_operand.vmem [shape: f32[32,1], index: 2, kind: input, shape index: {}]   ;;  %s7672_s3 = inlined_call_operand.vmem [shape: bf16[32,30720], index: 3, kind: output, shape index: {}]  }
   0x1   :  { %10 = vsyncpa [#allocation3 + $0x1], 0  ;;  %s6490_s12 = smov 0   ;;  %s6492_s13 = smov 0  }
   0x2   :  { %s6494_s14 = smov 0   ;;  %s6496_s15 = smov 0  }
   0x3 LB: > { %s6509_s16 = sadd.s32 4294967295, %s6463_s15   ;;  %s6512_s17 = sadd.s32 1, %s6463_s15   ;;  %s6463_s15 = sphi %s6496_s15, %s7680_s15   ;;  %s6459_s14 = sphi %s6494_s14, %s7679_s14   ;;  %s6455_s13 = sphi %s6492_s13, %s7678_s13   ;;  %s6451_s12 = sphi %s6490_s12, %s7677_s12  }
   0x4   : > { %s41_s18 = ssub.s32 %s6463_s15, %s6512_s17  ;;  %s44_s19 = sadd.s32 1, %s6459_s14 }
   0x5   : > { %p42_p0 = scmp.eq.s32.totalorder %s41_s18, 0  ;;  %p51_p1 = scmp.ne.s32.totalorder %s6459_s14, %s6455_s13 }
   0x6   : > { %p52_p2 = scmp.eq.s32.totalorder %s6463_s15, 0  ;;  %p57_p3 = scmp.ne.s32.totalorder %s6455_s13, %s6451_s12 }
   0x7   : > { %s6522_s20 = scalar_select %p42_p0, %s6459_s14, %s44_s19  }
   0x8   : > { %p53_p4 = por %p52_p2, %p51_p1  ;;  %p58_p5 = scmp.eq.s32.totalorder %s6509_s16, 0 }
   0x9   : > { %p102_p6 = scmp.eq.s32.totalorder %s6509_s16, 14  ;;  %p6328_p8 = scmp.lt.s32.totalorder %s6463_s15, 15 }
   0xa   : > { %p6526_p7 = por %p58_p5, %p57_p3  ;;  %s134_s23 = sand.u32 1, %s6459_s14  }
   0xb   : > { %p6531_p9 = por %p102_p6, %p51_p1  ;;  %s6320_s24 = smul.u32 4608, %s134_s23 }
   0xc   : > { %s6094_s25 = sshll.u32 %s6463_s15, 10  ;;  %p6537_p10 = pnand %p6328_p8, %p53_p4 }
   0xd   : > { %s7674_s22 = scalar_select %p6531_p9, 1, 0 }
   0xe   : > { %s6544_s29 = scalar_lea.hbm %s7670_s1, %s6094_s25  ;;  %s138_s30 = scalar_lea.vmem [#allocation2], %s6320_s24 }
   0xf   : > { %s145_s4 = sshll.u32 %s138_s30, 4  ;;  %s6548_s5 = scalar_lea.sflag [#allocation3], %s134_s23  ;;  %s6546_s4 = int_to_ptr.vmem [resolvable:$true] %s145_s4 }
  0x10   : > { %s6399_s6 = scalar_lea.hbm %s6544_s29, 73728  ;;  %p6401_p12 = pneg %p6537_p10 }
  0x11   : > { %p6400_p11 = scmp.ne.s32.totalorder %s6544_s29, %s6399_s6  ;;  %s6404_s9 = scalar_lea.hbm %s7670_s1, 1105920 }
  0x12   : > { %p6405_p1 = scmp.lt.u32.totalorder %s6544_s29, %s7670_s1  ;;  %p6406_p2 = scmp.lt.u32.totalorder %s6404_s9, %s6399_s6 }
  0x13   : > { %p6402_p13 = pnand %p6401_p12, %p6400_p11  ;;  %p6408_p4 = scmp.lt.u32.totalorder %s6399_s6, %s6544_s29 }
  0x14   : > { %p6407_p3 = por %p6406_p2, %p6405_p1 }
  0x15   : > { %p6403_p0 = pneg %p6402_p13 }
  0x16   : > { %p6409_p5 = por %p6408_p4, %p6407_p3 }
  0x18   : > { %p6410_p6 = pnand %p6409_p5, %p6403_p0 }
  0x1a   : > { %6413 = shalt.err (!%p6410_p6)
}
  0x1b   : > { %s6414_s12 = scalar_lea.vmem %s6546_s4, 73728  ;;  %s6465_s18 = smov [#allocation2]  }
  0x1c   : > { %p6415_p8 = scmp.ne.s32.totalorder %s6546_s4, %s6414_s12  ;;  %s6419_s19 = sshll.u32 %s6465_s18, 4  ;;  %s6420_s19 = int_to_ptr.vmem [resolvable:$false] %s6419_s19 }
  0x1d   : > { %s6421_s23 = scalar_lea.vmem %s6420_s19, 147456  ;;  %p6422_p9 = scmp.lt.s32.totalorder %s6546_s4, %s6420_s19 }
  0x1e   : > { %p6417_p11 = pnand %p6415_p8, %p6401_p12  ;;  %p6423_p1 = scmp.lt.s32.totalorder %s6421_s23, %s6414_s12 }
  0x20   : > { %p6418_p13 = pneg %p6417_p11  ;;  %p6424_p2 = por %p6423_p1, %p6422_p9 }
  0x22   : > { %p6425_p3 = pnand %p6424_p2, %p6418_p13 }
  0x24   : > { %6428 = shalt.err (!%p6425_p3)
}
  0x25   : > { %s6466_s24 = smov 15360   ;;  %s6467_s25 = smov 1024  }
  0x26   : > { %s6468_s27 = smov 64   ;;  %p5453_p12 = scmp.ge.s32.totalorder %s6463_s15, 1 }
  0x27   : > { %6327 = dma.hbm_to_vmem [thread:$0]  (!%p6537_p10), %s6544_s29, 73728, %s6546_s4, %s6548_s5, %s6466_s24, %s6467_s25, %s6468_s27  }
  0x28   : > { %p153_p0 = scmp.lt.s32.totalorder %s6463_s15, 16 }
  0x2a   : > { %p154_p4 = pnand %p5453_p12, %p153_p0 }
  0x2b   : > { %s6579_s28 = sand.u32 (!%p154_p4), 1, %s6455_s13  }
  0x2c   : > { %157 = sbr.rel (%p154_p4) target bundleno = 870 (0x366), region = 32  ;;  %s160_s6 = scalar_lea.sflag (!%p154_p4), [#allocation3], %s6579_s28 }
  0x2d   : > { %s6321_s30 = smul.u32 (!%p154_p4), 4608, %s6579_s28 }
  0x2f   : > { %s6583_s7 = scalar_lea.vmem (!%p154_p4), [#allocation2], %s6321_s30 }
  0x33   : > { %6446 = dma.done.wait (%p6526_p7), %s160_s6, 73728  }
  0x34   : > { %6448 = vsyncadd (%p6526_p7), %s160_s6, 4294893568  ;;  %v200_v0 = vld [vmem:[%s6583_s7] sm:$0xff]  ;;  %v201_v2 = vld [vmem:[%s6583_s7 + $0x8] sm:$0xff]  ;;  %v6469_v50 = vmov 0   ;;  %vm3730_vm0 = vcmask 523264   ;;  %s5454_s25 = sshll.u32 %s6579_s28, 8 }
  0x35   : > { %v208_v1 = vld [vmem:[%s6583_s7 + $0x40] sm:$0xff]  ;;  %v209_v4 = vld [vmem:[%s6583_s7 + $0x48] sm:$0xff]  ;;  %6365 = vset.pattern.permute.xlu0 %v6469_v50  ;;  %6366 = vset.pattern.permute.xlu1 %v6469_v50  ;;  %s7154_s6 = scalar_lea.vmem [#allocation4], %s5454_s25  ;;  %p7676_p7 = scmp.ne.s32.totalorder %s7674_s22, 0 }
  0x36   : > { %v5466_v3 = vcombine.high %v200_v0, %v208_v1  ;;  %v5465_v5 = vcombine.low %v200_v0, %v208_v1  ;;  %v216_v6 = vld [vmem:[%s6583_s7 + $0x80] sm:$0xff]  ;;  %v5468_v8 = vcombine.high %v201_v2, %v209_v4  ;;  %v5467_v9 = vcombine.low %v201_v2, %v209_v4  ;;  %v217_v11 = vld [vmem:[%s6583_s7 + $0x88] sm:$0xff] }
  0x37   : > { %v224_v7 = vld [vmem:[%s6583_s7 + $0xc0] sm:$0xff]  ;;  %v225_v12 = vld [vmem:[%s6583_s7 + $0xc8] sm:$0xff] }
  0x38   : > { %v5482_v10 = vcombine.high %v216_v6, %v224_v7  ;;  %v232_v13 = vld [vmem:[%s6583_s7 + $0x100] sm:$0xff]  ;;  %3737 = vmatprep.subr.bf16.mxu0 %v5466_v3  ;;  %v5484_v14 = vcombine.high %v217_v11, %v225_v12  ;;  %v233_v16 = vld [vmem:[%s6583_s7 + $0x108] sm:$0xff]  ;;  %3896 = vmatprep.subr.bf16.mxu1 %v5468_v8  ;;  %v5481_v18 = vcombine.low %v216_v6, %v224_v7 }
  0x39   : > { %v240_v15 = vld [vmem:[%s6583_s7 + $0x140] sm:$0xff]  ;;  %v241_v17 = vld [vmem:[%s6583_s7 + $0x148] sm:$0xff]  ;;  %3738 = vmatpush1.bf16.msra.mxu0 %v5465_v5  ;;  %3897 = vmatpush1.bf16.msra.mxu1 %v5467_v9  ;;  %v5483_v19 = vcombine.low %v217_v11, %v225_v12 }
  0x3a   : > { %3739 = vmatprep.subr.bf16.mxu0 %v5482_v10  ;;  %v5498_v20 = vcombine.high %v232_v13, %v240_v15  ;;  %3898 = vmatprep.subr.bf16.mxu1 %v5484_v14  ;;  %v5500_v21 = vcombine.high %v233_v16, %v241_v17  ;;  %v248_v22 = vld [vmem:[%s6583_s7 + $0x180] sm:$0xff]  ;;  %v249_v24 = vld [vmem:[%s6583_s7 + $0x188] sm:$0xff]  ;;  %v5497_v26 = vcombine.low %v232_v13, %v240_v15 }
  0x3b   : > { %v256_v23 = vld [vmem:[%s6583_s7 + $0x1c0] sm:$0xff]  ;;  %v257_v25 = vld [vmem:[%s6583_s7 + $0x1c8] sm:$0xff]  ;;  %v5499_v27 = vcombine.low %v233_v16, %v241_v17 }
  0x3c   : > { %v5514_v28 = vcombine.high %v248_v22, %v256_v23  ;;  %v5516_v29 = vcombine.high %v249_v24, %v257_v25  ;;  %v264_v30 = vld [vmem:[%s6583_s7 + $0x200] sm:$0xff]  ;;  %v265_v32 = vld [vmem:[%s6583_s7 + $0x208] sm:$0xff]  ;;  %v5513_v34 = vcombine.low %v248_v22, %v256_v23  ;;  %v5515_v35 = vcombine.low %v249_v24, %v257_v25 }
  0x3d   : > { %3740 = vmatpush1.bf16.msra.mxu0 %v5481_v18  ;;  %3899 = vmatpush1.bf16.msra.mxu1 %v5483_v19  ;;  %v272_v31 = vld [vmem:[%s6583_s7 + $0x240] sm:$0xff]  ;;  %v273_v33 = vld [vmem:[%s6583_s7 + $0x248] sm:$0xff] }
  0x3e   : > { %3741 = vmatprep.subr.bf16.mxu0 %v5498_v20  ;;  %3900 = vmatprep.subr.bf16.mxu1 %v5500_v21  ;;  %v5530_v36 = vcombine.high %v264_v30, %v272_v31  ;;  %v5532_v37 = vcombine.high %v265_v32, %v273_v33  ;;  %v280_v38 = vld [vmem:[%s6583_s7 + $0x280] sm:$0xff]  ;;  %v281_v40 = vld [vmem:[%s6583_s7 + $0x288] sm:$0xff]  ;;  %v5529_v42 = vcombine.low %v264_v30, %v272_v31 }
  0x3f   : > { %v288_v39 = vld [vmem:[%s6583_s7 + $0x2c0] sm:$0xff]  ;;  %v289_v41 = vld [vmem:[%s6583_s7 + $0x2c8] sm:$0xff]  ;;  %v5531_v43 = vcombine.low %v265_v32, %v273_v33 }
  0x40   : > { %v5546_v44 = vcombine.high %v280_v38, %v288_v39  ;;  %v5548_v45 = vcombine.high %v281_v40, %v289_v41  ;;  %v296_v46 = vld [vmem:[%s6583_s7 + $0x300] sm:$0xff]  ;;  %v297_v48 = vld [vmem:[%s6583_s7 + $0x308] sm:$0xff]  ;;  %v5545_v51 = vcombine.low %v280_v38, %v288_v39  ;;  %v5547_v52 = vcombine.low %v281_v40, %v289_v41 }
  0x41   : > { %3742 = vmatpush1.bf16.msra.mxu0 %v5497_v26  ;;  %3901 = vmatpush1.bf16.msra.mxu1 %v5499_v27  ;;  %v304_v47 = vld [vmem:[%s6583_s7 + $0x340] sm:$0xff]  ;;  %v305_v49 = vld [vmem:[%s6583_s7 + $0x348] sm:$0xff] }
  0x42   : > { %3743 = vmatprep.subr.bf16.mxu0 %v5514_v28  ;;  %3902 = vmatprep.subr.bf16.mxu1 %v5516_v29  ;;  %v5562_v53 = vcombine.high %v296_v46, %v304_v47  ;;  %v5564_v54 = vcombine.high %v297_v48, %v305_v49  ;;  %v312_v55 = vld [vmem:[%s6583_s7 + $0x380] sm:$0xff]  ;;  %v313_v58 = vld [vmem:[%s6583_s7 + $0x388] sm:$0xff]  ;;  %v5561_v60 = vcombine.low %v296_v46, %v304_v47 }
  0x43   : > { %v320_v56 = vld [vmem:[%s6583_s7 + $0x3c0] sm:$0xff]  ;;  %v321_v59 = vld [vmem:[%s6583_s7 + $0x3c8] sm:$0xff]  ;;  %v5563_v61 = vcombine.low %v297_v48, %v305_v49 }
  0x44   : > { %v6624_v57 = vld [vmem:[%s7669_s0 + $0x4] ss:$20 sps:$4 sm:$0xff]   ;;  %v5578_v62 = vcombine.high %v312_v55, %v320_v56  ;;  %v5580_v63 = vcombine.high %v313_v58, %v321_v59  ;;  %v329_v2 = vld [vmem:[%s6583_s7 + $0x408] sm:$0xff]  ;;  %v5577_v4 = vcombine.low %v312_v55, %v320_v56  ;;  %v5579_v5 = vcombine.low %v313_v58, %v321_v59 }
  0x45   : > { %3744 = vmatpush1.bf16.msra.mxu0 %v5513_v34  ;;  %3903 = vmatpush1.bf16.msra.mxu1 %v5515_v35  ;;  %v328_v0 = vld [vmem:[%s6583_s7 + $0x400] sm:$0xff]  ;;  %v337_v3 = vld [vmem:[%s6583_s7 + $0x448] sm:$0xff] }
  0x46   : > { %3745 = vmatprep.subr.bf16.mxu0 %v5530_v36  ;;  %3904 = vmatprep.subr.bf16.mxu1 %v5532_v37  ;;  %v336_v1 = vld [vmem:[%s6583_s7 + $0x440] sm:$0xff]  ;;  %v5596_v7 = vcombine.high %v329_v2, %v337_v3  ;;  %v345_v10 = vld [vmem:[%s6583_s7 + $0x488] sm:$0xff]  ;;  %v5595_v13 = vcombine.low %v329_v2, %v337_v3 }
  0x47   : > { %3769 = vmatprep.mubr.bf16.mxu0 %v6624_v57  ;;  %3928 = vmatprep.mubr.bf16.mxu1 %v6624_v57  ;;  %v5594_v6 = vcombine.high %v328_v0, %v336_v1  ;;  %v344_v8 = vld [vmem:[%s6583_s7 + $0x480] sm:$0xff]  ;;  %v353_v11 = vld [vmem:[%s6583_s7 + $0x4c8] sm:$0xff]  ;;  %v5593_v12 = vcombine.low %v328_v0, %v336_v1 }
  0x48   : > { %v352_v9 = vld [vmem:[%s6583_s7 + $0x4c0] sm:$0xff]  ;;  %v5612_v15 = vcombine.high %v345_v10, %v353_v11  ;;  %v361_v18 = vld [vmem:[%s6583_s7 + $0x508] sm:$0xff]  ;;  %v5611_v21 = vcombine.low %v345_v10, %v353_v11 }
  0x49   : > { %3746 = vmatpush1.bf16.msra.mxu0 %v5529_v42  ;;  %3905 = vmatpush1.bf16.msra.mxu1 %v5531_v43  ;;  %v5610_v14 = vcombine.high %v344_v8, %v352_v9  ;;  %v360_v16 = vld [vmem:[%s6583_s7 + $0x500] sm:$0xff]  ;;  %v369_v19 = vld [vmem:[%s6583_s7 + $0x548] sm:$0xff]  ;;  %v5609_v20 = vcombine.low %v344_v8, %v352_v9 }
  0x4a   : > { %3747 = vmatprep.subr.bf16.mxu0 %v5546_v44  ;;  %3906 = vmatprep.subr.bf16.mxu1 %v5548_v45  ;;  %v368_v17 = vld [vmem:[%s6583_s7 + $0x540] sm:$0xff]  ;;  %v5628_v23 = vcombine.high %v361_v18, %v369_v19  ;;  %v377_v26 = vld [vmem:[%s6583_s7 + $0x588] sm:$0xff]  ;;  %v5627_v29 = vcombine.low %v361_v18, %v369_v19 }
  0x4b   : > { %v5626_v22 = vcombine.high %v360_v16, %v368_v17  ;;  %v376_v24 = vld [vmem:[%s6583_s7 + $0x580] sm:$0xff]  ;;  %v385_v27 = vld [vmem:[%s6583_s7 + $0x5c8] sm:$0xff]  ;;  %v5625_v28 = vcombine.low %v360_v16, %v368_v17 }
  0x4c   : > { %v384_v25 = vld [vmem:[%s6583_s7 + $0x5c0] sm:$0xff]  ;;  %v5644_v31 = vcombine.high %v377_v26, %v385_v27  ;;  %v393_v34 = vld [vmem:[%s6583_s7 + $0x608] sm:$0xff]  ;;  %v5643_v37 = vcombine.low %v377_v26, %v385_v27 }
  0x4d   : > { %3748 = vmatpush1.bf16.msra.mxu0 %v5545_v51  ;;  %3907 = vmatpush1.bf16.msra.mxu1 %v5547_v52  ;;  %v5642_v30 = vcombine.high %v376_v24, %v384_v25  ;;  %v392_v32 = vld [vmem:[%s6583_s7 + $0x600] sm:$0xff]  ;;  %v401_v35 = vld [vmem:[%s6583_s7 + $0x648] sm:$0xff]  ;;  %v5641_v36 = vcombine.low %v376_v24, %v384_v25 }
  0x4e   : > { %3749 = vmatprep.subr.bf16.mxu0 %v5562_v53  ;;  %3908 = vmatprep.subr.bf16.mxu1 %v5564_v54  ;;  %v400_v33 = vld [vmem:[%s6583_s7 + $0x640] sm:$0xff]  ;;  %v5660_v39 = vcombine.high %v393_v34, %v401_v35  ;;  %v409_v42 = vld [vmem:[%s6583_s7 + $0x688] sm:$0xff]  ;;  %v5659_v45 = vcombine.low %v393_v34, %v401_v35 }
  0x4f   : > { %v5658_v38 = vcombine.high %v392_v32, %v400_v33  ;;  %v408_v40 = vld [vmem:[%s6583_s7 + $0x680] sm:$0xff]  ;;  %v417_v43 = vld [vmem:[%s6583_s7 + $0x6c8] sm:$0xff]  ;;  %v5657_v44 = vcombine.low %v392_v32, %v400_v33 }
  0x50   : > { %v416_v41 = vld [vmem:[%s6583_s7 + $0x6c0] sm:$0xff]  ;;  %v5676_v47 = vcombine.high %v409_v42, %v417_v43  ;;  %v425_v51 = vld [vmem:[%s6583_s7 + $0x708] sm:$0xff]  ;;  %v5675_v54 = vcombine.low %v409_v42, %v417_v43 }
  0x51   : > { %3750 = vmatpush1.bf16.msra.mxu0 %v5561_v60  ;;  %3909 = vmatpush1.bf16.msra.mxu1 %v5563_v61  ;;  %v5674_v46 = vcombine.high %v408_v40, %v416_v41  ;;  %v424_v48 = vld [vmem:[%s6583_s7 + $0x700] sm:$0xff]  ;;  %v433_v52 = vld [vmem:[%s6583_s7 + $0x748] sm:$0xff]  ;;  %v5673_v53 = vcombine.low %v408_v40, %v416_v41 }
  0x52   : > { %3751 = vmatprep.subr.bf16.mxu0 %v5578_v62  ;;  %3910 = vmatprep.subr.bf16.mxu1 %v5580_v63  ;;  %v432_v49 = vld [vmem:[%s6583_s7 + $0x740] sm:$0xff]  ;;  %v5692_v56 = vcombine.high %v425_v51, %v433_v52  ;;  %v441_v60 = vld [vmem:[%s6583_s7 + $0x788] sm:$0xff]  ;;  %v5691_v63 = vcombine.low %v425_v51, %v433_v52 }
  0x53   : > { %v5690_v55 = vcombine.high %v424_v48, %v432_v49  ;;  %v440_v58 = vld [vmem:[%s6583_s7 + $0x780] sm:$0xff]  ;;  %v449_v61 = vld [vmem:[%s6583_s7 + $0x7c8] sm:$0xff]  ;;  %v5689_v62 = vcombine.low %v424_v48, %v432_v49 }
  0x54   : > { %v448_v59 = vld [vmem:[%s6583_s7 + $0x7c0] sm:$0xff]  ;;  %v5708_v1 = vcombine.high %v441_v60, %v449_v61  ;;  %v6695_v32 = vld [vmem:[%s7669_s0 + $0x28] ss:$20 sps:$4 sm:$0xff]  }
  0x55   : > { %3752 = vmatpush1.bf16.msra.mxu0 %v5577_v4  ;;  %3911 = vmatpush1.bf16.msra.mxu1 %v5579_v5  ;;  %v5706_v0 = vcombine.high %v440_v58, %v448_v59  ;;  %v456_v2 = vld [vmem:[%s6583_s7 + $0x800] sm:$0xff]  ;;  %v457_v4 = vld [vmem:[%s6583_s7 + $0x808] sm:$0xff] }
  0x56   : > { %3753 = vmatprep.subr.bf16.mxu0 %v5594_v6  ;;  %3912 = vmatprep.subr.bf16.mxu1 %v5596_v7  ;;  %v464_v3 = vld [vmem:[%s6583_s7 + $0x840] sm:$0xff]  ;;  %v465_v5 = vld [vmem:[%s6583_s7 + $0x848] sm:$0xff]  ;;  %v5705_v6 = vcombine.low %v440_v58, %v448_v59  ;;  %v5707_v7 = vcombine.low %v441_v60, %v449_v61 }
  0x57   : > { %v5722_v8 = vcombine.high %v456_v2, %v464_v3  ;;  %v5724_v9 = vcombine.high %v457_v4, %v465_v5  ;;  %v472_v10 = vld [vmem:[%s6583_s7 + $0x880] sm:$0xff]  ;;  %v5723_v16 = vcombine.low %v457_v4, %v465_v5  ;;  %v521_v40 = vld [vmem:[%s6583_s7 + $0xa08] sm:$0xff] }
  0x58   : > { %v480_v11 = vld [vmem:[%s6583_s7 + $0x8c0] sm:$0xff]  ;;  %v529_v41 = vld [vmem:[%s6583_s7 + $0xa48] sm:$0xff] }
  0x59   : > { %3754 = vmatpush1.bf16.msra.mxu0 %v5593_v12  ;;  %3913 = vmatpush1.bf16.msra.mxu1 %v5595_v13  ;;  %v6671_v12 = vld [vmem:[%s7669_s0] ss:$20 sps:$4 sm:$0xff]   ;;  %v473_v13 = vld [vmem:[%s6583_s7 + $0x888] sm:$0xff]  ;;  %v5738_v17 = vcombine.high %v472_v10, %v480_v11  ;;  %v5737_v24 = vcombine.low %v472_v10, %v480_v11  ;;  %v5787_v52 = vcombine.low %v521_v40, %v529_v41 }
  0x5a   : > { %3755 = vmatprep.subr.bf16.mxu0 %v5610_v14  ;;  %3914 = vmatprep.subr.bf16.mxu1 %v5612_v15  ;;  %v481_v14 = vld [vmem:[%s6583_s7 + $0x8c8] sm:$0xff]  ;;  %v5721_v15 = vcombine.low %v456_v2, %v464_v3  ;;  %v488_v19 = vld [vmem:[%s6583_s7 + $0x900] sm:$0xff] }
  0x5b   : > { %v5740_v18 = vcombine.high %v473_v13, %v481_v14  ;;  %v5739_v25 = vcombine.low %v473_v13, %v481_v14  ;;  %v537_v48 = vld [vmem:[%s6583_s7 + $0xa88] sm:$0xff] }
  0x5c   : > { %v545_v49 = vld [vmem:[%s6583_s7 + $0xac8] sm:$0xff] }
  0x5d   : > { %3756 = vmatpush1.bf16.msra.mxu0 %v5609_v20  ;;  %3915 = vmatpush1.bf16.msra.mxu1 %v5611_v21  ;;  %v496_v20 = vld [vmem:[%s6583_s7 + $0x940] sm:$0xff]  ;;  %v553_v58 = vld [vmem:[%s6583_s7 + $0xb08] sm:$0xff]  ;;  %v5803_v61 = vcombine.low %v537_v48, %v545_v49 }
  0x5e   : > { %3757 = vmatprep.subr.bf16.mxu0 %v5626_v22  ;;  %3916 = vmatprep.subr.bf16.mxu1 %v5628_v23  ;;  %v6680_v21 = vld [vmem:[%s7669_s0 + $0x2c] ss:$20 sps:$4 sm:$0xff]   ;;  %v5754_v26 = vcombine.high %v488_v19, %v496_v20  ;;  %v5753_v33 = vcombine.low %v488_v19, %v496_v20 }
  0x5f   : > { %v489_v22 = vld [vmem:[%s6583_s7 + $0x908] sm:$0xff] }
  0x60   : > { %v497_v23 = vld [vmem:[%s6583_s7 + $0x948] sm:$0xff] }
  0x61   : > { %3758 = vmatpush1.bf16.msra.mxu0 %v5625_v28  ;;  %3917 = vmatpush1.bf16.msra.mxu1 %v5627_v29  ;;  %v5756_v27 = vcombine.high %v489_v22, %v497_v23  ;;  %v504_v28 = vld [vmem:[%s6583_s7 + $0x980] sm:$0xff]  ;;  %v5755_v34 = vcombine.low %v489_v22, %v497_v23  ;;  %v561_v59 = vld [vmem:[%s6583_s7 + $0xb48] sm:$0xff] }
  0x62   : > { %3759 = vmatprep.subr.bf16.mxu0 %v5642_v30  ;;  %3918 = vmatprep.subr.bf16.mxu1 %v5644_v31  ;;  %v512_v29 = vld [vmem:[%s6583_s7 + $0x9c0] sm:$0xff]  ;;  %v505_v30 = vld [vmem:[%s6583_s7 + $0x988] sm:$0xff]  ;;  %v5819_v5 = vcombine.low %v553_v58, %v561_v59 }
  0x63   : > { %v513_v31 = vld [vmem:[%s6583_s7 + $0x9c8] sm:$0xff]  ;;  %v5770_v35 = vcombine.high %v504_v28, %v512_v29  ;;  %v5769_v42 = vcombine.low %v504_v28, %v512_v29 }
  0x64   : > { %v5771_v43 = vcombine.low %v505_v30, %v513_v31  ;;  %v569_v2 = vld [vmem:[%s6583_s7 + $0xb88] sm:$0xff] }
  0x65   : > { %3760 = vmatpush1.bf16.msra.mxu0 %v5641_v36  ;;  %3919 = vmatpush1.bf16.msra.mxu1 %v5643_v37  ;;  %v5772_v36 = vcombine.high %v505_v30, %v513_v31  ;;  %v520_v37 = vld [vmem:[%s6583_s7 + $0xa00] sm:$0xff]  ;;  %v577_v3 = vld [vmem:[%s6583_s7 + $0xbc8] sm:$0xff] }
  0x66   : > { %3761 = vmatprep.subr.bf16.mxu0 %v5658_v38  ;;  %3920 = vmatprep.subr.bf16.mxu1 %v5660_v39  ;;  %v528_v38 = vld [vmem:[%s6583_s7 + $0xa40] sm:$0xff]  ;;  %v585_v10 = vld [vmem:[%s6583_s7 + $0xc08] sm:$0xff]  ;;  %v5835_v14 = vcombine.low %v569_v2, %v577_v3 }
  0x67   : > { %v6702_v39 = vld [vmem:[%s7669_s0 + $0xc] ss:$20 sps:$4 sm:$0xff]   ;;  %v5785_v51 = vcombine.low %v520_v37, %v528_v38 }
  0x68   : > { %v593_v11 = vld [vmem:[%s6583_s7 + $0xc48] sm:$0xff] }
  0x69   : > { %3762 = vmatpush1.bf16.msra.mxu0 %v5657_v44  ;;  %3921 = vmatpush1.bf16.msra.mxu1 %v5659_v45  ;;  %v5786_v44 = vcombine.high %v520_v37, %v528_v38  ;;  %v5788_v45 = vcombine.high %v521_v40, %v529_v41  ;;  %v601_v19 = vld [vmem:[%s6583_s7 + $0xc88] sm:$0xff]  ;;  %v5851_v23 = vcombine.low %v585_v10, %v593_v11  ;;  %v640_v37 = vld [vmem:[%s6583_s7 + $0xdc0] sm:$0xff] }
  0x6a   : > { %3763 = vmatprep.subr.bf16.mxu0 %v5674_v46  ;;  %3922 = vmatprep.subr.bf16.mxu1 %v5676_v47  ;;  %v536_v46 = vld [vmem:[%s6583_s7 + $0xa80] sm:$0xff]  ;;  %v609_v20 = vld [vmem:[%s6583_s7 + $0xcc8] sm:$0xff] }
  0x6b   : > { %v544_v47 = vld [vmem:[%s6583_s7 + $0xac0] sm:$0xff]  ;;  %v617_v28 = vld [vmem:[%s6583_s7 + $0xd08] sm:$0xff]  ;;  %v5867_v31 = vcombine.low %v601_v19, %v609_v20 }
  0x6c   : > { %v5801_v60 = vcombine.low %v536_v46, %v544_v47  ;;  %v625_v29 = vld [vmem:[%s6583_s7 + $0xd48] sm:$0xff] }
  0x6d   : > { %3764 = vmatpush1.bf16.msra.mxu0 %v5673_v53  ;;  %3923 = vmatpush1.bf16.msra.mxu1 %v5675_v54  ;;  %v5802_v53 = vcombine.high %v536_v46, %v544_v47  ;;  %v5804_v54 = vcombine.high %v537_v48, %v545_v49  ;;  %v633_v38 = vld [vmem:[%s6583_s7 + $0xd88] sm:$0xff]  ;;  %v648_v46 = vld [vmem:[%s6583_s7 + $0xe00] sm:$0xff] }
  0x6e   : > { %3765 = vmatprep.subr.bf16.mxu0 %v5690_v55  ;;  %3924 = vmatprep.subr.bf16.mxu1 %v5692_v56  ;;  %v552_v55 = vld [vmem:[%s6583_s7 + $0xb00] sm:$0xff]  ;;  %v641_v40 = vld [vmem:[%s6583_s7 + $0xdc8] sm:$0xff] }
  0x6f   : > { %v560_v56 = vld [vmem:[%s6583_s7 + $0xb40] sm:$0xff]  ;;  %v649_v48 = vld [vmem:[%s6583_s7 + $0xe08] sm:$0xff] }
  0x70   : > { %v5817_v4 = vcombine.low %v552_v55, %v560_v56  ;;  %v656_v47 = vld [vmem:[%s6583_s7 + $0xe40] sm:$0xff]  ;;  %v657_v49 = vld [vmem:[%s6583_s7 + $0xe48] sm:$0xff] }
  0x71   : > { %3766 = vmatpush1.bf16.msra.mxu0 %v5689_v62  ;;  %3925 = vmatpush1.bf16.msra.mxu1 %v5691_v63  ;;  %v5818_v62 = vcombine.high %v552_v55, %v560_v56  ;;  %v5820_v63 = vcombine.high %v553_v58, %v561_v59  ;;  %v5916_v55 = vcombine.high %v649_v48, %v657_v49  ;;  %v664_v56 = vld [vmem:[%s6583_s7 + $0xe80] sm:$0xff]  ;;  %v665_v59 = vld [vmem:[%s6583_s7 + $0xe88] sm:$0xff] }
  0x72   : > { %3767 = vmatprep.subr.bf16.mxu0 %v5706_v0  ;;  %3926 = vmatprep.subr.bf16.mxu1 %v5708_v1  ;;  %v568_v0 = vld [vmem:[%s6583_s7 + $0xb80] sm:$0xff] }
  0x73   : > { %v576_v1 = vld [vmem:[%s6583_s7 + $0xbc0] sm:$0xff] }
  0x74   : > { %v5833_v13 = vcombine.low %v568_v0, %v576_v1  ;;  %v672_v58 = vld [vmem:[%s6583_s7 + $0xec0] sm:$0xff] }
  0x75   : > { %3768 = vmatpush1.bf16.msra.mxu0 %v5705_v6  ;;  %3927 = vmatpush1.bf16.msra.mxu1 %v5707_v7  ;;  %v5834_v6 = vcombine.high %v568_v0, %v576_v1  ;;  %v5836_v7 = vcombine.high %v569_v2, %v577_v3  ;;  %v779_v0 = vld [vmem:[%s7671_s2 + $0x18] sm:$0xff]  ;;  %v680_v2 = vld [vmem:[%s6583_s7 + $0xf00] sm:$0xff] }
  0x76   : > { %3790 = vmatprep.subr.bf16.mxu0 %v5722_v8  ;;  %3949 = vmatprep.subr.bf16.mxu1 %v5724_v9  ;;  %v584_v8 = vld [vmem:[%s6583_s7 + $0xc00] sm:$0xff] }
  0x77   : > { %v592_v9 = vld [vmem:[%s6583_s7 + $0xc40] sm:$0xff] }
  0x78   : > { %3770 = vmatmul.mubr.bf16.vlgmr.msra.gmra.mrb[0].mxu0 %v6671_v12  ;;  %3929 = vmatmul.mubr.bf16.vlgmr.msra.gmra.mrb[0].mxu1 %v6671_v12  ;;  %v5849_v22 = vcombine.low %v584_v8, %v592_v9  ;;  %v688_v3 = vld [vmem:[%s6583_s7 + $0xf40] sm:$0xff] }
  0x79   : > { %3791 = vmatpush1.bf16.msra.mxu0 %v5721_v15  ;;  %3950 = vmatpush1.bf16.msra.mxu1 %v5723_v16  ;;  %v5850_v15 = vcombine.high %v584_v8, %v592_v9  ;;  %v5852_v16 = vcombine.high %v585_v10, %v593_v11  ;;  %v5946_v8 = vcombine.high %v680_v2, %v688_v3  ;;  %v696_v10 = vld [vmem:[%s6583_s7 + $0xf80] sm:$0xff] }
  0x7a   : > { %3792 = vmatprep.subr.bf16.mxu0 %v5738_v17  ;;  %3951 = vmatprep.subr.bf16.mxu1 %v5740_v18  ;;  %v600_v17 = vld [vmem:[%s6583_s7 + $0xc80] sm:$0xff] }
  0x7b   : > { %3779 = vmatprep.mubr.bf16.mxu0 %v6680_v21  ;;  %3938 = vmatprep.mubr.bf16.mxu1 %v6680_v21  ;;  %v608_v18 = vld [vmem:[%s6583_s7 + $0xcc0] sm:$0xff] }
  0x7c   : > { %v5865_v30 = vcombine.low %v600_v17, %v608_v18  ;;  %v704_v11 = vld [vmem:[%s6583_s7 + $0xfc0] sm:$0xff] }
  0x7d   : > { %3793 = vmatpush1.bf16.msra.mxu0 %v5737_v24  ;;  %3952 = vmatpush1.bf16.msra.mxu1 %v5739_v25  ;;  %v5866_v24 = vcombine.high %v600_v17, %v608_v18  ;;  %v5868_v25 = vcombine.high %v601_v19, %v609_v20  ;;  %v5962_v17 = vcombine.high %v696_v10, %v704_v11  ;;  %v712_v19 = vld [vmem:[%s6583_s7 + $0x1000] sm:$0xff] }
  0x7e   : > { %3794 = vmatprep.subr.bf16.mxu0 %v5754_v26  ;;  %3953 = vmatprep.subr.bf16.mxu1 %v5756_v27  ;;  %v616_v26 = vld [vmem:[%s6583_s7 + $0xd00] sm:$0xff] }
  0x7f   : > { %v624_v27 = vld [vmem:[%s6583_s7 + $0xd40] sm:$0xff] }
  0x80   : > { %3780 = vmatmul.mubr.bf16.gmra.mrb[4].mxu0 %v6695_v32  ;;  %3939 = vmatmul.mubr.bf16.gmra.mrb[4].mxu1 %v6695_v32  ;;  %v5881_v41 = vcombine.low %v616_v26, %v624_v27  ;;  %v720_v20 = vld [vmem:[%s6583_s7 + $0x1040] sm:$0xff] }
  0x81   : > { %3795 = vmatpush1.bf16.msra.mxu0 %v5753_v33  ;;  %3954 = vmatpush1.bf16.msra.mxu1 %v5755_v34  ;;  %v5882_v33 = vcombine.high %v616_v26, %v624_v27  ;;  %v776_v34 = vld [vmem:[%s7671_s2] sm:$0xff]  ;;  %v5978_v26 = vcombine.high %v712_v19, %v720_v20 }
  0x82   : > { %3796 = vmatprep.subr.bf16.mxu0 %v5770_v35  ;;  %3955 = vmatprep.subr.bf16.mxu1 %v5772_v36  ;;  %v5884_v35 = vcombine.high %v617_v28, %v625_v29  ;;  %v632_v36 = vld [vmem:[%s6583_s7 + $0xd80] sm:$0xff] }
  0x83   : > { %3822 = vmatprep.mubr.bf16.mxu0 %v6702_v39  ;;  %3981 = vmatprep.mubr.bf16.mxu1 %v6702_v39 }
  0x84   : > { %782 = vperm.xlu0 %6365, %v776_v34   ;;  %v5977_v34 = vcombine.low %v712_v19, %v720_v20 }
  0x85   : > { %3797 = vmatpush1.bf16.msra.mxu0 %v5769_v42  ;;  %3956 = vmatpush1.bf16.msra.mxu1 %v5771_v43  ;;  %v5883_v42 = vcombine.low %v617_v28, %v625_v29  ;;  %v5898_v43 = vcombine.high %v632_v36, %v640_v37  ;;  %v728_v28 = vld [vmem:[%s6583_s7 + $0x1080] sm:$0xff] }
  0x86   : > { %3798 = vmatprep.subr.bf16.mxu0 %v5786_v44  ;;  %3957 = vmatprep.subr.bf16.mxu1 %v5788_v45  ;;  %v777_v44 = vld [vmem:[%s7671_s2 + $0x8] sm:$0xff]  ;;  %v5900_v45 = vcombine.high %v633_v38, %v641_v40  ;;  %v736_v29 = vld [vmem:[%s6583_s7 + $0x10c0] sm:$0xff] }
  0x88   : > { %787 = vperm.xlu0 %6365, %v777_v44   ;;  %v5993_v44 = vcombine.low %v728_v28, %v736_v29 }
  0x89   : > { %3799 = vmatpush1.bf16.msra.mxu0 %v5785_v51  ;;  %3958 = vmatpush1.bf16.msra.mxu1 %v5787_v52  ;;  %v5897_v51 = vcombine.low %v632_v36, %v640_v37  ;;  %v5899_v52 = vcombine.low %v633_v38, %v641_v40  ;;  %v5994_v36 = vcombine.high %v728_v28, %v736_v29  ;;  %v6782_v38 = vld [vmem:[%s7669_s0 + $0x34] ss:$20 sps:$4 sm:$0xff]   ;;  %v744_v40 = vld [vmem:[%s6583_s7 + $0x1100] sm:$0xff] }
  0x8a   : > { %3800 = vmatprep.subr.bf16.mxu0 %v5802_v53  ;;  %3959 = vmatprep.subr.bf16.mxu1 %v5804_v54  ;;  %v5914_v53 = vcombine.high %v648_v46, %v656_v47  ;;  %v778_v54 = vld [vmem:[%s7671_s2 + $0x10] sm:$0xff] }
  0x8b   : > { %792 = vperm.xlu1 %6366, %v778_v54  }
  0x8d   : > { %3801 = vmatpush1.bf16.msra.mxu0 %v5801_v60  ;;  %3960 = vmatpush1.bf16.msra.mxu1 %v5803_v61  ;;  %v673_v60 = vld [vmem:[%s6583_s7 + $0xec8] sm:$0xff]  ;;  %v5913_v61 = vcombine.low %v648_v46, %v656_v47 }
  0x8e   : > { %3802 = vmatprep.subr.bf16.mxu0 %v5818_v62  ;;  %3961 = vmatprep.subr.bf16.mxu1 %v5820_v63  ;;  %v5915_v62 = vcombine.low %v649_v48, %v657_v49  ;;  %v5930_v63 = vcombine.high %v664_v56, %v672_v58  ;;  %v5932_v1 = vcombine.high %v665_v59, %v673_v60  ;;  %v760_v48 = vld [vmem:[%s6583_s7 + $0x1180] sm:$0xff] }
  0x8f   : > { %797 = vperm.xlu1 %6366, %v779_v0   ;;  %v768_v49 = vld [vmem:[%s6583_s7 + $0x11c0] sm:$0xff] }
  0x91   : > { %3803 = vmatpush1.bf16.msra.mxu0 %v5817_v4  ;;  %3962 = vmatpush1.bf16.msra.mxu1 %v5819_v5  ;;  %v681_v4 = vld [vmem:[%s6583_s7 + $0xf08] sm:$0xff] }
  0x92   : > { %3804 = vmatprep.subr.bf16.mxu0 %v5834_v6  ;;  %3963 = vmatprep.subr.bf16.mxu1 %v5836_v7  ;;  %v689_v5 = vld [vmem:[%s6583_s7 + $0xf48] sm:$0xff]  ;;  %v5929_v6 = vcombine.low %v664_v56, %v672_v58  ;;  %v5931_v7 = vcombine.low %v665_v59, %v673_v60  ;;  %v6026_v56 = vcombine.high %v760_v48, %v768_v49  ;;  %v202_v59 = vld [vmem:[%s6583_s7 + $0x10] sm:$0xff] }
  0x93   : > { %v5948_v9 = vcombine.high %v681_v4, %v689_v5  ;;  %v210_v60 = vld [vmem:[%s6583_s7 + $0x50] sm:$0xff] }
  0x95   : > { %3805 = vmatpush1.bf16.msra.mxu0 %v5833_v13  ;;  %3964 = vmatpush1.bf16.msra.mxu1 %v5835_v14  ;;  %v697_v13 = vld [vmem:[%s6583_s7 + $0xf88] sm:$0xff] }
  0x96   : > { %3806 = vmatprep.subr.bf16.mxu0 %v5850_v15  ;;  %3965 = vmatprep.subr.bf16.mxu1 %v5852_v16  ;;  %v705_v14 = vld [vmem:[%s6583_s7 + $0xfc8] sm:$0xff]  ;;  %v5945_v15 = vcombine.low %v680_v2, %v688_v3  ;;  %v5947_v16 = vcombine.low %v681_v4, %v689_v5  ;;  %v218_v3 = vld [vmem:[%s6583_s7 + $0x90] sm:$0xff] }
  0x97   : > { %v5964_v18 = vcombine.high %v697_v13, %v705_v14  ;;  %v226_v4 = vld [vmem:[%s6583_s7 + $0xd0] sm:$0xff] }
  0x98   : > { %v6814_v5 = vld [vmem:[%s7669_s0 + $0x10] ss:$20 sps:$4 sm:$0xff]  }
  0x99   : > { %3807 = vmatpush1.bf16.msra.mxu0 %v5849_v22  ;;  %3966 = vmatpush1.bf16.msra.mxu1 %v5851_v23  ;;  %v713_v22 = vld [vmem:[%s6583_s7 + $0x1008] sm:$0xff] }
  0x9a   : > { %3808 = vmatprep.subr.bf16.mxu0 %v5866_v24  ;;  %3967 = vmatprep.subr.bf16.mxu1 %v5868_v25  ;;  %v721_v23 = vld [vmem:[%s6583_s7 + $0x1048] sm:$0xff]  ;;  %v5961_v24 = vcombine.low %v696_v10, %v704_v11  ;;  %v5963_v25 = vcombine.low %v697_v13, %v705_v14  ;;  %v5486_v10 = vcombine.high %v218_v3, %v226_v4  ;;  %v234_v13 = vld [vmem:[%s6583_s7 + $0x110] sm:$0xff] }
  0x9b   : > { %v5980_v27 = vcombine.high %v713_v22, %v721_v23  ;;  %v242_v14 = vld [vmem:[%s6583_s7 + $0x150] sm:$0xff] }
  0x9c   : > { %v5502_v19 = vcombine.high %v234_v13, %v242_v14 }
  0x9d   : > { %3809 = vmatpush1.bf16.msra.mxu0 %v5865_v30  ;;  %3968 = vmatpush1.bf16.msra.mxu1 %v5867_v31  ;;  %v6775_v30 = vld [vmem:[%s7669_s0 + $0x8] ss:$20 sps:$4 sm:$0xff]  }
  0x9e   : > { %3810 = vmatprep.subr.bf16.mxu0 %v5882_v33  ;;  %3969 = vmatprep.subr.bf16.mxu1 %v5884_v35  ;;  %v729_v31 = vld [vmem:[%s6583_s7 + $0x1088] sm:$0xff]  ;;  %v5979_v35 = vcombine.low %v713_v22, %v721_v23  ;;  %v250_v22 = vld [vmem:[%s6583_s7 + $0x190] sm:$0xff] }
  0x9f   : > { %v737_v33 = vld [vmem:[%s6583_s7 + $0x10c8] sm:$0xff]  ;;  %v258_v23 = vld [vmem:[%s6583_s7 + $0x1d0] sm:$0xff] }
  0xa0   : > { %v5996_v37 = vcombine.high %v729_v31, %v737_v33  ;;  %v5518_v29 = vcombine.high %v250_v22, %v258_v23 }
  0xa1   : > { %3811 = vmatpush1.bf16.msra.mxu0 %v5881_v41  ;;  %3970 = vmatpush1.bf16.msra.mxu1 %v5883_v42  ;;  %v752_v41 = vld [vmem:[%s6583_s7 + $0x1140] sm:$0xff]  ;;  %v745_v42 = vld [vmem:[%s6583_s7 + $0x1108] sm:$0xff] }
  0xa2   : > { %3812 = vmatprep.subr.bf16.mxu0 %v5898_v43  ;;  %3971 = vmatprep.subr.bf16.mxu1 %v5900_v45  ;;  %v753_v43 = vld [vmem:[%s6583_s7 + $0x1148] sm:$0xff]  ;;  %v5995_v45 = vcombine.low %v729_v31, %v737_v33  ;;  %v6010_v46 = vcombine.high %v744_v40, %v752_v41  ;;  %v6009_v54 = vcombine.low %v744_v40, %v752_v41  ;;  %v266_v33 = vld [vmem:[%s6583_s7 + $0x210] sm:$0xff] }
  0xa3   : > { %v6012_v47 = vcombine.high %v745_v42, %v753_v43 }
  0xa5   : > { %3813 = vmatpush1.bf16.msra.mxu0 %v5897_v51  ;;  %3972 = vmatpush1.bf16.msra.mxu1 %v5899_v52  ;;  %v6797_v51 = vld [vmem:[%s7669_s0 + $0x30] ss:$20 sps:$4 sm:$0xff]   ;;  %v761_v52 = vld [vmem:[%s6583_s7 + $0x1188] sm:$0xff] }
  0xa6   : > { %3814 = vmatprep.subr.bf16.mxu0 %v5914_v53  ;;  %3973 = vmatprep.subr.bf16.mxu1 %v5916_v55  ;;  %v769_v53 = vld [vmem:[%s6583_s7 + $0x11c8] sm:$0xff]  ;;  %v6011_v55 = vcombine.low %v745_v42, %v753_v43  ;;  %v282_v43 = vld [vmem:[%s6583_s7 + $0x290] sm:$0xff] }
  0xa7   : > { %v6028_v58 = vcombine.high %v761_v52, %v769_v53  ;;  %v6027_v0 = vcombine.low %v761_v52, %v769_v53  ;;  %v298_v53 = vld [vmem:[%s6583_s7 + $0x310] sm:$0xff] }
  0xa9   : > { %3815 = vmatpush1.bf16.msra.mxu0 %v5913_v61  ;;  %3974 = vmatpush1.bf16.msra.mxu1 %v5915_v62  ;;  %v203_v61 = vld [vmem:[%s6583_s7 + $0x18] sm:$0xff] }
  0xaa   : > { %3816 = vmatprep.subr.bf16.mxu0 %v5930_v63  ;;  %3975 = vmatprep.subr.bf16.mxu1 %v5932_v1  ;;  %v211_v62 = vld [vmem:[%s6583_s7 + $0x58] sm:$0xff]  ;;  %v6025_v63 = vcombine.low %v760_v48, %v768_v49  ;;  %v5470_v1 = vcombine.high %v202_v59, %v210_v60 }
  0xab   : > { %v5472_v2 = vcombine.high %v203_v61, %v211_v62 }
  0xad   : > { %3817 = vmatpush1.bf16.msra.mxu0 %v5929_v6  ;;  %3976 = vmatpush1.bf16.msra.mxu1 %v5931_v7  ;;  %v219_v6 = vld [vmem:[%s6583_s7 + $0x98] sm:$0xff] }
  0xae   : > { %3818 = vmatprep.subr.bf16.mxu0 %v5946_v8  ;;  %3977 = vmatprep.subr.bf16.mxu1 %v5948_v9  ;;  %v227_v7 = vld [vmem:[%s6583_s7 + $0xd8] sm:$0xff]  ;;  %v5469_v8 = vcombine.low %v202_v59, %v210_v60  ;;  %v5471_v9 = vcombine.low %v203_v61, %v211_v62  ;;  %v314_v61 = vld [vmem:[%s6583_s7 + $0x390] sm:$0xff] }
  0xaf   : > { %v5488_v11 = vcombine.high %v219_v6, %v227_v7  ;;  %v322_v62 = vld [vmem:[%s6583_s7 + $0x3d0] sm:$0xff] }
  0xb1   : > { %3819 = vmatpush1.bf16.msra.mxu0 %v5945_v15  ;;  %3978 = vmatpush1.bf16.msra.mxu1 %v5947_v16  ;;  %v235_v15 = vld [vmem:[%s6583_s7 + $0x118] sm:$0xff] }
  0xb2   : > { %3820 = vmatprep.subr.bf16.mxu0 %v5962_v17  ;;  %3979 = vmatprep.subr.bf16.mxu1 %v5964_v18  ;;  %v243_v16 = vld [vmem:[%s6583_s7 + $0x158] sm:$0xff]  ;;  %v5485_v17 = vcombine.low %v218_v3, %v226_v4  ;;  %v5487_v18 = vcombine.low %v219_v6, %v227_v7  ;;  %v5582_v3 = vcombine.high %v314_v61, %v322_v62  ;;  %v330_v6 = vld [vmem:[%s6583_s7 + $0x410] sm:$0xff] }
  0xb3   : > { %v5504_v20 = vcombine.high %v235_v15, %v243_v16  ;;  %v5503_v28 = vcombine.low %v235_v15, %v243_v16  ;;  %v338_v7 = vld [vmem:[%s6583_s7 + $0x450] sm:$0xff] }
  0xb4   : > { %v346_v15 = vld [vmem:[%s6583_s7 + $0x490] sm:$0xff] }
  0xb5   : > { %3821 = vmatpush1.bf16.msra.mxu0 %v5961_v24  ;;  %3980 = vmatpush1.bf16.msra.mxu1 %v5963_v25  ;;  %v6833_v24 = vld [vmem:[%s7669_s0 + $0x38] ss:$20 sps:$4 sm:$0xff]   ;;  %v354_v16 = vld [vmem:[%s6583_s7 + $0x4d0] sm:$0xff] }
  0xb6   : > { %3843 = vmatprep.subr.bf16.mxu0 %v5978_v26  ;;  %4002 = vmatprep.subr.bf16.mxu1 %v5980_v27  ;;  %v251_v25 = vld [vmem:[%s6583_s7 + $0x198] sm:$0xff]  ;;  %v5501_v27 = vcombine.low %v234_v13, %v242_v14  ;;  %v5598_v13 = vcombine.high %v330_v6, %v338_v7 }
  0xb7   : > { %v259_v26 = vld [vmem:[%s6583_s7 + $0x1d8] sm:$0xff] }
  0xb8   : > { %3823 = vmatmul.mubr.bf16.vlgmr.msra.gmra.mrb[0].mxu0 %v6775_v30  ;;  %3982 = vmatmul.mubr.bf16.vlgmr.msra.gmra.mrb[0].mxu1 %v6775_v30  ;;  %v5520_v31 = vcombine.high %v251_v25, %v259_v26  ;;  %v5519_v40 = vcombine.low %v251_v25, %v259_v26  ;;  %v362_v25 = vld [vmem:[%s6583_s7 + $0x510] sm:$0xff] }
  0xb9   : > { %3844 = vmatpush1.bf16.msra.mxu0 %v5977_v34  ;;  %4003 = vmatpush1.bf16.msra.mxu1 %v5979_v35  ;;  %v274_v34 = vld [vmem:[%s6583_s7 + $0x250] sm:$0xff]  ;;  %v267_v35 = vld [vmem:[%s6583_s7 + $0x218] sm:$0xff] }
  0xba   : > { %3845 = vmatprep.subr.bf16.mxu0 %v5994_v36  ;;  %4004 = vmatprep.subr.bf16.mxu1 %v5996_v37  ;;  %v275_v36 = vld [vmem:[%s6583_s7 + $0x258] sm:$0xff]  ;;  %v5517_v37 = vcombine.low %v250_v22, %v258_v23  ;;  %v5534_v41 = vcombine.high %v266_v33, %v274_v34  ;;  %v5614_v22 = vcombine.high %v346_v15, %v354_v16  ;;  %v370_v26 = vld [vmem:[%s6583_s7 + $0x550] sm:$0xff] }
  0xbb   : > { %3832 = vmatprep.mubr.bf16.mxu0 %v6782_v38  ;;  %3991 = vmatprep.mubr.bf16.mxu1 %v6782_v38  ;;  %v5536_v42 = vcombine.high %v267_v35, %v275_v36  ;;  %v5535_v48 = vcombine.low %v267_v35, %v275_v36  ;;  %v378_v35 = vld [vmem:[%s6583_s7 + $0x590] sm:$0xff] }
  0xbc   : > { %v386_v36 = vld [vmem:[%s6583_s7 + $0x5d0] sm:$0xff] }
  0xbd   : > { %3846 = vmatpush1.bf16.msra.mxu0 %v5993_v44  ;;  %4005 = vmatpush1.bf16.msra.mxu1 %v5995_v45  ;;  %v290_v44 = vld [vmem:[%s6583_s7 + $0x2d0] sm:$0xff]  ;;  %v283_v45 = vld [vmem:[%s6583_s7 + $0x298] sm:$0xff] }
  0xbe   : > { %3847 = vmatprep.subr.bf16.mxu0 %v6010_v46  ;;  %4006 = vmatprep.subr.bf16.mxu1 %v6012_v47  ;;  %v291_v46 = vld [vmem:[%s6583_s7 + $0x2d8] sm:$0xff]  ;;  %v5533_v47 = vcombine.low %v266_v33, %v274_v34  ;;  %v5550_v49 = vcombine.high %v282_v43, %v290_v44  ;;  %v5630_v33 = vcombine.high %v362_v25, %v370_v26 }
  0xbf   : > { %v5552_v52 = vcombine.high %v283_v45, %v291_v46 }
  0xc0   : > { %3833 = vmatmul.mubr.bf16.gmra.mrb[4].mxu0 %v6797_v51  ;;  %3992 = vmatmul.mubr.bf16.gmra.mrb[4].mxu1 %v6797_v51 }
  0xc1   : > { %3848 = vmatpush1.bf16.msra.mxu0 %v6009_v54  ;;  %4007 = vmatpush1.bf16.msra.mxu1 %v6011_v55  ;;  %v306_v54 = vld [vmem:[%s6583_s7 + $0x350] sm:$0xff]  ;;  %v299_v55 = vld [vmem:[%s6583_s7 + $0x318] sm:$0xff] }
  0xc2   : > { %3849 = vmatprep.subr.bf16.mxu0 %v6026_v56  ;;  %4008 = vmatprep.subr.bf16.mxu1 %v6028_v58  ;;  %v307_v56 = vld [vmem:[%s6583_s7 + $0x358] sm:$0xff]  ;;  %v5549_v58 = vcombine.low %v282_v43, %v290_v44  ;;  %v5566_v59 = vcombine.high %v298_v53, %v306_v54  ;;  %v5646_v43 = vcombine.high %v378_v35, %v386_v36 }
  0xc3   : > { %3875 = vmatprep.mubr.bf16.mxu0 %v6469_v50  ;;  %4034 = vmatprep.mubr.bf16.mxu1 %v6469_v50  ;;  %v5568_v60 = vcombine.high %v299_v55, %v307_v56 }
  0xc5   : > { %3850 = vmatpush1.bf16.msra.mxu0 %v6025_v63  ;;  %4009 = vmatpush1.bf16.msra.mxu1 %v6027_v0  ;;  %v315_v63 = vld [vmem:[%s6583_s7 + $0x398] sm:$0xff] }
  0xc6   : > { %4055 = vmatprep.subr.bf16.mxu0 %v5470_v1  ;;  %4214 = vmatprep.subr.bf16.mxu1 %v5472_v2  ;;  %v323_v0 = vld [vmem:[%s6583_s7 + $0x3d8] sm:$0xff]  ;;  %v5565_v1 = vcombine.low %v298_v53, %v306_v54  ;;  %v5567_v2 = vcombine.low %v299_v55, %v307_v56  ;;  %v410_v55 = vld [vmem:[%s6583_s7 + $0x690] sm:$0xff] }
  0xc7   : > { %v5584_v4 = vcombine.high %v315_v63, %v323_v0  ;;  %v418_v56 = vld [vmem:[%s6583_s7 + $0x6d0] sm:$0xff] }
  0xc8   : > { %6041 = vmatmul.mubr.msk.bf16.vlgmr.msra.gmra.mrb[0].mxu0 %vm3730_vm0, %v6814_v5  ;;  %6043 = vmatmul.mubr.msk.bf16.vlgmr.msra.gmra.mrb[0].mxu1 %vm3730_vm0, %v6814_v5 }
  0xc9   : > { %4056 = vmatpush1.bf16.msra.mxu0 %v5469_v8  ;;  %4215 = vmatpush1.bf16.msra.mxu1 %v5471_v9  ;;  %v331_v8 = vld [vmem:[%s6583_s7 + $0x418] sm:$0xff] }
  0xca   : > { %4057 = vmatprep.subr.bf16.mxu0 %v5486_v10  ;;  %4216 = vmatprep.subr.bf16.mxu1 %v5488_v11  ;;  %v339_v9 = vld [vmem:[%s6583_s7 + $0x458] sm:$0xff]  ;;  %v5581_v10 = vcombine.low %v314_v61, %v322_v62  ;;  %v5583_v11 = vcombine.low %v315_v63, %v323_v0  ;;  %v5678_v61 = vcombine.high %v410_v55, %v418_v56  ;;  %v426_v63 = vld [vmem:[%s6583_s7 + $0x710] sm:$0xff] }
  0xcb   : > { %3885 = vmatprep.mubr.bf16.mxu0 %v6469_v50  ;;  %4044 = vmatprep.mubr.bf16.mxu1 %v6469_v50  ;;  %v5600_v14 = vcombine.high %v331_v8, %v339_v9  ;;  %v434_v0 = vld [vmem:[%s6583_s7 + $0x750] sm:$0xff] }
  0xcd   : > { %4058 = vmatpush1.bf16.msra.mxu0 %v5485_v17  ;;  %4217 = vmatpush1.bf16.msra.mxu1 %v5487_v18  ;;  %v347_v17 = vld [vmem:[%s6583_s7 + $0x498] sm:$0xff] }
  0xce   : > { %4059 = vmatprep.subr.bf16.mxu0 %v5502_v19  ;;  %4218 = vmatprep.subr.bf16.mxu1 %v5504_v20  ;;  %v355_v18 = vld [vmem:[%s6583_s7 + $0x4d8] sm:$0xff]  ;;  %v5597_v19 = vcombine.low %v330_v6, %v338_v7  ;;  %v5599_v20 = vcombine.low %v331_v8, %v339_v9  ;;  %v5694_v6 = vcombine.high %v426_v63, %v434_v0  ;;  %v442_v8 = vld [vmem:[%s6583_s7 + $0x790] sm:$0xff] }
  0xcf   : > { %v5616_v23 = vcombine.high %v347_v17, %v355_v18  ;;  %v450_v9 = vld [vmem:[%s6583_s7 + $0x7d0] sm:$0xff] }
  0xd0   : > { %6042 = vmatmul.mubr.msk.bf16.gmra.mrb[4].mxu0 %vm3730_vm0, %v6833_v24  ;;  %6044 = vmatmul.mubr.msk.bf16.gmra.mrb[4].mxu1 %vm3730_vm0, %v6833_v24 }
  0xd1   : > { %4060 = vmatpush1.bf16.msra.mxu0 %v5501_v27  ;;  %4219 = vmatpush1.bf16.msra.mxu1 %v5503_v28  ;;  %v363_v27 = vld [vmem:[%s6583_s7 + $0x518] sm:$0xff] }
  0xd2   : > { %4061 = vmatprep.subr.bf16.mxu0 %v5518_v29  ;;  %4220 = vmatprep.subr.bf16.mxu1 %v5520_v31  ;;  %v371_v28 = vld [vmem:[%s6583_s7 + $0x558] sm:$0xff]  ;;  %v5613_v29 = vcombine.low %v346_v15, %v354_v16  ;;  %v5615_v31 = vcombine.low %v347_v17, %v355_v18  ;;  %v5710_v15 = vcombine.high %v442_v8, %v450_v9  ;;  %v458_v17 = vld [vmem:[%s6583_s7 + $0x810] sm:$0xff] }
  0xd3   : > { %4087 = vmatprep.mubr.bf16.mxu0 %v6624_v57  ;;  %4246 = vmatprep.mubr.bf16.mxu1 %v6624_v57  ;;  %v5551_v57 = vcombine.low %v283_v45, %v291_v46  ;;  %v5632_v34 = vcombine.high %v363_v27, %v371_v28  ;;  %v394_v45 = vld [vmem:[%s6583_s7 + $0x610] sm:$0xff] }
  0xd4   : > { %v402_v46 = vld [vmem:[%s6583_s7 + $0x650] sm:$0xff] }
  0xd5   : > { %4062 = vmatpush1.bf16.msra.mxu0 %v5517_v37  ;;  %4221 = vmatpush1.bf16.msra.mxu1 %v5519_v40  ;;  %v379_v37 = vld [vmem:[%s6583_s7 + $0x598] sm:$0xff]  ;;  %v5662_v53 = vcombine.high %v394_v45, %v402_v46  ;;  %v466_v18 = vld [vmem:[%s6583_s7 + $0x850] sm:$0xff] }
  0xd6   : > { %4063 = vmatprep.subr.bf16.mxu0 %v5534_v41  ;;  %4222 = vmatprep.subr.bf16.mxu1 %v5536_v42  ;;  %v387_v40 = vld [vmem:[%s6583_s7 + $0x5d8] sm:$0xff]  ;;  %v5629_v41 = vcombine.low %v362_v25, %v370_v26  ;;  %v5631_v42 = vcombine.low %v363_v27, %v371_v28  ;;  %v5726_v25 = vcombine.high %v458_v17, %v466_v18  ;;  %v474_v27 = vld [vmem:[%s6583_s7 + $0x890] sm:$0xff] }
  0xd7   : > { %v5648_v44 = vcombine.high %v379_v37, %v387_v40  ;;  %v482_v28 = vld [vmem:[%s6583_s7 + $0x8d0] sm:$0xff] }
  0xd9   : > { %4064 = vmatpush1.bf16.msra.mxu0 %v5533_v47  ;;  %4223 = vmatpush1.bf16.msra.mxu1 %v5535_v48  ;;  %v395_v47 = vld [vmem:[%s6583_s7 + $0x618] sm:$0xff] }
  0xda   : > { %4065 = vmatprep.subr.bf16.mxu0 %v5550_v49  ;;  %4224 = vmatprep.subr.bf16.mxu1 %v5552_v52  ;;  %v403_v48 = vld [vmem:[%s6583_s7 + $0x658] sm:$0xff]  ;;  %v5645_v49 = vcombine.low %v378_v35, %v386_v36  ;;  %v5647_v52 = vcombine.low %v379_v37, %v387_v40  ;;  %v5742_v35 = vcombine.high %v474_v27, %v482_v28  ;;  %v490_v37 = vld [vmem:[%s6583_s7 + $0x910] sm:$0xff] }
  0xdb   : > { %v5664_v54 = vcombine.high %v395_v47, %v403_v48  ;;  %v498_v40 = vld [vmem:[%s6583_s7 + $0x950] sm:$0xff] }
  0xdd   : > { %4066 = vmatpush1.bf16.msra.mxu0 %v5549_v58  ;;  %4225 = vmatpush1.bf16.msra.mxu1 %v5551_v57  ;;  %v411_v58 = vld [vmem:[%s6583_s7 + $0x698] sm:$0xff] }
  0xde   : > { %4067 = vmatprep.subr.bf16.mxu0 %v5566_v59  ;;  %4226 = vmatprep.subr.bf16.mxu1 %v5568_v60  ;;  %v419_v57 = vld [vmem:[%s6583_s7 + $0x6d8] sm:$0xff]  ;;  %v5661_v59 = vcombine.low %v394_v45, %v402_v46  ;;  %v5663_v60 = vcombine.low %v395_v47, %v403_v48  ;;  %v5758_v45 = vcombine.high %v490_v37, %v498_v40  ;;  %v506_v47 = vld [vmem:[%s6583_s7 + $0x990] sm:$0xff] }
  0xdf   : > { %v5680_v62 = vcombine.high %v411_v58, %v419_v57  ;;  %v514_v48 = vld [vmem:[%s6583_s7 + $0x9d0] sm:$0xff] }
  0xe1   : > { %4068 = vmatpush1.bf16.msra.mxu0 %v5565_v1  ;;  %4227 = vmatpush1.bf16.msra.mxu1 %v5567_v2  ;;  %v427_v1 = vld [vmem:[%s6583_s7 + $0x718] sm:$0xff] }
  0xe2   : > { %4069 = vmatprep.subr.bf16.mxu0 %v5582_v3  ;;  %4228 = vmatprep.subr.bf16.mxu1 %v5584_v4  ;;  %v435_v2 = vld [vmem:[%s6583_s7 + $0x758] sm:$0xff]  ;;  %v5677_v3 = vcombine.low %v410_v55, %v418_v56  ;;  %v5679_v4 = vcombine.low %v411_v58, %v419_v57  ;;  %v522_v56 = vld [vmem:[%s6583_s7 + $0xa10] sm:$0xff] }
  0xe3   : > { %v5696_v7 = vcombine.high %v427_v1, %v435_v2  ;;  %v530_v58 = vld [vmem:[%s6583_s7 + $0xa50] sm:$0xff]  ;;  %v523_v57 = vld [vmem:[%s6583_s7 + $0xa18] sm:$0xff] }
  0xe5   : > { %4070 = vmatpush1.bf16.msra.mxu0 %v5581_v10  ;;  %4229 = vmatpush1.bf16.msra.mxu1 %v5583_v11  ;;  %v443_v10 = vld [vmem:[%s6583_s7 + $0x798] sm:$0xff] }
  0xe6   : > { %4071 = vmatprep.subr.bf16.mxu0 %v5598_v13  ;;  %4230 = vmatprep.subr.bf16.mxu1 %v5600_v14  ;;  %v451_v11 = vld [vmem:[%s6583_s7 + $0x7d8] sm:$0xff]  ;;  %v5693_v13 = vcombine.low %v426_v63, %v434_v0  ;;  %v5695_v14 = vcombine.low %v427_v1, %v435_v2  ;;  %v538_v63 = vld [vmem:[%s6583_s7 + $0xa90] sm:$0xff] }
  0xe7   : > { %v5712_v16 = vcombine.high %v443_v10, %v451_v11  ;;  %v546_v0 = vld [vmem:[%s6583_s7 + $0xad0] sm:$0xff]  ;;  %v539_v1 = vld [vmem:[%s6583_s7 + $0xa98] sm:$0xff] }
  0xe8   : > { %v547_v2 = vld [vmem:[%s6583_s7 + $0xad8] sm:$0xff] }
  0xe9   : > { %4072 = vmatpush1.bf16.msra.mxu0 %v5597_v19  ;;  %4231 = vmatpush1.bf16.msra.mxu1 %v5599_v20  ;;  %v459_v19 = vld [vmem:[%s6583_s7 + $0x818] sm:$0xff] }
  0xea   : > { %4073 = vmatprep.subr.bf16.mxu0 %v5614_v22  ;;  %4232 = vmatprep.subr.bf16.mxu1 %v5616_v23  ;;  %v467_v20 = vld [vmem:[%s6583_s7 + $0x858] sm:$0xff]  ;;  %v5709_v22 = vcombine.low %v442_v8, %v450_v9  ;;  %v5711_v23 = vcombine.low %v443_v10, %v451_v11  ;;  %v562_v8 = vld [vmem:[%s6583_s7 + $0xb50] sm:$0xff]  ;;  %v5805_v11 = vcombine.low %v538_v63, %v546_v0 }
  0xeb   : > { %v5728_v26 = vcombine.high %v459_v19, %v467_v20  ;;  %v555_v9 = vld [vmem:[%s6583_s7 + $0xb18] sm:$0xff] }
  0xec   : > { %v563_v10 = vld [vmem:[%s6583_s7 + $0xb58] sm:$0xff] }
  0xed   : > { %4074 = vmatpush1.bf16.msra.mxu0 %v5613_v29  ;;  %4233 = vmatpush1.bf16.msra.mxu1 %v5615_v31  ;;  %v475_v29 = vld [vmem:[%s6583_s7 + $0x898] sm:$0xff] }
  0xee   : > { %4075 = vmatprep.subr.bf16.mxu0 %v5630_v33  ;;  %4234 = vmatprep.subr.bf16.mxu1 %v5632_v34  ;;  %v483_v31 = vld [vmem:[%s6583_s7 + $0x8d8] sm:$0xff]  ;;  %v5725_v33 = vcombine.low %v458_v17, %v466_v18  ;;  %v5727_v34 = vcombine.low %v459_v19, %v467_v20  ;;  %v5823_v20 = vcombine.low %v555_v9, %v563_v10 }
  0xef   : > { %v5744_v36 = vcombine.high %v475_v29, %v483_v31  ;;  %v571_v17 = vld [vmem:[%s6583_s7 + $0xb98] sm:$0xff] }
  0xf0   : > { %v579_v18 = vld [vmem:[%s6583_s7 + $0xbd8] sm:$0xff] }
  0xf1   : > { %4076 = vmatpush1.bf16.msra.mxu0 %v5629_v41  ;;  %4235 = vmatpush1.bf16.msra.mxu1 %v5631_v42  ;;  %v491_v41 = vld [vmem:[%s6583_s7 + $0x918] sm:$0xff] }
  0xf2   : > { %4077 = vmatprep.subr.bf16.mxu0 %v5646_v43  ;;  %4236 = vmatprep.subr.bf16.mxu1 %v5648_v44  ;;  %v499_v42 = vld [vmem:[%s6583_s7 + $0x958] sm:$0xff]  ;;  %v5741_v43 = vcombine.low %v474_v27, %v482_v28  ;;  %v5743_v44 = vcombine.low %v475_v29, %v483_v31  ;;  %v5839_v31 = vcombine.low %v571_v17, %v579_v18 }
  0xf3   : > { %v5760_v46 = vcombine.high %v491_v41, %v499_v42  ;;  %v587_v27 = vld [vmem:[%s6583_s7 + $0xc18] sm:$0xff] }
  0xf4   : > { %v595_v28 = vld [vmem:[%s6583_s7 + $0xc58] sm:$0xff] }
  0xf5   : > { %4078 = vmatpush1.bf16.msra.mxu0 %v5645_v49  ;;  %4237 = vmatpush1.bf16.msra.mxu1 %v5647_v52  ;;  %v507_v49 = vld [vmem:[%s6583_s7 + $0x998] sm:$0xff] }
  0xf6   : > { %4079 = vmatprep.subr.bf16.mxu0 %v5662_v53  ;;  %4238 = vmatprep.subr.bf16.mxu1 %v5664_v54  ;;  %v515_v52 = vld [vmem:[%s6583_s7 + $0x9d8] sm:$0xff]  ;;  %v5759_v53 = vcombine.low %v491_v41, %v499_v42  ;;  %v5774_v54 = vcombine.high %v506_v47, %v514_v48  ;;  %v5855_v42 = vcombine.low %v587_v27, %v595_v28 }
  0xf7   : > { %v5776_v55 = vcombine.high %v507_v49, %v515_v52 }
  0xf9   : > { %4080 = vmatpush1.bf16.msra.mxu0 %v5661_v59  ;;  %4239 = vmatpush1.bf16.msra.mxu1 %v5663_v60  ;;  %v531_v59 = vld [vmem:[%s6583_s7 + $0xa58] sm:$0xff]  ;;  %v5775_v60 = vcombine.low %v507_v49, %v515_v52 }
  0xfa   : > { %4081 = vmatprep.subr.bf16.mxu0 %v5678_v61  ;;  %4240 = vmatprep.subr.bf16.mxu1 %v5680_v62  ;;  %v5790_v61 = vcombine.high %v522_v56, %v530_v58  ;;  %v5792_v62 = vcombine.high %v523_v57, %v531_v59 }
  0xfd   : > { %4082 = vmatpush1.bf16.msra.mxu0 %v5677_v3  ;;  %4241 = vmatpush1.bf16.msra.mxu1 %v5679_v4  ;;  %v5791_v3 = vcombine.low %v523_v57, %v531_v59  ;;  %v5806_v4 = vcombine.high %v538_v63, %v546_v0  ;;  %v651_v63 = vld [vmem:[%s6583_s7 + $0xe18] sm:$0xff] }
  0xfe   : > { %4083 = vmatprep.subr.bf16.mxu0 %v5694_v6  ;;  %4242 = vmatprep.subr.bf16.mxu1 %v5696_v7  ;;  %v5808_v6 = vcombine.high %v539_v1, %v547_v2  ;;  %v554_v7 = vld [vmem:[%s6583_s7 + $0xb10] sm:$0xff]  ;;  %v659_v0 = vld [vmem:[%s6583_s7 + $0xe58] sm:$0xff] }
  0xff   : > { %v5821_v19 = vcombine.low %v554_v7, %v562_v8 }
 0x101   : > { %4084 = vmatpush1.bf16.msra.mxu0 %v5693_v13  ;;  %4243 = vmatpush1.bf16.msra.mxu1 %v5695_v14  ;;  %v5822_v13 = vcombine.high %v554_v7, %v562_v8  ;;  %v5824_v14 = vcombine.high %v555_v9, %v563_v10  ;;  %v667_v7 = vld [vmem:[%s6583_s7 + $0xe98] sm:$0xff]  ;;  %v5919_v10 = vcombine.low %v651_v63, %v659_v0 }
 0x102   : > { %4085 = vmatprep.subr.bf16.mxu0 %v5710_v15  ;;  %4244 = vmatprep.subr.bf16.mxu1 %v5712_v16  ;;  %v570_v15 = vld [vmem:[%s6583_s7 + $0xb90] sm:$0xff]  ;;  %v675_v8 = vld [vmem:[%s6583_s7 + $0xed8] sm:$0xff] }
 0x103   : > { %v578_v16 = vld [vmem:[%s6583_s7 + $0xbd0] sm:$0xff] }
 0x104   : > { %v5837_v29 = vcombine.low %v570_v15, %v578_v16 }
 0x105   : > { %4086 = vmatpush1.bf16.msra.mxu0 %v5709_v22  ;;  %4245 = vmatpush1.bf16.msra.mxu1 %v5711_v23  ;;  %v5838_v22 = vcombine.high %v570_v15, %v578_v16  ;;  %v5840_v23 = vcombine.high %v571_v17, %v579_v18  ;;  %v683_v15 = vld [vmem:[%s6583_s7 + $0xf18] sm:$0xff]  ;;  %v5935_v18 = vcombine.low %v667_v7, %v675_v8 }
 0x106   : > { %4108 = vmatprep.subr.bf16.mxu0 %v5726_v25  ;;  %4267 = vmatprep.subr.bf16.mxu1 %v5728_v26  ;;  %v586_v25 = vld [vmem:[%s6583_s7 + $0xc10] sm:$0xff]  ;;  %v691_v16 = vld [vmem:[%s6583_s7 + $0xf58] sm:$0xff] }
 0x107   : > { %v594_v26 = vld [vmem:[%s6583_s7 + $0xc50] sm:$0xff] }
 0x108   : > { %4088 = vmatmul.mubr.bf16.vlgmr.msra.gmra.mrb[8].mxu0 %v6671_v12  ;;  %4247 = vmatmul.mubr.bf16.vlgmr.msra.gmra.mrb[8].mxu1 %v6671_v12  ;;  %v5757_v12 = vcombine.low %v490_v37, %v498_v40  ;;  %v603_v37 = vld [vmem:[%s6583_s7 + $0xc98] sm:$0xff]  ;;  %v5853_v41 = vcombine.low %v586_v25, %v594_v26 }
 0x109   : > { %4109 = vmatpush1.bf16.msra.mxu0 %v5725_v33  ;;  %4268 = vmatpush1.bf16.msra.mxu1 %v5727_v34  ;;  %v5854_v33 = vcombine.high %v586_v25, %v594_v26  ;;  %v5856_v34 = vcombine.high %v587_v27, %v595_v28  ;;  %v611_v40 = vld [vmem:[%s6583_s7 + $0xcd8] sm:$0xff]  ;;  %v5951_v28 = vcombine.low %v683_v15, %v691_v16 }
 0x10a   : > { %4110 = vmatprep.subr.bf16.mxu0 %v5742_v35  ;;  %4269 = vmatprep.subr.bf16.mxu1 %v5744_v36  ;;  %v602_v35 = vld [vmem:[%s6583_s7 + $0xc90] sm:$0xff]  ;;  %v5871_v52 = vcombine.low %v603_v37, %v611_v40  ;;  %v699_v25 = vld [vmem:[%s6583_s7 + $0xf98] sm:$0xff] }
 0x10b   : > { %4097 = vmatprep.mubr.bf16.mxu0 %v6680_v21  ;;  %4256 = vmatprep.mubr.bf16.mxu1 %v6680_v21  ;;  %v5773_v21 = vcombine.low %v506_v47, %v514_v48  ;;  %v610_v36 = vld [vmem:[%s6583_s7 + $0xcd0] sm:$0xff]  ;;  %v619_v47 = vld [vmem:[%s6583_s7 + $0xd18] sm:$0xff] }
 0x10c   : > { %v627_v48 = vld [vmem:[%s6583_s7 + $0xd58] sm:$0xff]  ;;  %v5869_v49 = vcombine.low %v602_v35, %v610_v36 }
 0x10d   : > { %4111 = vmatpush1.bf16.msra.mxu0 %v5741_v43  ;;  %4270 = vmatpush1.bf16.msra.mxu1 %v5743_v44  ;;  %v5870_v43 = vcombine.high %v602_v35, %v610_v36  ;;  %v5872_v44 = vcombine.high %v603_v37, %v611_v40  ;;  %v5887_v59 = vcombine.low %v619_v47, %v627_v48  ;;  %v707_v26 = vld [vmem:[%s6583_s7 + $0xfd8] sm:$0xff] }
 0x10e   : > { %4112 = vmatprep.subr.bf16.mxu0 %v5758_v45  ;;  %4271 = vmatprep.subr.bf16.mxu1 %v5760_v46  ;;  %v618_v45 = vld [vmem:[%s6583_s7 + $0xd10] sm:$0xff]  ;;  %v715_v35 = vld [vmem:[%s6583_s7 + $0x1018] sm:$0xff]  ;;  %v5967_v40 = vcombine.low %v699_v25, %v707_v26 }
 0x10f   : > { %v626_v46 = vld [vmem:[%s6583_s7 + $0xd50] sm:$0xff]  ;;  %v723_v36 = vld [vmem:[%s6583_s7 + $0x1058] sm:$0xff] }
 0x110   : > { %4098 = vmatmul.mubr.bf16.gmra.mrb[12].mxu0 %v6695_v32  ;;  %4257 = vmatmul.mubr.bf16.gmra.mrb[12].mxu1 %v6695_v32  ;;  %v5789_v32 = vcombine.low %v522_v56, %v530_v58  ;;  %v635_v56 = vld [vmem:[%s6583_s7 + $0xd98] sm:$0xff]  ;;  %v5885_v57 = vcombine.low %v618_v45, %v626_v46 }
 0x111   : > { %4113 = vmatpush1.bf16.msra.mxu0 %v5757_v12  ;;  %4272 = vmatpush1.bf16.msra.mxu1 %v5759_v53  ;;  %v5886_v12 = vcombine.high %v618_v45, %v626_v46  ;;  %v5888_v53 = vcombine.high %v619_v47, %v627_v48  ;;  %v643_v58 = vld [vmem:[%s6583_s7 + $0xdd8] sm:$0xff]  ;;  %v5983_v48 = vcombine.low %v715_v35, %v723_v36 }
 0x112   : > { %4114 = vmatprep.subr.bf16.mxu0 %v5774_v54  ;;  %4273 = vmatprep.subr.bf16.mxu1 %v5776_v55  ;;  %v634_v54 = vld [vmem:[%s6583_s7 + $0xd90] sm:$0xff]  ;;  %v731_v45 = vld [vmem:[%s6583_s7 + $0x1098] sm:$0xff] }
 0x113   : > { %4140 = vmatprep.mubr.bf16.mxu0 %v6702_v39  ;;  %4299 = vmatprep.mubr.bf16.mxu1 %v6702_v39  ;;  %v5807_v39 = vcombine.low %v539_v1, %v547_v2  ;;  %v642_v55 = vld [vmem:[%s6583_s7 + $0xdd0] sm:$0xff]  ;;  %v5903_v2 = vcombine.low %v635_v56, %v643_v58  ;;  %v739_v46 = vld [vmem:[%s6583_s7 + $0x10d8] sm:$0xff] }
 0x114   : > { %v5901_v1 = vcombine.low %v634_v54, %v642_v55 }
 0x115   : > { %4115 = vmatpush1.bf16.msra.mxu0 %v5773_v21  ;;  %4274 = vmatpush1.bf16.msra.mxu1 %v5775_v60  ;;  %v5902_v21 = vcombine.high %v634_v54, %v642_v55  ;;  %v5904_v60 = vcombine.high %v635_v56, %v643_v58  ;;  %v747_v54 = vld [vmem:[%s6583_s7 + $0x1118] sm:$0xff]  ;;  %v5999_v58 = vcombine.low %v731_v45, %v739_v46 }
 0x116   : > { %4116 = vmatprep.subr.bf16.mxu0 %v5790_v61  ;;  %4275 = vmatprep.subr.bf16.mxu1 %v5792_v62  ;;  %v650_v61 = vld [vmem:[%s6583_s7 + $0xe10] sm:$0xff]  ;;  %v755_v55 = vld [vmem:[%s6583_s7 + $0x1158] sm:$0xff] }
 0x117   : > { %v658_v62 = vld [vmem:[%s6583_s7 + $0xe50] sm:$0xff] }
 0x118   : > { %v5917_v9 = vcombine.low %v650_v61, %v658_v62 }
 0x119   : > { %4117 = vmatpush1.bf16.msra.mxu0 %v5789_v32  ;;  %4276 = vmatpush1.bf16.msra.mxu1 %v5791_v3  ;;  %v5918_v32 = vcombine.high %v650_v61, %v658_v62  ;;  %v5920_v3 = vcombine.high %v651_v63, %v659_v0  ;;  %v763_v61 = vld [vmem:[%s6583_s7 + $0x1198] sm:$0xff]  ;;  %v6015_v63 = vcombine.low %v747_v54, %v755_v55 }
 0x11a   : > { %4118 = vmatprep.subr.bf16.mxu0 %v5806_v4  ;;  %4277 = vmatprep.subr.bf16.mxu1 %v5808_v6  ;;  %v666_v4 = vld [vmem:[%s6583_s7 + $0xe90] sm:$0xff] }
 0x11b   : > { %v674_v6 = vld [vmem:[%s6583_s7 + $0xed0] sm:$0xff] }
 0x11c   : > { %v5933_v17 = vcombine.low %v666_v4, %v674_v6 }
 0x11d   : > { %4119 = vmatpush1.bf16.msra.mxu0 %v5805_v11  ;;  %4278 = vmatpush1.bf16.msra.mxu1 %v5807_v39  ;;  %v5934_v11 = vcombine.high %v666_v4, %v674_v6  ;;  %v5936_v39 = vcombine.high %v667_v7, %v675_v8 }
 0x11e   : > { %4120 = vmatprep.subr.bf16.mxu0 %v5822_v13  ;;  %4279 = vmatprep.subr.bf16.mxu1 %v5824_v14  ;;  %v682_v13 = vld [vmem:[%s6583_s7 + $0xf10] sm:$0xff] }
 0x11f   : > { %v690_v14 = vld [vmem:[%s6583_s7 + $0xf50] sm:$0xff] }
 0x120   : > { %v5949_v27 = vcombine.low %v682_v13, %v690_v14 }
 0x121   : > { %4121 = vmatpush1.bf16.msra.mxu0 %v5821_v19  ;;  %4280 = vmatpush1.bf16.msra.mxu1 %v5823_v20  ;;  %v5950_v19 = vcombine.high %v682_v13, %v690_v14  ;;  %v5952_v20 = vcombine.high %v683_v15, %v691_v16  ;;  %v236_v16 = vld [vmem:[%s6583_s7 + $0x120] sm:$0xff] }
 0x122   : > { %4122 = vmatprep.subr.bf16.mxu0 %v5838_v22  ;;  %4281 = vmatprep.subr.bf16.mxu1 %v5840_v23  ;;  %v698_v22 = vld [vmem:[%s6583_s7 + $0xf90] sm:$0xff] }
 0x123   : > { %v706_v23 = vld [vmem:[%s6583_s7 + $0xfd0] sm:$0xff] }
 0x124   : > { %v5965_v37 = vcombine.low %v698_v22, %v706_v23 }
 0x125   : > { %4123 = vmatpush1.bf16.msra.mxu0 %v5837_v29  ;;  %4282 = vmatpush1.bf16.msra.mxu1 %v5839_v31  ;;  %v5966_v29 = vcombine.high %v698_v22, %v706_v23  ;;  %v5968_v31 = vcombine.high %v699_v25, %v707_v26  ;;  %v252_v26 = vld [vmem:[%s6583_s7 + $0x1a0] sm:$0xff] }
 0x126   : > { %4124 = vmatprep.subr.bf16.mxu0 %v5854_v33  ;;  %4283 = vmatprep.subr.bf16.mxu1 %v5856_v34  ;;  %v714_v33 = vld [vmem:[%s6583_s7 + $0x1010] sm:$0xff] }
 0x127   : > { %v722_v34 = vld [vmem:[%s6583_s7 + $0x1050] sm:$0xff] }
 0x128   : > { %v5981_v47 = vcombine.low %v714_v33, %v722_v34 }
 0x129   : > { %4125 = vmatpush1.bf16.msra.mxu0 %v5853_v41  ;;  %4284 = vmatpush1.bf16.msra.mxu1 %v5855_v42  ;;  %v5982_v41 = vcombine.high %v714_v33, %v722_v34  ;;  %v5984_v42 = vcombine.high %v715_v35, %v723_v36  ;;  %v268_v35 = vld [vmem:[%s6583_s7 + $0x220] sm:$0xff] }
 0x12a   : > { %4126 = vmatprep.subr.bf16.mxu0 %v5870_v43  ;;  %4285 = vmatprep.subr.bf16.mxu1 %v5872_v44  ;;  %v730_v43 = vld [vmem:[%s6583_s7 + $0x1090] sm:$0xff]  ;;  %v276_v36 = vld [vmem:[%s6583_s7 + $0x260] sm:$0xff] }
 0x12b   : > { %v738_v44 = vld [vmem:[%s6583_s7 + $0x10d0] sm:$0xff] }
 0x12c   : > { %v5997_v56 = vcombine.low %v730_v43, %v738_v44 }
 0x12d   : > { %4127 = vmatpush1.bf16.msra.mxu0 %v5869_v49  ;;  %4286 = vmatpush1.bf16.msra.mxu1 %v5871_v52  ;;  %v5998_v49 = vcombine.high %v730_v43, %v738_v44  ;;  %v6000_v52 = vcombine.high %v731_v45, %v739_v46  ;;  %v5538_v43 = vcombine.high %v268_v35, %v276_v36  ;;  %v284_v45 = vld [vmem:[%s6583_s7 + $0x2a0] sm:$0xff] }
 0x12e   : > { %4128 = vmatprep.subr.bf16.mxu0 %v5886_v12  ;;  %4287 = vmatprep.subr.bf16.mxu1 %v5888_v53  ;;  %v746_v12 = vld [vmem:[%s6583_s7 + $0x1110] sm:$0xff]  ;;  %v292_v46 = vld [vmem:[%s6583_s7 + $0x2e0] sm:$0xff] }
 0x12f   : > { %v754_v53 = vld [vmem:[%s6583_s7 + $0x1150] sm:$0xff] }
 0x130   : > { %v6013_v62 = vcombine.low %v746_v12, %v754_v53 }
 0x131   : > { %4129 = vmatpush1.bf16.msra.mxu0 %v5885_v57  ;;  %4288 = vmatpush1.bf16.msra.mxu1 %v5887_v59  ;;  %v6014_v57 = vcombine.high %v746_v12, %v754_v53  ;;  %v6016_v59 = vcombine.high %v747_v54, %v755_v55  ;;  %v5554_v12 = vcombine.high %v284_v45, %v292_v46  ;;  %v300_v54 = vld [vmem:[%s6583_s7 + $0x320] sm:$0xff] }
 0x132   : > { %4130 = vmatprep.subr.bf16.mxu0 %v5902_v21  ;;  %4289 = vmatprep.subr.bf16.mxu1 %v5904_v60  ;;  %v762_v21 = vld [vmem:[%s6583_s7 + $0x1190] sm:$0xff]  ;;  %v308_v55 = vld [vmem:[%s6583_s7 + $0x360] sm:$0xff] }
 0x133   : > { %v770_v60 = vld [vmem:[%s6583_s7 + $0x11d0] sm:$0xff] }
 0x134   : > { %v6030_v0 = vcombine.high %v762_v21, %v770_v60  ;;  %v6029_v4 = vcombine.low %v762_v21, %v770_v60  ;;  %v5570_v21 = vcombine.high %v300_v54, %v308_v55 }
 0x135   : > { %4131 = vmatpush1.bf16.msra.mxu0 %v5901_v1  ;;  %4290 = vmatpush1.bf16.msra.mxu1 %v5903_v2  ;;  %v204_v2 = vld [vmem:[%s6583_s7 + $0x20] sm:$0xff] }
 0x136   : > { %4132 = vmatprep.subr.bf16.mxu0 %v5918_v32  ;;  %4291 = vmatprep.subr.bf16.mxu1 %v5920_v3  ;;  %v212_v32 = vld [vmem:[%s6583_s7 + $0x60] sm:$0xff]  ;;  %v205_v3 = vld [vmem:[%s6583_s7 + $0x28] sm:$0xff] }
 0x137   : > { %v5474_v7 = vcombine.high %v204_v2, %v212_v32 }
 0x139   : > { %4133 = vmatpush1.bf16.msra.mxu0 %v5917_v9  ;;  %4292 = vmatpush1.bf16.msra.mxu1 %v5919_v10  ;;  %v220_v9 = vld [vmem:[%s6583_s7 + $0xa0] sm:$0xff] }
 0x13a   : > { %4134 = vmatprep.subr.bf16.mxu0 %v5934_v11  ;;  %4293 = vmatprep.subr.bf16.mxu1 %v5936_v39  ;;  %v228_v10 = vld [vmem:[%s6583_s7 + $0xe0] sm:$0xff]  ;;  %v221_v11 = vld [vmem:[%s6583_s7 + $0xa8] sm:$0xff]  ;;  %v5473_v39 = vcombine.low %v204_v2, %v212_v32 }
 0x13b   : > { %v5490_v14 = vcombine.high %v220_v9, %v228_v10 }
 0x13d   : > { %4135 = vmatpush1.bf16.msra.mxu0 %v5933_v17  ;;  %4294 = vmatpush1.bf16.msra.mxu1 %v5935_v18  ;;  %v244_v17 = vld [vmem:[%s6583_s7 + $0x160] sm:$0xff]  ;;  %v237_v18 = vld [vmem:[%s6583_s7 + $0x128] sm:$0xff] }
 0x13e   : > { %4136 = vmatprep.subr.bf16.mxu0 %v5950_v19  ;;  %4295 = vmatprep.subr.bf16.mxu1 %v5952_v20  ;;  %v245_v19 = vld [vmem:[%s6583_s7 + $0x168] sm:$0xff]  ;;  %v5489_v20 = vcombine.low %v220_v9, %v228_v10  ;;  %v5506_v23 = vcombine.high %v236_v16, %v244_v17 }
 0x13f   : > { %v5508_v25 = vcombine.high %v237_v18, %v245_v19 }
 0x141   : > { %4137 = vmatpush1.bf16.msra.mxu0 %v5949_v27  ;;  %4296 = vmatpush1.bf16.msra.mxu1 %v5951_v28  ;;  %v260_v27 = vld [vmem:[%s6583_s7 + $0x1e0] sm:$0xff]  ;;  %v253_v28 = vld [vmem:[%s6583_s7 + $0x1a8] sm:$0xff] }
 0x142   : > { %4138 = vmatprep.subr.bf16.mxu0 %v5966_v29  ;;  %4297 = vmatprep.subr.bf16.mxu1 %v5968_v31  ;;  %v5505_v29 = vcombine.low %v236_v16, %v244_v17  ;;  %v5507_v31 = vcombine.low %v237_v18, %v245_v19  ;;  %v5522_v33 = vcombine.high %v252_v26, %v260_v27  ;;  %v364_v18 = vld [vmem:[%s6583_s7 + $0x520] sm:$0xff] }
 0x143   : > { %v372_v19 = vld [vmem:[%s6583_s7 + $0x560] sm:$0xff] }
 0x145   : > { %4139 = vmatpush1.bf16.msra.mxu0 %v5965_v37  ;;  %4298 = vmatpush1.bf16.msra.mxu1 %v5967_v40  ;;  %v269_v37 = vld [vmem:[%s6583_s7 + $0x228] sm:$0xff] }
 0x146   : > { %4161 = vmatprep.subr.bf16.mxu0 %v5982_v41  ;;  %4320 = vmatprep.subr.bf16.mxu1 %v5984_v42  ;;  %v277_v40 = vld [vmem:[%s6583_s7 + $0x268] sm:$0xff]  ;;  %v5521_v41 = vcombine.low %v252_v26, %v260_v27  ;;  %v5634_v26 = vcombine.high %v364_v18, %v372_v19 }
 0x147   : > { %v5540_v44 = vcombine.high %v269_v37, %v277_v40 }
 0x148   : > { %4141 = vmatmul.mubr.bf16.vlgmr.msra.gmra.mrb[8].mxu0 %v6775_v30  ;;  %4300 = vmatmul.mubr.bf16.vlgmr.msra.gmra.mrb[8].mxu1 %v6775_v30  ;;  %v771_v30 = vld [vmem:[%s6583_s7 + $0x11d8] sm:$0xff] }
 0x149   : > { %4162 = vmatpush1.bf16.msra.mxu0 %v5981_v47  ;;  %4321 = vmatpush1.bf16.msra.mxu1 %v5983_v48  ;;  %v6032_v1 = vcombine.high %v763_v61, %v771_v30  ;;  %v6031_v6 = vcombine.low %v763_v61, %v771_v30  ;;  %v6381_v47 = vld [vmem:[%s7669_s0 + $0x4] ss:$20 sps:$4 sm:$0xff]   ;;  %v293_v48 = vld [vmem:[%s6583_s7 + $0x2e8] sm:$0xff] }
 0x14a   : > { %4163 = vmatprep.subr.bf16.mxu0 %v5998_v49  ;;  %4322 = vmatprep.subr.bf16.mxu1 %v6000_v52  ;;  %v5537_v49 = vcombine.low %v268_v35, %v276_v36  ;;  %v5539_v52 = vcombine.low %v269_v37, %v277_v40  ;;  %v316_v61 = vld [vmem:[%s6583_s7 + $0x3a0] sm:$0xff] }
 0x14b   : > { %4150 = vmatprep.mubr.bf16.mxu0 %v6782_v38  ;;  %4309 = vmatprep.mubr.bf16.mxu1 %v6782_v38  ;;  %v213_v38 = vld [vmem:[%s6583_s7 + $0x68] sm:$0xff]  ;;  %v324_v30 = vld [vmem:[%s6583_s7 + $0x3e0] sm:$0xff] }
 0x14c   : > { %v5476_v8 = vcombine.high %v205_v3, %v213_v38  ;;  %v5475_v13 = vcombine.low %v205_v3, %v213_v38  ;;  %v5586_v2 = vcombine.high %v316_v61, %v324_v30  ;;  %v332_v3 = vld [vmem:[%s6583_s7 + $0x420] sm:$0xff] }
 0x14d   : > { %4164 = vmatpush1.bf16.msra.mxu0 %v5997_v56  ;;  %4323 = vmatpush1.bf16.msra.mxu1 %v5999_v58  ;;  %v301_v56 = vld [vmem:[%s6583_s7 + $0x328] sm:$0xff]  ;;  %v340_v38 = vld [vmem:[%s6583_s7 + $0x460] sm:$0xff] }
 0x14e   : > { %4165 = vmatprep.subr.bf16.mxu0 %v6014_v57  ;;  %4324 = vmatprep.subr.bf16.mxu1 %v6016_v59  ;;  %v309_v58 = vld [vmem:[%s6583_s7 + $0x368] sm:$0xff]  ;;  %v5553_v57 = vcombine.low %v284_v45, %v292_v46  ;;  %v5602_v9 = vcombine.high %v332_v3, %v340_v38  ;;  %v396_v37 = vld [vmem:[%s6583_s7 + $0x620] sm:$0xff] }
 0x14f   : > { %v5572_v60 = vcombine.high %v301_v56, %v309_v58  ;;  %v404_v40 = vld [vmem:[%s6583_s7 + $0x660] sm:$0xff] }
 0x150   : > { %4151 = vmatmul.mubr.bf16.gmra.mrb[12].mxu0 %v6797_v51  ;;  %4310 = vmatmul.mubr.bf16.gmra.mrb[12].mxu1 %v6797_v51  ;;  %v229_v51 = vld [vmem:[%s6583_s7 + $0xe8] sm:$0xff]  ;;  %v5666_v45 = vcombine.high %v396_v37, %v404_v40 }
 0x151   : > { %4166 = vmatpush1.bf16.msra.mxu0 %v6013_v62  ;;  %4325 = vmatpush1.bf16.msra.mxu1 %v6015_v63  ;;  %v5492_v15 = vcombine.high %v221_v11, %v229_v51  ;;  %v5491_v22 = vcombine.low %v221_v11, %v229_v51  ;;  %v317_v62 = vld [vmem:[%s6583_s7 + $0x3a8] sm:$0xff]  ;;  %v348_v11 = vld [vmem:[%s6583_s7 + $0x4a0] sm:$0xff] }
 0x152   : > { %4167 = vmatprep.subr.bf16.mxu0 %v6030_v0  ;;  %4326 = vmatprep.subr.bf16.mxu1 %v6032_v1  ;;  %v325_v63 = vld [vmem:[%s6583_s7 + $0x3e8] sm:$0xff]  ;;  %v5569_v0 = vcombine.low %v300_v54, %v308_v55  ;;  %v5571_v1 = vcombine.low %v301_v56, %v309_v58  ;;  %v356_v51 = vld [vmem:[%s6583_s7 + $0x4e0] sm:$0xff] }
 0x153   : > { %4193 = vmatprep.mubr.bf16.mxu0 %v6469_v50  ;;  %4352 = vmatprep.mubr.bf16.mxu1 %v6469_v50  ;;  %v5588_v32 = vcombine.high %v317_v62, %v325_v63  ;;  %v5618_v16 = vcombine.high %v348_v11, %v356_v51  ;;  %v428_v55 = vld [vmem:[%s6583_s7 + $0x720] sm:$0xff]  ;;  %v429_v58 = vld [vmem:[%s6583_s7 + $0x728] sm:$0xff] }
 0x154   : > { %v436_v56 = vld [vmem:[%s6583_s7 + $0x760] sm:$0xff] }
 0x155   : > { %4168 = vmatpush1.bf16.msra.mxu0 %v6029_v4  ;;  %4327 = vmatpush1.bf16.msra.mxu1 %v6031_v6  ;;  %v333_v4 = vld [vmem:[%s6583_s7 + $0x428] sm:$0xff] }
 0x156   : > { %4373 = vmatprep.subr.bf16.mxu0 %v5474_v7  ;;  %4532 = vmatprep.subr.bf16.mxu1 %v5476_v8  ;;  %v341_v6 = vld [vmem:[%s6583_s7 + $0x468] sm:$0xff]  ;;  %v5585_v7 = vcombine.low %v316_v61, %v324_v30  ;;  %v5587_v8 = vcombine.low %v317_v62, %v325_v63  ;;  %v444_v30 = vld [vmem:[%s6583_s7 + $0x7a0] sm:$0xff] }
 0x157   : > { %v5604_v10 = vcombine.high %v333_v4, %v341_v6  ;;  %v452_v62 = vld [vmem:[%s6583_s7 + $0x7e0] sm:$0xff]  ;;  %v445_v63 = vld [vmem:[%s6583_s7 + $0x7a8] sm:$0xff] }
 0x158   : > { %6045 = vmatmul.mubr.msk.bf16.vlgmr.msra.gmra.mrb[8].mxu0 %vm3730_vm0, %v6814_v5  ;;  %6047 = vmatmul.mubr.msk.bf16.vlgmr.msra.gmra.mrb[8].mxu1 %vm3730_vm0, %v6814_v5  ;;  %v261_v5 = vld [vmem:[%s6583_s7 + $0x1e8] sm:$0xff] }
 0x159   : > { %4374 = vmatpush1.bf16.msra.mxu0 %v5473_v39  ;;  %4533 = vmatpush1.bf16.msra.mxu1 %v5475_v13  ;;  %v5524_v34 = vcombine.high %v253_v28, %v261_v5  ;;  %v5523_v42 = vcombine.low %v253_v28, %v261_v5  ;;  %v349_v39 = vld [vmem:[%s6583_s7 + $0x4a8] sm:$0xff]  ;;  %v380_v28 = vld [vmem:[%s6583_s7 + $0x5a0] sm:$0xff] }
 0x15a   : > { %4375 = vmatprep.subr.bf16.mxu0 %v5490_v14  ;;  %4534 = vmatprep.subr.bf16.mxu1 %v5492_v15  ;;  %v357_v13 = vld [vmem:[%s6583_s7 + $0x4e8] sm:$0xff]  ;;  %v5601_v14 = vcombine.low %v332_v3, %v340_v38  ;;  %v5603_v15 = vcombine.low %v333_v4, %v341_v6  ;;  %v388_v5 = vld [vmem:[%s6583_s7 + $0x5e0] sm:$0xff] }
 0x15b   : > { %4203 = vmatprep.mubr.bf16.mxu0 %v6469_v50  ;;  %4362 = vmatprep.mubr.bf16.mxu1 %v6469_v50  ;;  %v5620_v17 = vcombine.high %v349_v39, %v357_v13  ;;  %v5650_v35 = vcombine.high %v380_v28, %v388_v5  ;;  %v460_v38 = vld [vmem:[%s6583_s7 + $0x820] sm:$0xff]  ;;  %v461_v6 = vld [vmem:[%s6583_s7 + $0x828] sm:$0xff] }
 0x15c   : > { %v468_v4 = vld [vmem:[%s6583_s7 + $0x860] sm:$0xff] }
 0x15d   : > { %4376 = vmatpush1.bf16.msra.mxu0 %v5489_v20  ;;  %4535 = vmatpush1.bf16.msra.mxu1 %v5491_v22  ;;  %v365_v20 = vld [vmem:[%s6583_s7 + $0x528] sm:$0xff] }
 0x15e   : > { %4377 = vmatprep.subr.bf16.mxu0 %v5506_v23  ;;  %4536 = vmatprep.subr.bf16.mxu1 %v5508_v25  ;;  %v373_v22 = vld [vmem:[%s6583_s7 + $0x568] sm:$0xff]  ;;  %v5617_v23 = vcombine.low %v348_v11, %v356_v51  ;;  %v5619_v25 = vcombine.low %v349_v39, %v357_v13  ;;  %v476_v51 = vld [vmem:[%s6583_s7 + $0x8a0] sm:$0xff]  ;;  %v7070_v13 = vpop.permute.xlu0 %782 }
 0x15f   : > { %v5636_v27 = vcombine.high %v365_v20, %v373_v22  ;;  %v484_v39 = vld [vmem:[%s6583_s7 + $0x8e0] sm:$0xff] }
 0x160   : > { %6046 = vmatmul.mubr.msk.bf16.gmra.mrb[12].mxu0 %vm3730_vm0, %v6833_v24  ;;  %6048 = vmatmul.mubr.msk.bf16.gmra.mrb[12].mxu1 %vm3730_vm0, %v6833_v24  ;;  %v285_v24 = vld [vmem:[%s6583_s7 + $0x2a8] sm:$0xff] }
 0x161   : > { %4378 = vmatpush1.bf16.msra.mxu0 %v5505_v29  ;;  %4537 = vmatpush1.bf16.msra.mxu1 %v5507_v31  ;;  %v5556_v53 = vcombine.high %v285_v24, %v293_v48  ;;  %v5555_v59 = vcombine.low %v285_v24, %v293_v48  ;;  %v381_v29 = vld [vmem:[%s6583_s7 + $0x5a8] sm:$0xff]  ;;  %v420_v24 = vld [vmem:[%s6583_s7 + $0x6e0] sm:$0xff] }
 0x162   : > { %4379 = vmatprep.subr.bf16.mxu0 %v5522_v33  ;;  %4538 = vmatprep.subr.bf16.mxu1 %v5524_v34  ;;  %v389_v31 = vld [vmem:[%s6583_s7 + $0x5e8] sm:$0xff]  ;;  %v5633_v33 = vcombine.low %v364_v18, %v372_v19  ;;  %v5635_v34 = vcombine.low %v365_v20, %v373_v22  ;;  %v5746_v18 = vcombine.high %v476_v51, %v484_v39  ;;  %v7075_v20 = vld [vmem:[%s6583_s7 + $0x920] sm:$0xff] }
 0x163   : > { %4405 = vmatprep.mubr.bf16.mxu0 %v6381_v47  ;;  %4564 = vmatprep.mubr.bf16.mxu1 %v6381_v47  ;;  %v5652_v36 = vcombine.high %v381_v29, %v389_v31  ;;  %v412_v47 = vld [vmem:[%s6583_s7 + $0x6a0] sm:$0xff]  ;;  %v413_v48 = vld [vmem:[%s6583_s7 + $0x6a8] sm:$0xff] }
 0x164   : > { %v500_v22 = vld [vmem:[%s6583_s7 + $0x960] sm:$0xff] }
 0x165   : > { %4380 = vmatpush1.bf16.msra.mxu0 %v5521_v41  ;;  %4539 = vmatpush1.bf16.msra.mxu1 %v5523_v42  ;;  %v397_v41 = vld [vmem:[%s6583_s7 + $0x628] sm:$0xff] }
 0x166   : > { %4381 = vmatprep.subr.bf16.mxu0 %v5538_v43  ;;  %4540 = vmatprep.subr.bf16.mxu1 %v5540_v44  ;;  %v405_v42 = vld [vmem:[%s6583_s7 + $0x668] sm:$0xff]  ;;  %v5649_v43 = vcombine.low %v380_v28, %v388_v5  ;;  %v5651_v44 = vcombine.low %v381_v29, %v389_v31  ;;  %v7087_v5 = vpop.permute.xlu0 %787  ;;  %v5762_v29 = vcombine.high %v7075_v20, %v500_v22  ;;  %v7091_v31 = vld [vmem:[%s6583_s7 + $0x9a0] sm:$0xff] }
 0x167   : > { %v5668_v46 = vcombine.high %v397_v41, %v405_v42 }
 0x169   : > { %4382 = vmatpush1.bf16.msra.mxu0 %v5537_v49  ;;  %4541 = vmatpush1.bf16.msra.mxu1 %v5539_v52  ;;  %v421_v49 = vld [vmem:[%s6583_s7 + $0x6e8] sm:$0xff]  ;;  %v5665_v52 = vcombine.low %v396_v37, %v404_v40 }
 0x16a   : > { %4383 = vmatprep.subr.bf16.mxu0 %v5554_v12  ;;  %4542 = vmatprep.subr.bf16.mxu1 %v5556_v53  ;;  %v5667_v12 = vcombine.low %v397_v41, %v405_v42  ;;  %v5682_v53 = vcombine.high %v412_v47, %v420_v24  ;;  %v5684_v54 = vcombine.high %v413_v48, %v421_v49  ;;  %v7101_v37 = vld [vmem:[%s6583_s7 + $0x9a8] sm:$0xff] }
 0x16b   : > { %v7104_v40 = vld [vmem:[%s6583_s7 + $0x9e8] sm:$0xff] }
 0x16c   : > { %v6383_v41 = vld [vmem:[%s7669_s0 + $0x2c] ss:$20 sps:$4 sm:$0xff]  }
 0x16d   : > { %4384 = vmatpush1.bf16.msra.mxu0 %v5553_v57  ;;  %4543 = vmatpush1.bf16.msra.mxu1 %v5555_v59  ;;  %v437_v57 = vld [vmem:[%s6583_s7 + $0x768] sm:$0xff]  ;;  %v5681_v59 = vcombine.low %v412_v47, %v420_v24 }
 0x16e   : > { %4385 = vmatprep.subr.bf16.mxu0 %v5570_v21  ;;  %4544 = vmatprep.subr.bf16.mxu1 %v5572_v60  ;;  %v5683_v21 = vcombine.low %v413_v48, %v421_v49  ;;  %v5698_v60 = vcombine.high %v428_v55, %v436_v56  ;;  %v5700_v61 = vcombine.high %v429_v58, %v437_v57 }
 0x171   : > { %4386 = vmatpush1.bf16.msra.mxu0 %v5569_v0  ;;  %4545 = vmatpush1.bf16.msra.mxu1 %v5571_v1  ;;  %v453_v0 = vld [vmem:[%s6583_s7 + $0x7e8] sm:$0xff]  ;;  %v5697_v1 = vcombine.low %v428_v55, %v436_v56 }
 0x172   : > { %4387 = vmatprep.subr.bf16.mxu0 %v5586_v2  ;;  %4546 = vmatprep.subr.bf16.mxu1 %v5588_v32  ;;  %v5699_v2 = vcombine.low %v429_v58, %v437_v57  ;;  %v5714_v32 = vcombine.high %v444_v30, %v452_v62  ;;  %v5716_v3 = vcombine.high %v445_v63, %v453_v0 }
 0x173   : > { %v5780_v58 = vcombine.high %v7101_v37, %v7104_v40 }
 0x175   : > { %4388 = vmatpush1.bf16.msra.mxu0 %v5585_v7  ;;  %4547 = vmatpush1.bf16.msra.mxu1 %v5587_v8  ;;  %v469_v7 = vld [vmem:[%s6583_s7 + $0x868] sm:$0xff]  ;;  %v5713_v8 = vcombine.low %v444_v30, %v452_v62  ;;  %v7125_v30 = vld [vmem:[%s6583_s7 + $0xa20] sm:$0xff] }
 0x176   : > { %4389 = vmatprep.subr.bf16.mxu0 %v5602_v9  ;;  %4548 = vmatprep.subr.bf16.mxu1 %v5604_v10  ;;  %v5715_v9 = vcombine.low %v445_v63, %v453_v0  ;;  %v5730_v10 = vcombine.high %v460_v38, %v468_v4  ;;  %v5732_v11 = vcombine.high %v461_v6, %v469_v7  ;;  %v7128_v62 = vld [vmem:[%s6583_s7 + $0xa60] sm:$0xff] }
 0x179   : > { %4390 = vmatpush1.bf16.msra.mxu0 %v5601_v14  ;;  %4549 = vmatpush1.bf16.msra.mxu1 %v5603_v15  ;;  %v477_v14 = vld [vmem:[%s6583_s7 + $0x8a8] sm:$0xff] }
 0x17a   : > { %4391 = vmatprep.subr.bf16.mxu0 %v5618_v16  ;;  %4550 = vmatprep.subr.bf16.mxu1 %v5620_v17  ;;  %v485_v15 = vld [vmem:[%s6583_s7 + $0x8e8] sm:$0xff]  ;;  %v5729_v16 = vcombine.low %v460_v38, %v468_v4  ;;  %v5731_v17 = vcombine.low %v461_v6, %v469_v7 }
 0x17b   : > { %v5748_v19 = vcombine.high %v477_v14, %v485_v15  ;;  %v5747_v28 = vcombine.low %v477_v14, %v485_v15 }
 0x17d   : > { %4392 = vmatpush1.bf16.msra.mxu0 %v5617_v23  ;;  %4551 = vmatpush1.bf16.msra.mxu1 %v5619_v25  ;;  %v6382_v23 = vld [vmem:[%s7669_s0] ss:$20 sps:$4 sm:$0xff]   ;;  %v7082_v25 = vld [vmem:[%s6583_s7 + $0x928] sm:$0xff] }
 0x17e   : > { %4393 = vmatprep.subr.bf16.mxu0 %v5634_v26  ;;  %4552 = vmatprep.subr.bf16.mxu1 %v5636_v27  ;;  %v7085_v26 = vld [vmem:[%s6583_s7 + $0x968] sm:$0xff]  ;;  %v5745_v27 = vcombine.low %v476_v51, %v484_v39  ;;  %v7147_v51 = vld [vmem:[%s6583_s7 + $0xaa0] sm:$0xff] }
 0x17f   : > { %v5763_v49 = vcombine.low %v7082_v25, %v7085_v26  ;;  %v7150_v39 = vld [vmem:[%s6583_s7 + $0xae0] sm:$0xff] }
 0x181   : > { %4394 = vmatpush1.bf16.msra.mxu0 %v5633_v33  ;;  %4553 = vmatpush1.bf16.msra.mxu1 %v5635_v34  ;;  %v7094_v33 = vld [vmem:[%s6583_s7 + $0x9e0] sm:$0xff] }
 0x182   : > { %4395 = vmatprep.subr.bf16.mxu0 %v5650_v35  ;;  %4554 = vmatprep.subr.bf16.mxu1 %v5652_v36  ;;  %v5764_v35 = vcombine.high %v7082_v25, %v7085_v26  ;;  %v7098_v36 = vpop.permute.xlu1 %792  ;;  %v5777_v7 = vcombine.low %v7091_v31, %v7094_v33 }
 0x185   : > { %4396 = vmatpush1.bf16.msra.mxu0 %v5649_v43  ;;  %4555 = vmatpush1.bf16.msra.mxu1 %v5651_v44 }
 0x186   : > { %4397 = vmatprep.subr.bf16.mxu0 %v5666_v45  ;;  %4556 = vmatprep.subr.bf16.mxu1 %v5668_v46  ;;  %v5761_v45 = vcombine.low %v7075_v20, %v500_v22  ;;  %v6385_v20 = vld [vmem:[%s7669_s0 + $0xc] ss:$20 sps:$4 sm:$0xff]  }
 0x189   : > { %4398 = vmatpush1.bf16.msra.mxu0 %v5665_v52  ;;  %4557 = vmatpush1.bf16.msra.mxu1 %v5667_v12  ;;  %v5778_v52 = vcombine.high %v7091_v31, %v7094_v33 }
 0x18a   : > { %4399 = vmatprep.subr.bf16.mxu0 %v5682_v53  ;;  %4558 = vmatprep.subr.bf16.mxu1 %v5684_v54 }
 0x18d   : > { %4400 = vmatpush1.bf16.msra.mxu0 %v5681_v59  ;;  %4559 = vmatpush1.bf16.msra.mxu1 %v5683_v21 }
 0x18e   : > { %4401 = vmatprep.subr.bf16.mxu0 %v5698_v60  ;;  %4560 = vmatprep.subr.bf16.mxu1 %v5700_v61 }
 0x191   : > { %4402 = vmatpush1.bf16.msra.mxu0 %v5697_v1  ;;  %4561 = vmatpush1.bf16.msra.mxu1 %v5699_v2  ;;  %v7132_v2 = vld [vmem:[%s6583_s7 + $0xa28] sm:$0xff] }
 0x192   : > { %4403 = vmatprep.subr.bf16.mxu0 %v5714_v32  ;;  %4562 = vmatprep.subr.bf16.mxu1 %v5716_v3  ;;  %v7135_v32 = vld [vmem:[%s6583_s7 + $0xa68] sm:$0xff] }
 0x193   : > { %v6384_v3 = vld [vmem:[%s7669_s0 + $0x28] ss:$20 sps:$4 sm:$0xff]  }
 0x195   : > { %4404 = vmatpush1.bf16.msra.mxu0 %v5713_v8  ;;  %4563 = vmatpush1.bf16.msra.mxu1 %v5715_v9 }
 0x196   : > { %4426 = vmatprep.subr.bf16.mxu0 %v5730_v10  ;;  %4585 = vmatprep.subr.bf16.mxu1 %v5732_v11  ;;  %v5779_v10 = vcombine.low %v7101_v37, %v7104_v40  ;;  %v5794_v11 = vcombine.high %v7125_v30, %v7128_v62 }
 0x198   : > { %4406 = vmatmul.mubr.bf16.vlgmr.msra.gmra.mrb[16].mxu0 %v6382_v23  ;;  %4565 = vmatmul.mubr.bf16.vlgmr.msra.gmra.mrb[16].mxu1 %v6382_v23 }
 0x199   : > { %4427 = vmatpush1.bf16.msra.mxu0 %v5729_v16  ;;  %4586 = vmatpush1.bf16.msra.mxu1 %v5731_v17  ;;  %v7157_v16 = vpop.permute.xlu1 %797  ;;  %v5796_v17 = vcombine.high %v7132_v2, %v7135_v32 }
 0x19a   : > { %4428 = vmatprep.subr.bf16.mxu0 %v5746_v18  ;;  %4587 = vmatprep.subr.bf16.mxu1 %v5748_v19  ;;  %v7162_v18 = vld [vmem:[%s6583_s7 + $0xaa8] sm:$0xff] }
 0x19b   : > { %v3877_v34 = vpop.f32.mrb[0].mxu0  ;;  %4415 = vmatprep.mubr.bf16.mxu0 %v6383_v41  ;;  %v4036_v43 = vpop.f32.mrb[0].mxu1  ;;  %4574 = vmatprep.mubr.bf16.mxu1 %v6383_v41  ;;  %v7165_v19 = vld [vmem:[%s6583_s7 + $0xae8] sm:$0xff] }
 0x19c   : > { %v6128_v42 = vadd.f32 %v3877_v34, %v7070_v13  ;;  %v3879_v44 = vpop.f32.mrb[1].mxu0  ;;  %v6136_v46 = vadd.f32 %v4036_v43, %v7070_v13  ;;  %v4038_v24 = vpop.f32.mrb[1].mxu1  ;;  %v5795_v34 = vcombine.low %v7132_v2, %v7135_v32  ;;  %v580_v2 = vld [vmem:[%s6583_s7 + $0xbe0] sm:$0xff] }
 0x19d   : > { %v6129_v47 = vadd.f32 %v3879_v44, %v7070_v13  ;;  %v3881_v48 = vpop.f32.mrb[2].mxu0  ;;  %4429 = vmatpush1.bf16.msra.mxu0 %v5745_v27  ;;  %v6137_v53 = vadd.f32 %v4038_v24, %v7070_v13  ;;  %v4040_v55 = vpop.f32.mrb[2].mxu1  ;;  %4588 = vmatpush1.bf16.msra.mxu1 %v5747_v28  ;;  %v5793_v27 = vcombine.low %v7125_v30, %v7128_v62 }
 0x19e   : > { %v5009_v12 = vmax.f32 %v6128_v42, 0.0  ;;  %v6130_v54 = vadd.f32 %v3881_v48, %v7087_v5  ;;  %v3883_v56 = vpop.f32.mrb[3].mxu0  ;;  %4430 = vmatprep.subr.bf16.mxu0 %v5762_v29  ;;  %v5011_v57 = vmax.f32 %v6136_v46, 0.0  ;;  %v6138_v21 = vadd.f32 %v4040_v55, %v7087_v5  ;;  %v4042_v61 = vpop.f32.mrb[3].mxu1  ;;  %4589 = vmatprep.subr.bf16.mxu1 %v5764_v35  ;;  %v557_v55 = vld [vmem:[%s6583_s7 + $0xb28] sm:$0xff] }
 0x19f   : > { %v5010_v59 = vmax.f32 %v6129_v47, 0.0  ;;  %v6131_v60 = vadd.f32 %v3883_v56, %v7087_v5  ;;  %v5012_v63 = vmax.f32 %v6137_v53, 0.0  ;;  %v6139_v1 = vadd.f32 %v4042_v61, %v7087_v5  ;;  %v565_v56 = vld [vmem:[%s6583_s7 + $0xb68] sm:$0xff] }
 0x1a0   : > { %v5025_v0 = vmax.f32 %v6130_v54, 0.0  ;;  %4416 = vmatmul.mubr.bf16.gmra.mrb[20].mxu0 %v6384_v3  ;;  %v5027_v4 = vmax.f32 %v6138_v21, 0.0  ;;  %4575 = vmatmul.mubr.bf16.gmra.mrb[20].mxu1 %v6384_v3  ;;  %v5810_v35 = vcombine.high %v7147_v51, %v7150_v39  ;;  %v5812_v44 = vcombine.high %v7162_v18, %v7165_v19  ;;  %v573_v3 = vld [vmem:[%s6583_s7 + $0xba8] sm:$0xff] }
 0x1a1   : > { %v6095_v38 = vpack.c.bf16 %v5010_v59, %v5009_v12  ;;  %v5026_v6 = vmax.f32 %v6131_v60, 0.0  ;;  %4431 = vmatpush1.bf16.msra.mxu0 %v5761_v45  ;;  %v6096_v8 = vpack.c.bf16 %v5012_v63, %v5011_v57  ;;  %v5028_v9 = vmax.f32 %v6139_v1, 0.0  ;;  %4590 = vmatpush1.bf16.msra.mxu1 %v5763_v49  ;;  %v556_v49 = vld [vmem:[%s6583_s7 + $0xb20] sm:$0xff] }
 0x1a2   : > { %4432 = vmatprep.subr.bf16.mxu0 %v5778_v52  ;;  %4591 = vmatprep.subr.bf16.mxu1 %v5780_v58  ;;  %v564_v52 = vld [vmem:[%s6583_s7 + $0xb60] sm:$0xff]  ;;  %v5809_v21 = vcombine.low %v7147_v51, %v7150_v39  ;;  %v5811_v30 = vcombine.low %v7162_v18, %v7165_v19  ;;  %v597_v51 = vld [vmem:[%s6583_s7 + $0xc68] sm:$0xff] }
 0x1a3   : > { %5265 = vst [vmem:[%s7154_s6] sm:$0xff] %v6095_v38  ;;  %v6103_v14 = vpack.c.bf16 %v5026_v6, %v5025_v0  ;;  %v3887_v15 = vpop.f32.mrb[4].mxu0  ;;  %4458 = vmatprep.mubr.bf16.mxu0 %v6385_v20  ;;  %5266 = vst [vmem:[%s7154_s6 + $0x8] sm:$0xff] %v6096_v8  ;;  %v6104_v22 = vpack.c.bf16 %v5028_v9, %v5027_v4  ;;  %v4046_v25 = vpop.f32.mrb[4].mxu1  ;;  %4617 = vmatprep.mubr.bf16.mxu1 %v6385_v20  ;;  %v572_v1 = vld [vmem:[%s6583_s7 + $0xba0] sm:$0xff]  ;;  %v581_v38 = vld [vmem:[%s6583_s7 + $0xbe8] sm:$0xff] }
 0x1a4   : > { %v6132_v23 = vadd.f32 %v3887_v15, %v7098_v36  ;;  %v3889_v26 = vpop.f32.mrb[5].mxu0  ;;  %v6140_v28 = vadd.f32 %v4046_v25, %v7098_v36  ;;  %v4048_v31 = vpop.f32.mrb[5].mxu1  ;;  %v5826_v62 = vcombine.high %v556_v49, %v564_v52  ;;  %v5828_v0 = vcombine.high %v557_v55, %v565_v56  ;;  %v588_v9 = vld [vmem:[%s6583_s7 + $0xc20] sm:$0xff]  ;;  %v605_v20 = vld [vmem:[%s6583_s7 + $0xca8] sm:$0xff] }
 0x1a5   : > { %5273 = vst [vmem:[%s7154_s6 + $0x40] sm:$0xff] %v6103_v14  ;;  %v6133_v29 = vadd.f32 %v3889_v26, %v7098_v36  ;;  %v3891_v33 = vpop.f32.mrb[6].mxu0  ;;  %4433 = vmatpush1.bf16.msra.mxu0 %v5777_v7  ;;  %5274 = vst [vmem:[%s7154_s6 + $0x48] sm:$0xff] %v6104_v22  ;;  %v6141_v40 = vadd.f32 %v4048_v31, %v7098_v36  ;;  %v4050_v42 = vpop.f32.mrb[6].mxu1  ;;  %4592 = vmatpush1.bf16.msra.mxu1 %v5779_v10  ;;  %v596_v10 = vld [vmem:[%s6583_s7 + $0xc60] sm:$0xff]  ;;  %v613_v22 = vld [vmem:[%s6583_s7 + $0xce8] sm:$0xff] }
 0x1a6   : > { %v5041_v37 = vmax.f32 %v6132_v23, 0.0  ;;  %v6134_v41 = vadd.f32 %v3891_v33, %v7157_v16  ;;  %v3893_v43 = vpop.f32.mrb[7].mxu0  ;;  %4434 = vmatprep.subr.bf16.mxu0 %v5794_v11  ;;  %v5043_v45 = vmax.f32 %v6140_v28, 0.0  ;;  %v6142_v47 = vadd.f32 %v4050_v42, %v7157_v16  ;;  %v4052_v48 = vpop.f32.mrb[7].mxu1  ;;  %4593 = vmatprep.subr.bf16.mxu1 %v5796_v17  ;;  %v589_v11 = vld [vmem:[%s6583_s7 + $0xc28] sm:$0xff]  ;;  %v604_v18 = vld [vmem:[%s6583_s7 + $0xca0] sm:$0xff] }
 0x1a7   : > { %v5042_v46 = vmax.f32 %v6133_v29, 0.0  ;;  %v6135_v24 = vadd.f32 %v3893_v43, %v7157_v16  ;;  %v5044_v12 = vmax.f32 %v6141_v40, 0.0  ;;  %v6143_v54 = vadd.f32 %v4052_v48, %v7157_v16  ;;  %v612_v19 = vld [vmem:[%s6583_s7 + $0xce0] sm:$0xff]  ;;  %v621_v31 = vld [vmem:[%s6583_s7 + $0xd28] sm:$0xff] }
 0x1a8   : > { %v5057_v53 = vmax.f32 %v6134_v41, 0.0  ;;  %v5059_v57 = vmax.f32 %v6142_v47, 0.0  ;;  %v5825_v4 = vcombine.low %v556_v49, %v564_v52  ;;  %v5827_v6 = vcombine.low %v557_v55, %v565_v56  ;;  %v620_v28 = vld [vmem:[%s6583_s7 + $0xd20] sm:$0xff]  ;;  %v629_v33 = vld [vmem:[%s6583_s7 + $0xd68] sm:$0xff] }
 0x1a9   : > { %v6111_v58 = vpack.c.bf16 %v5042_v46, %v5041_v37  ;;  %v5058_v59 = vmax.f32 %v6135_v24, 0.0  ;;  %4435 = vmatpush1.bf16.msra.mxu0 %v5793_v27  ;;  %v6112_v60 = vpack.c.bf16 %v5044_v12, %v5043_v45  ;;  %v5060_v61 = vmax.f32 %v6143_v54, 0.0  ;;  %4594 = vmatpush1.bf16.msra.mxu1 %v5795_v34  ;;  %v628_v29 = vld [vmem:[%s6583_s7 + $0xd60] sm:$0xff]  ;;  %v637_v43 = vld [vmem:[%s6583_s7 + $0xda8] sm:$0xff] }
 0x1aa   : > { %4436 = vmatprep.subr.bf16.mxu0 %v5810_v35  ;;  %4595 = vmatprep.subr.bf16.mxu1 %v5812_v44  ;;  %v5842_v7 = vcombine.high %v572_v1, %v580_v2  ;;  %v5844_v8 = vcombine.high %v573_v3, %v581_v38  ;;  %v5841_v39 = vcombine.low %v572_v1, %v580_v2  ;;  %v636_v41 = vld [vmem:[%s6583_s7 + $0xda0] sm:$0xff]  ;;  %v645_v44 = vld [vmem:[%s6583_s7 + $0xde8] sm:$0xff] }
 0x1ab   : > { %5281 = vst [vmem:[%s7154_s6 + $0x80] sm:$0xff] %v6111_v58  ;;  %v6119_v63 = vpack.c.bf16 %v5058_v59, %v5057_v53  ;;  %5282 = vst [vmem:[%s7154_s6 + $0x88] sm:$0xff] %v6112_v60  ;;  %v6120_v32 = vpack.c.bf16 %v5060_v61, %v5059_v57  ;;  %v5843_v14 = vcombine.low %v573_v3, %v581_v38  ;;  %v644_v42 = vld [vmem:[%s6583_s7 + $0xde0] sm:$0xff]  ;;  %v653_v52 = vld [vmem:[%s6583_s7 + $0xe28] sm:$0xff] }
 0x1ac   : > { %v5858_v15 = vcombine.high %v588_v9, %v596_v10  ;;  %v5860_v17 = vcombine.high %v589_v11, %v597_v51  ;;  %v5857_v23 = vcombine.low %v588_v9, %v596_v10  ;;  %v5859_v25 = vcombine.low %v589_v11, %v597_v51  ;;  %v652_v48 = vld [vmem:[%s6583_s7 + $0xe20] sm:$0xff]  ;;  %v661_v12 = vld [vmem:[%s6583_s7 + $0xe68] sm:$0xff] }
 0x1ad   : > { %5289 = vst [vmem:[%s7154_s6 + $0xc0] sm:$0xff] %v6119_v63  ;;  %4437 = vmatpush1.bf16.msra.mxu0 %v5809_v21  ;;  %5290 = vst [vmem:[%s7154_s6 + $0xc8] sm:$0xff] %v6120_v32  ;;  %4596 = vmatpush1.bf16.msra.mxu1 %v5811_v30  ;;  %v5874_v26 = vcombine.high %v604_v18, %v612_v19  ;;  %v5876_v27 = vcombine.high %v605_v20, %v613_v22  ;;  %v660_v49 = vld [vmem:[%s6583_s7 + $0xe60] sm:$0xff]  ;;  %v669_v59 = vld [vmem:[%s6583_s7 + $0xea8] sm:$0xff] }
 0x1ae   : > { %4438 = vmatprep.subr.bf16.mxu0 %v5826_v62  ;;  %4597 = vmatprep.subr.bf16.mxu1 %v5828_v0  ;;  %v5873_v34 = vcombine.low %v604_v18, %v612_v19  ;;  %v5875_v35 = vcombine.low %v605_v20, %v613_v22  ;;  %v5890_v37 = vcombine.high %v620_v28, %v628_v29  ;;  %v668_v58 = vld [vmem:[%s6583_s7 + $0xea0] sm:$0xff]  ;;  %v677_v21 = vld [vmem:[%s6583_s7 + $0xee8] sm:$0xff] }
 0x1af   : > { %v5892_v40 = vcombine.high %v621_v31, %v629_v33  ;;  %v5889_v45 = vcombine.low %v620_v28, %v628_v29  ;;  %v5891_v46 = vcombine.low %v621_v31, %v629_v33  ;;  %v5906_v47 = vcombine.high %v636_v41, %v644_v42  ;;  %v676_v57 = vld [vmem:[%s6583_s7 + $0xee0] sm:$0xff]  ;;  %v685_v1 = vld [vmem:[%s6583_s7 + $0xf28] sm:$0xff] }
 0x1b0   : > { %v5908_v24 = vcombine.high %v637_v43, %v645_v44  ;;  %v5905_v53 = vcombine.low %v636_v41, %v644_v42  ;;  %v5907_v54 = vcombine.low %v637_v43, %v645_v44  ;;  %v5922_v55 = vcombine.high %v652_v48, %v660_v49  ;;  %v684_v63 = vld [vmem:[%s6583_s7 + $0xf20] sm:$0xff]  ;;  %v693_v2 = vld [vmem:[%s6583_s7 + $0xf68] sm:$0xff] }
 0x1b1   : > { %4439 = vmatpush1.bf16.msra.mxu0 %v5825_v4  ;;  %4598 = vmatpush1.bf16.msra.mxu1 %v5827_v6  ;;  %v5924_v56 = vcombine.high %v653_v52, %v661_v12  ;;  %v5921_v60 = vcombine.low %v652_v48, %v660_v49  ;;  %v5923_v61 = vcombine.low %v653_v52, %v661_v12  ;;  %v692_v0 = vld [vmem:[%s6583_s7 + $0xf60] sm:$0xff]  ;;  %v709_v9 = vld [vmem:[%s6583_s7 + $0xfe8] sm:$0xff] }
 0x1b2   : > { %4440 = vmatprep.subr.bf16.mxu0 %v5842_v7  ;;  %4599 = vmatprep.subr.bf16.mxu1 %v5844_v8  ;;  %v5938_v30 = vcombine.high %v668_v58, %v676_v57  ;;  %v5940_v62 = vcombine.high %v669_v59, %v677_v21  ;;  %v5937_v32 = vcombine.low %v668_v58, %v676_v57  ;;  %v700_v6 = vld [vmem:[%s6583_s7 + $0xfa0] sm:$0xff]  ;;  %v701_v8 = vld [vmem:[%s6583_s7 + $0xfa8] sm:$0xff]  ;;  %v214_v58 = vld [vmem:[%s6583_s7 + $0x70] sm:$0xff] }
 0x1b3   : > { %v5939_v3 = vcombine.low %v669_v59, %v677_v21  ;;  %v5954_v38 = vcombine.high %v684_v63, %v692_v0  ;;  %v5956_v4 = vcombine.high %v685_v1, %v693_v2  ;;  %v708_v7 = vld [vmem:[%s6583_s7 + $0xfe0] sm:$0xff]  ;;  %v5953_v10 = vcombine.low %v684_v63, %v692_v0  ;;  %v725_v18 = vld [vmem:[%s6583_s7 + $0x1068] sm:$0xff]  ;;  %v207_v59 = vld [vmem:[%s6583_s7 + $0x38] sm:$0xff] }
 0x1b4   : > { %v5955_v11 = vcombine.low %v685_v1, %v693_v2  ;;  %v5970_v51 = vcombine.high %v700_v6, %v708_v7  ;;  %v5969_v19 = vcombine.low %v700_v6, %v708_v7  ;;  %v5971_v20 = vcombine.low %v701_v8, %v709_v9  ;;  %v741_v28 = vld [vmem:[%s6583_s7 + $0x10e8] sm:$0xff]  ;;  %v772_v48 = vld [vmem:[%s6583_s7 + $0x11e0] sm:$0xff]  ;;  %v215_v21 = vld [vmem:[%s6583_s7 + $0x78] sm:$0xff] }
 0x1b5   : > { %4441 = vmatpush1.bf16.msra.mxu0 %v5841_v39  ;;  %4600 = vmatpush1.bf16.msra.mxu1 %v5843_v14  ;;  %v5972_v39 = vcombine.high %v701_v8, %v709_v9  ;;  %v716_v14 = vld [vmem:[%s6583_s7 + $0x1020] sm:$0xff]  ;;  %v749_v41 = vld [vmem:[%s6583_s7 + $0x1128] sm:$0xff]  ;;  %v222_v63 = vld [vmem:[%s6583_s7 + $0xb0] sm:$0xff] }
 0x1b6   : > { %4442 = vmatprep.subr.bf16.mxu0 %v5858_v15  ;;  %4601 = vmatprep.subr.bf16.mxu1 %v5860_v17  ;;  %v724_v15 = vld [vmem:[%s6583_s7 + $0x1060] sm:$0xff]  ;;  %v717_v17 = vld [vmem:[%s6583_s7 + $0x1028] sm:$0xff]  ;;  %v230_v0 = vld [vmem:[%s6583_s7 + $0xf0] sm:$0xff] }
 0x1b7   : > { %v5986_v22 = vcombine.high %v716_v14, %v724_v15  ;;  %v5985_v29 = vcombine.low %v716_v14, %v724_v15  ;;  %v5987_v31 = vcombine.low %v717_v17, %v725_v18  ;;  %v757_v42 = vld [vmem:[%s6583_s7 + $0x1168] sm:$0xff]  ;;  %v6388_v57 = vld [vmem:[%s7669_s0 + $0x30] ss:$20 sps:$4 sm:$0xff]   ;;  %v223_v1 = vld [vmem:[%s6583_s7 + $0xb8] sm:$0xff] }
 0x1b8   : > { %v765_v49 = vld [vmem:[%s6583_s7 + $0x11a8] sm:$0xff]  ;;  %v231_v2 = vld [vmem:[%s6583_s7 + $0xf8] sm:$0xff]  ;;  %v238_v6 = vld [vmem:[%s6583_s7 + $0x130] sm:$0xff] }
 0x1b9   : > { %4443 = vmatpush1.bf16.msra.mxu0 %v5857_v23  ;;  %4602 = vmatpush1.bf16.msra.mxu1 %v5859_v25  ;;  %v5988_v23 = vcombine.high %v717_v17, %v725_v18  ;;  %v732_v25 = vld [vmem:[%s6583_s7 + $0x10a0] sm:$0xff]  ;;  %v773_v52 = vld [vmem:[%s6583_s7 + $0x11e8] sm:$0xff]  ;;  %v246_v7 = vld [vmem:[%s6583_s7 + $0x170] sm:$0xff] }
 0x1ba   : > { %4444 = vmatprep.subr.bf16.mxu0 %v5874_v26  ;;  %4603 = vmatprep.subr.bf16.mxu1 %v5876_v27  ;;  %v740_v26 = vld [vmem:[%s6583_s7 + $0x10e0] sm:$0xff]  ;;  %v733_v27 = vld [vmem:[%s6583_s7 + $0x10a8] sm:$0xff]  ;;  %v239_v9 = vld [vmem:[%s6583_s7 + $0x138] sm:$0xff] }
 0x1bb   : > { %v6002_v33 = vcombine.high %v732_v25, %v740_v26  ;;  %v6001_v43 = vcombine.low %v732_v25, %v740_v26  ;;  %v6003_v44 = vcombine.low %v733_v27, %v741_v28  ;;  %v7277_v8 = vld [vmem:[%s7669_s0 + $0x10] ss:$20 sps:$4 sm:$0xff]   ;;  %v255_v18 = vld [vmem:[%s6583_s7 + $0x1b8] sm:$0xff] }
 0x1bc   : > { %v254_v15 = vld [vmem:[%s6583_s7 + $0x1b0] sm:$0xff] }
 0x1bd   : > { %4445 = vmatpush1.bf16.msra.mxu0 %v5873_v34  ;;  %4604 = vmatpush1.bf16.msra.mxu1 %v5875_v35  ;;  %v6004_v34 = vcombine.high %v733_v27, %v741_v28  ;;  %v748_v35 = vld [vmem:[%s6583_s7 + $0x1120] sm:$0xff]  ;;  %v262_v17 = vld [vmem:[%s6583_s7 + $0x1f0] sm:$0xff]  ;;  %v7296_v28 = vld [vmem:[%s7669_s0 + $0x38] ss:$20 sps:$4 sm:$0xff]  }
 0x1be   : > { %4446 = vmatprep.subr.bf16.mxu0 %v5890_v37  ;;  %4605 = vmatprep.subr.bf16.mxu1 %v5892_v40  ;;  %v756_v37 = vld [vmem:[%s6583_s7 + $0x1160] sm:$0xff]  ;;  %v6386_v40 = vld [vmem:[%s7669_s0 + $0x8] ss:$20 sps:$4 sm:$0xff]   ;;  %v270_v26 = vld [vmem:[%s6583_s7 + $0x230] sm:$0xff] }
 0x1bf   : > { %v6017_v12 = vcombine.low %v748_v35, %v756_v37  ;;  %v278_v27 = vld [vmem:[%s6583_s7 + $0x270] sm:$0xff] }
 0x1c1   : > { %4447 = vmatpush1.bf16.msra.mxu0 %v5889_v45  ;;  %4606 = vmatpush1.bf16.msra.mxu1 %v5891_v46  ;;  %v6018_v45 = vcombine.high %v748_v35, %v756_v37  ;;  %v6387_v46 = vld [vmem:[%s7669_s0 + $0x34] ss:$20 sps:$4 sm:$0xff]   ;;  %v5542_v35 = vcombine.high %v270_v26, %v278_v27 }
 0x1c2   : > { %4448 = vmatprep.subr.bf16.mxu0 %v5906_v47  ;;  %4607 = vmatprep.subr.bf16.mxu1 %v5908_v24  ;;  %v6020_v47 = vcombine.high %v749_v41, %v757_v42  ;;  %v764_v24 = vld [vmem:[%s6583_s7 + $0x11a0] sm:$0xff] }
 0x1c5   : > { %4449 = vmatpush1.bf16.msra.mxu0 %v5905_v53  ;;  %4608 = vmatpush1.bf16.msra.mxu1 %v5907_v54  ;;  %v6019_v53 = vcombine.low %v749_v41, %v757_v42  ;;  %v6034_v54 = vcombine.high %v764_v24, %v772_v48  ;;  %v294_v41 = vld [vmem:[%s6583_s7 + $0x2f0] sm:$0xff]  ;;  %v6391_v42 = vld [vmem:[%s7669_s0 + $0x4] ss:$20 sps:$4 sm:$0xff]  }
 0x1c6   : > { %4450 = vmatprep.subr.bf16.mxu0 %v5922_v55  ;;  %4609 = vmatprep.subr.bf16.mxu1 %v5924_v56  ;;  %v6036_v55 = vcombine.high %v765_v49, %v773_v52  ;;  %v206_v56 = vld [vmem:[%s6583_s7 + $0x30] sm:$0xff] }
 0x1c9   : > { %4451 = vmatpush1.bf16.msra.mxu0 %v5921_v60  ;;  %4610 = vmatpush1.bf16.msra.mxu1 %v5923_v61  ;;  %v6033_v60 = vcombine.low %v764_v24, %v772_v48  ;;  %v6035_v61 = vcombine.low %v765_v49, %v773_v52  ;;  %v302_v48 = vld [vmem:[%s6583_s7 + $0x330] sm:$0xff]  ;;  %v303_v52 = vld [vmem:[%s6583_s7 + $0x338] sm:$0xff] }
 0x1ca   : > { %4452 = vmatprep.subr.bf16.mxu0 %v5938_v30  ;;  %4611 = vmatprep.subr.bf16.mxu1 %v5940_v62  ;;  %v5478_v30 = vcombine.high %v206_v56, %v214_v58  ;;  %v5480_v62 = vcombine.high %v207_v59, %v215_v21  ;;  %v310_v49 = vld [vmem:[%s6583_s7 + $0x370] sm:$0xff] }
 0x1cd   : > { %4453 = vmatpush1.bf16.msra.mxu0 %v5937_v32  ;;  %4612 = vmatpush1.bf16.msra.mxu1 %v5939_v3  ;;  %v5477_v32 = vcombine.low %v206_v56, %v214_v58  ;;  %v5479_v3 = vcombine.low %v207_v59, %v215_v21  ;;  %v318_v58 = vld [vmem:[%s6583_s7 + $0x3b0] sm:$0xff]  ;;  %v319_v59 = vld [vmem:[%s6583_s7 + $0x3b8] sm:$0xff] }
 0x1ce   : > { %4454 = vmatprep.subr.bf16.mxu0 %v5954_v38  ;;  %4613 = vmatprep.subr.bf16.mxu1 %v5956_v4  ;;  %v5494_v38 = vcombine.high %v222_v63, %v230_v0  ;;  %v5496_v4 = vcombine.high %v223_v1, %v231_v2  ;;  %v327_v21 = vld [vmem:[%s6583_s7 + $0x3f8] sm:$0xff] }
 0x1d1   : > { %4455 = vmatpush1.bf16.msra.mxu0 %v5953_v10  ;;  %4614 = vmatpush1.bf16.msra.mxu1 %v5955_v11  ;;  %v247_v10 = vld [vmem:[%s6583_s7 + $0x178] sm:$0xff]  ;;  %v5493_v11 = vcombine.low %v222_v63, %v230_v0  ;;  %v334_v63 = vld [vmem:[%s6583_s7 + $0x430] sm:$0xff] }
 0x1d2   : > { %4456 = vmatprep.subr.bf16.mxu0 %v5970_v51  ;;  %4615 = vmatprep.subr.bf16.mxu1 %v5972_v39  ;;  %v5495_v51 = vcombine.low %v223_v1, %v231_v2  ;;  %v5510_v39 = vcombine.high %v238_v6, %v246_v7  ;;  %v5512_v14 = vcombine.high %v239_v9, %v247_v10  ;;  %v342_v0 = vld [vmem:[%s6583_s7 + $0x470] sm:$0xff]  ;;  %v335_v1 = vld [vmem:[%s6583_s7 + $0x438] sm:$0xff] }
 0x1d3   : > { %v343_v2 = vld [vmem:[%s6583_s7 + $0x478] sm:$0xff] }
 0x1d5   : > { %4457 = vmatpush1.bf16.msra.mxu0 %v5969_v19  ;;  %4616 = vmatpush1.bf16.msra.mxu1 %v5971_v20  ;;  %v263_v19 = vld [vmem:[%s6583_s7 + $0x1f8] sm:$0xff]  ;;  %v5509_v20 = vcombine.low %v238_v6, %v246_v7  ;;  %v350_v6 = vld [vmem:[%s6583_s7 + $0x4b0] sm:$0xff] }
 0x1d6   : > { %4479 = vmatprep.subr.bf16.mxu0 %v5986_v22  ;;  %4638 = vmatprep.subr.bf16.mxu1 %v5988_v23  ;;  %v5511_v22 = vcombine.low %v239_v9, %v247_v10  ;;  %v5526_v23 = vcombine.high %v254_v15, %v262_v17  ;;  %v5528_v25 = vcombine.high %v255_v18, %v263_v19  ;;  %v358_v7 = vld [vmem:[%s6583_s7 + $0x4f0] sm:$0xff]  ;;  %v351_v9 = vld [vmem:[%s6583_s7 + $0x4b8] sm:$0xff] }
 0x1d7   : > { %v359_v10 = vld [vmem:[%s6583_s7 + $0x4f8] sm:$0xff] }
 0x1d8   : > { %4459 = vmatmul.mubr.bf16.vlgmr.msra.gmra.mrb[16].mxu0 %v6386_v40  ;;  %4618 = vmatmul.mubr.bf16.vlgmr.msra.gmra.mrb[16].mxu1 %v6386_v40  ;;  %v286_v40 = vld [vmem:[%s6583_s7 + $0x2b0] sm:$0xff] }
 0x1d9   : > { %4480 = vmatpush1.bf16.msra.mxu0 %v5985_v29  ;;  %4639 = vmatpush1.bf16.msra.mxu1 %v5987_v31  ;;  %v271_v29 = vld [vmem:[%s6583_s7 + $0x238] sm:$0xff] }
 0x1da   : > { %4481 = vmatprep.subr.bf16.mxu0 %v6002_v33  ;;  %4640 = vmatprep.subr.bf16.mxu1 %v6004_v34  ;;  %v279_v31 = vld [vmem:[%s6583_s7 + $0x278] sm:$0xff]  ;;  %v5525_v33 = vcombine.low %v254_v15, %v262_v17  ;;  %v5527_v34 = vcombine.low %v255_v18, %v263_v19  ;;  %v366_v15 = vld [vmem:[%s6583_s7 + $0x530] sm:$0xff] }
 0x1db   : > { %4468 = vmatprep.mubr.bf16.mxu0 %v6387_v46  ;;  %4627 = vmatprep.mubr.bf16.mxu1 %v6387_v46  ;;  %v5544_v37 = vcombine.high %v271_v29, %v279_v31  ;;  %v5543_v46 = vcombine.low %v271_v29, %v279_v31  ;;  %v374_v17 = vld [vmem:[%s6583_s7 + $0x570] sm:$0xff]  ;;  %v367_v18 = vld [vmem:[%s6583_s7 + $0x538] sm:$0xff] }
 0x1dc   : > { %v375_v19 = vld [vmem:[%s6583_s7 + $0x578] sm:$0xff] }
 0x1dd   : > { %4482 = vmatpush1.bf16.msra.mxu0 %v6001_v43  ;;  %4641 = vmatpush1.bf16.msra.mxu1 %v6003_v44  ;;  %v287_v43 = vld [vmem:[%s6583_s7 + $0x2b8] sm:$0xff] }
 0x1de   : > { %4483 = vmatprep.subr.bf16.mxu0 %v6018_v45  ;;  %4642 = vmatprep.subr.bf16.mxu1 %v6020_v47  ;;  %v295_v44 = vld [vmem:[%s6583_s7 + $0x2f8] sm:$0xff]  ;;  %v5541_v45 = vcombine.low %v270_v26, %v278_v27  ;;  %v5558_v47 = vcombine.high %v286_v40, %v294_v41  ;;  %v382_v26 = vld [vmem:[%s6583_s7 + $0x5b0] sm:$0xff] }
 0x1df   : > { %v5560_v24 = vcombine.high %v287_v43, %v295_v44  ;;  %v390_v27 = vld [vmem:[%s6583_s7 + $0x5f0] sm:$0xff]  ;;  %v383_v29 = vld [vmem:[%s6583_s7 + $0x5b8] sm:$0xff] }
 0x1e0   : > { %4469 = vmatmul.mubr.bf16.gmra.mrb[20].mxu0 %v6388_v57  ;;  %4628 = vmatmul.mubr.bf16.gmra.mrb[20].mxu1 %v6388_v57  ;;  %v326_v57 = vld [vmem:[%s6583_s7 + $0x3f0] sm:$0xff]  ;;  %v391_v31 = vld [vmem:[%s6583_s7 + $0x5f8] sm:$0xff] }
 0x1e1   : > { %4484 = vmatpush1.bf16.msra.mxu0 %v6017_v12  ;;  %4643 = vmatpush1.bf16.msra.mxu1 %v6019_v53  ;;  %v311_v12 = vld [vmem:[%s6583_s7 + $0x378] sm:$0xff]  ;;  %v5557_v53 = vcombine.low %v286_v40, %v294_v41  ;;  %v398_v40 = vld [vmem:[%s6583_s7 + $0x630] sm:$0xff] }
 0x1e2   : > { %4485 = vmatprep.subr.bf16.mxu0 %v6034_v54  ;;  %4644 = vmatprep.subr.bf16.mxu1 %v6036_v55  ;;  %v5559_v54 = vcombine.low %v287_v43, %v295_v44  ;;  %v5574_v55 = vcombine.high %v302_v48, %v310_v49  ;;  %v5576_v56 = vcombine.high %v303_v52, %v311_v12  ;;  %v406_v41 = vld [vmem:[%s6583_s7 + $0x670] sm:$0xff]  ;;  %v407_v43 = vld [vmem:[%s6583_s7 + $0x678] sm:$0xff] }
 0x1e3   : > { %4511 = vmatprep.mubr.bf16.mxu0 %v6469_v50  ;;  %4670 = vmatprep.mubr.bf16.mxu1 %v6469_v50  ;;  %v5653_v44 = vcombine.low %v382_v26, %v390_v27 }
 0x1e5   : > { %4486 = vmatpush1.bf16.msra.mxu0 %v6033_v60  ;;  %4645 = vmatpush1.bf16.msra.mxu1 %v6035_v61  ;;  %v5573_v60 = vcombine.low %v302_v48, %v310_v49  ;;  %v5575_v61 = vcombine.low %v303_v52, %v311_v12  ;;  %v422_v48 = vld [vmem:[%s6583_s7 + $0x6f0] sm:$0xff]  ;;  %v415_v49 = vld [vmem:[%s6583_s7 + $0x6b8] sm:$0xff]  ;;  %v5669_v12 = vcombine.low %v398_v40, %v406_v41 }
 0x1e6   : > { %4691 = vmatprep.subr.bf16.mxu0 %v5478_v30  ;;  %4850 = vmatprep.subr.bf16.mxu1 %v5480_v62  ;;  %v5590_v30 = vcombine.high %v318_v58, %v326_v57  ;;  %v5592_v62 = vcombine.high %v319_v59, %v327_v21  ;;  %v423_v52 = vld [vmem:[%s6583_s7 + $0x6f8] sm:$0xff] }
 0x1e8   : > { %6049 = vmatmul.mubr.msk.bf16.vlgmr.msra.gmra.mrb[16].mxu0 %vm3730_vm0, %v7277_v8  ;;  %6051 = vmatmul.mubr.msk.bf16.vlgmr.msra.gmra.mrb[16].mxu1 %vm3730_vm0, %v7277_v8 }
 0x1e9   : > { %4692 = vmatpush1.bf16.msra.mxu0 %v5477_v32  ;;  %4851 = vmatpush1.bf16.msra.mxu1 %v5479_v3  ;;  %v5589_v32 = vcombine.low %v318_v58, %v326_v57  ;;  %v5591_v3 = vcombine.low %v319_v59, %v327_v21  ;;  %v438_v58 = vld [vmem:[%s6583_s7 + $0x770] sm:$0xff]  ;;  %v431_v57 = vld [vmem:[%s6583_s7 + $0x738] sm:$0xff] }
 0x1ea   : > { %4693 = vmatprep.subr.bf16.mxu0 %v5494_v38  ;;  %4852 = vmatprep.subr.bf16.mxu1 %v5496_v4  ;;  %v5606_v38 = vcombine.high %v334_v63, %v342_v0  ;;  %v5608_v4 = vcombine.high %v335_v1, %v343_v2  ;;  %v439_v59 = vld [vmem:[%s6583_s7 + $0x778] sm:$0xff] }
 0x1eb   : > { %4521 = vmatprep.mubr.bf16.mxu0 %v6469_v50  ;;  %4680 = vmatprep.mubr.bf16.mxu1 %v6469_v50 }
 0x1ed   : > { %4694 = vmatpush1.bf16.msra.mxu0 %v5493_v11  ;;  %4853 = vmatpush1.bf16.msra.mxu1 %v5495_v51  ;;  %v5605_v11 = vcombine.low %v334_v63, %v342_v0  ;;  %v5607_v51 = vcombine.low %v335_v1, %v343_v2  ;;  %v454_v63 = vld [vmem:[%s6583_s7 + $0x7f0] sm:$0xff]  ;;  %v447_v0 = vld [vmem:[%s6583_s7 + $0x7b8] sm:$0xff] }
 0x1ee   : > { %4695 = vmatprep.subr.bf16.mxu0 %v5510_v39  ;;  %4854 = vmatprep.subr.bf16.mxu1 %v5512_v14  ;;  %v5622_v39 = vcombine.high %v350_v6, %v358_v7  ;;  %v5624_v14 = vcombine.high %v351_v9, %v359_v10  ;;  %v455_v1 = vld [vmem:[%s6583_s7 + $0x7f8] sm:$0xff] }
 0x1f0   : > { %6050 = vmatmul.mubr.msk.bf16.gmra.mrb[20].mxu0 %vm3730_vm0, %v7296_v28  ;;  %6052 = vmatmul.mubr.msk.bf16.gmra.mrb[20].mxu1 %vm3730_vm0, %v7296_v28 }
 0x1f1   : > { %4696 = vmatpush1.bf16.msra.mxu0 %v5509_v20  ;;  %4855 = vmatpush1.bf16.msra.mxu1 %v5511_v22  ;;  %v5621_v20 = vcombine.low %v350_v6, %v358_v7  ;;  %v5623_v22 = vcombine.low %v351_v9, %v359_v10  ;;  %v470_v6 = vld [vmem:[%s6583_s7 + $0x870] sm:$0xff]  ;;  %v463_v7 = vld [vmem:[%s6583_s7 + $0x838] sm:$0xff] }
 0x1f2   : > { %4697 = vmatprep.subr.bf16.mxu0 %v5526_v23  ;;  %4856 = vmatprep.subr.bf16.mxu1 %v5528_v25  ;;  %v5638_v23 = vcombine.high %v366_v15, %v374_v17  ;;  %v5640_v25 = vcombine.high %v367_v18, %v375_v19  ;;  %v471_v9 = vld [vmem:[%s6583_s7 + $0x878] sm:$0xff] }
 0x1f3   : > { %4723 = vmatprep.mubr.bf16.mxu0 %v6391_v42  ;;  %4882 = vmatprep.mubr.bf16.mxu1 %v6391_v42  ;;  %v399_v42 = vld [vmem:[%s6583_s7 + $0x638] sm:$0xff] }
 0x1f5   : > { %4698 = vmatpush1.bf16.msra.mxu0 %v5525_v33  ;;  %4857 = vmatpush1.bf16.msra.mxu1 %v5527_v34  ;;  %v5637_v33 = vcombine.low %v366_v15, %v374_v17  ;;  %v5639_v34 = vcombine.low %v367_v18, %v375_v19  ;;  %v486_v15 = vld [vmem:[%s6583_s7 + $0x8f0] sm:$0xff]  ;;  %v479_v17 = vld [vmem:[%s6583_s7 + $0x8b8] sm:$0xff] }
 0x1f6   : > { %4699 = vmatprep.subr.bf16.mxu0 %v5542_v35  ;;  %4858 = vmatprep.subr.bf16.mxu1 %v5544_v37  ;;  %v5654_v35 = vcombine.high %v382_v26, %v390_v27  ;;  %v5656_v37 = vcombine.high %v383_v29, %v391_v31  ;;  %v487_v18 = vld [vmem:[%s6583_s7 + $0x8f8] sm:$0xff]  ;;  %v502_v26 = vld [vmem:[%s6583_s7 + $0x970] sm:$0xff] }
 0x1f7   : > { %v6392_v27 = vld [vmem:[%s7669_s0] ss:$20 sps:$4 sm:$0xff]  }
 0x1f9   : > { %4700 = vmatpush1.bf16.msra.mxu0 %v5541_v45  ;;  %4859 = vmatpush1.bf16.msra.mxu1 %v5543_v46  ;;  %v5655_v45 = vcombine.low %v383_v29, %v391_v31  ;;  %v5670_v46 = vcombine.high %v398_v40, %v406_v41  ;;  %v495_v29 = vld [vmem:[%s6583_s7 + $0x938] sm:$0xff]  ;;  %v7370_v40 = vld [vmem:[%s6583_s7 + $0x9f0] sm:$0xff] }
 0x1fa   : > { %4701 = vmatprep.subr.bf16.mxu0 %v5558_v47  ;;  %4860 = vmatprep.subr.bf16.mxu1 %v5560_v24  ;;  %v5672_v47 = vcombine.high %v399_v42, %v407_v43  ;;  %v414_v24 = vld [vmem:[%s6583_s7 + $0x6b0] sm:$0xff]  ;;  %v503_v31 = vld [vmem:[%s6583_s7 + $0x978] sm:$0xff] }
 0x1fb   : > { %v5685_v21 = vcombine.low %v414_v24, %v422_v48 }
 0x1fd   : > { %4702 = vmatpush1.bf16.msra.mxu0 %v5557_v53  ;;  %4861 = vmatpush1.bf16.msra.mxu1 %v5559_v54  ;;  %v5671_v53 = vcombine.low %v399_v42, %v407_v43  ;;  %v5686_v54 = vcombine.high %v414_v24, %v422_v48  ;;  %v5768_v42 = vcombine.high %v495_v29, %v503_v31  ;;  %v7373_v43 = vld [vmem:[%s6583_s7 + $0x9b8] sm:$0xff] }
 0x1fe   : > { %4703 = vmatprep.subr.bf16.mxu0 %v5574_v55  ;;  %4862 = vmatprep.subr.bf16.mxu1 %v5576_v56  ;;  %v5688_v55 = vcombine.high %v415_v49, %v423_v52  ;;  %v430_v56 = vld [vmem:[%s6583_s7 + $0x730] sm:$0xff] }
 0x1ff   : > { %v5701_v2 = vcombine.low %v430_v56, %v438_v58 }
 0x201   : > { %4704 = vmatpush1.bf16.msra.mxu0 %v5573_v60  ;;  %4863 = vmatpush1.bf16.msra.mxu1 %v5575_v61  ;;  %v5687_v60 = vcombine.low %v415_v49, %v423_v52  ;;  %v5702_v61 = vcombine.high %v430_v56, %v438_v58 }
 0x202   : > { %4705 = vmatprep.subr.bf16.mxu0 %v5590_v30  ;;  %4864 = vmatprep.subr.bf16.mxu1 %v5592_v62  ;;  %v5704_v30 = vcombine.high %v431_v57, %v439_v59  ;;  %v446_v62 = vld [vmem:[%s6583_s7 + $0x7b0] sm:$0xff] }
 0x203   : > { %v5717_v10 = vcombine.low %v446_v62, %v454_v63 }
 0x205   : > { %4706 = vmatpush1.bf16.msra.mxu0 %v5589_v32  ;;  %4865 = vmatpush1.bf16.msra.mxu1 %v5591_v3  ;;  %v5703_v32 = vcombine.low %v431_v57, %v439_v59  ;;  %v5718_v3 = vcombine.high %v446_v62, %v454_v63 }
 0x206   : > { %4707 = vmatprep.subr.bf16.mxu0 %v5606_v38  ;;  %4866 = vmatprep.subr.bf16.mxu1 %v5608_v4  ;;  %v5720_v38 = vcombine.high %v447_v0, %v455_v1  ;;  %v462_v4 = vld [vmem:[%s6583_s7 + $0x830] sm:$0xff] }
 0x207   : > { %v5733_v19 = vcombine.low %v462_v4, %v470_v6 }
 0x209   : > { %4708 = vmatpush1.bf16.msra.mxu0 %v5605_v11  ;;  %4867 = vmatpush1.bf16.msra.mxu1 %v5607_v51  ;;  %v5719_v11 = vcombine.low %v447_v0, %v455_v1  ;;  %v5734_v51 = vcombine.high %v462_v4, %v470_v6  ;;  %v7393_v1 = vld [vmem:[%s6583_s7 + $0xa30] sm:$0xff]  ;;  %v7400_v4 = vld [vmem:[%s6583_s7 + $0xa38] sm:$0xff] }
 0x20a   : > { %4709 = vmatprep.subr.bf16.mxu0 %v5622_v39  ;;  %4868 = vmatprep.subr.bf16.mxu1 %v5624_v14  ;;  %v5736_v39 = vcombine.high %v463_v7, %v471_v9  ;;  %v478_v14 = vld [vmem:[%s6583_s7 + $0x8b0] sm:$0xff]  ;;  %v7403_v6 = vld [vmem:[%s6583_s7 + $0xa78] sm:$0xff] }
 0x20d   : > { %4710 = vmatpush1.bf16.msra.mxu0 %v5621_v20  ;;  %4869 = vmatpush1.bf16.msra.mxu1 %v5623_v22  ;;  %v5735_v20 = vcombine.low %v463_v7, %v471_v9  ;;  %v5750_v22 = vcombine.high %v478_v14, %v486_v15  ;;  %v6394_v7 = vld [vmem:[%s7669_s0 + $0x28] ss:$20 sps:$4 sm:$0xff]  }
 0x20e   : > { %4711 = vmatprep.subr.bf16.mxu0 %v5638_v23  ;;  %4870 = vmatprep.subr.bf16.mxu1 %v5640_v25  ;;  %v5752_v23 = vcombine.high %v479_v17, %v487_v18  ;;  %v494_v25 = vld [vmem:[%s6583_s7 + $0x930] sm:$0xff] }
 0x20f   : > { %v5765_v48 = vcombine.low %v494_v25, %v502_v26 }
 0x211   : > { %4712 = vmatpush1.bf16.msra.mxu0 %v5637_v33  ;;  %4871 = vmatpush1.bf16.msra.mxu1 %v5639_v34  ;;  %v5749_v33 = vcombine.low %v478_v14, %v486_v15  ;;  %v5751_v34 = vcombine.low %v479_v17, %v487_v18  ;;  %v7415_v18 = vld [vmem:[%s6583_s7 + $0xab0] sm:$0xff] }
 0x212   : > { %4713 = vmatprep.subr.bf16.mxu0 %v5654_v35  ;;  %4872 = vmatprep.subr.bf16.mxu1 %v5656_v37  ;;  %v5766_v35 = vcombine.high %v494_v25, %v502_v26  ;;  %v7367_v37 = vld [vmem:[%s6583_s7 + $0x9b0] sm:$0xff]  ;;  %v7424_v25 = vld [vmem:[%s6583_s7 + $0xab8] sm:$0xff] }
 0x213   : > { %v7427_v26 = vld [vmem:[%s6583_s7 + $0xaf8] sm:$0xff] }
 0x215   : > { %4714 = vmatpush1.bf16.msra.mxu0 %v5653_v44  ;;  %4873 = vmatpush1.bf16.msra.mxu1 %v5655_v45  ;;  %v7376_v44 = vld [vmem:[%s6583_s7 + $0x9f8] sm:$0xff]  ;;  %v6393_v45 = vld [vmem:[%s7669_s0 + $0x2c] ss:$20 sps:$4 sm:$0xff]  }
 0x216   : > { %4715 = vmatprep.subr.bf16.mxu0 %v5670_v46  ;;  %4874 = vmatprep.subr.bf16.mxu1 %v5672_v47  ;;  %v5783_v15 = vcombine.low %v7373_v43, %v7376_v44 }
 0x219   : > { %4716 = vmatpush1.bf16.msra.mxu0 %v5669_v12  ;;  %4875 = vmatpush1.bf16.msra.mxu1 %v5671_v53 }
 0x21a   : > { %4717 = vmatprep.subr.bf16.mxu0 %v5686_v54  ;;  %4876 = vmatprep.subr.bf16.mxu1 %v5688_v55  ;;  %v5767_v54 = vcombine.low %v495_v29, %v503_v31  ;;  %v5782_v55 = vcombine.high %v7367_v37, %v7370_v40 }
 0x21d   : > { %4718 = vmatpush1.bf16.msra.mxu0 %v5685_v21  ;;  %4877 = vmatpush1.bf16.msra.mxu1 %v5687_v60  ;;  %v5784_v60 = vcombine.high %v7373_v43, %v7376_v44  ;;  %v5799_v43 = vcombine.low %v7400_v4, %v7403_v6 }
 0x21e   : > { %4719 = vmatprep.subr.bf16.mxu0 %v5702_v61  ;;  %4878 = vmatprep.subr.bf16.mxu1 %v5704_v30 }
 0x221   : > { %4720 = vmatpush1.bf16.msra.mxu0 %v5701_v2  ;;  %4879 = vmatpush1.bf16.msra.mxu1 %v5703_v32  ;;  %v7396_v2 = vld [vmem:[%s6583_s7 + $0xa70] sm:$0xff] }
 0x222   : > { %4721 = vmatprep.subr.bf16.mxu0 %v5718_v3  ;;  %4880 = vmatprep.subr.bf16.mxu1 %v5720_v38  ;;  %v5798_v17 = vcombine.high %v7393_v1, %v7396_v2 }
 0x225   : > { %4722 = vmatpush1.bf16.msra.mxu0 %v5717_v10  ;;  %4881 = vmatpush1.bf16.msra.mxu1 %v5719_v11 }
 0x226   : > { %4744 = vmatprep.subr.bf16.mxu0 %v5734_v51  ;;  %4903 = vmatprep.subr.bf16.mxu1 %v5736_v39  ;;  %v5781_v51 = vcombine.low %v7367_v37, %v7370_v40 }
 0x228   : > { %4724 = vmatmul.mubr.bf16.vlgmr.msra.gmra.mrb[24].mxu0 %v6392_v27  ;;  %4883 = vmatmul.mubr.bf16.vlgmr.msra.gmra.mrb[24].mxu1 %v6392_v27  ;;  %v6395_v27 = vld [vmem:[%s7669_s0 + $0xc] ss:$20 sps:$4 sm:$0xff]  }
 0x229   : > { %4745 = vmatpush1.bf16.msra.mxu0 %v5733_v19  ;;  %4904 = vmatpush1.bf16.msra.mxu1 %v5735_v20  ;;  %v7418_v19 = vld [vmem:[%s6583_s7 + $0xaf0] sm:$0xff] }
 0x22a   : > { %4746 = vmatprep.subr.bf16.mxu0 %v5750_v22  ;;  %4905 = vmatprep.subr.bf16.mxu1 %v5752_v23  ;;  %v5800_v23 = vcombine.high %v7400_v4, %v7403_v6  ;;  %v5814_v44 = vcombine.high %v7415_v18, %v7418_v19  ;;  %v574_v6 = vld [vmem:[%s6583_s7 + $0xbb0] sm:$0xff] }
 0x22b   : > { %v4195_v41 = vpop.f32.mrb[8].mxu0  ;;  %4733 = vmatprep.mubr.bf16.mxu0 %v6393_v45  ;;  %v4354_v47 = vpop.f32.mrb[8].mxu1  ;;  %4892 = vmatprep.mubr.bf16.mxu1 %v6393_v45 }
 0x22c   : > { %v6144_v46 = vadd.f32 %v4195_v41, %v7070_v13  ;;  %v4197_v24 = vpop.f32.mrb[9].mxu0  ;;  %v6152_v49 = vadd.f32 %v4354_v47, %v7070_v13  ;;  %v4356_v12 = vpop.f32.mrb[9].mxu1 }
 0x22d   : > { %v6145_v52 = vadd.f32 %v4197_v24, %v7070_v13  ;;  %v4199_v53 = vpop.f32.mrb[10].mxu0  ;;  %4747 = vmatpush1.bf16.msra.mxu0 %v5749_v33  ;;  %v6153_v58 = vadd.f32 %v4356_v12, %v7070_v13  ;;  %v4358_v59 = vpop.f32.mrb[10].mxu1  ;;  %4906 = vmatpush1.bf16.msra.mxu1 %v5751_v34 }
 0x22e   : > { %v5013_v56 = vmax.f32 %v6144_v46, 0.0  ;;  %v6146_v57 = vadd.f32 %v4199_v53, %v7087_v5  ;;  %v4201_v21 = vpop.f32.mrb[11].mxu0  ;;  %4748 = vmatprep.subr.bf16.mxu0 %v5766_v35  ;;  %v5015_v61 = vmax.f32 %v6152_v49, 0.0  ;;  %v6154_v62 = vadd.f32 %v4358_v59, %v7087_v5  ;;  %v4360_v0 = vpop.f32.mrb[11].mxu1  ;;  %4907 = vmatprep.subr.bf16.mxu1 %v5768_v42 }
 0x22f   : > { %v5014_v30 = vmax.f32 %v6145_v52, 0.0  ;;  %v6147_v63 = vadd.f32 %v4201_v21, %v7087_v5  ;;  %v5016_v32 = vmax.f32 %v6153_v58, 0.0  ;;  %v6155_v38 = vadd.f32 %v4360_v0, %v7087_v5  ;;  %v566_v58 = vld [vmem:[%s6583_s7 + $0xb70] sm:$0xff] }
 0x230   : > { %v5029_v3 = vmax.f32 %v6146_v57, 0.0  ;;  %4734 = vmatmul.mubr.bf16.gmra.mrb[28].mxu0 %v6394_v7  ;;  %v5031_v10 = vmax.f32 %v6154_v62, 0.0  ;;  %4893 = vmatmul.mubr.bf16.gmra.mrb[28].mxu1 %v6394_v7  ;;  %v5797_v35 = vcombine.low %v7393_v1, %v7396_v2  ;;  %v5816_v49 = vcombine.high %v7424_v25, %v7427_v26  ;;  %v582_v7 = vld [vmem:[%s6583_s7 + $0xbf0] sm:$0xff] }
 0x231   : > { %v6097_v9 = vpack.c.bf16 %v5014_v30, %v5013_v56  ;;  %v5030_v11 = vmax.f32 %v6147_v63, 0.0  ;;  %4749 = vmatpush1.bf16.msra.mxu0 %v5765_v48  ;;  %v6098_v39 = vpack.c.bf16 %v5016_v32, %v5015_v61  ;;  %v5032_v14 = vmax.f32 %v6155_v38, 0.0  ;;  %4908 = vmatpush1.bf16.msra.mxu1 %v5767_v54  ;;  %v558_v56 = vld [vmem:[%s6583_s7 + $0xb30] sm:$0xff]  ;;  %v567_v61 = vld [vmem:[%s6583_s7 + $0xb78] sm:$0xff] }
 0x232   : > { %4750 = vmatprep.subr.bf16.mxu0 %v5782_v55  ;;  %4909 = vmatprep.subr.bf16.mxu1 %v5784_v60  ;;  %v559_v60 = vld [vmem:[%s6583_s7 + $0xb38] sm:$0xff]  ;;  %v5813_v0 = vcombine.low %v7415_v18, %v7418_v19  ;;  %v5815_v32 = vcombine.low %v7424_v25, %v7427_v26  ;;  %v598_v18 = vld [vmem:[%s6583_s7 + $0xc70] sm:$0xff] }
 0x233   : > { %5267 = vst [vmem:[%s7154_s6 + $0x10] sm:$0xff] %v6097_v9  ;;  %v6105_v20 = vpack.c.bf16 %v5030_v11, %v5029_v3  ;;  %v4205_v22 = vpop.f32.mrb[12].mxu0  ;;  %4776 = vmatprep.mubr.bf16.mxu0 %v6395_v27  ;;  %5268 = vst [vmem:[%s7154_s6 + $0x18] sm:$0xff] %v6098_v39  ;;  %v6106_v29 = vpack.c.bf16 %v5032_v14, %v5031_v10  ;;  %v4364_v33 = vpop.f32.mrb[12].mxu1  ;;  %4935 = vmatprep.mubr.bf16.mxu1 %v6395_v27  ;;  %v575_v10 = vld [vmem:[%s6583_s7 + $0xbb8] sm:$0xff]  ;;  %v606_v27 = vld [vmem:[%s6583_s7 + $0xcb0] sm:$0xff] }
 0x234   : > { %v6148_v31 = vadd.f32 %v4205_v22, %v7098_v36  ;;  %v4207_v34 = vpop.f32.mrb[13].mxu0  ;;  %v6156_v37 = vadd.f32 %v4364_v33, %v7098_v36  ;;  %v4366_v41 = vpop.f32.mrb[13].mxu1  ;;  %v5830_v3 = vcombine.high %v558_v56, %v566_v58  ;;  %v5832_v4 = vcombine.high %v559_v60, %v567_v61  ;;  %v583_v11 = vld [vmem:[%s6583_s7 + $0xbf8] sm:$0xff] }
 0x235   : > { %5275 = vst [vmem:[%s7154_s6 + $0x50] sm:$0xff] %v6105_v20  ;;  %v6149_v40 = vadd.f32 %v4207_v34, %v7098_v36  ;;  %v4209_v42 = vpop.f32.mrb[14].mxu0  ;;  %4751 = vmatpush1.bf16.msra.mxu0 %v5781_v51  ;;  %5276 = vst [vmem:[%s7154_s6 + $0x58] sm:$0xff] %v6106_v29  ;;  %v6157_v46 = vadd.f32 %v4366_v41, %v7098_v36  ;;  %v4368_v24 = vpop.f32.mrb[14].mxu1  ;;  %4910 = vmatpush1.bf16.msra.mxu1 %v5783_v15  ;;  %v591_v19 = vld [vmem:[%s6583_s7 + $0xc38] sm:$0xff]  ;;  %v614_v29 = vld [vmem:[%s6583_s7 + $0xcf0] sm:$0xff] }
 0x236   : > { %v5045_v45 = vmax.f32 %v6148_v31, 0.0  ;;  %v6150_v47 = vadd.f32 %v4209_v42, %v7157_v16  ;;  %v4211_v48 = vpop.f32.mrb[15].mxu0  ;;  %4752 = vmatprep.subr.bf16.mxu0 %v5798_v17  ;;  %v5047_v52 = vmax.f32 %v6156_v37, 0.0  ;;  %v6158_v53 = vadd.f32 %v4368_v24, %v7157_v16  ;;  %v4370_v55 = vpop.f32.mrb[15].mxu1  ;;  %4911 = vmatprep.subr.bf16.mxu1 %v5800_v23  ;;  %v590_v17 = vld [vmem:[%s6583_s7 + $0xc30] sm:$0xff]  ;;  %v599_v20 = vld [vmem:[%s6583_s7 + $0xc78] sm:$0xff] }
 0x237   : > { %v5046_v12 = vmax.f32 %v6149_v40, 0.0  ;;  %v6151_v54 = vadd.f32 %v4211_v48, %v7157_v16  ;;  %v5048_v57 = vmax.f32 %v6157_v46, 0.0  ;;  %v6159_v21 = vadd.f32 %v4370_v55, %v7157_v16  ;;  %v607_v31 = vld [vmem:[%s6583_s7 + $0xcb8] sm:$0xff]  ;;  %v622_v41 = vld [vmem:[%s6583_s7 + $0xd30] sm:$0xff] }
 0x238   : > { %v5061_v59 = vmax.f32 %v6150_v47, 0.0  ;;  %v5063_v62 = vmax.f32 %v6158_v53, 0.0  ;;  %v5829_v51 = vcombine.low %v558_v56, %v566_v58  ;;  %v5831_v39 = vcombine.low %v559_v60, %v567_v61  ;;  %v615_v33 = vld [vmem:[%s6583_s7 + $0xcf8] sm:$0xff]  ;;  %v630_v42 = vld [vmem:[%s6583_s7 + $0xd70] sm:$0xff] }
 0x239   : > { %v6113_v30 = vpack.c.bf16 %v5046_v12, %v5045_v45  ;;  %v5062_v63 = vmax.f32 %v6151_v54, 0.0  ;;  %4753 = vmatpush1.bf16.msra.mxu0 %v5797_v35  ;;  %v6114_v1 = vpack.c.bf16 %v5048_v57, %v5047_v52  ;;  %v5064_v2 = vmax.f32 %v6159_v21, 0.0  ;;  %4912 = vmatpush1.bf16.msra.mxu1 %v5799_v43  ;;  %v623_v43 = vld [vmem:[%s6583_s7 + $0xd38] sm:$0xff]  ;;  %v638_v48 = vld [vmem:[%s6583_s7 + $0xdb0] sm:$0xff] }
 0x23a   : > { %4754 = vmatprep.subr.bf16.mxu0 %v5814_v44  ;;  %4913 = vmatprep.subr.bf16.mxu1 %v5816_v49  ;;  %v5846_v14 = vcombine.high %v574_v6, %v582_v7  ;;  %v5848_v15 = vcombine.high %v575_v10, %v583_v11  ;;  %v5845_v22 = vcombine.low %v574_v6, %v582_v7  ;;  %v631_v44 = vld [vmem:[%s6583_s7 + $0xd78] sm:$0xff]  ;;  %v646_v49 = vld [vmem:[%s6583_s7 + $0xdf0] sm:$0xff] }
 0x23b   : > { %5283 = vst [vmem:[%s7154_s6 + $0x90] sm:$0xff] %v6113_v30  ;;  %v6121_v38 = vpack.c.bf16 %v5062_v63, %v5061_v59  ;;  %5284 = vst [vmem:[%s7154_s6 + $0x98] sm:$0xff] %v6114_v1  ;;  %v6122_v9 = vpack.c.bf16 %v5064_v2, %v5063_v62  ;;  %v5847_v23 = vcombine.low %v575_v10, %v583_v11  ;;  %v639_v52 = vld [vmem:[%s6583_s7 + $0xdb8] sm:$0xff]  ;;  %v654_v58 = vld [vmem:[%s6583_s7 + $0xe30] sm:$0xff] }
 0x23c   : > { %v5862_v25 = vcombine.high %v590_v17, %v598_v18  ;;  %v5864_v26 = vcombine.high %v591_v19, %v599_v20  ;;  %v5861_v34 = vcombine.low %v590_v17, %v598_v18  ;;  %v5863_v35 = vcombine.low %v591_v19, %v599_v20  ;;  %v647_v12 = vld [vmem:[%s6583_s7 + $0xdf8] sm:$0xff]  ;;  %v662_v57 = vld [vmem:[%s6583_s7 + $0xe70] sm:$0xff] }
 0x23d   : > { %5291 = vst [vmem:[%s7154_s6 + $0xd0] sm:$0xff] %v6121_v38  ;;  %4755 = vmatpush1.bf16.msra.mxu0 %v5813_v0  ;;  %5292 = vst [vmem:[%s7154_s6 + $0xd8] sm:$0xff] %v6122_v9  ;;  %4914 = vmatpush1.bf16.msra.mxu1 %v5815_v32  ;;  %v5878_v37 = vcombine.high %v606_v27, %v614_v29  ;;  %v5880_v40 = vcombine.high %v607_v31, %v615_v33  ;;  %v655_v59 = vld [vmem:[%s6583_s7 + $0xe38] sm:$0xff]  ;;  %v670_v63 = vld [vmem:[%s6583_s7 + $0xeb0] sm:$0xff] }
 0x23e   : > { %4756 = vmatprep.subr.bf16.mxu0 %v5830_v3  ;;  %4915 = vmatprep.subr.bf16.mxu1 %v5832_v4  ;;  %v5877_v45 = vcombine.low %v606_v27, %v614_v29  ;;  %v5879_v46 = vcombine.low %v607_v31, %v615_v33  ;;  %v5894_v47 = vcombine.high %v622_v41, %v630_v42  ;;  %v663_v21 = vld [vmem:[%s6583_s7 + $0xe78] sm:$0xff]  ;;  %v678_v0 = vld [vmem:[%s6583_s7 + $0xef0] sm:$0xff] }
 0x23f   : > { %v5896_v24 = vcombine.high %v623_v43, %v631_v44  ;;  %v5893_v53 = vcombine.low %v622_v41, %v630_v42  ;;  %v5895_v54 = vcombine.low %v623_v43, %v631_v44  ;;  %v5910_v55 = vcombine.high %v638_v48, %v646_v49  ;;  %v671_v1 = vld [vmem:[%s6583_s7 + $0xeb8] sm:$0xff]  ;;  %v686_v6 = vld [vmem:[%s6583_s7 + $0xf30] sm:$0xff] }
 0x240   : > { %v5912_v56 = vcombine.high %v639_v52, %v647_v12  ;;  %v5909_v60 = vcombine.low %v638_v48, %v646_v49  ;;  %v5911_v61 = vcombine.low %v639_v52, %v647_v12  ;;  %v5926_v30 = vcombine.high %v654_v58, %v662_v57  ;;  %v679_v2 = vld [vmem:[%s6583_s7 + $0xef8] sm:$0xff]  ;;  %v694_v7 = vld [vmem:[%s6583_s7 + $0xf70] sm:$0xff] }
 0x241   : > { %4757 = vmatpush1.bf16.msra.mxu0 %v5829_v51  ;;  %4916 = vmatpush1.bf16.msra.mxu1 %v5831_v39  ;;  %v5928_v62 = vcombine.high %v655_v59, %v663_v21  ;;  %v5925_v32 = vcombine.low %v654_v58, %v662_v57  ;;  %v5927_v3 = vcombine.low %v655_v59, %v663_v21  ;;  %v687_v9 = vld [vmem:[%s6583_s7 + $0xf38] sm:$0xff]  ;;  %v710_v17 = vld [vmem:[%s6583_s7 + $0xff0] sm:$0xff] }
 0x242   : > { %4758 = vmatprep.subr.bf16.mxu0 %v5846_v14  ;;  %4917 = vmatprep.subr.bf16.mxu1 %v5848_v15  ;;  %v5942_v38 = vcombine.high %v670_v63, %v678_v0  ;;  %v5944_v4 = vcombine.high %v671_v1, %v679_v2  ;;  %v695_v10 = vld [vmem:[%s6583_s7 + $0xf78] sm:$0xff]  ;;  %v5941_v11 = vcombine.low %v670_v63, %v678_v0  ;;  %v702_v15 = vld [vmem:[%s6583_s7 + $0xfb0] sm:$0xff] }
 0x243   : > { %v5943_v51 = vcombine.low %v671_v1, %v679_v2  ;;  %v5958_v39 = vcombine.high %v686_v6, %v694_v7  ;;  %v5960_v14 = vcombine.high %v687_v9, %v695_v10  ;;  %v703_v18 = vld [vmem:[%s6583_s7 + $0xfb8] sm:$0xff]  ;;  %v5957_v20 = vcombine.low %v686_v6, %v694_v7  ;;  %v726_v27 = vld [vmem:[%s6583_s7 + $0x1070] sm:$0xff] }
 0x244   : > { %v711_v19 = vld [vmem:[%s6583_s7 + $0xff8] sm:$0xff]  ;;  %v5973_v33 = vcombine.low %v702_v15, %v710_v17  ;;  %v742_v41 = vld [vmem:[%s6583_s7 + $0x10f0] sm:$0xff] }
 0x245   : > { %4759 = vmatpush1.bf16.msra.mxu0 %v5845_v22  ;;  %4918 = vmatpush1.bf16.msra.mxu1 %v5847_v23  ;;  %v5959_v22 = vcombine.low %v687_v9, %v695_v10  ;;  %v5974_v23 = vcombine.high %v702_v15, %v710_v17  ;;  %v719_v29 = vld [vmem:[%s6583_s7 + $0x1038] sm:$0xff]  ;;  %v758_v48 = vld [vmem:[%s6583_s7 + $0x1170] sm:$0xff] }
 0x246   : > { %4760 = vmatprep.subr.bf16.mxu0 %v5862_v25  ;;  %4919 = vmatprep.subr.bf16.mxu1 %v5864_v26  ;;  %v5976_v25 = vcombine.high %v703_v18, %v711_v19  ;;  %v718_v26 = vld [vmem:[%s6583_s7 + $0x1030] sm:$0xff]  ;;  %v727_v31 = vld [vmem:[%s6583_s7 + $0x1078] sm:$0xff] }
 0x247   : > { %v735_v42 = vld [vmem:[%s6583_s7 + $0x10b8] sm:$0xff]  ;;  %v5989_v44 = vcombine.low %v718_v26, %v726_v27  ;;  %v766_v57 = vld [vmem:[%s6583_s7 + $0x11b0] sm:$0xff] }
 0x248   : > { %v743_v43 = vld [vmem:[%s6583_s7 + $0x10f8] sm:$0xff]  ;;  %v774_v59 = vld [vmem:[%s6583_s7 + $0x11f0] sm:$0xff] }
 0x249   : > { %4761 = vmatpush1.bf16.msra.mxu0 %v5861_v34  ;;  %4920 = vmatpush1.bf16.msra.mxu1 %v5863_v35  ;;  %v5975_v34 = vcombine.low %v703_v18, %v711_v19  ;;  %v5990_v35 = vcombine.high %v718_v26, %v726_v27  ;;  %v6396_v49 = vld [vmem:[%s7669_s0 + $0x8] ss:$20 sps:$4 sm:$0xff]   ;;  %v6398_v0 = vld [vmem:[%s7669_s0 + $0x30] ss:$20 sps:$4 sm:$0xff]   ;;  %v6037_v1 = vcombine.low %v766_v57, %v774_v59 }
 0x24a   : > { %4762 = vmatprep.subr.bf16.mxu0 %v5878_v37  ;;  %4921 = vmatprep.subr.bf16.mxu1 %v5880_v40  ;;  %v5992_v37 = vcombine.high %v719_v29, %v727_v31  ;;  %v734_v40 = vld [vmem:[%s6583_s7 + $0x10b0] sm:$0xff]  ;;  %v751_v52 = vld [vmem:[%s6583_s7 + $0x1138] sm:$0xff] }
 0x24b   : > { %v759_v12 = vld [vmem:[%s6583_s7 + $0x1178] sm:$0xff] }
 0x24c   : > { %v6024_v58 = vcombine.high %v751_v52, %v759_v12  ;;  %v767_v21 = vld [vmem:[%s6583_s7 + $0x11b8] sm:$0xff] }
 0x24d   : > { %4763 = vmatpush1.bf16.msra.mxu0 %v5877_v45  ;;  %4922 = vmatpush1.bf16.msra.mxu1 %v5879_v46  ;;  %v5991_v45 = vcombine.low %v719_v29, %v727_v31  ;;  %v6006_v46 = vcombine.high %v734_v40, %v742_v41 }
 0x24e   : > { %4764 = vmatprep.subr.bf16.mxu0 %v5894_v47  ;;  %4923 = vmatprep.subr.bf16.mxu1 %v5896_v24  ;;  %v6008_v47 = vcombine.high %v735_v42, %v743_v43  ;;  %v750_v24 = vld [vmem:[%s6583_s7 + $0x1130] sm:$0xff] }
 0x251   : > { %4765 = vmatpush1.bf16.msra.mxu0 %v5893_v53  ;;  %4924 = vmatpush1.bf16.msra.mxu1 %v5895_v54  ;;  %v6005_v53 = vcombine.low %v734_v40, %v742_v41  ;;  %v6007_v54 = vcombine.low %v735_v42, %v743_v43 }
 0x252   : > { %4766 = vmatprep.subr.bf16.mxu0 %v5910_v55  ;;  %4925 = vmatprep.subr.bf16.mxu1 %v5912_v56  ;;  %v6022_v55 = vcombine.high %v750_v24, %v758_v48  ;;  %v6397_v56 = vld [vmem:[%s7669_s0 + $0x34] ss:$20 sps:$4 sm:$0xff]  }
 0x255   : > { %4767 = vmatpush1.bf16.msra.mxu0 %v5909_v60  ;;  %4926 = vmatpush1.bf16.msra.mxu1 %v5911_v61  ;;  %v775_v60 = vld [vmem:[%s6583_s7 + $0x11f8] sm:$0xff]  ;;  %v6021_v61 = vcombine.low %v750_v24, %v758_v48  ;;  %s6127_s7 = sshll.u32 (%p7676_p7), %s6509_s16, 6 }
 0x256   : > { %4768 = vmatprep.subr.bf16.mxu0 %v5926_v30  ;;  %4927 = vmatprep.subr.bf16.mxu1 %v5928_v62  ;;  %v6023_v30 = vcombine.low %v751_v52, %v759_v12  ;;  %v6038_v62 = vcombine.high %v766_v57, %v774_v59  ;;  %v6040_v63 = vcombine.high %v767_v21, %v775_v60  ;;  %s7593_s12 = scalar_lea.vmem (%p7676_p7), %s7672_s3, %s6127_s7 }
 0x257   : > { %v6039_v2 = vcombine.low %v767_v21, %v775_v60 }
 0x259   : > { %4769 = vmatpush1.bf16.msra.mxu0 %v5925_v32  ;;  %4928 = vmatpush1.bf16.msra.mxu1 %v5927_v3 }
 0x25a   : > { %4770 = vmatprep.subr.bf16.mxu0 %v5942_v38  ;;  %4929 = vmatprep.subr.bf16.mxu1 %v5944_v4 }
 0x25d   : > { %4771 = vmatpush1.bf16.msra.mxu0 %v5941_v11  ;;  %4930 = vmatpush1.bf16.msra.mxu1 %v5943_v51 }
 0x25e   : > { %4772 = vmatprep.subr.bf16.mxu0 %v5958_v39  ;;  %4931 = vmatprep.subr.bf16.mxu1 %v5960_v14 }
 0x261   : > { %4773 = vmatpush1.bf16.msra.mxu0 %v5957_v20  ;;  %4932 = vmatpush1.bf16.msra.mxu1 %v5959_v22 }
 0x262   : > { %4774 = vmatprep.subr.bf16.mxu0 %v5974_v23  ;;  %4933 = vmatprep.subr.bf16.mxu1 %v5976_v25 }
 0x265   : > { %4775 = vmatpush1.bf16.msra.mxu0 %v5973_v33  ;;  %4934 = vmatpush1.bf16.msra.mxu1 %v5975_v34 }
 0x266   : > { %4797 = vmatprep.subr.bf16.mxu0 %v5990_v35  ;;  %4956 = vmatprep.subr.bf16.mxu1 %v5992_v37 }
 0x268   : > { %4777 = vmatmul.mubr.bf16.vlgmr.msra.gmra.mrb[24].mxu0 %v6396_v49  ;;  %4936 = vmatmul.mubr.bf16.vlgmr.msra.gmra.mrb[24].mxu1 %v6396_v49 }
 0x269   : > { %4798 = vmatpush1.bf16.msra.mxu0 %v5989_v44  ;;  %4957 = vmatpush1.bf16.msra.mxu1 %v5991_v45 }
 0x26a   : > { %4799 = vmatprep.subr.bf16.mxu0 %v6006_v46  ;;  %4958 = vmatprep.subr.bf16.mxu1 %v6008_v47 }
 0x26b   : > { %4786 = vmatprep.mubr.bf16.mxu0 %v6397_v56  ;;  %4945 = vmatprep.mubr.bf16.mxu1 %v6397_v56 }
 0x26d   : > { %4800 = vmatpush1.bf16.msra.mxu0 %v6005_v53  ;;  %4959 = vmatpush1.bf16.msra.mxu1 %v6007_v54 }
 0x26e   : > { %4801 = vmatprep.subr.bf16.mxu0 %v6022_v55  ;;  %4960 = vmatprep.subr.bf16.mxu1 %v6024_v58 }
 0x270   : > { %4787 = vmatmul.mubr.bf16.gmra.mrb[28].mxu0 %v6398_v0  ;;  %4946 = vmatmul.mubr.bf16.gmra.mrb[28].mxu1 %v6398_v0 }
 0x271   : > { %4802 = vmatpush1.bf16.msra.mxu0 %v6021_v61  ;;  %4961 = vmatpush1.bf16.msra.mxu1 %v6023_v30 }
 0x272   : > { %4803 = vmatprep.subr.bf16.mxu0 %v6038_v62  ;;  %4962 = vmatprep.subr.bf16.mxu1 %v6040_v63 }
 0x273   : > { %4829 = vmatprep.mubr.bf16.mxu0 %v6469_v50  ;;  %4988 = vmatprep.mubr.bf16.mxu1 %v6469_v50 }
 0x275   : > { %4804 = vmatpush1.bf16.msra.mxu0 %v6037_v1  ;;  %4963 = vmatpush1.bf16.msra.mxu1 %v6039_v2 }
 0x278   : > { %6053 = vmatmul.mubr.msk.bf16.vlgmr.msra.gmra.mrb[24].mxu0 %vm3730_vm0, %v7277_v8  ;;  %6055 = vmatmul.mubr.msk.bf16.vlgmr.msra.gmra.mrb[24].mxu1 %vm3730_vm0, %v7277_v8 }
 0x279   : > { %4839 = vmatprep.mubr.bf16.mxu0 %v6469_v50  ;;  %4998 = vmatprep.mubr.bf16.mxu1 %v6469_v50 }
 0x280   : > { %6054 = vmatmul.mubr.msk.bf16.gmra.mrb[28].mxu0 %vm3730_vm0, %v7296_v28  ;;  %6056 = vmatmul.mubr.msk.bf16.gmra.mrb[28].mxu1 %vm3730_vm0, %v7296_v28 }
 0x2bb   : > { %v4513_v32 = vpop.f32.mrb[16].mxu0  ;;  %v4672_v38 = vpop.f32.mrb[16].mxu1 }
 0x2bc   : > { %v6160_v3 = vadd.f32 %v4513_v32, %v7070_v13  ;;  %v4515_v4 = vpop.f32.mrb[17].mxu0  ;;  %v6168_v6 = vadd.f32 %v4672_v38, %v7070_v13  ;;  %v4674_v8 = vpop.f32.mrb[17].mxu1 }
 0x2bd   : > { %v6161_v7 = vadd.f32 %v4515_v4, %v7070_v13  ;;  %v4517_v9 = vpop.f32.mrb[18].mxu0  ;;  %v6169_v50 = vadd.f32 %v4674_v8, %v7070_v13  ;;  %v4676_v51 = vpop.f32.mrb[18].mxu1 }
 0x2be   : > { %v5017_v10 = vmax.f32 %v6160_v3, 0.0  ;;  %v6162_v11 = vadd.f32 %v4517_v9, %v7087_v5  ;;  %v4519_v39 = vpop.f32.mrb[19].mxu0  ;;  %v5019_v28 = vmax.f32 %v6168_v6, 0.0  ;;  %v6170_v15 = vadd.f32 %v4676_v51, %v7087_v5  ;;  %v4678_v18 = vpop.f32.mrb[19].mxu1 }
 0x2bf   : > { %v5018_v14 = vmax.f32 %v6161_v7, 0.0  ;;  %v6163_v17 = vadd.f32 %v4519_v39, %v7087_v5  ;;  %v5020_v19 = vmax.f32 %v6169_v50, 0.0  ;;  %v6171_v22 = vadd.f32 %v4678_v18, %v7087_v5 }
 0x2c0   : > { %v5033_v20 = vmax.f32 %v6162_v11, 0.0  ;;  %v5035_v25 = vmax.f32 %v6170_v15, 0.0 }
 0x2c1   : > { %v6099_v23 = vpack.c.bf16 %v5018_v14, %v5017_v10  ;;  %v5034_v26 = vmax.f32 %v6163_v17, 0.0  ;;  %v6100_v27 = vpack.c.bf16 %v5020_v19, %v5019_v28  ;;  %v5036_v29 = vmax.f32 %v6171_v22, 0.0 }
 0x2c3   : > { %5269 = vst [vmem:[%s7154_s6 + $0x20] sm:$0xff] %v6099_v23  ;;  %v6107_v31 = vpack.c.bf16 %v5034_v26, %v5033_v20  ;;  %v4523_v33 = vpop.f32.mrb[20].mxu0  ;;  %5270 = vst [vmem:[%s7154_s6 + $0x28] sm:$0xff] %v6100_v27  ;;  %v6108_v34 = vpack.c.bf16 %v5036_v29, %v5035_v25  ;;  %v4682_v37 = vpop.f32.mrb[20].mxu1 }
 0x2c4   : > { %v6164_v35 = vadd.f32 %v4523_v33, %v7098_v36  ;;  %v4525_v40 = vpop.f32.mrb[21].mxu0  ;;  %v6172_v41 = vadd.f32 %v4682_v37, %v7098_v36  ;;  %v4684_v43 = vpop.f32.mrb[21].mxu1 }
 0x2c5   : > { %5277 = vst [vmem:[%s7154_s6 + $0x60] sm:$0xff] %v6107_v31  ;;  %v6165_v42 = vadd.f32 %v4525_v40, %v7098_v36  ;;  %v4527_v44 = vpop.f32.mrb[22].mxu0  ;;  %5278 = vst [vmem:[%s7154_s6 + $0x68] sm:$0xff] %v6108_v34  ;;  %v6173_v46 = vadd.f32 %v4684_v43, %v7098_v36  ;;  %v4686_v24 = vpop.f32.mrb[22].mxu1 }
 0x2c6   : > { %v5049_v45 = vmax.f32 %v6164_v35, 0.0  ;;  %v6166_v47 = vadd.f32 %v4527_v44, %v7157_v16  ;;  %v4529_v48 = vpop.f32.mrb[23].mxu0  ;;  %v5051_v49 = vmax.f32 %v6172_v41, 0.0  ;;  %v6174_v12 = vadd.f32 %v4686_v24, %v7157_v16  ;;  %v4688_v54 = vpop.f32.mrb[23].mxu1 }
 0x2c7   : > { %v5050_v52 = vmax.f32 %v6165_v42, 0.0  ;;  %v6167_v53 = vadd.f32 %v4529_v48, %v7157_v16  ;;  %v5052_v55 = vmax.f32 %v6173_v46, 0.0  ;;  %v6175_v58 = vadd.f32 %v4688_v54, %v7157_v16 }
 0x2c8   : > { %v5065_v56 = vmax.f32 %v6166_v47, 0.0  ;;  %v5067_v59 = vmax.f32 %v6174_v12, 0.0 }
 0x2c9   : > { %v6115_v57 = vpack.c.bf16 %v5050_v52, %v5049_v45  ;;  %v5066_v21 = vmax.f32 %v6167_v53, 0.0  ;;  %v6116_v60 = vpack.c.bf16 %v5052_v55, %v5051_v49  ;;  %v5068_v61 = vmax.f32 %v6175_v58, 0.0 }
 0x2cb   : > { %5285 = vst [vmem:[%s7154_s6 + $0xa0] sm:$0xff] %v6115_v57  ;;  %v6123_v30 = vpack.c.bf16 %v5066_v21, %v5065_v56  ;;  %5286 = vst [vmem:[%s7154_s6 + $0xa8] sm:$0xff] %v6116_v60  ;;  %v6124_v62 = vpack.c.bf16 %v5068_v61, %v5067_v59  ;;  %v5321_v57 = vld [vmem:[%s7154_s6 + $0x8] sm:$0xff] (%p7676_p7)  ;;  %v5323_v59 = vld [vmem:[%s7154_s6 + $0x10] sm:$0xff] (%p7676_p7) }
 0x2cc   : > { %v5325_v21 = vld [vmem:[%s7154_s6 + $0x18] sm:$0xff] (%p7676_p7)  ;;  %v5327_v60 = vld [vmem:[%s7154_s6 + $0x20] sm:$0xff] (%p7676_p7)  ;;  %v5329_v61 = vld [vmem:[%s7154_s6 + $0x28] sm:$0xff] (%p7676_p7)  ;;  %5322 = vst [vmem:[%s7593_s12 + $0x8] sm:$0xff] (%p7676_p7), %v5321_v57 }
 0x2cd   : > { %5293 = vst [vmem:[%s7154_s6 + $0xe0] sm:$0xff] %v6123_v30  ;;  %5294 = vst [vmem:[%s7154_s6 + $0xe8] sm:$0xff] %v6124_v62 }
 0x2ce   : > { %5324 = vst [vmem:[%s7593_s12 + $0x10] sm:$0xff] (%p7676_p7), %v5323_v59  ;;  %5326 = vst [vmem:[%s7593_s12 + $0x18] sm:$0xff] (%p7676_p7), %v5325_v21 }
 0x2cf   : > { %5328 = vst [vmem:[%s7593_s12 + $0x20] sm:$0xff] (%p7676_p7), %v5327_v60  ;;  %5330 = vst [vmem:[%s7593_s12 + $0x28] sm:$0xff] (%p7676_p7), %v5329_v61 }
 0x34b   : > { %v4831_v63 = vpop.f32.mrb[24].mxu0  ;;  %v4990_v1 = vpop.f32.mrb[24].mxu1 }
 0x34c   : > { %v6176_v0 = vadd.f32 %v4831_v63, %v7070_v13  ;;  %v4833_v2 = vpop.f32.mrb[25].mxu0  ;;  %v6184_v32 = vadd.f32 %v4990_v1, %v7070_v13  ;;  %v4992_v38 = vpop.f32.mrb[25].mxu1  ;;  %v5335_v63 = vld [vmem:[%s7154_s6 + $0x40] sm:$0xff] (%p7676_p7)  ;;  %v5339_v1 = vld [vmem:[%s7154_s6 + $0x50] sm:$0xff] (%p7676_p7) }
 0x34d   : > { %v6177_v3 = vadd.f32 %v4833_v2, %v7070_v13  ;;  %v4835_v4 = vpop.f32.mrb[26].mxu0  ;;  %v6185_v7 = vadd.f32 %v4992_v38, %v7070_v13  ;;  %v4994_v9 = vpop.f32.mrb[26].mxu1  ;;  %5336 = vst [vmem:[%s7593_s12 + $0x3c0] sm:$0xff] (%p7676_p7), %v5335_v63  ;;  %v5341_v2 = vld [vmem:[%s7154_s6 + $0x58] sm:$0xff] (%p7676_p7)  ;;  %5340 = vst [vmem:[%s7593_s12 + $0x3d0] sm:$0xff] (%p7676_p7), %v5339_v1 }
 0x34e   : > { %v5021_v6 = vmax.f32 %v6176_v0, 0.0  ;;  %v6178_v8 = vadd.f32 %v4835_v4, %v7087_v5  ;;  %v4837_v10 = vpop.f32.mrb[27].mxu0  ;;  %v5023_v50 = vmax.f32 %v6184_v32, 0.0  ;;  %v6186_v51 = vadd.f32 %v4994_v9, %v7087_v5  ;;  %v4996_v28 = vpop.f32.mrb[27].mxu1  ;;  %v5337_v0 = vld [vmem:[%s7154_s6 + $0x48] sm:$0xff] (%p7676_p7)  ;;  %5342 = vst [vmem:[%s7593_s12 + $0x3d8] sm:$0xff] (%p7676_p7), %v5341_v2 }
 0x34f   : > { %v5022_v11 = vmax.f32 %v6177_v3, 0.0  ;;  %v6179_v39 = vadd.f32 %v4837_v10, %v7087_v5  ;;  %v5024_v14 = vmax.f32 %v6185_v7, 0.0  ;;  %v6187_v17 = vadd.f32 %v4996_v28, %v7087_v5  ;;  %5338 = vst [vmem:[%s7593_s12 + $0x3c8] sm:$0xff] (%p7676_p7), %v5337_v0  ;;  %v5343_v32 = vld [vmem:[%s7154_s6 + $0x60] sm:$0xff] (%p7676_p7)  ;;  %v5345_v3 = vld [vmem:[%s7154_s6 + $0x68] sm:$0xff] (%p7676_p7)  ;;  %v5357_v9 = vld [vmem:[%s7154_s6 + $0x98] sm:$0xff] (%p7676_p7) }
 0x350   : > { %v5037_v15 = vmax.f32 %v6178_v8, 0.0  ;;  %v5039_v13 = vmax.f32 %v6186_v51, 0.0  ;;  %5344 = vst [vmem:[%s7593_s12 + $0x3e0] sm:$0xff] (%p7676_p7), %v5343_v32  ;;  %5346 = vst [vmem:[%s7593_s12 + $0x3e8] sm:$0xff] (%p7676_p7), %v5345_v3  ;;  %v5353_v7 = vld [vmem:[%s7154_s6 + $0x88] sm:$0xff] (%p7676_p7)  ;;  %v5355_v8 = vld [vmem:[%s7154_s6 + $0x90] sm:$0xff] (%p7676_p7) }
 0x351   : > { %v6101_v18 = vpack.c.bf16 %v5022_v11, %v5021_v6  ;;  %v5038_v19 = vmax.f32 %v6179_v39, 0.0  ;;  %v6102_v20 = vpack.c.bf16 %v5024_v14, %v5023_v50  ;;  %v5040_v22 = vmax.f32 %v6187_v17, 0.0  ;;  %v5351_v6 = vld [vmem:[%s7154_s6 + $0x80] sm:$0xff] (%p7676_p7)  ;;  %5354 = vst [vmem:[%s7593_s12 + $0x788] sm:$0xff] (%p7676_p7), %v5353_v7  ;;  %5356 = vst [vmem:[%s7593_s12 + $0x790] sm:$0xff] (%p7676_p7), %v5355_v8  ;;  %v5361_v50 = vld [vmem:[%s7154_s6 + $0xa8] sm:$0xff] (%p7676_p7) }
 0x352   : > { %5352 = vst [vmem:[%s7593_s12 + $0x780] sm:$0xff] (%p7676_p7), %v5351_v6  ;;  %v5359_v10 = vld [vmem:[%s7154_s6 + $0xa0] sm:$0xff] (%p7676_p7)  ;;  %5358 = vst [vmem:[%s7593_s12 + $0x798] sm:$0xff] (%p7676_p7), %v5357_v9  ;;  %v5369_v28 = vld [vmem:[%s7154_s6 + $0xc8] sm:$0xff] (%p7676_p7) }
 0x353   : > { %5271 = vst [vmem:[%s7154_s6 + $0x30] sm:$0xff] %v6101_v18  ;;  %v6109_v23 = vpack.c.bf16 %v5038_v19, %v5037_v15  ;;  %v4841_v25 = vpop.f32.mrb[28].mxu0  ;;  %5272 = vst [vmem:[%s7154_s6 + $0x38] sm:$0xff] %v6102_v20  ;;  %v6110_v26 = vpack.c.bf16 %v5040_v22, %v5039_v13  ;;  %v5000_v29 = vpop.f32.mrb[28].mxu1  ;;  %v5367_v39 = vld [vmem:[%s7154_s6 + $0xc0] sm:$0xff] (%p7676_p7)  ;;  %v5371_v14 = vld [vmem:[%s7154_s6 + $0xd0] sm:$0xff] (%p7676_p7) }
 0x354   : > { %v6180_v27 = vadd.f32 %v4841_v25, %v7098_v36  ;;  %v4843_v31 = vpop.f32.mrb[29].mxu0  ;;  %v6188_v33 = vadd.f32 %v5000_v29, %v7098_v36  ;;  %v5002_v34 = vpop.f32.mrb[29].mxu1  ;;  %5360 = vst [vmem:[%s7593_s12 + $0x7a0] sm:$0xff] (%p7676_p7), %v5359_v10  ;;  %5362 = vst [vmem:[%s7593_s12 + $0x7a8] sm:$0xff] (%p7676_p7), %v5361_v50  ;;  %v5373_v15 = vld [vmem:[%s7154_s6 + $0xd8] sm:$0xff] (%p7676_p7)  ;;  %v5375_v17 = vld [vmem:[%s7154_s6 + $0xe0] sm:$0xff] (%p7676_p7) }
 0x355   : > { %5279 = vst [vmem:[%s7154_s6 + $0x70] sm:$0xff] %v6109_v23  ;;  %v6181_v5 = vadd.f32 %v4843_v31, %v7098_v36  ;;  %v4845_v35 = vpop.f32.mrb[30].mxu0  ;;  %5280 = vst [vmem:[%s7154_s6 + $0x78] sm:$0xff] %v6110_v26  ;;  %v6189_v40 = vadd.f32 %v5002_v34, %v7098_v36  ;;  %v5004_v42 = vpop.f32.mrb[30].mxu1  ;;  %v5377_v18 = vld [vmem:[%s7154_s6 + $0xe8] sm:$0xff] (%p7676_p7) }
 0x356   : > { %v5053_v37 = vmax.f32 %v6180_v27, 0.0  ;;  %v6182_v41 = vadd.f32 %v4845_v35, %v7157_v16  ;;  %v4847_v43 = vpop.f32.mrb[31].mxu0  ;;  %v5055_v44 = vmax.f32 %v6188_v33, 0.0  ;;  %v6190_v46 = vadd.f32 %v5004_v42, %v7157_v16  ;;  %v5006_v24 = vpop.f32.mrb[31].mxu1  ;;  %5368 = vst [vmem:[%s7593_s12 + $0xb40] sm:$0xff] (%p7676_p7), %v5367_v39  ;;  %5370 = vst [vmem:[%s7593_s12 + $0xb48] sm:$0xff] (%p7676_p7), %v5369_v28 }
 0x357   : > { %v5054_v45 = vmax.f32 %v6181_v5, 0.0  ;;  %v6183_v47 = vadd.f32 %v4847_v43, %v7157_v16  ;;  %v5056_v48 = vmax.f32 %v6189_v40, 0.0  ;;  %v6191_v52 = vadd.f32 %v5006_v24, %v7157_v16  ;;  %5303 = sbr.rel (!%p7676_p7) target bundleno = 870 (0x366), region = 40  ;;  %v5319_v16 = vld [vmem:[%s7154_s6] sm:$0xff] (%p7676_p7)  ;;  %5372 = vst [vmem:[%s7593_s12 + $0xb50] sm:$0xff] (%p7676_p7), %v5371_v14  ;;  %5374 = vst [vmem:[%s7593_s12 + $0xb58] sm:$0xff] (%p7676_p7), %v5373_v15 }
 0x358   : > { %v5069_v49 = vmax.f32 %v6182_v41, 0.0  ;;  %v5071_v12 = vmax.f32 %v6190_v46, 0.0  ;;  %5320 = vst [vmem:[%s7593_s12] sm:$0xff] (%p7676_p7), %v5319_v16  ;;  %5376 = vst [vmem:[%s7593_s12 + $0xb60] sm:$0xff] (%p7676_p7), %v5375_v17 }
 0x359   : > { %v6117_v36 = vpack.c.bf16 %v5054_v45, %v5053_v37  ;;  %v5070_v53 = vmax.f32 %v6183_v47, 0.0  ;;  %v6118_v54 = vpack.c.bf16 %v5056_v48, %v5055_v44  ;;  %v5072_v55 = vmax.f32 %v6191_v52, 0.0  ;;  %5378 = vst [vmem:[%s7593_s12 + $0xb68] sm:$0xff] (%p7676_p7), %v5377_v18 }
 0x35a   : > { %v5331_v30 = vld [vmem:[%s7154_s6 + $0x30] sm:$0xff] (%p7676_p7)  ;;  %v5333_v62 = vld [vmem:[%s7154_s6 + $0x38] sm:$0xff] (%p7676_p7) }
 0x35b   : > { %5287 = vst [vmem:[%s7154_s6 + $0xb0] sm:$0xff] %v6117_v36  ;;  %v6125_v56 = vpack.c.bf16 %v5070_v53, %v5069_v49  ;;  %5288 = vst [vmem:[%s7154_s6 + $0xb8] sm:$0xff] %v6118_v54  ;;  %v6126_v58 = vpack.c.bf16 %v5072_v55, %v5071_v12 }
 0x35c   : > { %5332 = vst [vmem:[%s7593_s12 + $0x30] sm:$0xff] (%p7676_p7), %v5331_v30  ;;  %5334 = vst [vmem:[%s7593_s12 + $0x38] sm:$0xff] (%p7676_p7), %v5333_v62  ;;  %v5347_v38 = vld [vmem:[%s7154_s6 + $0x70] sm:$0xff] (%p7676_p7)  ;;  %v5349_v4 = vld [vmem:[%s7154_s6 + $0x78] sm:$0xff] (%p7676_p7) }
 0x35d   : > { %5295 = vst [vmem:[%s7154_s6 + $0xf0] sm:$0xff] %v6125_v56  ;;  %5296 = vst [vmem:[%s7154_s6 + $0xf8] sm:$0xff] %v6126_v58 }
 0x35e   : > { %5348 = vst [vmem:[%s7593_s12 + $0x3f0] sm:$0xff] %v5347_v38  ;;  %5350 = vst [vmem:[%s7593_s12 + $0x3f8] sm:$0xff] %v5349_v4 }
 0x362   : > { %v5363_v11 = vld [vmem:[%s7154_s6 + $0xb0] sm:$0xff]  ;;  %v5365_v51 = vld [vmem:[%s7154_s6 + $0xb8] sm:$0xff] }
 0x363   : > { %5364 = vst [vmem:[%s7593_s12 + $0x7b0] sm:$0xff] %v5363_v11  ;;  %5366 = vst [vmem:[%s7593_s12 + $0x7b8] sm:$0xff] %v5365_v51 }
 0x364   : > { %v5379_v13 = vld [vmem:[%s7154_s6 + $0xf0] sm:$0xff]  ;;  %v5381_v19 = vld [vmem:[%s7154_s6 + $0xf8] sm:$0xff] }
 0x365   : > { %5380 = vst [vmem:[%s7593_s12 + $0xb70] sm:$0xff] %v5379_v13  ;;  %5382 = vst [vmem:[%s7593_s12 + $0xb78] sm:$0xff] %v5381_v19 }
 0x366 PF: > { %p13_p9 = scmp.ge.s32.totalorder %s6512_s17, 17   ;;  %s7677_s12 = smov %s6455_s13 }
 0x367   : > { %s7678_s13 = smov %s6459_s14  ;;  %s7679_s14 = smov %s6522_s20 }
 0x368   : > { %s7680_s15 = smov %s6512_s17  ;;  %15 = sbr.rel (!%p13_p9) target bundleno = 3 (0x3), region = 95 }
 0x36f   :  { %5398 = vsyncpa [#allocation3], 1 }
 0x370   :  { %5400 = vsyncpa [#allocation3 + $0x1], 1 }

// kernel: cnn_forward.6
= control target key start
LH: loop header
LB: loop body
LE: loop exit
PB: predicated region body
PF: predicated region fallthrough
CT: control target
= control target key end

     0   :  { %8 = vsyncpa [#allocation4], 0  ;;  %s15073_s0 = inlined_call_operand.vmem [shape: bf16[2,272384], index: 0, kind: input, shape index: {}]   ;;  %s15074_s1 = inlined_call_operand.hbm [shape: bf16[272384,512], index: 1, kind: input, shape index: {}]   ;;  %s15075_s2 = inlined_call_operand.vmem [shape: f32[1,512], index: 2, kind: input, shape index: {}]   ;;  %s15076_s3 = inlined_call_operand.vmem [shape: bf16[2,512], index: 3, kind: output, shape index: {}]  }
   0x1   :  { %10 = vsyncpa [#allocation4 + $0x1], 0  ;;  %s13314_s12 = smov 0   ;;  %s13316_s13 = smov 0  }
   0x2   :  { %s13318_s14 = smov 0   ;;  %s13320_s15 = smov 0  }
   0x3   :  { %s13322_s16 = smov 0   ;;  %s13324_s17 = smov 0  }
   0x4   :  { %s13326_s18 = smov 0   ;;  %s13328_s19 = smov 0  }
   0x5 LB: > { %s9889_s20 = sadd.s32 4294967295, %s13285_s19   ;;  %s28_s21 = sadd.s32 1, %s13277_s17  ;;  %s13285_s19 = sphi %s13328_s19, %s16_s19   ;;  %s13281_s18 = sphi %s13326_s18, %s15086_s18   ;;  %s13277_s17 = sphi %s13324_s17, %s15085_s17   ;;  %s13273_s16 = sphi %s13322_s16, %s15084_s16   ;;  %s13269_s15 = sphi %s13320_s15, %s15083_s15   ;;  %s13265_s14 = sphi %s13318_s14, %s15082_s14   ;;  %s13261_s13 = sphi %s13316_s13, %s15081_s13   ;;  %s13257_s12 = sphi %s13314_s12, %s15080_s12  }
   0x6   : > { %p29_p0 = scmp.ge.s32.totalorder %s28_s21, 28  ;;  %s31_s22 = sadd.s32 1, %s13281_s18 }
   0x7   : > { %s72_s23 = sadd.s32 1, %s13265_s14  ;;  %p79_p1 = scmp.ne.s32.totalorder %s13265_s14, %s13261_s13 }
   0x8   : > { %s15088_s21 = smov (%p29_p0, %s28_s21), 0  ;;  %s15090_s22 = smov (!%p29_p0, %s31_s22), %s13281_s18 }
   0x9   : > { %s67_s24 = ssub.s32 %s13277_s17, %s15088_s21  ;;  %p80_p2 = scmp.eq.s32.totalorder %s13285_s19, 0 }
   0xa   : > { %p33_p3 = scmp.ge.s32.totalorder %s15090_s22, 2  ;;  %p85_p4 = scmp.ne.s32.totalorder %s13261_s13, %s13257_s12 }
   0xb   : > { %p13365_p5 = por %p80_p2, %p79_p1  ;;  %p86_p6 = scmp.eq.s32.totalorder %s9889_s20, 0 }
   0xc   : > { %s15092_s22 = smov (%p33_p3, %s15090_s22), 0  ;;  %p11277_p8 = scmp.lt.s32.totalorder %s13285_s19, 56 }
   0xd   : > { %p13371_p7 = por %p86_p6, %p85_p4  ;;  %s68_s27 = ssub.s32 %s13281_s18, %s15092_s22 }
   0xe   : > { %s69_s28 = sor.u32 %s68_s27, %s67_s24  ;;  %s175_s29 = sand.u32 1, %s13265_s14  }
   0xf   : > { %p70_p9 = scmp.eq.s32.totalorder %s69_s28, 0  ;;  %s11269_s30 = smul.u32 9728, %s175_s29 }
  0x10   : > { %s9893_s4 = sshll.u32 %s13281_s18, 1  ;;  %s11122_s6 = smul.u32 4864, %s13277_s17 }
  0x11   : > { %s13381_s5 = scalar_select %p70_p9, %s13265_s14, %s72_s23  }
  0x12   : > { %s179_s7 = scalar_lea.vmem [#allocation3], %s11269_s30  ;;  %p13386_p10 = pnand %p11277_p8, %p13365_p5 }
  0x13   : > { %s189_s8 = sshll.u32 %s179_s7, 4  ;;  %s186_s10 = sadd.s32 %s11122_s6, %s9893_s4  ;;  %s13390_s8 = int_to_ptr.vmem [resolvable:$true] %s189_s8 }
  0x14   : > { %s9895_s11 = sshll.u32 %s186_s10, 6  ;;  %s13397_s23 = scalar_lea.sflag [#allocation4], %s175_s29 }
  0x15   : > { %s13395_s24 = scalar_lea.hbm %s15074_s1, %s9895_s11  ;;  %p13191_p12 = pneg %p13386_p10 }
  0x16   : > { %s13189_s25 = scalar_lea.hbm %s13395_s24, 155648  ;;  %s13194_s30 = scalar_lea.hbm %s15074_s1, 8716288 }
  0x17   : > { %p13190_p11 = scmp.ne.s32.totalorder %s13395_s24, %s13189_s25  ;;  %p13195_p1 = scmp.lt.u32.totalorder %s13395_s24, %s15074_s1 }
  0x18   : > { %p13196_p2 = scmp.lt.u32.totalorder %s13194_s30, %s13189_s25  ;;  %p13198_p4 = scmp.lt.u32.totalorder %s13189_s25, %s13395_s24 }
  0x19   : > { %p13192_p13 = pnand %p13191_p12, %p13190_p11 }
  0x1a   : > { %p13197_p3 = por %p13196_p2, %p13195_p1 }
  0x1b   : > { %p13193_p0 = pneg %p13192_p13 }
  0x1c   : > { %p13199_p5 = por %p13198_p4, %p13197_p3 }
  0x1e   : > { %p13200_p6 = pnand %p13199_p5, %p13193_p0 }
  0x20   : > { %13203 = shalt.err (!%p13200_p6)
}
  0x21   : > { %s13204_s29 = scalar_lea.vmem %s13390_s8, 155648  ;;  %s13287_s7 = smov [#allocation3]  }
  0x22   : > { %p13205_p8 = scmp.ne.s32.totalorder %s13390_s8, %s13204_s29  ;;  %s13209_s10 = sshll.u32 %s13287_s7, 4  ;;  %s13210_s10 = int_to_ptr.vmem [resolvable:$false] %s13209_s10 }
  0x23   : > { %s13211_s11 = scalar_lea.vmem %s13210_s10, 311296  ;;  %p13212_p13 = scmp.lt.s32.totalorder %s13390_s8, %s13210_s10 }
  0x24   : > { %p13207_p9 = pnand %p13205_p8, %p13191_p12  ;;  %p13213_p1 = scmp.lt.s32.totalorder %s13211_s11, %s13204_s29 }
  0x26   : > { %p13208_p11 = pneg %p13207_p9  ;;  %p13214_p2 = por %p13213_p1, %p13212_p13 }
  0x28   : > { %p13215_p3 = pnand %p13214_p2, %p13208_p11 }
  0x2a   : > { %13218 = shalt.err (!%p13215_p3)
}
  0x2b   : > { %s13288_s12 = smov 256   ;;  %s13289_s20 = smov 128  }
  0x2c   : > { %s13290_s25 = smov 8   ;;  %p9896_p12 = scmp.ge.s32.totalorder %s13285_s19, 1 }
  0x2d   : > { %11276 = dma.hbm_to_vmem [thread:$0]  (!%p13386_p10), %s13395_s24, 155648, %s13390_s8, %s13397_s23, %s13288_s12, %s13289_s20, %s13290_s25  }
  0x2e   : > { %p205_p0 = scmp.lt.s32.totalorder %s13285_s19, 57 }
  0x30   : > { %p206_p4 = pnand %p9896_p12, %p205_p0 }
  0x31   : > { %s211_s27 = sand.u32 (!%p206_p4), 1, %s13261_s13  }
  0x32   : > { %209 = sbr.rel (%p206_p4) target bundleno = 1528 (0x5f8), region = 32  ;;  %s212_s30 = scalar_lea.sflag (!%p206_p4), [#allocation4], %s211_s27 }
  0x33   : > { %s11270_s28 = smul.u32 (!%p206_p4), 9728, %s211_s27 }
  0x35   : > { %s13428_s4 = scalar_lea.vmem (!%p206_p4), [#allocation3], %s11270_s28 }
  0x39   : > { %13252 = dma.done.wait (%p13371_p7), %s212_s30, 155648  }
  0x3a   : > { %13254 = vsyncadd (%p13371_p7), %s212_s30, 4294811648  ;;  %s253_s9 = smul.u32 76, %s13269_s15  ;;  %s9897_s8 = sshll.u32 %s13273_s16, 1 }
  0x3b   : > { %p265_p10 = scmp.lt.s32.totalorder %s9897_s8, 3  ;;  %p9899_p7 = scmp.ne.s32.totalorder %s13269_s15, 0 }
  0x3c   : > { %p256_p5 = scmp.lt.s32.totalorder %s253_s9, 2127  ;;  %v13291_v0 = vmov (!%p9899_p7), 0.0  }
  0x3d   : > { %s15094_s8 = smov (!%p265_p10, %s9897_s8), 3  ;;  %281 = sbr.rel (%p9899_p7) target bundleno = 68 (0x44), region = 40 }
  0x3e   : > { %s15096_s9 = smov (!%p256_p5, %s253_s9), 2127  ;;  %s267_s6 = scalar_lea.vmem %s15075_s2, %s15094_s8  ;;  %282 = vst [vmem:[#allocation2] sm:$0xf] (!%p9899_p7), %v13291_v0 }
  0x3f   : > { %s276_s26 = scalar_lea.vmem %s15076_s3, %s15094_s8  ;;  %s13449_s12 = scalar_lea.vmem %s15073_s0, %s15096_s9 }
  0x44 PF: > { %v11348_v1 = vld [vmem:[%s13428_s4 + $0x4] ss:$8 sps:$4 sm:$0xff]   ;;  %v11352_v3 = vld [vmem:[%s13428_s4] ss:$8 sps:$4 sm:$0xff]   ;;  %v11354_v5 = vld [vmem:[%s13428_s4 + $0x14] ss:$8 sps:$4 sm:$0xff]   ;;  %v1524_v41 = vlaneseq }
  0x45   : > { %v11350_v2 = vld [vmem:[%s13428_s4 + $0x1304] ss:$8 sps:$4 sm:$0xff]   ;;  %8141 = vmatprep.subr.bf16.mxu1 %v11348_v1  ;;  %v11353_v4 = vld [vmem:[%s13428_s4 + $0x1300] ss:$8 sps:$4 sm:$0xff]   ;;  %v11356_v6 = vld [vmem:[%s13428_s4 + $0x1314] ss:$8 sps:$4 sm:$0xff]  }
  0x46   : > { %8920 = vmatprep.subr.bf16.mxu0 %v11350_v2  ;;  %8142 = vmatpush1.bf16.msra.mxu1 %v11352_v3  ;;  %v11358_v7 = vld [vmem:[%s13428_s4 + $0x10] ss:$8 sps:$4 sm:$0xff]   ;;  %v11360_v9 = vld [vmem:[%s13428_s4 + $0x24] ss:$8 sps:$4 sm:$0xff]   ;;  %v11364_v11 = vld [vmem:[%s13428_s4 + $0x20] ss:$8 sps:$4 sm:$0xff]  }
  0x47   : > { %8921 = vmatpush1.bf16.msra.mxu0 %v11353_v4  ;;  %8143 = vmatprep.subr.bf16.mxu1 %v11354_v5  ;;  %v11359_v8 = vld [vmem:[%s13428_s4 + $0x1310] ss:$8 sps:$4 sm:$0xff]   ;;  %v11362_v10 = vld [vmem:[%s13428_s4 + $0x1324] ss:$8 sps:$4 sm:$0xff]   ;;  %v11365_v12 = vld [vmem:[%s13428_s4 + $0x1320] ss:$8 sps:$4 sm:$0xff]  }
  0x48   : > { %8922 = vmatprep.subr.bf16.mxu0 %v11356_v6  ;;  %v11366_v13 = vld [vmem:[%s13428_s4 + $0x34] ss:$8 sps:$4 sm:$0xff]   ;;  %v11370_v15 = vld [vmem:[%s13428_s4 + $0x30] ss:$8 sps:$4 sm:$0xff]   ;;  %v11372_v17 = vld [vmem:[%s13428_s4 + $0x44] ss:$8 sps:$4 sm:$0xff]  }
  0x49   : > { %v11368_v14 = vld [vmem:[%s13428_s4 + $0x1334] ss:$8 sps:$4 sm:$0xff]   ;;  %v11371_v16 = vld [vmem:[%s13428_s4 + $0x1330] ss:$8 sps:$4 sm:$0xff]   ;;  %v11374_v18 = vld [vmem:[%s13428_s4 + $0x1344] ss:$8 sps:$4 sm:$0xff]  }
  0x4a   : > { %8144 = vmatpush1.bf16.msra.mxu1 %v11358_v7  ;;  %v11376_v19 = vld [vmem:[%s13428_s4 + $0x40] ss:$8 sps:$4 sm:$0xff]   ;;  %v11378_v21 = vld [vmem:[%s13428_s4 + $0x54] ss:$8 sps:$4 sm:$0xff]   ;;  %v11382_v23 = vld [vmem:[%s13428_s4 + $0x50] ss:$8 sps:$4 sm:$0xff]  }
  0x4b   : > { %8923 = vmatpush1.bf16.msra.mxu0 %v11359_v8  ;;  %8145 = vmatprep.subr.bf16.mxu1 %v11360_v9  ;;  %v11377_v20 = vld [vmem:[%s13428_s4 + $0x1340] ss:$8 sps:$4 sm:$0xff]   ;;  %v11380_v22 = vld [vmem:[%s13428_s4 + $0x1354] ss:$8 sps:$4 sm:$0xff]   ;;  %v11383_v24 = vld [vmem:[%s13428_s4 + $0x1350] ss:$8 sps:$4 sm:$0xff]  }
  0x4c   : > { %8924 = vmatprep.subr.bf16.mxu0 %v11362_v10  ;;  %v11384_v25 = vld [vmem:[%s13428_s4 + $0x64] ss:$8 sps:$4 sm:$0xff]   ;;  %v11388_v27 = vld [vmem:[%s13428_s4 + $0x60] ss:$8 sps:$4 sm:$0xff]   ;;  %v11390_v29 = vld [vmem:[%s13428_s4 + $0x74] ss:$8 sps:$4 sm:$0xff]  }
  0x4d   : > { %v11386_v26 = vld [vmem:[%s13428_s4 + $0x1364] ss:$8 sps:$4 sm:$0xff]   ;;  %v11389_v28 = vld [vmem:[%s13428_s4 + $0x1360] ss:$8 sps:$4 sm:$0xff]   ;;  %v11392_v30 = vld [vmem:[%s13428_s4 + $0x1374] ss:$8 sps:$4 sm:$0xff]  }
  0x4e   : > { %8146 = vmatpush1.bf16.msra.mxu1 %v11364_v11  ;;  %v11394_v31 = vld [vmem:[%s13428_s4 + $0x70] ss:$8 sps:$4 sm:$0xff]   ;;  %v11396_v33 = vld [vmem:[%s13428_s4 + $0x84] ss:$8 sps:$4 sm:$0xff]   ;;  %v11400_v35 = vld [vmem:[%s13428_s4 + $0x80] ss:$8 sps:$4 sm:$0xff]  }
  0x4f   : > { %8925 = vmatpush1.bf16.msra.mxu0 %v11365_v12  ;;  %8147 = vmatprep.subr.bf16.mxu1 %v11366_v13  ;;  %v11395_v32 = vld [vmem:[%s13428_s4 + $0x1370] ss:$8 sps:$4 sm:$0xff]   ;;  %v11398_v34 = vld [vmem:[%s13428_s4 + $0x1384] ss:$8 sps:$4 sm:$0xff]   ;;  %v11401_v36 = vld [vmem:[%s13428_s4 + $0x1380] ss:$8 sps:$4 sm:$0xff]  }
  0x50   : > { %8926 = vmatprep.subr.bf16.mxu0 %v11368_v14  ;;  %v11402_v37 = vld [vmem:[%s13428_s4 + $0x94] ss:$8 sps:$4 sm:$0xff]   ;;  %v13292_v39 = vmov 1966171168   ;;  %v11406_v42 = vld [vmem:[%s13428_s4 + $0x90] ss:$8 sps:$4 sm:$0xff]  }
  0x51   : > { %v11404_v38 = vld [vmem:[%s13428_s4 + $0x1394] ss:$8 sps:$4 sm:$0xff]   ;;  %v1522_v40 = vunpack.c.l.s4 %v13292_v39  ;;  %v11407_v43 = vld [vmem:[%s13428_s4 + $0x1390] ss:$8 sps:$4 sm:$0xff]   ;;  %v11408_v44 = vld [vmem:[%s13428_s4 + $0xa4] ss:$8 sps:$4 sm:$0xff]  }
  0x52   : > { %8148 = vmatpush1.bf16.msra.mxu1 %v11370_v15  ;;  %v11410_v45 = vld [vmem:[%s13428_s4 + $0x13a4] ss:$8 sps:$4 sm:$0xff]   ;;  %v13494_v47 = vshrl.u32 %v1524_v41, 7  ;;  %v11412_v48 = vld [vmem:[%s13428_s4 + $0xa0] ss:$8 sps:$4 sm:$0xff]   ;;  %p11117_p6 = scmp.ne.s32.totalorder %s13269_s15, 27 }
  0x53   : > { %8927 = vmatpush1.bf16.msra.mxu0 %v11371_v16  ;;  %8149 = vmatprep.subr.bf16.mxu1 %v11372_v17  ;;  %v1523_v46 = vunpack.c.0.s8 %v1522_v40  ;;  %v11413_v49 = vld [vmem:[%s13428_s4 + $0x13a0] ss:$8 sps:$4 sm:$0xff]   ;;  %v11414_v50 = vld [vmem:[%s13428_s4 + $0xb4] ss:$8 sps:$4 sm:$0xff]   ;;  %v11418_v54 = vld [vmem:[%s13428_s4 + $0xb0] ss:$8 sps:$4 sm:$0xff]  }
  0x54   : > { %8928 = vmatprep.subr.bf16.mxu0 %v11374_v18  ;;  %v11416_v51 = vld [vmem:[%s13428_s4 + $0x13b4] ss:$8 sps:$4 sm:$0xff]   ;;  %v11419_v56 = vld [vmem:[%s13428_s4 + $0x13b0] ss:$8 sps:$4 sm:$0xff]   ;;  %v11420_v58 = vld [vmem:[%s13428_s4 + $0xc4] ss:$8 sps:$4 sm:$0xff]  }
  0x55   : > { %v13501_v52 = vsub.s32 %v1523_v46, %v13494_v47  ;;  %v13504_v53 = vld [vmem:[%s13449_s12] sm:$0xff]  ;;  %v11422_v59 = vld [vmem:[%s13428_s4 + $0x13c4] ss:$8 sps:$4 sm:$0xff]   ;;  %v11430_v6 = vld [vmem:[%s13428_s4 + $0xd0] ss:$8 sps:$4 sm:$0xff]  }
  0x56   : > { %8150 = vmatpush1.bf16.msra.mxu1 %v11376_v19  ;;  %v288_v57 = vld [vmem:[%s13449_s12 + $0x20] sm:$0xff]  ;;  %v11431_v7 = vld [vmem:[%s13428_s4 + $0x13d0] ss:$8 sps:$4 sm:$0xff]   ;;  %v11432_v8 = vld [vmem:[%s13428_s4 + $0xe4] ss:$8 sps:$4 sm:$0xff]  }
  0x57   : > { %8929 = vmatpush1.bf16.msra.mxu0 %v11377_v20  ;;  %8151 = vmatprep.subr.bf16.mxu1 %v11378_v21  ;;  %v1527_v55 = vrot.slane %v13504_v53, %v13501_v52  ;;  %v1716_v61 = vcombine.high %v288_v57, %v288_v57  ;;  %v11424_v0 = vld [vmem:[%s13428_s4 + $0xc0] ss:$8 sps:$4 sm:$0xff]   ;;  %v11426_v2 = vld [vmem:[%s13428_s4 + $0xd4] ss:$8 sps:$4 sm:$0xff]   ;;  %v11434_v9 = vld [vmem:[%s13428_s4 + $0x13e4] ss:$8 sps:$4 sm:$0xff]  }
  0x58   : > { %8930 = vmatprep.subr.bf16.mxu0 %v11380_v22  ;;  %v11425_v1 = vld [vmem:[%s13428_s4 + $0x13c0] ss:$8 sps:$4 sm:$0xff]   ;;  %v11428_v3 = vld [vmem:[%s13428_s4 + $0x13d4] ss:$8 sps:$4 sm:$0xff]   ;;  %v11442_v16 = vld [vmem:[%s13428_s4 + $0xf0] ss:$8 sps:$4 sm:$0xff]  }
  0x59   : > { %v1535_v60 = vcombine.high %v1527_v55, %v1527_v55  ;;  %v1730_v63 = vrot.slane %v1716_v61, %v13501_v52  ;;  %v11436_v11 = vld [vmem:[%s13428_s4 + $0xe0] ss:$8 sps:$4 sm:$0xff]   ;;  %v11438_v13 = vld [vmem:[%s13428_s4 + $0xf4] ss:$8 sps:$4 sm:$0xff]   ;;  %v11443_v17 = vld [vmem:[%s13428_s4 + $0x13f0] ss:$8 sps:$4 sm:$0xff]   ;;  %v13540_v20 = vrot.slane %v1527_v55, %v13501_v52 }
  0x5a   : > { %8152 = vmatpush1.bf16.msra.mxu1 %v11382_v23  ;;  %v11437_v12 = vld [vmem:[%s13428_s4 + $0x13e0] ss:$8 sps:$4 sm:$0xff]   ;;  %v11440_v14 = vld [vmem:[%s13428_s4 + $0x13f4] ss:$8 sps:$4 sm:$0xff]   ;;  %v11447_v18 = vld [vmem:[%s13428_s4 + $0x104] ss:$8 sps:$4 sm:$0xff]  }
  0x5b   : > { %8931 = vmatpush1.bf16.msra.mxu0 %v11383_v24  ;;  %8153 = vmatprep.subr.bf16.mxu1 %v11384_v25  ;;  %v1557_v62 = vrot.slane %v1535_v60, %v13501_v52  ;;  %v1732_v4 = vcombine.high %v1730_v63, %v1730_v63  ;;  %v13533_v15 = vrot.slane %v1730_v63, %v13501_v52  ;;  %v11451_v19 = vld [vmem:[%s13428_s4 + $0x1404] ss:$8 sps:$4 sm:$0xff]   ;;  %v11445_v22 = vld [vmem:[%s13428_s4 + $0x100] ss:$8 sps:$4 sm:$0xff]   ;;  %v11454_v24 = vld [vmem:[%s13428_s4 + $0x114] ss:$8 sps:$4 sm:$0xff]  }
  0x5c   : > { %8932 = vmatprep.subr.bf16.mxu0 %v11386_v26  ;;  %v11449_v23 = vld [vmem:[%s13428_s4 + $0x1400] ss:$8 sps:$4 sm:$0xff]   ;;  %v11457_v25 = vld [vmem:[%s13428_s4 + $0x1414] ss:$8 sps:$4 sm:$0xff]   ;;  %v11487_v46 = vld [vmem:[%s13428_s4 + $0x1464] ss:$8 sps:$4 sm:$0xff]  }
  0x5d   : > { %8173 = vmatprep.mubr.bf16.mxu1 %v1557_v62  ;;  %v13520_v5 = vrot.slane %v1732_v4, %v13501_v52  ;;  %v1762_v21 = vcombine.high %v13533_v15, %v13533_v15  ;;  %v1567_v26 = vcombine.high %v1557_v62, %v1557_v62  ;;  %v11470_v39 = vld [vmem:[%s13428_s4 + $0x140] ss:$8 sps:$4 sm:$0xff]   ;;  %v11478_v41 = vld [vmem:[%s13428_s4 + $0x154] ss:$8 sps:$4 sm:$0xff]   ;;  %v11488_v57 = vld [vmem:[%s13428_s4 + $0x170] ss:$8 sps:$4 sm:$0xff]  }
  0x5e   : > { %8154 = vmatpush1.bf16.msra.mxu1 %v11388_v27  ;;  %v11452_v27 = vld [vmem:[%s13428_s4 + $0x110] ss:$8 sps:$4 sm:$0xff]   ;;  %v11473_v40 = vld [vmem:[%s13428_s4 + $0x1440] ss:$8 sps:$4 sm:$0xff]   ;;  %v11493_v55 = vld [vmem:[%s13428_s4 + $0x1474] ss:$8 sps:$4 sm:$0xff]  }
  0x5f   : > { %8933 = vmatpush1.bf16.msra.mxu0 %v11389_v28  ;;  %8155 = vmatprep.subr.bf16.mxu1 %v11390_v29  ;;  %v1764_v10 = vcombine.high %v13520_v5, %v13520_v5  ;;  %v11455_v28 = vld [vmem:[%s13428_s4 + $0x1410] ss:$8 sps:$4 sm:$0xff]   ;;  %v11460_v29 = vld [vmem:[%s13428_s4 + $0x124] ss:$8 sps:$4 sm:$0xff]   ;;  %v11494_v62 = vld [vmem:[%s13428_s4 + $0x180] ss:$8 sps:$4 sm:$0xff]  }
  0x60   : > { %8934 = vmatprep.subr.bf16.mxu0 %v11392_v30  ;;  %v11463_v30 = vld [vmem:[%s13428_s4 + $0x1424] ss:$8 sps:$4 sm:$0xff]   ;;  %v11497_v63 = vld [vmem:[%s13428_s4 + $0x1480] ss:$8 sps:$4 sm:$0xff]  }
  0x61   : > { %8952 = vmatprep.mubr.bf16.mxu0 %v1764_v10  ;;  %v11499_v61 = vld [vmem:[%s13428_s4 + $0x1484] ss:$8 sps:$4 sm:$0xff]   ;;  %v11517_v10 = vld [vmem:[%s13428_s4 + $0x14b4] ss:$8 sps:$4 sm:$0xff]  }
  0x62   : > { %8156 = vmatpush1.bf16.msra.mxu1 %v11394_v31  ;;  %v11458_v31 = vld [vmem:[%s13428_s4 + $0x120] ss:$8 sps:$4 sm:$0xff]   ;;  %v11508_v4 = vld [vmem:[%s13428_s4 + $0x1a4] ss:$8 sps:$4 sm:$0xff]  }
  0x63   : > { %8935 = vmatpush1.bf16.msra.mxu0 %v11395_v32  ;;  %8157 = vmatprep.subr.bf16.mxu1 %v11396_v33  ;;  %v11461_v32 = vld [vmem:[%s13428_s4 + $0x1420] ss:$8 sps:$4 sm:$0xff]   ;;  %v11466_v33 = vld [vmem:[%s13428_s4 + $0x134] ss:$8 sps:$4 sm:$0xff]  }
  0x64   : > { %8936 = vmatprep.subr.bf16.mxu0 %v11398_v34  ;;  %v11469_v34 = vld [vmem:[%s13428_s4 + $0x1434] ss:$8 sps:$4 sm:$0xff]  }
  0x66   : > { %8158 = vmatpush1.bf16.msra.mxu1 %v11400_v35  ;;  %v11464_v35 = vld [vmem:[%s13428_s4 + $0x130] ss:$8 sps:$4 sm:$0xff]  }
  0x67   : > { %8937 = vmatpush1.bf16.msra.mxu0 %v11401_v36  ;;  %8159 = vmatprep.subr.bf16.mxu1 %v11402_v37  ;;  %v11467_v36 = vld [vmem:[%s13428_s4 + $0x1430] ss:$8 sps:$4 sm:$0xff]   ;;  %v11472_v37 = vld [vmem:[%s13428_s4 + $0x144] ss:$8 sps:$4 sm:$0xff]  }
  0x68   : > { %8938 = vmatprep.subr.bf16.mxu0 %v11404_v38  ;;  %v11475_v38 = vld [vmem:[%s13428_s4 + $0x1444] ss:$8 sps:$4 sm:$0xff]  }
  0x6a   : > { %8160 = vmatpush1.bf16.msra.mxu1 %v11406_v42  ;;  %v11481_v42 = vld [vmem:[%s13428_s4 + $0x1454] ss:$8 sps:$4 sm:$0xff]  }
  0x6b   : > { %8939 = vmatpush1.bf16.msra.mxu0 %v11407_v43  ;;  %8161 = vmatprep.subr.bf16.mxu1 %v11408_v44  ;;  %v11476_v43 = vld [vmem:[%s13428_s4 + $0x150] ss:$8 sps:$4 sm:$0xff]  }
  0x6c   : > { %8940 = vmatprep.subr.bf16.mxu0 %v11410_v45  ;;  %v11479_v44 = vld [vmem:[%s13428_s4 + $0x1450] ss:$8 sps:$4 sm:$0xff]   ;;  %v11484_v45 = vld [vmem:[%s13428_s4 + $0x164] ss:$8 sps:$4 sm:$0xff]  }
  0x6e   : > { %8162 = vmatpush1.bf16.msra.mxu1 %v11412_v48  ;;  %v11482_v48 = vld [vmem:[%s13428_s4 + $0x160] ss:$8 sps:$4 sm:$0xff]  }
  0x6f   : > { %8941 = vmatpush1.bf16.msra.mxu0 %v11413_v49  ;;  %8163 = vmatprep.subr.bf16.mxu1 %v11414_v50  ;;  %v13571_v49 = vld [vmem:[%s13449_s12 + $0x28] sm:$0xff] }
  0x70   : > { %8942 = vmatprep.subr.bf16.mxu0 %v11416_v51  ;;  %v11485_v50 = vld [vmem:[%s13428_s4 + $0x1460] ss:$8 sps:$4 sm:$0xff]   ;;  %v11490_v51 = vld [vmem:[%s13428_s4 + $0x174] ss:$8 sps:$4 sm:$0xff]  }
  0x72   : > { %8164 = vmatpush1.bf16.msra.mxu1 %v11418_v54  ;;  %v13577_v54 = vrot.slane %v13571_v49, %v13501_v52 }
  0x73   : > { %8943 = vmatpush1.bf16.msra.mxu0 %v11419_v56  ;;  %8165 = vmatprep.subr.bf16.mxu1 %v11420_v58  ;;  %v11491_v58 = vld [vmem:[%s13428_s4 + $0x1470] ss:$8 sps:$4 sm:$0xff]  }
  0x74   : > { %8944 = vmatprep.subr.bf16.mxu0 %v11422_v59  ;;  %v1780_v56 = vcombine.high %v13577_v54, %v13577_v54  ;;  %v11496_v59 = vld [vmem:[%s13428_s4 + $0x184] ss:$8 sps:$4 sm:$0xff]  }
  0x76   : > { %8166 = vmatpush1.bf16.msra.mxu1 %v11424_v0  ;;  %v13586_v60 = vrot.slane %v1780_v56, %v13501_v52  ;;  %v11502_v0 = vld [vmem:[%s13428_s4 + $0x194] ss:$8 sps:$4 sm:$0xff]   ;;  %v11568_v56 = vld [vmem:[%s13428_s4 + $0x244] ss:$8 sps:$4 sm:$0xff]  }
  0x77   : > { %8945 = vmatpush1.bf16.msra.mxu0 %v11425_v1  ;;  %8167 = vmatprep.subr.bf16.mxu1 %v11426_v2  ;;  %v11505_v1 = vld [vmem:[%s13428_s4 + $0x1494] ss:$8 sps:$4 sm:$0xff]   ;;  %v11500_v2 = vld [vmem:[%s13428_s4 + $0x190] ss:$8 sps:$4 sm:$0xff]  }
  0x78   : > { %8946 = vmatprep.subr.bf16.mxu0 %v11428_v3  ;;  %v11503_v3 = vld [vmem:[%s13428_s4 + $0x1490] ss:$8 sps:$4 sm:$0xff]  }
  0x7a   : > { %8168 = vmatpush1.bf16.msra.mxu1 %v11430_v6  ;;  %v11511_v6 = vld [vmem:[%s13428_s4 + $0x14a4] ss:$8 sps:$4 sm:$0xff]  }
  0x7b   : > { %8947 = vmatpush1.bf16.msra.mxu0 %v11431_v7  ;;  %8169 = vmatprep.subr.bf16.mxu1 %v11432_v8  ;;  %v11506_v7 = vld [vmem:[%s13428_s4 + $0x1a0] ss:$8 sps:$4 sm:$0xff]  }
  0x7c   : > { %8948 = vmatprep.subr.bf16.mxu0 %v11434_v9  ;;  %v11509_v8 = vld [vmem:[%s13428_s4 + $0x14a0] ss:$8 sps:$4 sm:$0xff]   ;;  %v11514_v9 = vld [vmem:[%s13428_s4 + $0x1b4] ss:$8 sps:$4 sm:$0xff]  }
  0x7e   : > { %8170 = vmatpush1.bf16.msra.mxu1 %v11436_v11  ;;  %v11512_v11 = vld [vmem:[%s13428_s4 + $0x1b0] ss:$8 sps:$4 sm:$0xff]  }
  0x7f   : > { %8949 = vmatpush1.bf16.msra.mxu0 %v11437_v12  ;;  %8171 = vmatprep.subr.bf16.mxu1 %v11438_v13  ;;  %v11515_v12 = vld [vmem:[%s13428_s4 + $0x14b0] ss:$8 sps:$4 sm:$0xff]   ;;  %v11520_v13 = vld [vmem:[%s13428_s4 + $0x1c4] ss:$8 sps:$4 sm:$0xff]  }
  0x80   : > { %8950 = vmatprep.subr.bf16.mxu0 %v11440_v14  ;;  %v11523_v14 = vld [vmem:[%s13428_s4 + $0x14c4] ss:$8 sps:$4 sm:$0xff]  }
  0x82   : > { %8172 = vmatpush1.bf16.msra.mxu1 %v11442_v16  ;;  %v11518_v16 = vld [vmem:[%s13428_s4 + $0x1c0] ss:$8 sps:$4 sm:$0xff]  }
  0x83   : > { %8951 = vmatpush1.bf16.msra.mxu0 %v11443_v17  ;;  %8182 = vmatprep.subr.bf16.mxu1 %v11447_v18  ;;  %v11521_v17 = vld [vmem:[%s13428_s4 + $0x14c0] ss:$8 sps:$4 sm:$0xff]   ;;  %v11526_v18 = vld [vmem:[%s13428_s4 + $0x1d4] ss:$8 sps:$4 sm:$0xff]  }
  0x84   : > { %8961 = vmatprep.subr.bf16.mxu0 %v11451_v19  ;;  %v11529_v19 = vld [vmem:[%s13428_s4 + $0x14d4] ss:$8 sps:$4 sm:$0xff]  }
  0x85   : > { %8174 = vmatmul.mubr.bf16.vlgmr.msra.gmra.mrb[0].mxu1 %v13540_v20 }
  0x86   : > { %8953 = vmatmul.mubr.bf16.vlgmr.msra.gmra.mrb[0].mxu0 %v1762_v21  ;;  %8183 = vmatpush1.bf16.msra.mxu1 %v11445_v22  ;;  %v11524_v21 = vld [vmem:[%s13428_s4 + $0x1d0] ss:$8 sps:$4 sm:$0xff]  }
  0x87   : > { %8962 = vmatpush1.bf16.msra.mxu0 %v11449_v23  ;;  %8184 = vmatprep.subr.bf16.mxu1 %v11454_v24  ;;  %v11527_v22 = vld [vmem:[%s13428_s4 + $0x14d0] ss:$8 sps:$4 sm:$0xff]   ;;  %v11532_v23 = vld [vmem:[%s13428_s4 + $0x1e4] ss:$8 sps:$4 sm:$0xff]  }
  0x88   : > { %8963 = vmatprep.subr.bf16.mxu0 %v11457_v25  ;;  %8214 = vmatprep.mubr.bf16.mxu1 %v1567_v26  ;;  %v11535_v24 = vld [vmem:[%s13428_s4 + $0x14e4] ss:$8 sps:$4 sm:$0xff]   ;;  %v1520_v25 = vcombine.high %v13504_v53, %v13504_v53  ;;  %v11530_v26 = vld [vmem:[%s13428_s4 + $0x1e0] ss:$8 sps:$4 sm:$0xff]   ;;  %v11539_v53 = vld [vmem:[%s13428_s4 + $0x14f0] ss:$8 sps:$4 sm:$0xff]  }
  0x89   : > { %8993 = vmatprep.mubr.bf16.mxu0 %v13586_v60 }
  0x8a   : > { %8185 = vmatpush1.bf16.msra.mxu1 %v11452_v27  ;;  %v11533_v27 = vld [vmem:[%s13428_s4 + $0x14e0] ss:$8 sps:$4 sm:$0xff]  }
  0x8b   : > { %8964 = vmatpush1.bf16.msra.mxu0 %v11455_v28  ;;  %8186 = vmatprep.subr.bf16.mxu1 %v11460_v29  ;;  %v11538_v28 = vld [vmem:[%s13428_s4 + $0x1f4] ss:$8 sps:$4 sm:$0xff]  }
  0x8c   : > { %8965 = vmatprep.subr.bf16.mxu0 %v11463_v30  ;;  %v11541_v29 = vld [vmem:[%s13428_s4 + $0x14f4] ss:$8 sps:$4 sm:$0xff]   ;;  %v13621_v30 = vrot.slane %v1520_v25, %v13501_v52  ;;  %v11608_v25 = vld [vmem:[%s13428_s4 + $0x2b0] ss:$8 sps:$4 sm:$0xff]  }
  0x8e   : > { %8187 = vmatpush1.bf16.msra.mxu1 %v11458_v31  ;;  %v11536_v31 = vld [vmem:[%s13428_s4 + $0x1f0] ss:$8 sps:$4 sm:$0xff]  }
  0x8f   : > { %8966 = vmatpush1.bf16.msra.mxu0 %v11461_v32  ;;  %8188 = vmatprep.subr.bf16.mxu1 %v11466_v33  ;;  %v11544_v32 = vld [vmem:[%s13428_s4 + $0x204] ss:$8 sps:$4 sm:$0xff]  }
  0x90   : > { %8967 = vmatprep.subr.bf16.mxu0 %v11469_v34  ;;  %v11547_v33 = vld [vmem:[%s13428_s4 + $0x1504] ss:$8 sps:$4 sm:$0xff]   ;;  %v1536_v34 = vcombine.high %v13621_v30, %v13621_v30 }
  0x92   : > { %8189 = vmatpush1.bf16.msra.mxu1 %v11464_v35  ;;  %v1565_v35 = vcombine.high %v13540_v20, %v13540_v20  ;;  %v1812_v20 = vcombine.high %v13586_v60, %v13586_v60  ;;  %v11574_v60 = vld [vmem:[%s13428_s4 + $0x254] ss:$8 sps:$4 sm:$0xff]  }
  0x93   : > { %8968 = vmatpush1.bf16.msra.mxu0 %v11467_v36  ;;  %8190 = vmatprep.subr.bf16.mxu1 %v11472_v37  ;;  %v11542_v36 = vld [vmem:[%s13428_s4 + $0x200] ss:$8 sps:$4 sm:$0xff]   ;;  %v13634_v37 = vrot.slane %v13577_v54, %v13501_v52  ;;  %v11560_v54 = vld [vmem:[%s13428_s4 + $0x230] ss:$8 sps:$4 sm:$0xff]  }
  0x94   : > { %8969 = vmatprep.subr.bf16.mxu0 %v11475_v38  ;;  %v11545_v38 = vld [vmem:[%s13428_s4 + $0x1500] ss:$8 sps:$4 sm:$0xff]  }
  0x96   : > { %8191 = vmatpush1.bf16.msra.mxu1 %v11470_v39  ;;  %v11550_v39 = vld [vmem:[%s13428_s4 + $0x214] ss:$8 sps:$4 sm:$0xff]  }
  0x97   : > { %8970 = vmatpush1.bf16.msra.mxu0 %v11473_v40  ;;  %8192 = vmatprep.subr.bf16.mxu1 %v11478_v41  ;;  %v11553_v40 = vld [vmem:[%s13428_s4 + $0x1514] ss:$8 sps:$4 sm:$0xff]   ;;  %v13640_v41 = vrot.slane %v1536_v34, %v13501_v52  ;;  %v11623_v34 = vld [vmem:[%s13428_s4 + $0x15d0] ss:$8 sps:$4 sm:$0xff]  }
  0x98   : > { %8971 = vmatprep.subr.bf16.mxu0 %v11481_v42  ;;  %v11548_v42 = vld [vmem:[%s13428_s4 + $0x210] ss:$8 sps:$4 sm:$0xff]  }
  0x9a   : > { %8193 = vmatpush1.bf16.msra.mxu1 %v11476_v43  ;;  %v11551_v43 = vld [vmem:[%s13428_s4 + $0x1510] ss:$8 sps:$4 sm:$0xff]  }
  0x9b   : > { %8972 = vmatpush1.bf16.msra.mxu0 %v11479_v44  ;;  %8194 = vmatprep.subr.bf16.mxu1 %v11484_v45  ;;  %v11556_v44 = vld [vmem:[%s13428_s4 + $0x224] ss:$8 sps:$4 sm:$0xff]  }
  0x9c   : > { %8973 = vmatprep.subr.bf16.mxu0 %v11487_v46  ;;  %v11559_v45 = vld [vmem:[%s13428_s4 + $0x1524] ss:$8 sps:$4 sm:$0xff]   ;;  %v11554_v46 = vld [vmem:[%s13428_s4 + $0x220] ss:$8 sps:$4 sm:$0xff]  }
  0x9e   : > { %8195 = vmatpush1.bf16.msra.mxu1 %v11482_v48  ;;  %v11557_v48 = vld [vmem:[%s13428_s4 + $0x1520] ss:$8 sps:$4 sm:$0xff]  }
  0x9f   : > { %8974 = vmatpush1.bf16.msra.mxu0 %v11485_v50  ;;  %8196 = vmatprep.subr.bf16.mxu1 %v11490_v51  ;;  %v11562_v50 = vld [vmem:[%s13428_s4 + $0x234] ss:$8 sps:$4 sm:$0xff]  }
  0xa0   : > { %8975 = vmatprep.subr.bf16.mxu0 %v11493_v55  ;;  %v11565_v51 = vld [vmem:[%s13428_s4 + $0x1534] ss:$8 sps:$4 sm:$0xff]   ;;  %v11563_v55 = vld [vmem:[%s13428_s4 + $0x1530] ss:$8 sps:$4 sm:$0xff]  }
  0xa2   : > { %8197 = vmatpush1.bf16.msra.mxu1 %v11488_v57  ;;  %v11571_v57 = vld [vmem:[%s13428_s4 + $0x1544] ss:$8 sps:$4 sm:$0xff]  }
  0xa3   : > { %8976 = vmatpush1.bf16.msra.mxu0 %v11491_v58  ;;  %8198 = vmatprep.subr.bf16.mxu1 %v11496_v59  ;;  %v11566_v58 = vld [vmem:[%s13428_s4 + $0x240] ss:$8 sps:$4 sm:$0xff]  }
  0xa4   : > { %8977 = vmatprep.subr.bf16.mxu0 %v11499_v61  ;;  %v11569_v59 = vld [vmem:[%s13428_s4 + $0x1540] ss:$8 sps:$4 sm:$0xff]   ;;  %v11577_v61 = vld [vmem:[%s13428_s4 + $0x1554] ss:$8 sps:$4 sm:$0xff]  }
  0xa6   : > { %8199 = vmatpush1.bf16.msra.mxu1 %v11494_v62  ;;  %v11572_v62 = vld [vmem:[%s13428_s4 + $0x250] ss:$8 sps:$4 sm:$0xff]  }
  0xa7   : > { %8978 = vmatpush1.bf16.msra.mxu0 %v11497_v63  ;;  %8200 = vmatprep.subr.bf16.mxu1 %v11502_v0  ;;  %v11575_v63 = vld [vmem:[%s13428_s4 + $0x1550] ss:$8 sps:$4 sm:$0xff]   ;;  %v11580_v0 = vld [vmem:[%s13428_s4 + $0x264] ss:$8 sps:$4 sm:$0xff]  }
  0xa8   : > { %8979 = vmatprep.subr.bf16.mxu0 %v11505_v1  ;;  %v11583_v1 = vld [vmem:[%s13428_s4 + $0x1564] ss:$8 sps:$4 sm:$0xff]  }
  0xaa   : > { %8201 = vmatpush1.bf16.msra.mxu1 %v11500_v2  ;;  %v11578_v2 = vld [vmem:[%s13428_s4 + $0x260] ss:$8 sps:$4 sm:$0xff]  }
  0xab   : > { %8980 = vmatpush1.bf16.msra.mxu0 %v11503_v3  ;;  %8202 = vmatprep.subr.bf16.mxu1 %v11508_v4  ;;  %v11581_v3 = vld [vmem:[%s13428_s4 + $0x1560] ss:$8 sps:$4 sm:$0xff]   ;;  %v11586_v4 = vld [vmem:[%s13428_s4 + $0x274] ss:$8 sps:$4 sm:$0xff]  }
  0xac   : > { %8981 = vmatprep.subr.bf16.mxu0 %v11511_v6  ;;  %v11589_v6 = vld [vmem:[%s13428_s4 + $0x1574] ss:$8 sps:$4 sm:$0xff]  }
  0xae   : > { %8203 = vmatpush1.bf16.msra.mxu1 %v11506_v7  ;;  %v11584_v7 = vld [vmem:[%s13428_s4 + $0x270] ss:$8 sps:$4 sm:$0xff]  }
  0xaf   : > { %8982 = vmatpush1.bf16.msra.mxu0 %v11509_v8  ;;  %8204 = vmatprep.subr.bf16.mxu1 %v11514_v9  ;;  %v11587_v8 = vld [vmem:[%s13428_s4 + $0x1570] ss:$8 sps:$4 sm:$0xff]   ;;  %v11592_v9 = vld [vmem:[%s13428_s4 + $0x284] ss:$8 sps:$4 sm:$0xff]  }
  0xb0   : > { %8983 = vmatprep.subr.bf16.mxu0 %v11517_v10  ;;  %v11595_v10 = vld [vmem:[%s13428_s4 + $0x1584] ss:$8 sps:$4 sm:$0xff]  }
  0xb2   : > { %8205 = vmatpush1.bf16.msra.mxu1 %v11512_v11  ;;  %v11590_v11 = vld [vmem:[%s13428_s4 + $0x280] ss:$8 sps:$4 sm:$0xff]  }
  0xb3   : > { %8984 = vmatpush1.bf16.msra.mxu0 %v11515_v12  ;;  %8206 = vmatprep.subr.bf16.mxu1 %v11520_v13  ;;  %v11593_v12 = vld [vmem:[%s13428_s4 + $0x1580] ss:$8 sps:$4 sm:$0xff]   ;;  %v11598_v13 = vld [vmem:[%s13428_s4 + $0x294] ss:$8 sps:$4 sm:$0xff]  }
  0xb4   : > { %8985 = vmatprep.subr.bf16.mxu0 %v11523_v14  ;;  %v11601_v14 = vld [vmem:[%s13428_s4 + $0x1594] ss:$8 sps:$4 sm:$0xff]  }
  0xb6   : > { %8207 = vmatpush1.bf16.msra.mxu1 %v11518_v16  ;;  %v11596_v16 = vld [vmem:[%s13428_s4 + $0x290] ss:$8 sps:$4 sm:$0xff]  }
  0xb7   : > { %8986 = vmatpush1.bf16.msra.mxu0 %v11521_v17  ;;  %8208 = vmatprep.subr.bf16.mxu1 %v11526_v18  ;;  %v11599_v17 = vld [vmem:[%s13428_s4 + $0x1590] ss:$8 sps:$4 sm:$0xff]   ;;  %v11604_v18 = vld [vmem:[%s13428_s4 + $0x2a4] ss:$8 sps:$4 sm:$0xff]  }
  0xb8   : > { %8987 = vmatprep.subr.bf16.mxu0 %v11529_v19  ;;  %v11607_v19 = vld [vmem:[%s13428_s4 + $0x15a4] ss:$8 sps:$4 sm:$0xff]  }
  0xba   : > { %8209 = vmatpush1.bf16.msra.mxu1 %v11524_v21  ;;  %v11602_v21 = vld [vmem:[%s13428_s4 + $0x2a0] ss:$8 sps:$4 sm:$0xff]  }
  0xbb   : > { %8988 = vmatpush1.bf16.msra.mxu0 %v11527_v22  ;;  %8210 = vmatprep.subr.bf16.mxu1 %v11532_v23  ;;  %v11605_v22 = vld [vmem:[%s13428_s4 + $0x15a0] ss:$8 sps:$4 sm:$0xff]   ;;  %v11610_v23 = vld [vmem:[%s13428_s4 + $0x2b4] ss:$8 sps:$4 sm:$0xff]  }
  0xbc   : > { %8989 = vmatprep.subr.bf16.mxu0 %v11535_v24  ;;  %v11613_v24 = vld [vmem:[%s13428_s4 + $0x15b4] ss:$8 sps:$4 sm:$0xff]  }
  0xbe   : > { %8211 = vmatpush1.bf16.msra.mxu1 %v11530_v26  ;;  %v11611_v26 = vld [vmem:[%s13428_s4 + $0x15b0] ss:$8 sps:$4 sm:$0xff]  }
  0xbf   : > { %8990 = vmatpush1.bf16.msra.mxu0 %v11533_v27  ;;  %8212 = vmatprep.subr.bf16.mxu1 %v11538_v28  ;;  %v11616_v27 = vld [vmem:[%s13428_s4 + $0x2c4] ss:$8 sps:$4 sm:$0xff]  }
  0xc0   : > { %8991 = vmatprep.subr.bf16.mxu0 %v11541_v29  ;;  %v11619_v28 = vld [vmem:[%s13428_s4 + $0x15c4] ss:$8 sps:$4 sm:$0xff]   ;;  %v11614_v29 = vld [vmem:[%s13428_s4 + $0x2c0] ss:$8 sps:$4 sm:$0xff]  }
  0xc2   : > { %8213 = vmatpush1.bf16.msra.mxu1 %v11536_v31  ;;  %v11617_v31 = vld [vmem:[%s13428_s4 + $0x15c0] ss:$8 sps:$4 sm:$0xff]  }
  0xc3   : > { %8992 = vmatpush1.bf16.msra.mxu0 %v11539_v53  ;;  %8223 = vmatprep.subr.bf16.mxu1 %v11544_v32  ;;  %v11622_v53 = vld [vmem:[%s13428_s4 + $0x2d4] ss:$8 sps:$4 sm:$0xff]  }
  0xc4   : > { %9002 = vmatprep.subr.bf16.mxu0 %v11547_v33  ;;  %v11625_v32 = vld [vmem:[%s13428_s4 + $0x15d4] ss:$8 sps:$4 sm:$0xff]   ;;  %v11620_v33 = vld [vmem:[%s13428_s4 + $0x2d0] ss:$8 sps:$4 sm:$0xff]  }
  0xc5   : > { %8215 = vmatmul.mubr.bf16.vlgmr.msra.gmra.mrb[0].mxu1 %v1565_v35  ;;  %v11628_v35 = vld [vmem:[%s13428_s4 + $0x2e4] ss:$8 sps:$4 sm:$0xff]  }
  0xc6   : > { %8994 = vmatmul.mubr.bf16.vlgmr.msra.gmra.mrb[0].mxu0 %v13634_v37  ;;  %8224 = vmatpush1.bf16.msra.mxu1 %v11542_v36  ;;  %v11631_v36 = vld [vmem:[%s13428_s4 + $0x15e4] ss:$8 sps:$4 sm:$0xff]  }
  0xc7   : > { %9003 = vmatpush1.bf16.msra.mxu0 %v11545_v38  ;;  %8225 = vmatprep.subr.bf16.mxu1 %v11550_v39  ;;  %v1765_v38 = vcombine.high %v13571_v49, %v13571_v49  ;;  %v11626_v39 = vld [vmem:[%s13428_s4 + $0x2e0] ss:$8 sps:$4 sm:$0xff]   ;;  %v11635_v49 = vld [vmem:[%s13428_s4 + $0x15f0] ss:$8 sps:$4 sm:$0xff]  }
  0xc8   : > { %9004 = vmatprep.subr.bf16.mxu0 %v11553_v40  ;;  %8255 = vmatprep.mubr.bf16.mxu1 %v13640_v41  ;;  %v11629_v40 = vld [vmem:[%s13428_s4 + $0x15e0] ss:$8 sps:$4 sm:$0xff]  }
  0xc9   : > { %9034 = vmatprep.mubr.bf16.mxu0 %v1812_v20  ;;  %v11634_v20 = vld [vmem:[%s13428_s4 + $0x2f4] ss:$8 sps:$4 sm:$0xff]  }
  0xca   : > { %8226 = vmatpush1.bf16.msra.mxu1 %v11548_v42  ;;  %v11637_v42 = vld [vmem:[%s13428_s4 + $0x15f4] ss:$8 sps:$4 sm:$0xff]  }
  0xcb   : > { %9005 = vmatpush1.bf16.msra.mxu0 %v11551_v43  ;;  %8227 = vmatprep.subr.bf16.mxu1 %v11556_v44  ;;  %v13705_v43 = vrot.slane %v1765_v38, %v13501_v52  ;;  %v11632_v44 = vld [vmem:[%s13428_s4 + $0x2f0] ss:$8 sps:$4 sm:$0xff]  }
  0xcc   : > { %9006 = vmatprep.subr.bf16.mxu0 %v11559_v45  ;;  %v11640_v45 = vld [vmem:[%s13428_s4 + $0x304] ss:$8 sps:$4 sm:$0xff]   ;;  %v11707_v38 = vld [vmem:[%s13428_s4 + $0x16b0] ss:$8 sps:$4 sm:$0xff]  }
  0xce   : > { %8228 = vmatpush1.bf16.msra.mxu1 %v11554_v46  ;;  %v11643_v46 = vld [vmem:[%s13428_s4 + $0x1604] ss:$8 sps:$4 sm:$0xff]  }
  0xcf   : > { %9007 = vmatpush1.bf16.msra.mxu0 %v11557_v48  ;;  %8229 = vmatprep.subr.bf16.mxu1 %v11562_v50  ;;  %v1781_v48 = vcombine.high %v13705_v43, %v13705_v43  ;;  %v11638_v50 = vld [vmem:[%s13428_s4 + $0x300] ss:$8 sps:$4 sm:$0xff]  }
  0xd0   : > { %9008 = vmatprep.subr.bf16.mxu0 %v11565_v51  ;;  %v13716_v51 = vrot.slane %v13621_v30, %v13501_v52 }
  0xd1   : > { %v13726_v30 = vrot.slane %v1781_v48, %v13501_v52  ;;  %v11724_v48 = vld [vmem:[%s13428_s4 + $0x3e4] ss:$8 sps:$4 sm:$0xff]  }
  0xd2   : > { %8230 = vmatpush1.bf16.msra.mxu1 %v11560_v54  ;;  %v1810_v54 = vcombine.high %v13634_v37, %v13634_v37  ;;  %v11644_v37 = vld [vmem:[%s13428_s4 + $0x310] ss:$8 sps:$4 sm:$0xff]  }
  0xd3   : > { %9009 = vmatpush1.bf16.msra.mxu0 %v11563_v55  ;;  %8231 = vmatprep.subr.bf16.mxu1 %v11568_v56  ;;  %v11641_v55 = vld [vmem:[%s13428_s4 + $0x1600] ss:$8 sps:$4 sm:$0xff]   ;;  %v11646_v56 = vld [vmem:[%s13428_s4 + $0x314] ss:$8 sps:$4 sm:$0xff]  }
  0xd4   : > { %9010 = vmatprep.subr.bf16.mxu0 %v11571_v57  ;;  %v11649_v57 = vld [vmem:[%s13428_s4 + $0x1614] ss:$8 sps:$4 sm:$0xff]  }
  0xd6   : > { %8232 = vmatpush1.bf16.msra.mxu1 %v11566_v58  ;;  %v1568_v58 = vcombine.high %v13640_v41, %v13640_v41  ;;  %v11655_v41 = vld [vmem:[%s13428_s4 + $0x1624] ss:$8 sps:$4 sm:$0xff]  }
  0xd7   : > { %9011 = vmatpush1.bf16.msra.mxu0 %v11569_v59  ;;  %8233 = vmatprep.subr.bf16.mxu1 %v11574_v60  ;;  %v11647_v59 = vld [vmem:[%s13428_s4 + $0x1610] ss:$8 sps:$4 sm:$0xff]   ;;  %v11652_v60 = vld [vmem:[%s13428_s4 + $0x324] ss:$8 sps:$4 sm:$0xff]  }
  0xd8   : > { %9012 = vmatprep.subr.bf16.mxu0 %v11577_v61  ;;  %v11650_v61 = vld [vmem:[%s13428_s4 + $0x320] ss:$8 sps:$4 sm:$0xff]  }
  0xda   : > { %8234 = vmatpush1.bf16.msra.mxu1 %v11572_v62  ;;  %v11653_v62 = vld [vmem:[%s13428_s4 + $0x1620] ss:$8 sps:$4 sm:$0xff]  }
  0xdb   : > { %9013 = vmatpush1.bf16.msra.mxu0 %v11575_v63  ;;  %8235 = vmatprep.subr.bf16.mxu1 %v11580_v0  ;;  %v11658_v63 = vld [vmem:[%s13428_s4 + $0x334] ss:$8 sps:$4 sm:$0xff]  }
  0xdc   : > { %9014 = vmatprep.subr.bf16.mxu0 %v11583_v1  ;;  %v11661_v0 = vld [vmem:[%s13428_s4 + $0x1634] ss:$8 sps:$4 sm:$0xff]   ;;  %v11656_v1 = vld [vmem:[%s13428_s4 + $0x330] ss:$8 sps:$4 sm:$0xff]  }
  0xde   : > { %8236 = vmatpush1.bf16.msra.mxu1 %v11578_v2  ;;  %v11659_v2 = vld [vmem:[%s13428_s4 + $0x1630] ss:$8 sps:$4 sm:$0xff]  }
  0xdf   : > { %9015 = vmatpush1.bf16.msra.mxu0 %v11581_v3  ;;  %8237 = vmatprep.subr.bf16.mxu1 %v11586_v4  ;;  %v11664_v3 = vld [vmem:[%s13428_s4 + $0x344] ss:$8 sps:$4 sm:$0xff]  }
  0xe0   : > { %9016 = vmatprep.subr.bf16.mxu0 %v11589_v6  ;;  %v11667_v4 = vld [vmem:[%s13428_s4 + $0x1644] ss:$8 sps:$4 sm:$0xff]   ;;  %v11662_v6 = vld [vmem:[%s13428_s4 + $0x340] ss:$8 sps:$4 sm:$0xff]  }
  0xe2   : > { %8238 = vmatpush1.bf16.msra.mxu1 %v11584_v7  ;;  %v11665_v7 = vld [vmem:[%s13428_s4 + $0x1640] ss:$8 sps:$4 sm:$0xff]  }
  0xe3   : > { %9017 = vmatpush1.bf16.msra.mxu0 %v11587_v8  ;;  %8239 = vmatprep.subr.bf16.mxu1 %v11592_v9  ;;  %v11670_v8 = vld [vmem:[%s13428_s4 + $0x354] ss:$8 sps:$4 sm:$0xff]  }
  0xe4   : > { %9018 = vmatprep.subr.bf16.mxu0 %v11595_v10  ;;  %v11673_v9 = vld [vmem:[%s13428_s4 + $0x1654] ss:$8 sps:$4 sm:$0xff]   ;;  %v11668_v10 = vld [vmem:[%s13428_s4 + $0x350] ss:$8 sps:$4 sm:$0xff]  }
  0xe6   : > { %8240 = vmatpush1.bf16.msra.mxu1 %v11590_v11  ;;  %v11671_v11 = vld [vmem:[%s13428_s4 + $0x1650] ss:$8 sps:$4 sm:$0xff]  }
  0xe7   : > { %9019 = vmatpush1.bf16.msra.mxu0 %v11593_v12  ;;  %8241 = vmatprep.subr.bf16.mxu1 %v11598_v13  ;;  %v11676_v12 = vld [vmem:[%s13428_s4 + $0x364] ss:$8 sps:$4 sm:$0xff]  }
  0xe8   : > { %9020 = vmatprep.subr.bf16.mxu0 %v11601_v14  ;;  %v11679_v13 = vld [vmem:[%s13428_s4 + $0x1664] ss:$8 sps:$4 sm:$0xff]   ;;  %v11674_v14 = vld [vmem:[%s13428_s4 + $0x360] ss:$8 sps:$4 sm:$0xff]  }
  0xea   : > { %8242 = vmatpush1.bf16.msra.mxu1 %v11596_v16  ;;  %v11677_v16 = vld [vmem:[%s13428_s4 + $0x1660] ss:$8 sps:$4 sm:$0xff]  }
  0xeb   : > { %9021 = vmatpush1.bf16.msra.mxu0 %v11599_v17  ;;  %8243 = vmatprep.subr.bf16.mxu1 %v11604_v18  ;;  %v11682_v17 = vld [vmem:[%s13428_s4 + $0x374] ss:$8 sps:$4 sm:$0xff]  }
  0xec   : > { %9022 = vmatprep.subr.bf16.mxu0 %v11607_v19  ;;  %v11685_v18 = vld [vmem:[%s13428_s4 + $0x1674] ss:$8 sps:$4 sm:$0xff]   ;;  %v11680_v19 = vld [vmem:[%s13428_s4 + $0x370] ss:$8 sps:$4 sm:$0xff]  }
  0xee   : > { %8244 = vmatpush1.bf16.msra.mxu1 %v11602_v21  ;;  %v11683_v21 = vld [vmem:[%s13428_s4 + $0x1670] ss:$8 sps:$4 sm:$0xff]  }
  0xef   : > { %9023 = vmatpush1.bf16.msra.mxu0 %v11605_v22  ;;  %8245 = vmatprep.subr.bf16.mxu1 %v11610_v23  ;;  %v11688_v22 = vld [vmem:[%s13428_s4 + $0x384] ss:$8 sps:$4 sm:$0xff]  }
  0xf0   : > { %9024 = vmatprep.subr.bf16.mxu0 %v11613_v24  ;;  %v11691_v23 = vld [vmem:[%s13428_s4 + $0x1684] ss:$8 sps:$4 sm:$0xff]   ;;  %v11686_v24 = vld [vmem:[%s13428_s4 + $0x380] ss:$8 sps:$4 sm:$0xff]  }
  0xf2   : > { %8246 = vmatpush1.bf16.msra.mxu1 %v11608_v25  ;;  %v11689_v25 = vld [vmem:[%s13428_s4 + $0x1680] ss:$8 sps:$4 sm:$0xff]  }
  0xf3   : > { %9025 = vmatpush1.bf16.msra.mxu0 %v11611_v26  ;;  %8247 = vmatprep.subr.bf16.mxu1 %v11616_v27  ;;  %v11694_v26 = vld [vmem:[%s13428_s4 + $0x394] ss:$8 sps:$4 sm:$0xff]  }
  0xf4   : > { %9026 = vmatprep.subr.bf16.mxu0 %v11619_v28  ;;  %v11697_v27 = vld [vmem:[%s13428_s4 + $0x1694] ss:$8 sps:$4 sm:$0xff]   ;;  %v11692_v28 = vld [vmem:[%s13428_s4 + $0x390] ss:$8 sps:$4 sm:$0xff]  }
  0xf6   : > { %8248 = vmatpush1.bf16.msra.mxu1 %v11614_v29  ;;  %v11695_v29 = vld [vmem:[%s13428_s4 + $0x1690] ss:$8 sps:$4 sm:$0xff]  }
  0xf7   : > { %9027 = vmatpush1.bf16.msra.mxu0 %v11617_v31  ;;  %8249 = vmatprep.subr.bf16.mxu1 %v11622_v53  ;;  %v11700_v31 = vld [vmem:[%s13428_s4 + $0x3a4] ss:$8 sps:$4 sm:$0xff]  }
  0xf8   : > { %9028 = vmatprep.subr.bf16.mxu0 %v11625_v32  ;;  %v11703_v53 = vld [vmem:[%s13428_s4 + $0x16a4] ss:$8 sps:$4 sm:$0xff]   ;;  %v11698_v32 = vld [vmem:[%s13428_s4 + $0x3a0] ss:$8 sps:$4 sm:$0xff]  }
  0xfa   : > { %8250 = vmatpush1.bf16.msra.mxu1 %v11620_v33  ;;  %v11701_v33 = vld [vmem:[%s13428_s4 + $0x16a0] ss:$8 sps:$4 sm:$0xff]  }
  0xfb   : > { %9029 = vmatpush1.bf16.msra.mxu0 %v11623_v34  ;;  %8251 = vmatprep.subr.bf16.mxu1 %v11628_v35  ;;  %v11706_v34 = vld [vmem:[%s13428_s4 + $0x3b4] ss:$8 sps:$4 sm:$0xff]  }
  0xfc   : > { %9030 = vmatprep.subr.bf16.mxu0 %v11631_v36  ;;  %v11709_v35 = vld [vmem:[%s13428_s4 + $0x16b4] ss:$8 sps:$4 sm:$0xff]   ;;  %v11704_v36 = vld [vmem:[%s13428_s4 + $0x3b0] ss:$8 sps:$4 sm:$0xff]  }
  0xfe   : > { %8252 = vmatpush1.bf16.msra.mxu1 %v11626_v39  ;;  %v11712_v39 = vld [vmem:[%s13428_s4 + $0x3c4] ss:$8 sps:$4 sm:$0xff]  }
  0xff   : > { %9031 = vmatpush1.bf16.msra.mxu0 %v11629_v40  ;;  %8253 = vmatprep.subr.bf16.mxu1 %v11634_v20  ;;  %v11715_v40 = vld [vmem:[%s13428_s4 + $0x16c4] ss:$8 sps:$4 sm:$0xff]   ;;  %v11710_v20 = vld [vmem:[%s13428_s4 + $0x3c0] ss:$8 sps:$4 sm:$0xff]  }
 0x100   : > { %9032 = vmatprep.subr.bf16.mxu0 %v11637_v42  ;;  %v11713_v42 = vld [vmem:[%s13428_s4 + $0x16c0] ss:$8 sps:$4 sm:$0xff]  }
 0x102   : > { %8254 = vmatpush1.bf16.msra.mxu1 %v11632_v44  ;;  %v11718_v44 = vld [vmem:[%s13428_s4 + $0x3d4] ss:$8 sps:$4 sm:$0xff]  }
 0x103   : > { %9033 = vmatpush1.bf16.msra.mxu0 %v11635_v49  ;;  %8264 = vmatprep.subr.bf16.mxu1 %v11640_v45  ;;  %v11721_v49 = vld [vmem:[%s13428_s4 + $0x16d4] ss:$8 sps:$4 sm:$0xff]   ;;  %v11716_v45 = vld [vmem:[%s13428_s4 + $0x3d0] ss:$8 sps:$4 sm:$0xff]  }
 0x104   : > { %9043 = vmatprep.subr.bf16.mxu0 %v11643_v46  ;;  %v11719_v46 = vld [vmem:[%s13428_s4 + $0x16d0] ss:$8 sps:$4 sm:$0xff]  }
 0x105   : > { %8256 = vmatmul.mubr.bf16.vlgmr.msra.gmra.mrb[0].mxu1 %v13716_v51 }
 0x106   : > { %9035 = vmatmul.mubr.bf16.vlgmr.msra.gmra.mrb[0].mxu0 %v1810_v54  ;;  %8265 = vmatpush1.bf16.msra.mxu1 %v11638_v50  ;;  %v11727_v50 = vld [vmem:[%s13428_s4 + $0x16e4] ss:$8 sps:$4 sm:$0xff]   ;;  %v11722_v54 = vld [vmem:[%s13428_s4 + $0x3e0] ss:$8 sps:$4 sm:$0xff]  }
 0x107   : > { %9044 = vmatpush1.bf16.msra.mxu0 %v11641_v55  ;;  %8266 = vmatprep.subr.bf16.mxu1 %v11646_v56  ;;  %v11725_v55 = vld [vmem:[%s13428_s4 + $0x16e0] ss:$8 sps:$4 sm:$0xff]  }
 0x108   : > { %9045 = vmatprep.subr.bf16.mxu0 %v11649_v57  ;;  %8296 = vmatprep.mubr.bf16.mxu1 %v1568_v58  ;;  %v13785_v56 = vld.sshfl [vmem:[%s13449_s12 + $0x8] sm:$0xff pattern:$0x75316420]  ;;  %v11730_v57 = vld [vmem:[%s13428_s4 + $0x3f4] ss:$8 sps:$4 sm:$0xff]  }
 0x109   : > { %9075 = vmatprep.mubr.bf16.mxu0 %v13726_v30  ;;  %v11733_v58 = vld [vmem:[%s13428_s4 + $0x16f4] ss:$8 sps:$4 sm:$0xff]  }
 0x10a   : > { %8267 = vmatpush1.bf16.msra.mxu1 %v11644_v37  ;;  %v11728_v37 = vld [vmem:[%s13428_s4 + $0x3f0] ss:$8 sps:$4 sm:$0xff]  }
 0x10b   : > { %9046 = vmatpush1.bf16.msra.mxu0 %v11647_v59  ;;  %8268 = vmatprep.subr.bf16.mxu1 %v11652_v60  ;;  %v11731_v59 = vld [vmem:[%s13428_s4 + $0x16f0] ss:$8 sps:$4 sm:$0xff]   ;;  %v11736_v60 = vld [vmem:[%s13428_s4 + $0x404] ss:$8 sps:$4 sm:$0xff]  }
 0x10c   : > { %9047 = vmatprep.subr.bf16.mxu0 %v11655_v41  ;;  %v11740_v41 = vld [vmem:[%s13428_s4 + $0x1704] ss:$8 sps:$4 sm:$0xff]  }
 0x10e   : > { %8269 = vmatpush1.bf16.msra.mxu1 %v11650_v61  ;;  %v1584_v61 = vcombine.high %v13785_v56, %v13785_v56 }
 0x10f   : > { %9048 = vmatpush1.bf16.msra.mxu0 %v11653_v62  ;;  %8270 = vmatprep.subr.bf16.mxu1 %v11658_v63  ;;  %v11734_v62 = vld [vmem:[%s13428_s4 + $0x400] ss:$8 sps:$4 sm:$0xff]  }
 0x110   : > { %9049 = vmatprep.subr.bf16.mxu0 %v11661_v0  ;;  %v11738_v63 = vld [vmem:[%s13428_s4 + $0x1700] ss:$8 sps:$4 sm:$0xff]   ;;  %v1566_v0 = vcombine.high %v13716_v51, %v13716_v51  ;;  %v11744_v51 = vld [vmem:[%s13428_s4 + $0x1710] ss:$8 sps:$4 sm:$0xff]  }
 0x112   : > { %8271 = vmatpush1.bf16.msra.mxu1 %v11656_v1  ;;  %v13801_v1 = vrot.slane %v13705_v43, %v13501_v52  ;;  %v11741_v43 = vld [vmem:[%s13428_s4 + $0x410] ss:$8 sps:$4 sm:$0xff]  }
 0x113   : > { %9050 = vmatpush1.bf16.msra.mxu0 %v11659_v2  ;;  %8272 = vmatprep.subr.bf16.mxu1 %v11664_v3  ;;  %v11743_v2 = vld [vmem:[%s13428_s4 + $0x414] ss:$8 sps:$4 sm:$0xff]  }
 0x114   : > { %9051 = vmatprep.subr.bf16.mxu0 %v11667_v4  ;;  %v11746_v3 = vld [vmem:[%s13428_s4 + $0x1714] ss:$8 sps:$4 sm:$0xff]   ;;  %v13806_v4 = vrot.slane %v1584_v61, %v13501_v52  ;;  %v11821_v61 = vld [vmem:[%s13428_s4 + $0x4e4] ss:$8 sps:$4 sm:$0xff]  }
 0x116   : > { %8273 = vmatpush1.bf16.msra.mxu1 %v11662_v6  ;;  %v1813_v6 = vcombine.high %v13726_v30, %v13726_v30  ;;  %v11747_v30 = vld [vmem:[%s13428_s4 + $0x420] ss:$8 sps:$4 sm:$0xff]  }
 0x117   : > { %9052 = vmatpush1.bf16.msra.mxu0 %v11665_v7  ;;  %8274 = vmatprep.subr.bf16.mxu1 %v11670_v8  ;;  %v11749_v7 = vld [vmem:[%s13428_s4 + $0x424] ss:$8 sps:$4 sm:$0xff]  }
 0x118   : > { %9053 = vmatprep.subr.bf16.mxu0 %v11673_v9  ;;  %v11752_v8 = vld [vmem:[%s13428_s4 + $0x1724] ss:$8 sps:$4 sm:$0xff]   ;;  %v11750_v9 = vld [vmem:[%s13428_s4 + $0x1720] ss:$8 sps:$4 sm:$0xff]  }
 0x11a   : > { %8275 = vmatpush1.bf16.msra.mxu1 %v11668_v10  ;;  %v11755_v10 = vld [vmem:[%s13428_s4 + $0x434] ss:$8 sps:$4 sm:$0xff]  }
 0x11b   : > { %9054 = vmatpush1.bf16.msra.mxu0 %v11671_v11  ;;  %8276 = vmatprep.subr.bf16.mxu1 %v11676_v12  ;;  %v11758_v11 = vld [vmem:[%s13428_s4 + $0x1734] ss:$8 sps:$4 sm:$0xff]   ;;  %v11753_v12 = vld [vmem:[%s13428_s4 + $0x430] ss:$8 sps:$4 sm:$0xff]  }
 0x11c   : > { %9055 = vmatprep.subr.bf16.mxu0 %v11679_v13  ;;  %v11756_v13 = vld [vmem:[%s13428_s4 + $0x1730] ss:$8 sps:$4 sm:$0xff]  }
 0x11e   : > { %8277 = vmatpush1.bf16.msra.mxu1 %v11674_v14  ;;  %v11761_v14 = vld [vmem:[%s13428_s4 + $0x444] ss:$8 sps:$4 sm:$0xff]  }
 0x11f   : > { %9056 = vmatpush1.bf16.msra.mxu0 %v11677_v16  ;;  %8278 = vmatprep.subr.bf16.mxu1 %v11682_v17  ;;  %v11764_v16 = vld [vmem:[%s13428_s4 + $0x1744] ss:$8 sps:$4 sm:$0xff]   ;;  %v11759_v17 = vld [vmem:[%s13428_s4 + $0x440] ss:$8 sps:$4 sm:$0xff]  }
 0x120   : > { %9057 = vmatprep.subr.bf16.mxu0 %v11685_v18  ;;  %v11762_v18 = vld [vmem:[%s13428_s4 + $0x1740] ss:$8 sps:$4 sm:$0xff]  }
 0x122   : > { %8279 = vmatpush1.bf16.msra.mxu1 %v11680_v19  ;;  %v11767_v19 = vld [vmem:[%s13428_s4 + $0x454] ss:$8 sps:$4 sm:$0xff]  }
 0x123   : > { %9058 = vmatpush1.bf16.msra.mxu0 %v11683_v21  ;;  %8280 = vmatprep.subr.bf16.mxu1 %v11688_v22  ;;  %v11770_v21 = vld [vmem:[%s13428_s4 + $0x1754] ss:$8 sps:$4 sm:$0xff]   ;;  %v11765_v22 = vld [vmem:[%s13428_s4 + $0x450] ss:$8 sps:$4 sm:$0xff]  }
 0x124   : > { %9059 = vmatprep.subr.bf16.mxu0 %v11691_v23  ;;  %v11768_v23 = vld [vmem:[%s13428_s4 + $0x1750] ss:$8 sps:$4 sm:$0xff]  }
 0x126   : > { %8281 = vmatpush1.bf16.msra.mxu1 %v11686_v24  ;;  %v11773_v24 = vld [vmem:[%s13428_s4 + $0x464] ss:$8 sps:$4 sm:$0xff]  }
 0x127   : > { %9060 = vmatpush1.bf16.msra.mxu0 %v11689_v25  ;;  %8282 = vmatprep.subr.bf16.mxu1 %v11694_v26  ;;  %v11776_v25 = vld [vmem:[%s13428_s4 + $0x1764] ss:$8 sps:$4 sm:$0xff]   ;;  %v11771_v26 = vld [vmem:[%s13428_s4 + $0x460] ss:$8 sps:$4 sm:$0xff]  }
 0x128   : > { %9061 = vmatprep.subr.bf16.mxu0 %v11697_v27  ;;  %v11774_v27 = vld [vmem:[%s13428_s4 + $0x1760] ss:$8 sps:$4 sm:$0xff]  }
 0x12a   : > { %8283 = vmatpush1.bf16.msra.mxu1 %v11692_v28  ;;  %v11779_v28 = vld [vmem:[%s13428_s4 + $0x474] ss:$8 sps:$4 sm:$0xff]  }
 0x12b   : > { %9062 = vmatpush1.bf16.msra.mxu0 %v11695_v29  ;;  %8284 = vmatprep.subr.bf16.mxu1 %v11700_v31  ;;  %v11782_v29 = vld [vmem:[%s13428_s4 + $0x1774] ss:$8 sps:$4 sm:$0xff]   ;;  %v11777_v31 = vld [vmem:[%s13428_s4 + $0x470] ss:$8 sps:$4 sm:$0xff]  }
 0x12c   : > { %9063 = vmatprep.subr.bf16.mxu0 %v11703_v53  ;;  %v11780_v53 = vld [vmem:[%s13428_s4 + $0x1770] ss:$8 sps:$4 sm:$0xff]  }
 0x12e   : > { %8285 = vmatpush1.bf16.msra.mxu1 %v11698_v32  ;;  %v11785_v32 = vld [vmem:[%s13428_s4 + $0x484] ss:$8 sps:$4 sm:$0xff]  }
 0x12f   : > { %9064 = vmatpush1.bf16.msra.mxu0 %v11701_v33  ;;  %8286 = vmatprep.subr.bf16.mxu1 %v11706_v34  ;;  %v11788_v33 = vld [vmem:[%s13428_s4 + $0x1784] ss:$8 sps:$4 sm:$0xff]   ;;  %v11783_v34 = vld [vmem:[%s13428_s4 + $0x480] ss:$8 sps:$4 sm:$0xff]  }
 0x130   : > { %9065 = vmatprep.subr.bf16.mxu0 %v11709_v35  ;;  %v11786_v35 = vld [vmem:[%s13428_s4 + $0x1780] ss:$8 sps:$4 sm:$0xff]  }
 0x132   : > { %8287 = vmatpush1.bf16.msra.mxu1 %v11704_v36  ;;  %v11791_v36 = vld [vmem:[%s13428_s4 + $0x494] ss:$8 sps:$4 sm:$0xff]  }
 0x133   : > { %9066 = vmatpush1.bf16.msra.mxu0 %v11707_v38  ;;  %8288 = vmatprep.subr.bf16.mxu1 %v11712_v39  ;;  %v11794_v38 = vld [vmem:[%s13428_s4 + $0x1794] ss:$8 sps:$4 sm:$0xff]   ;;  %v11789_v39 = vld [vmem:[%s13428_s4 + $0x490] ss:$8 sps:$4 sm:$0xff]  }
 0x134   : > { %9067 = vmatprep.subr.bf16.mxu0 %v11715_v40  ;;  %v11792_v40 = vld [vmem:[%s13428_s4 + $0x1790] ss:$8 sps:$4 sm:$0xff]  }
 0x136   : > { %8289 = vmatpush1.bf16.msra.mxu1 %v11710_v20  ;;  %v11797_v20 = vld [vmem:[%s13428_s4 + $0x4a4] ss:$8 sps:$4 sm:$0xff]  }
 0x137   : > { %9068 = vmatpush1.bf16.msra.mxu0 %v11713_v42  ;;  %8290 = vmatprep.subr.bf16.mxu1 %v11718_v44  ;;  %v11800_v42 = vld [vmem:[%s13428_s4 + $0x17a4] ss:$8 sps:$4 sm:$0xff]   ;;  %v11795_v44 = vld [vmem:[%s13428_s4 + $0x4a0] ss:$8 sps:$4 sm:$0xff]  }
 0x138   : > { %9069 = vmatprep.subr.bf16.mxu0 %v11721_v49  ;;  %v11798_v49 = vld [vmem:[%s13428_s4 + $0x17a0] ss:$8 sps:$4 sm:$0xff]  }
 0x13a   : > { %8291 = vmatpush1.bf16.msra.mxu1 %v11716_v45  ;;  %v11803_v45 = vld [vmem:[%s13428_s4 + $0x4b4] ss:$8 sps:$4 sm:$0xff]  }
 0x13b   : > { %9070 = vmatpush1.bf16.msra.mxu0 %v11719_v46  ;;  %8292 = vmatprep.subr.bf16.mxu1 %v11724_v48  ;;  %v11806_v46 = vld [vmem:[%s13428_s4 + $0x17b4] ss:$8 sps:$4 sm:$0xff]   ;;  %v11801_v48 = vld [vmem:[%s13428_s4 + $0x4b0] ss:$8 sps:$4 sm:$0xff]  }
 0x13c   : > { %9071 = vmatprep.subr.bf16.mxu0 %v11727_v50  ;;  %v11804_v50 = vld [vmem:[%s13428_s4 + $0x17b0] ss:$8 sps:$4 sm:$0xff]  }
 0x13e   : > { %8293 = vmatpush1.bf16.msra.mxu1 %v11722_v54  ;;  %v11809_v54 = vld [vmem:[%s13428_s4 + $0x4c4] ss:$8 sps:$4 sm:$0xff]  }
 0x13f   : > { %9072 = vmatpush1.bf16.msra.mxu0 %v11725_v55  ;;  %8294 = vmatprep.subr.bf16.mxu1 %v11730_v57  ;;  %v11812_v55 = vld [vmem:[%s13428_s4 + $0x17c4] ss:$8 sps:$4 sm:$0xff]   ;;  %v11807_v57 = vld [vmem:[%s13428_s4 + $0x4c0] ss:$8 sps:$4 sm:$0xff]  }
 0x140   : > { %9073 = vmatprep.subr.bf16.mxu0 %v11733_v58  ;;  %v11810_v58 = vld [vmem:[%s13428_s4 + $0x17c0] ss:$8 sps:$4 sm:$0xff]  }
 0x142   : > { %8295 = vmatpush1.bf16.msra.mxu1 %v11728_v37  ;;  %v11815_v37 = vld [vmem:[%s13428_s4 + $0x4d4] ss:$8 sps:$4 sm:$0xff]  }
 0x143   : > { %9074 = vmatpush1.bf16.msra.mxu0 %v11731_v59  ;;  %8305 = vmatprep.subr.bf16.mxu1 %v11736_v60  ;;  %v11818_v59 = vld [vmem:[%s13428_s4 + $0x17d4] ss:$8 sps:$4 sm:$0xff]   ;;  %v11813_v60 = vld [vmem:[%s13428_s4 + $0x4d0] ss:$8 sps:$4 sm:$0xff]  }
 0x144   : > { %9084 = vmatprep.subr.bf16.mxu0 %v11740_v41  ;;  %v11816_v41 = vld [vmem:[%s13428_s4 + $0x17d0] ss:$8 sps:$4 sm:$0xff]  }
 0x145   : > { %8297 = vmatmul.mubr.bf16.vlgmr.msra.gmra.mrb[0].mxu1 %v1566_v0  ;;  %v11819_v0 = vld [vmem:[%s13428_s4 + $0x4e0] ss:$8 sps:$4 sm:$0xff]  }
 0x146   : > { %9076 = vmatmul.mubr.bf16.vlgmr.msra.gmra.mrb[0].mxu0 %v13801_v1  ;;  %8306 = vmatpush1.bf16.msra.mxu1 %v11734_v62  ;;  %v11824_v62 = vld [vmem:[%s13428_s4 + $0x17e4] ss:$8 sps:$4 sm:$0xff]  }
 0x147   : > { %9085 = vmatpush1.bf16.msra.mxu0 %v11738_v63  ;;  %8307 = vmatprep.subr.bf16.mxu1 %v11743_v2  ;;  %v13865_v63 = vld.sshfl [vmem:[%s13449_s12 + $0x30] sm:$0xff pattern:$0x75316420]  ;;  %v11822_v2 = vld [vmem:[%s13428_s4 + $0x17e0] ss:$8 sps:$4 sm:$0xff]  }
 0x148   : > { %9086 = vmatprep.subr.bf16.mxu0 %v11746_v3  ;;  %8337 = vmatprep.mubr.bf16.mxu1 %v13806_v4  ;;  %v11827_v3 = vld [vmem:[%s13428_s4 + $0x4f4] ss:$8 sps:$4 sm:$0xff]  }
 0x149   : > { %9116 = vmatprep.mubr.bf16.mxu0 %v1813_v6  ;;  %v11830_v6 = vld [vmem:[%s13428_s4 + $0x17f4] ss:$8 sps:$4 sm:$0xff]  }
 0x14a   : > { %8308 = vmatpush1.bf16.msra.mxu1 %v11741_v43  ;;  %v11825_v43 = vld [vmem:[%s13428_s4 + $0x4f0] ss:$8 sps:$4 sm:$0xff]  }
 0x14b   : > { %9087 = vmatpush1.bf16.msra.mxu0 %v11744_v51  ;;  %8309 = vmatprep.subr.bf16.mxu1 %v11749_v7  ;;  %v11828_v51 = vld [vmem:[%s13428_s4 + $0x17f0] ss:$8 sps:$4 sm:$0xff]   ;;  %v11833_v7 = vld [vmem:[%s13428_s4 + $0x504] ss:$8 sps:$4 sm:$0xff]  }
 0x14c   : > { %9088 = vmatprep.subr.bf16.mxu0 %v11752_v8  ;;  %v11836_v8 = vld [vmem:[%s13428_s4 + $0x1804] ss:$8 sps:$4 sm:$0xff]  }
 0x14e   : > { %8310 = vmatpush1.bf16.msra.mxu1 %v11747_v30  ;;  %v1829_v30 = vcombine.high %v13865_v63, %v13865_v63 }
 0x14f   : > { %9089 = vmatpush1.bf16.msra.mxu0 %v11750_v9  ;;  %8311 = vmatprep.subr.bf16.mxu1 %v11755_v10  ;;  %v13879_v9 = vrot.slane %v13785_v56, %v13501_v52  ;;  %v1811_v10 = vcombine.high %v13801_v1, %v13801_v1  ;;  %v11837_v1 = vld [vmem:[%s13428_s4 + $0x510] ss:$8 sps:$4 sm:$0xff]  }
 0x150   : > { %9090 = vmatprep.subr.bf16.mxu0 %v11758_v11  ;;  %v11831_v11 = vld [vmem:[%s13428_s4 + $0x500] ss:$8 sps:$4 sm:$0xff]   ;;  %v13890_v56 = vrot.slane %v1829_v30, %v13501_v52  ;;  %v11917_v30 = vld [vmem:[%s13428_s4 + $0x5e4] ss:$8 sps:$4 sm:$0xff]  }
 0x152   : > { %8312 = vmatpush1.bf16.msra.mxu1 %v11753_v12  ;;  %v11834_v12 = vld [vmem:[%s13428_s4 + $0x1800] ss:$8 sps:$4 sm:$0xff]  }
 0x153   : > { %9091 = vmatpush1.bf16.msra.mxu0 %v11756_v13  ;;  %8313 = vmatprep.subr.bf16.mxu1 %v11761_v14  ;;  %v11839_v13 = vld [vmem:[%s13428_s4 + $0x514] ss:$8 sps:$4 sm:$0xff]  }
 0x154   : > { %9092 = vmatprep.subr.bf16.mxu0 %v11764_v16  ;;  %v11842_v14 = vld [vmem:[%s13428_s4 + $0x1814] ss:$8 sps:$4 sm:$0xff]   ;;  %v1616_v16 = vcombine.high %v13806_v4, %v13806_v4  ;;  %v11848_v4 = vld [vmem:[%s13428_s4 + $0x1824] ss:$8 sps:$4 sm:$0xff]  }
 0x156   : > { %8314 = vmatpush1.bf16.msra.mxu1 %v11759_v17  ;;  %v11840_v17 = vld [vmem:[%s13428_s4 + $0x1810] ss:$8 sps:$4 sm:$0xff]  }
 0x157   : > { %9093 = vmatpush1.bf16.msra.mxu0 %v11762_v18  ;;  %8315 = vmatprep.subr.bf16.mxu1 %v11767_v19  ;;  %v11845_v18 = vld [vmem:[%s13428_s4 + $0x524] ss:$8 sps:$4 sm:$0xff]   ;;  %v11843_v19 = vld [vmem:[%s13428_s4 + $0x520] ss:$8 sps:$4 sm:$0xff]  }
 0x158   : > { %9094 = vmatprep.subr.bf16.mxu0 %v11770_v21  ;;  %v11846_v21 = vld [vmem:[%s13428_s4 + $0x1820] ss:$8 sps:$4 sm:$0xff]  }
 0x15a   : > { %8316 = vmatpush1.bf16.msra.mxu1 %v11765_v22  ;;  %v11851_v22 = vld [vmem:[%s13428_s4 + $0x534] ss:$8 sps:$4 sm:$0xff]  }
 0x15b   : > { %9095 = vmatpush1.bf16.msra.mxu0 %v11768_v23  ;;  %8317 = vmatprep.subr.bf16.mxu1 %v11773_v24  ;;  %v11854_v23 = vld [vmem:[%s13428_s4 + $0x1834] ss:$8 sps:$4 sm:$0xff]   ;;  %v11849_v24 = vld [vmem:[%s13428_s4 + $0x530] ss:$8 sps:$4 sm:$0xff]  }
 0x15c   : > { %9096 = vmatprep.subr.bf16.mxu0 %v11776_v25  ;;  %v11852_v25 = vld [vmem:[%s13428_s4 + $0x1830] ss:$8 sps:$4 sm:$0xff]  }
 0x15e   : > { %8318 = vmatpush1.bf16.msra.mxu1 %v11771_v26  ;;  %v11857_v26 = vld [vmem:[%s13428_s4 + $0x544] ss:$8 sps:$4 sm:$0xff]  }
 0x15f   : > { %9097 = vmatpush1.bf16.msra.mxu0 %v11774_v27  ;;  %8319 = vmatprep.subr.bf16.mxu1 %v11779_v28  ;;  %v11860_v27 = vld [vmem:[%s13428_s4 + $0x1844] ss:$8 sps:$4 sm:$0xff]   ;;  %v11855_v28 = vld [vmem:[%s13428_s4 + $0x540] ss:$8 sps:$4 sm:$0xff]  }
 0x160   : > { %9098 = vmatprep.subr.bf16.mxu0 %v11782_v29  ;;  %v11858_v29 = vld [vmem:[%s13428_s4 + $0x1840] ss:$8 sps:$4 sm:$0xff]  }
 0x162   : > { %8320 = vmatpush1.bf16.msra.mxu1 %v11777_v31  ;;  %v11863_v31 = vld [vmem:[%s13428_s4 + $0x554] ss:$8 sps:$4 sm:$0xff]  }
 0x163   : > { %9099 = vmatpush1.bf16.msra.mxu0 %v11780_v53  ;;  %8321 = vmatprep.subr.bf16.mxu1 %v11785_v32  ;;  %v11866_v53 = vld [vmem:[%s13428_s4 + $0x1854] ss:$8 sps:$4 sm:$0xff]   ;;  %v11861_v32 = vld [vmem:[%s13428_s4 + $0x550] ss:$8 sps:$4 sm:$0xff]  }
 0x164   : > { %9100 = vmatprep.subr.bf16.mxu0 %v11788_v33  ;;  %v11864_v33 = vld [vmem:[%s13428_s4 + $0x1850] ss:$8 sps:$4 sm:$0xff]  }
 0x166   : > { %8322 = vmatpush1.bf16.msra.mxu1 %v11783_v34  ;;  %v11869_v34 = vld [vmem:[%s13428_s4 + $0x564] ss:$8 sps:$4 sm:$0xff]  }
 0x167   : > { %9101 = vmatpush1.bf16.msra.mxu0 %v11786_v35  ;;  %8323 = vmatprep.subr.bf16.mxu1 %v11791_v36  ;;  %v11872_v35 = vld [vmem:[%s13428_s4 + $0x1864] ss:$8 sps:$4 sm:$0xff]   ;;  %v11867_v36 = vld [vmem:[%s13428_s4 + $0x560] ss:$8 sps:$4 sm:$0xff]  }
 0x168   : > { %9102 = vmatprep.subr.bf16.mxu0 %v11794_v38  ;;  %v11870_v38 = vld [vmem:[%s13428_s4 + $0x1860] ss:$8 sps:$4 sm:$0xff]  }
 0x16a   : > { %8324 = vmatpush1.bf16.msra.mxu1 %v11789_v39  ;;  %v11875_v39 = vld [vmem:[%s13428_s4 + $0x574] ss:$8 sps:$4 sm:$0xff]  }
 0x16b   : > { %9103 = vmatpush1.bf16.msra.mxu0 %v11792_v40  ;;  %8325 = vmatprep.subr.bf16.mxu1 %v11797_v20  ;;  %v11878_v40 = vld [vmem:[%s13428_s4 + $0x1874] ss:$8 sps:$4 sm:$0xff]   ;;  %v11873_v20 = vld [vmem:[%s13428_s4 + $0x570] ss:$8 sps:$4 sm:$0xff]  }
 0x16c   : > { %9104 = vmatprep.subr.bf16.mxu0 %v11800_v42  ;;  %v11876_v42 = vld [vmem:[%s13428_s4 + $0x1870] ss:$8 sps:$4 sm:$0xff]  }
 0x16e   : > { %8326 = vmatpush1.bf16.msra.mxu1 %v11795_v44  ;;  %v11881_v44 = vld [vmem:[%s13428_s4 + $0x584] ss:$8 sps:$4 sm:$0xff]  }
 0x16f   : > { %9105 = vmatpush1.bf16.msra.mxu0 %v11798_v49  ;;  %8327 = vmatprep.subr.bf16.mxu1 %v11803_v45  ;;  %v11884_v49 = vld [vmem:[%s13428_s4 + $0x1884] ss:$8 sps:$4 sm:$0xff]   ;;  %v11879_v45 = vld [vmem:[%s13428_s4 + $0x580] ss:$8 sps:$4 sm:$0xff]  }
 0x170   : > { %9106 = vmatprep.subr.bf16.mxu0 %v11806_v46  ;;  %v11882_v46 = vld [vmem:[%s13428_s4 + $0x1880] ss:$8 sps:$4 sm:$0xff]  }
 0x172   : > { %8328 = vmatpush1.bf16.msra.mxu1 %v11801_v48  ;;  %v11887_v48 = vld [vmem:[%s13428_s4 + $0x594] ss:$8 sps:$4 sm:$0xff]  }
 0x173   : > { %9107 = vmatpush1.bf16.msra.mxu0 %v11804_v50  ;;  %8329 = vmatprep.subr.bf16.mxu1 %v11809_v54  ;;  %v11890_v50 = vld [vmem:[%s13428_s4 + $0x1894] ss:$8 sps:$4 sm:$0xff]   ;;  %v11885_v54 = vld [vmem:[%s13428_s4 + $0x590] ss:$8 sps:$4 sm:$0xff]  }
 0x174   : > { %9108 = vmatprep.subr.bf16.mxu0 %v11812_v55  ;;  %v11888_v55 = vld [vmem:[%s13428_s4 + $0x1890] ss:$8 sps:$4 sm:$0xff]  }
 0x176   : > { %8330 = vmatpush1.bf16.msra.mxu1 %v11807_v57  ;;  %v11893_v57 = vld [vmem:[%s13428_s4 + $0x5a4] ss:$8 sps:$4 sm:$0xff]  }
 0x177   : > { %9109 = vmatpush1.bf16.msra.mxu0 %v11810_v58  ;;  %8331 = vmatprep.subr.bf16.mxu1 %v11815_v37  ;;  %v11896_v58 = vld [vmem:[%s13428_s4 + $0x18a4] ss:$8 sps:$4 sm:$0xff]   ;;  %v11891_v37 = vld [vmem:[%s13428_s4 + $0x5a0] ss:$8 sps:$4 sm:$0xff]  }
 0x178   : > { %9110 = vmatprep.subr.bf16.mxu0 %v11818_v59  ;;  %v11894_v59 = vld [vmem:[%s13428_s4 + $0x18a0] ss:$8 sps:$4 sm:$0xff]  }
 0x17a   : > { %8332 = vmatpush1.bf16.msra.mxu1 %v11813_v60  ;;  %v11899_v60 = vld [vmem:[%s13428_s4 + $0x5b4] ss:$8 sps:$4 sm:$0xff]  }
 0x17b   : > { %9111 = vmatpush1.bf16.msra.mxu0 %v11816_v41  ;;  %8333 = vmatprep.subr.bf16.mxu1 %v11821_v61  ;;  %v11902_v41 = vld [vmem:[%s13428_s4 + $0x18b4] ss:$8 sps:$4 sm:$0xff]   ;;  %v11897_v61 = vld [vmem:[%s13428_s4 + $0x5b0] ss:$8 sps:$4 sm:$0xff]  }
 0x17c   : > { %9112 = vmatprep.subr.bf16.mxu0 %v11824_v62  ;;  %v11900_v62 = vld [vmem:[%s13428_s4 + $0x18b0] ss:$8 sps:$4 sm:$0xff]  }
 0x17e   : > { %8334 = vmatpush1.bf16.msra.mxu1 %v11819_v0  ;;  %v11905_v0 = vld [vmem:[%s13428_s4 + $0x5c4] ss:$8 sps:$4 sm:$0xff]  }
 0x17f   : > { %9113 = vmatpush1.bf16.msra.mxu0 %v11822_v2  ;;  %8335 = vmatprep.subr.bf16.mxu1 %v11827_v3  ;;  %v11908_v2 = vld [vmem:[%s13428_s4 + $0x18c4] ss:$8 sps:$4 sm:$0xff]   ;;  %v11903_v3 = vld [vmem:[%s13428_s4 + $0x5c0] ss:$8 sps:$4 sm:$0xff]  }
 0x180   : > { %9114 = vmatprep.subr.bf16.mxu0 %v11830_v6  ;;  %v11906_v6 = vld [vmem:[%s13428_s4 + $0x18c0] ss:$8 sps:$4 sm:$0xff]  }
 0x182   : > { %8336 = vmatpush1.bf16.msra.mxu1 %v11825_v43  ;;  %v11911_v43 = vld [vmem:[%s13428_s4 + $0x5d4] ss:$8 sps:$4 sm:$0xff]  }
 0x183   : > { %9115 = vmatpush1.bf16.msra.mxu0 %v11828_v51  ;;  %8346 = vmatprep.subr.bf16.mxu1 %v11833_v7  ;;  %v11914_v51 = vld [vmem:[%s13428_s4 + $0x18d4] ss:$8 sps:$4 sm:$0xff]   ;;  %v11909_v7 = vld [vmem:[%s13428_s4 + $0x5d0] ss:$8 sps:$4 sm:$0xff]  }
 0x184   : > { %9125 = vmatprep.subr.bf16.mxu0 %v11836_v8  ;;  %v11912_v8 = vld [vmem:[%s13428_s4 + $0x18d0] ss:$8 sps:$4 sm:$0xff]  }
 0x185   : > { %8338 = vmatmul.mubr.bf16.vlgmr.msra.gmra.mrb[0].mxu1 %v13879_v9 }
 0x186   : > { %9117 = vmatmul.mubr.bf16.vlgmr.msra.gmra.mrb[0].mxu0 %v1811_v10  ;;  %8347 = vmatpush1.bf16.msra.mxu1 %v11831_v11  ;;  %v11920_v10 = vld [vmem:[%s13428_s4 + $0x18e4] ss:$8 sps:$4 sm:$0xff]  }
 0x187   : > { %9126 = vmatpush1.bf16.msra.mxu0 %v11834_v12  ;;  %8348 = vmatprep.subr.bf16.mxu1 %v11839_v13  ;;  %v13181_v11 = vld [vmem:[%s13449_s12 + $0x8] sm:$0xff] }
 0x188   : > { %9127 = vmatprep.subr.bf16.mxu0 %v11842_v14  ;;  %8378 = vmatprep.mubr.bf16.mxu1 %v1616_v16  ;;  %v1569_v12 = vcombine.high %v13181_v11, %v13181_v11  ;;  %v11915_v13 = vld [vmem:[%s13428_s4 + $0x5e0] ss:$8 sps:$4 sm:$0xff]   ;;  %v11923_v16 = vld [vmem:[%s13428_s4 + $0x5f4] ss:$8 sps:$4 sm:$0xff]   ;;  %v11993_v11 = vld [vmem:[%s13428_s4 + $0x6b0] ss:$8 sps:$4 sm:$0xff]  }
 0x189   : > { %9157 = vmatprep.mubr.bf16.mxu0 %v13890_v56  ;;  %v11918_v14 = vld [vmem:[%s13428_s4 + $0x18e0] ss:$8 sps:$4 sm:$0xff]  }
 0x18a   : > { %8349 = vmatpush1.bf16.msra.mxu1 %v11837_v1  ;;  %v11926_v1 = vld [vmem:[%s13428_s4 + $0x18f4] ss:$8 sps:$4 sm:$0xff]  }
 0x18b   : > { %9128 = vmatpush1.bf16.msra.mxu0 %v11840_v17  ;;  %8350 = vmatprep.subr.bf16.mxu1 %v11845_v18  ;;  %v13952_v17 = vrot.slane %v1569_v12, %v13501_v52  ;;  %v11921_v18 = vld [vmem:[%s13428_s4 + $0x5f0] ss:$8 sps:$4 sm:$0xff]  }
 0x18c   : > { %9129 = vmatprep.subr.bf16.mxu0 %v11848_v4  ;;  %v11924_v4 = vld [vmem:[%s13428_s4 + $0x18f0] ss:$8 sps:$4 sm:$0xff]  }
 0x18d   : > { %v11996_v12 = vld [vmem:[%s13428_s4 + $0x19b0] ss:$8 sps:$4 sm:$0xff]  }
 0x18e   : > { %8351 = vmatpush1.bf16.msra.mxu1 %v11843_v19  ;;  %v11929_v19 = vld [vmem:[%s13428_s4 + $0x604] ss:$8 sps:$4 sm:$0xff]  }
 0x18f   : > { %9130 = vmatpush1.bf16.msra.mxu0 %v11846_v21  ;;  %8352 = vmatprep.subr.bf16.mxu1 %v11851_v22  ;;  %v11932_v21 = vld [vmem:[%s13428_s4 + $0x1904] ss:$8 sps:$4 sm:$0xff]   ;;  %v1585_v22 = vcombine.high %v13952_v17, %v13952_v17 }
 0x190   : > { %9131 = vmatprep.subr.bf16.mxu0 %v11854_v23  ;;  %v1614_v23 = vcombine.high %v13879_v9, %v13879_v9  ;;  %v1861_v9 = vcombine.high %v13890_v56, %v13890_v56  ;;  %v11939_v56 = vld [vmem:[%s13428_s4 + $0x620] ss:$8 sps:$4 sm:$0xff]  }
 0x192   : > { %8353 = vmatpush1.bf16.msra.mxu1 %v11849_v24  ;;  %v13964_v24 = vrot.slane %v13865_v63, %v13501_v52  ;;  %v11933_v63 = vld [vmem:[%s13428_s4 + $0x610] ss:$8 sps:$4 sm:$0xff]  }
 0x193   : > { %9132 = vmatpush1.bf16.msra.mxu0 %v11852_v25  ;;  %8354 = vmatprep.subr.bf16.mxu1 %v11857_v26  ;;  %v11927_v25 = vld [vmem:[%s13428_s4 + $0x600] ss:$8 sps:$4 sm:$0xff]  }
 0x194   : > { %9133 = vmatprep.subr.bf16.mxu0 %v11860_v27  ;;  %v11930_v26 = vld [vmem:[%s13428_s4 + $0x1900] ss:$8 sps:$4 sm:$0xff]   ;;  %v11935_v27 = vld [vmem:[%s13428_s4 + $0x614] ss:$8 sps:$4 sm:$0xff]  }
 0x196   : > { %8355 = vmatpush1.bf16.msra.mxu1 %v11855_v28  ;;  %v11938_v28 = vld [vmem:[%s13428_s4 + $0x1914] ss:$8 sps:$4 sm:$0xff]  }
 0x197   : > { %9134 = vmatpush1.bf16.msra.mxu0 %v11858_v29  ;;  %8356 = vmatprep.subr.bf16.mxu1 %v11863_v31  ;;  %v13971_v29 = vrot.slane %v1585_v22, %v13501_v52  ;;  %v11936_v31 = vld [vmem:[%s13428_s4 + $0x1910] ss:$8 sps:$4 sm:$0xff]   ;;  %v12013_v22 = vld [vmem:[%s13428_s4 + $0x6e4] ss:$8 sps:$4 sm:$0xff]  }
 0x198   : > { %9135 = vmatprep.subr.bf16.mxu0 %v11866_v53  ;;  %v11941_v53 = vld [vmem:[%s13428_s4 + $0x624] ss:$8 sps:$4 sm:$0xff]  }
 0x19a   : > { %8357 = vmatpush1.bf16.msra.mxu1 %v11861_v32  ;;  %v11944_v32 = vld [vmem:[%s13428_s4 + $0x1924] ss:$8 sps:$4 sm:$0xff]  }
 0x19b   : > { %9136 = vmatpush1.bf16.msra.mxu0 %v11864_v33  ;;  %8358 = vmatprep.subr.bf16.mxu1 %v11869_v34  ;;  %v11942_v33 = vld [vmem:[%s13428_s4 + $0x1920] ss:$8 sps:$4 sm:$0xff]   ;;  %v11947_v34 = vld [vmem:[%s13428_s4 + $0x634] ss:$8 sps:$4 sm:$0xff]  }
 0x19c   : > { %9137 = vmatprep.subr.bf16.mxu0 %v11872_v35  ;;  %v11950_v35 = vld [vmem:[%s13428_s4 + $0x1934] ss:$8 sps:$4 sm:$0xff]  }
 0x19e   : > { %8359 = vmatpush1.bf16.msra.mxu1 %v11867_v36  ;;  %v11945_v36 = vld [vmem:[%s13428_s4 + $0x630] ss:$8 sps:$4 sm:$0xff]  }
 0x19f   : > { %9138 = vmatpush1.bf16.msra.mxu0 %v11870_v38  ;;  %8360 = vmatprep.subr.bf16.mxu1 %v11875_v39  ;;  %v11948_v38 = vld [vmem:[%s13428_s4 + $0x1930] ss:$8 sps:$4 sm:$0xff]   ;;  %v11953_v39 = vld [vmem:[%s13428_s4 + $0x644] ss:$8 sps:$4 sm:$0xff]  }
 0x1a0   : > { %9139 = vmatprep.subr.bf16.mxu0 %v11878_v40  ;;  %v11956_v40 = vld [vmem:[%s13428_s4 + $0x1944] ss:$8 sps:$4 sm:$0xff]  }
 0x1a2   : > { %8361 = vmatpush1.bf16.msra.mxu1 %v11873_v20  ;;  %v11951_v20 = vld [vmem:[%s13428_s4 + $0x640] ss:$8 sps:$4 sm:$0xff]  }
 0x1a3   : > { %9140 = vmatpush1.bf16.msra.mxu0 %v11876_v42  ;;  %8362 = vmatprep.subr.bf16.mxu1 %v11881_v44  ;;  %v11954_v42 = vld [vmem:[%s13428_s4 + $0x1940] ss:$8 sps:$4 sm:$0xff]   ;;  %v11959_v44 = vld [vmem:[%s13428_s4 + $0x654] ss:$8 sps:$4 sm:$0xff]  }
 0x1a4   : > { %9141 = vmatprep.subr.bf16.mxu0 %v11884_v49  ;;  %v11962_v49 = vld [vmem:[%s13428_s4 + $0x1954] ss:$8 sps:$4 sm:$0xff]  }
 0x1a6   : > { %8363 = vmatpush1.bf16.msra.mxu1 %v11879_v45  ;;  %v11957_v45 = vld [vmem:[%s13428_s4 + $0x650] ss:$8 sps:$4 sm:$0xff]  }
 0x1a7   : > { %9142 = vmatpush1.bf16.msra.mxu0 %v11882_v46  ;;  %8364 = vmatprep.subr.bf16.mxu1 %v11887_v48  ;;  %v11960_v46 = vld [vmem:[%s13428_s4 + $0x1950] ss:$8 sps:$4 sm:$0xff]   ;;  %v11965_v48 = vld [vmem:[%s13428_s4 + $0x664] ss:$8 sps:$4 sm:$0xff]  }
 0x1a8   : > { %9143 = vmatprep.subr.bf16.mxu0 %v11890_v50  ;;  %v11968_v50 = vld [vmem:[%s13428_s4 + $0x1964] ss:$8 sps:$4 sm:$0xff]  }
 0x1aa   : > { %8365 = vmatpush1.bf16.msra.mxu1 %v11885_v54  ;;  %v11963_v54 = vld [vmem:[%s13428_s4 + $0x660] ss:$8 sps:$4 sm:$0xff]  }
 0x1ab   : > { %9144 = vmatpush1.bf16.msra.mxu0 %v11888_v55  ;;  %8366 = vmatprep.subr.bf16.mxu1 %v11893_v57  ;;  %v11966_v55 = vld [vmem:[%s13428_s4 + $0x1960] ss:$8 sps:$4 sm:$0xff]   ;;  %v11971_v57 = vld [vmem:[%s13428_s4 + $0x674] ss:$8 sps:$4 sm:$0xff]  }
 0x1ac   : > { %9145 = vmatprep.subr.bf16.mxu0 %v11896_v58  ;;  %v11974_v58 = vld [vmem:[%s13428_s4 + $0x1974] ss:$8 sps:$4 sm:$0xff]  }
 0x1ae   : > { %8367 = vmatpush1.bf16.msra.mxu1 %v11891_v37  ;;  %v11969_v37 = vld [vmem:[%s13428_s4 + $0x670] ss:$8 sps:$4 sm:$0xff]  }
 0x1af   : > { %9146 = vmatpush1.bf16.msra.mxu0 %v11894_v59  ;;  %8368 = vmatprep.subr.bf16.mxu1 %v11899_v60  ;;  %v11972_v59 = vld [vmem:[%s13428_s4 + $0x1970] ss:$8 sps:$4 sm:$0xff]   ;;  %v11977_v60 = vld [vmem:[%s13428_s4 + $0x684] ss:$8 sps:$4 sm:$0xff]  }
 0x1b0   : > { %9147 = vmatprep.subr.bf16.mxu0 %v11902_v41  ;;  %v11980_v41 = vld [vmem:[%s13428_s4 + $0x1984] ss:$8 sps:$4 sm:$0xff]  }
 0x1b2   : > { %8369 = vmatpush1.bf16.msra.mxu1 %v11897_v61  ;;  %v11975_v61 = vld [vmem:[%s13428_s4 + $0x680] ss:$8 sps:$4 sm:$0xff]  }
 0x1b3   : > { %9148 = vmatpush1.bf16.msra.mxu0 %v11900_v62  ;;  %8370 = vmatprep.subr.bf16.mxu1 %v11905_v0  ;;  %v11978_v62 = vld [vmem:[%s13428_s4 + $0x1980] ss:$8 sps:$4 sm:$0xff]   ;;  %v11983_v0 = vld [vmem:[%s13428_s4 + $0x694] ss:$8 sps:$4 sm:$0xff]  }
 0x1b4   : > { %9149 = vmatprep.subr.bf16.mxu0 %v11908_v2  ;;  %v11986_v2 = vld [vmem:[%s13428_s4 + $0x1994] ss:$8 sps:$4 sm:$0xff]  }
 0x1b6   : > { %8371 = vmatpush1.bf16.msra.mxu1 %v11903_v3  ;;  %v11981_v3 = vld [vmem:[%s13428_s4 + $0x690] ss:$8 sps:$4 sm:$0xff]  }
 0x1b7   : > { %9150 = vmatpush1.bf16.msra.mxu0 %v11906_v6  ;;  %8372 = vmatprep.subr.bf16.mxu1 %v11911_v43  ;;  %v11984_v6 = vld [vmem:[%s13428_s4 + $0x1990] ss:$8 sps:$4 sm:$0xff]   ;;  %v11989_v43 = vld [vmem:[%s13428_s4 + $0x6a4] ss:$8 sps:$4 sm:$0xff]  }
 0x1b8   : > { %9151 = vmatprep.subr.bf16.mxu0 %v11914_v51  ;;  %v11992_v51 = vld [vmem:[%s13428_s4 + $0x19a4] ss:$8 sps:$4 sm:$0xff]  }
 0x1ba   : > { %8373 = vmatpush1.bf16.msra.mxu1 %v11909_v7  ;;  %v11987_v7 = vld [vmem:[%s13428_s4 + $0x6a0] ss:$8 sps:$4 sm:$0xff]  }
 0x1bb   : > { %9152 = vmatpush1.bf16.msra.mxu0 %v11912_v8  ;;  %8374 = vmatprep.subr.bf16.mxu1 %v11917_v30  ;;  %v11990_v8 = vld [vmem:[%s13428_s4 + $0x19a0] ss:$8 sps:$4 sm:$0xff]   ;;  %v11995_v30 = vld [vmem:[%s13428_s4 + $0x6b4] ss:$8 sps:$4 sm:$0xff]  }
 0x1bc   : > { %9153 = vmatprep.subr.bf16.mxu0 %v11920_v10  ;;  %v11998_v10 = vld [vmem:[%s13428_s4 + $0x19b4] ss:$8 sps:$4 sm:$0xff]  }
 0x1be   : > { %8375 = vmatpush1.bf16.msra.mxu1 %v11915_v13  ;;  %v12001_v13 = vld [vmem:[%s13428_s4 + $0x6c4] ss:$8 sps:$4 sm:$0xff]  }
 0x1bf   : > { %9154 = vmatpush1.bf16.msra.mxu0 %v11918_v14  ;;  %8376 = vmatprep.subr.bf16.mxu1 %v11923_v16  ;;  %v12004_v14 = vld [vmem:[%s13428_s4 + $0x19c4] ss:$8 sps:$4 sm:$0xff]   ;;  %v11999_v16 = vld [vmem:[%s13428_s4 + $0x6c0] ss:$8 sps:$4 sm:$0xff]  }
 0x1c0   : > { %9155 = vmatprep.subr.bf16.mxu0 %v11926_v1  ;;  %v12002_v1 = vld [vmem:[%s13428_s4 + $0x19c0] ss:$8 sps:$4 sm:$0xff]  }
 0x1c2   : > { %8377 = vmatpush1.bf16.msra.mxu1 %v11921_v18  ;;  %v12007_v18 = vld [vmem:[%s13428_s4 + $0x6d4] ss:$8 sps:$4 sm:$0xff]  }
 0x1c3   : > { %9156 = vmatpush1.bf16.msra.mxu0 %v11924_v4  ;;  %8387 = vmatprep.subr.bf16.mxu1 %v11929_v19  ;;  %v12010_v4 = vld [vmem:[%s13428_s4 + $0x19d4] ss:$8 sps:$4 sm:$0xff]   ;;  %v12005_v19 = vld [vmem:[%s13428_s4 + $0x6d0] ss:$8 sps:$4 sm:$0xff]  }
 0x1c4   : > { %9166 = vmatprep.subr.bf16.mxu0 %v11932_v21  ;;  %v12008_v21 = vld [vmem:[%s13428_s4 + $0x19d0] ss:$8 sps:$4 sm:$0xff]  }
 0x1c5   : > { %8379 = vmatmul.mubr.bf16.vlgmr.msra.gmra.mrb[0].mxu1 %v1614_v23  ;;  %v12016_v23 = vld [vmem:[%s13428_s4 + $0x19e4] ss:$8 sps:$4 sm:$0xff]  }
 0x1c6   : > { %9158 = vmatmul.mubr.bf16.vlgmr.msra.gmra.mrb[0].mxu0 %v13964_v24  ;;  %8388 = vmatpush1.bf16.msra.mxu1 %v11927_v25  ;;  %v13182_v25 = vld [vmem:[%s13449_s12 + $0x30] sm:$0xff] }
 0x1c7   : > { %9167 = vmatpush1.bf16.msra.mxu0 %v11930_v26  ;;  %8389 = vmatprep.subr.bf16.mxu1 %v11935_v27  ;;  %v1814_v26 = vcombine.high %v13182_v25, %v13182_v25  ;;  %v12011_v27 = vld [vmem:[%s13428_s4 + $0x6e0] ss:$8 sps:$4 sm:$0xff]   ;;  %v12090_v25 = vld [vmem:[%s13428_s4 + $0x7b0] ss:$8 sps:$4 sm:$0xff]  }
 0x1c8   : > { %9168 = vmatprep.subr.bf16.mxu0 %v11938_v28  ;;  %8419 = vmatprep.mubr.bf16.mxu1 %v13971_v29  ;;  %v12014_v28 = vld [vmem:[%s13428_s4 + $0x19e0] ss:$8 sps:$4 sm:$0xff]  }
 0x1c9   : > { %9198 = vmatprep.mubr.bf16.mxu0 %v1861_v9  ;;  %v12019_v9 = vld [vmem:[%s13428_s4 + $0x6f4] ss:$8 sps:$4 sm:$0xff]  }
 0x1ca   : > { %8390 = vmatpush1.bf16.msra.mxu1 %v11933_v63  ;;  %v12022_v63 = vld [vmem:[%s13428_s4 + $0x19f4] ss:$8 sps:$4 sm:$0xff]  }
 0x1cb   : > { %9169 = vmatpush1.bf16.msra.mxu0 %v11936_v31  ;;  %8391 = vmatprep.subr.bf16.mxu1 %v11941_v53  ;;  %v14035_v31 = vrot.slane %v1814_v26, %v13501_v52  ;;  %v12017_v53 = vld [vmem:[%s13428_s4 + $0x6f0] ss:$8 sps:$4 sm:$0xff]  }
 0x1cc   : > { %9170 = vmatprep.subr.bf16.mxu0 %v11944_v32  ;;  %v12020_v32 = vld [vmem:[%s13428_s4 + $0x19f0] ss:$8 sps:$4 sm:$0xff]  }
 0x1cd   : > { %v12093_v26 = vld [vmem:[%s13428_s4 + $0x1ab0] ss:$8 sps:$4 sm:$0xff]  }
 0x1ce   : > { %8392 = vmatpush1.bf16.msra.mxu1 %v11939_v56  ;;  %v12026_v56 = vld [vmem:[%s13428_s4 + $0x704] ss:$8 sps:$4 sm:$0xff]  }
 0x1cf   : > { %9171 = vmatpush1.bf16.msra.mxu0 %v11942_v33  ;;  %8393 = vmatprep.subr.bf16.mxu1 %v11947_v34  ;;  %v12029_v33 = vld [vmem:[%s13428_s4 + $0x1a04] ss:$8 sps:$4 sm:$0xff]   ;;  %v1830_v34 = vcombine.high %v14035_v31, %v14035_v31 }
 0x1d0   : > { %9172 = vmatprep.subr.bf16.mxu0 %v11950_v35  ;;  %v14045_v35 = vrot.slane %v13952_v17, %v13501_v52 }
 0x1d1   : > { %v14056_v17 = vrot.slane %v1830_v34, %v13501_v52  ;;  %v12110_v34 = vld [vmem:[%s13428_s4 + $0x7e4] ss:$8 sps:$4 sm:$0xff]  }
 0x1d2   : > { %8394 = vmatpush1.bf16.msra.mxu1 %v11945_v36  ;;  %v1859_v36 = vcombine.high %v13964_v24, %v13964_v24  ;;  %v12030_v24 = vld [vmem:[%s13428_s4 + $0x710] ss:$8 sps:$4 sm:$0xff]  }
 0x1d3   : > { %9173 = vmatpush1.bf16.msra.mxu0 %v11948_v38  ;;  %8395 = vmatprep.subr.bf16.mxu1 %v11953_v39  ;;  %v12024_v38 = vld [vmem:[%s13428_s4 + $0x700] ss:$8 sps:$4 sm:$0xff]  }
 0x1d4   : > { %9174 = vmatprep.subr.bf16.mxu0 %v11956_v40  ;;  %v12027_v39 = vld [vmem:[%s13428_s4 + $0x1a00] ss:$8 sps:$4 sm:$0xff]   ;;  %v12032_v40 = vld [vmem:[%s13428_s4 + $0x714] ss:$8 sps:$4 sm:$0xff]  }
 0x1d6   : > { %8396 = vmatpush1.bf16.msra.mxu1 %v11951_v20  ;;  %v12035_v20 = vld [vmem:[%s13428_s4 + $0x1a14] ss:$8 sps:$4 sm:$0xff]  }
 0x1d7   : > { %9175 = vmatpush1.bf16.msra.mxu0 %v11954_v42  ;;  %8397 = vmatprep.subr.bf16.mxu1 %v11959_v44  ;;  %v1617_v42 = vcombine.high %v13971_v29, %v13971_v29  ;;  %v12033_v44 = vld [vmem:[%s13428_s4 + $0x1a10] ss:$8 sps:$4 sm:$0xff]   ;;  %v12041_v29 = vld [vmem:[%s13428_s4 + $0x1a24] ss:$8 sps:$4 sm:$0xff]  }
 0x1d8   : > { %9176 = vmatprep.subr.bf16.mxu0 %v11962_v49  ;;  %v12038_v49 = vld [vmem:[%s13428_s4 + $0x724] ss:$8 sps:$4 sm:$0xff]  }
 0x1da   : > { %8398 = vmatpush1.bf16.msra.mxu1 %v11957_v45  ;;  %v12036_v45 = vld [vmem:[%s13428_s4 + $0x720] ss:$8 sps:$4 sm:$0xff]  }
 0x1db   : > { %9177 = vmatpush1.bf16.msra.mxu0 %v11960_v46  ;;  %8399 = vmatprep.subr.bf16.mxu1 %v11965_v48  ;;  %v12039_v46 = vld [vmem:[%s13428_s4 + $0x1a20] ss:$8 sps:$4 sm:$0xff]   ;;  %v12044_v48 = vld [vmem:[%s13428_s4 + $0x734] ss:$8 sps:$4 sm:$0xff]  }
 0x1dc   : > { %9178 = vmatprep.subr.bf16.mxu0 %v11968_v50  ;;  %v12047_v50 = vld [vmem:[%s13428_s4 + $0x1a34] ss:$8 sps:$4 sm:$0xff]  }
 0x1de   : > { %8400 = vmatpush1.bf16.msra.mxu1 %v11963_v54  ;;  %v12042_v54 = vld [vmem:[%s13428_s4 + $0x730] ss:$8 sps:$4 sm:$0xff]  }
 0x1df   : > { %9179 = vmatpush1.bf16.msra.mxu0 %v11966_v55  ;;  %8401 = vmatprep.subr.bf16.mxu1 %v11971_v57  ;;  %v12045_v55 = vld [vmem:[%s13428_s4 + $0x1a30] ss:$8 sps:$4 sm:$0xff]   ;;  %v12050_v57 = vld [vmem:[%s13428_s4 + $0x744] ss:$8 sps:$4 sm:$0xff]  }
 0x1e0   : > { %9180 = vmatprep.subr.bf16.mxu0 %v11974_v58  ;;  %v12053_v58 = vld [vmem:[%s13428_s4 + $0x1a44] ss:$8 sps:$4 sm:$0xff]  }
 0x1e2   : > { %8402 = vmatpush1.bf16.msra.mxu1 %v11969_v37  ;;  %v12048_v37 = vld [vmem:[%s13428_s4 + $0x740] ss:$8 sps:$4 sm:$0xff]  }
 0x1e3   : > { %9181 = vmatpush1.bf16.msra.mxu0 %v11972_v59  ;;  %8403 = vmatprep.subr.bf16.mxu1 %v11977_v60  ;;  %v12051_v59 = vld [vmem:[%s13428_s4 + $0x1a40] ss:$8 sps:$4 sm:$0xff]   ;;  %v12056_v60 = vld [vmem:[%s13428_s4 + $0x754] ss:$8 sps:$4 sm:$0xff]  }
 0x1e4   : > { %9182 = vmatprep.subr.bf16.mxu0 %v11980_v41  ;;  %v12059_v41 = vld [vmem:[%s13428_s4 + $0x1a54] ss:$8 sps:$4 sm:$0xff]  }
 0x1e6   : > { %8404 = vmatpush1.bf16.msra.mxu1 %v11975_v61  ;;  %v12054_v61 = vld [vmem:[%s13428_s4 + $0x750] ss:$8 sps:$4 sm:$0xff]  }
 0x1e7   : > { %9183 = vmatpush1.bf16.msra.mxu0 %v11978_v62  ;;  %8405 = vmatprep.subr.bf16.mxu1 %v11983_v0  ;;  %v12057_v62 = vld [vmem:[%s13428_s4 + $0x1a50] ss:$8 sps:$4 sm:$0xff]   ;;  %v12062_v0 = vld [vmem:[%s13428_s4 + $0x764] ss:$8 sps:$4 sm:$0xff]  }
 0x1e8   : > { %9184 = vmatprep.subr.bf16.mxu0 %v11986_v2  ;;  %v12065_v2 = vld [vmem:[%s13428_s4 + $0x1a64] ss:$8 sps:$4 sm:$0xff]  }
 0x1ea   : > { %8406 = vmatpush1.bf16.msra.mxu1 %v11981_v3  ;;  %v12060_v3 = vld [vmem:[%s13428_s4 + $0x760] ss:$8 sps:$4 sm:$0xff]  }
 0x1eb   : > { %9185 = vmatpush1.bf16.msra.mxu0 %v11984_v6  ;;  %8407 = vmatprep.subr.bf16.mxu1 %v11989_v43  ;;  %v12063_v6 = vld [vmem:[%s13428_s4 + $0x1a60] ss:$8 sps:$4 sm:$0xff]   ;;  %v12068_v43 = vld [vmem:[%s13428_s4 + $0x774] ss:$8 sps:$4 sm:$0xff]  }
 0x1ec   : > { %9186 = vmatprep.subr.bf16.mxu0 %v11992_v51  ;;  %v12071_v51 = vld [vmem:[%s13428_s4 + $0x1a74] ss:$8 sps:$4 sm:$0xff]  }
 0x1ee   : > { %8408 = vmatpush1.bf16.msra.mxu1 %v11987_v7  ;;  %v12066_v7 = vld [vmem:[%s13428_s4 + $0x770] ss:$8 sps:$4 sm:$0xff]  }
 0x1ef   : > { %9187 = vmatpush1.bf16.msra.mxu0 %v11990_v8  ;;  %8409 = vmatprep.subr.bf16.mxu1 %v11995_v30  ;;  %v12069_v8 = vld [vmem:[%s13428_s4 + $0x1a70] ss:$8 sps:$4 sm:$0xff]   ;;  %v12074_v30 = vld [vmem:[%s13428_s4 + $0x784] ss:$8 sps:$4 sm:$0xff]  }
 0x1f0   : > { %9188 = vmatprep.subr.bf16.mxu0 %v11998_v10  ;;  %v12077_v10 = vld [vmem:[%s13428_s4 + $0x1a84] ss:$8 sps:$4 sm:$0xff]  }
 0x1f2   : > { %8410 = vmatpush1.bf16.msra.mxu1 %v11993_v11  ;;  %v12072_v11 = vld [vmem:[%s13428_s4 + $0x780] ss:$8 sps:$4 sm:$0xff]  }
 0x1f3   : > { %9189 = vmatpush1.bf16.msra.mxu0 %v11996_v12  ;;  %8411 = vmatprep.subr.bf16.mxu1 %v12001_v13  ;;  %v12075_v12 = vld [vmem:[%s13428_s4 + $0x1a80] ss:$8 sps:$4 sm:$0xff]   ;;  %v12080_v13 = vld [vmem:[%s13428_s4 + $0x794] ss:$8 sps:$4 sm:$0xff]  }
 0x1f4   : > { %9190 = vmatprep.subr.bf16.mxu0 %v12004_v14  ;;  %v12083_v14 = vld [vmem:[%s13428_s4 + $0x1a94] ss:$8 sps:$4 sm:$0xff]  }
 0x1f6   : > { %8412 = vmatpush1.bf16.msra.mxu1 %v11999_v16  ;;  %v12078_v16 = vld [vmem:[%s13428_s4 + $0x790] ss:$8 sps:$4 sm:$0xff]  }
 0x1f7   : > { %9191 = vmatpush1.bf16.msra.mxu0 %v12002_v1  ;;  %8413 = vmatprep.subr.bf16.mxu1 %v12007_v18  ;;  %v12081_v1 = vld [vmem:[%s13428_s4 + $0x1a90] ss:$8 sps:$4 sm:$0xff]   ;;  %v12086_v18 = vld [vmem:[%s13428_s4 + $0x7a4] ss:$8 sps:$4 sm:$0xff]  }
 0x1f8   : > { %9192 = vmatprep.subr.bf16.mxu0 %v12010_v4  ;;  %v12089_v4 = vld [vmem:[%s13428_s4 + $0x1aa4] ss:$8 sps:$4 sm:$0xff]  }
 0x1fa   : > { %8414 = vmatpush1.bf16.msra.mxu1 %v12005_v19  ;;  %v12084_v19 = vld [vmem:[%s13428_s4 + $0x7a0] ss:$8 sps:$4 sm:$0xff]  }
 0x1fb   : > { %9193 = vmatpush1.bf16.msra.mxu0 %v12008_v21  ;;  %8415 = vmatprep.subr.bf16.mxu1 %v12013_v22  ;;  %v12087_v21 = vld [vmem:[%s13428_s4 + $0x1aa0] ss:$8 sps:$4 sm:$0xff]   ;;  %v12092_v22 = vld [vmem:[%s13428_s4 + $0x7b4] ss:$8 sps:$4 sm:$0xff]  }
 0x1fc   : > { %9194 = vmatprep.subr.bf16.mxu0 %v12016_v23  ;;  %v12095_v23 = vld [vmem:[%s13428_s4 + $0x1ab4] ss:$8 sps:$4 sm:$0xff]  }
 0x1fe   : > { %8416 = vmatpush1.bf16.msra.mxu1 %v12011_v27  ;;  %v12098_v27 = vld [vmem:[%s13428_s4 + $0x7c4] ss:$8 sps:$4 sm:$0xff]  }
 0x1ff   : > { %9195 = vmatpush1.bf16.msra.mxu0 %v12014_v28  ;;  %8417 = vmatprep.subr.bf16.mxu1 %v12019_v9  ;;  %v12101_v28 = vld [vmem:[%s13428_s4 + $0x1ac4] ss:$8 sps:$4 sm:$0xff]   ;;  %v12096_v9 = vld [vmem:[%s13428_s4 + $0x7c0] ss:$8 sps:$4 sm:$0xff]  }
 0x200   : > { %9196 = vmatprep.subr.bf16.mxu0 %v12022_v63  ;;  %v12099_v63 = vld [vmem:[%s13428_s4 + $0x1ac0] ss:$8 sps:$4 sm:$0xff]  }
 0x202   : > { %8418 = vmatpush1.bf16.msra.mxu1 %v12017_v53  ;;  %v12104_v53 = vld [vmem:[%s13428_s4 + $0x7d4] ss:$8 sps:$4 sm:$0xff]  }
 0x203   : > { %9197 = vmatpush1.bf16.msra.mxu0 %v12020_v32  ;;  %8428 = vmatprep.subr.bf16.mxu1 %v12026_v56  ;;  %v12107_v32 = vld [vmem:[%s13428_s4 + $0x1ad4] ss:$8 sps:$4 sm:$0xff]   ;;  %v12102_v56 = vld [vmem:[%s13428_s4 + $0x7d0] ss:$8 sps:$4 sm:$0xff]  }
 0x204   : > { %9207 = vmatprep.subr.bf16.mxu0 %v12029_v33  ;;  %v12105_v33 = vld [vmem:[%s13428_s4 + $0x1ad0] ss:$8 sps:$4 sm:$0xff]  }
 0x205   : > { %8420 = vmatmul.mubr.bf16.vlgmr.msra.gmra.mrb[0].mxu1 %v14045_v35 }
 0x206   : > { %9199 = vmatmul.mubr.bf16.vlgmr.msra.gmra.mrb[0].mxu0 %v1859_v36  ;;  %8429 = vmatpush1.bf16.msra.mxu1 %v12024_v38  ;;  %v12113_v36 = vld [vmem:[%s13428_s4 + $0x1ae4] ss:$8 sps:$4 sm:$0xff]  }
 0x207   : > { %9208 = vmatpush1.bf16.msra.mxu0 %v12027_v39  ;;  %8430 = vmatprep.subr.bf16.mxu1 %v12032_v40  ;;  %v14113_v38 = vld.sshfl [vmem:[%s13449_s12 + $0x10] sm:$0xff pattern:$0x75316420]  ;;  %v12108_v39 = vld [vmem:[%s13428_s4 + $0x7e0] ss:$8 sps:$4 sm:$0xff]  }
 0x208   : > { %9209 = vmatprep.subr.bf16.mxu0 %v12035_v20  ;;  %8460 = vmatprep.mubr.bf16.mxu1 %v1617_v42  ;;  %v12111_v40 = vld [vmem:[%s13428_s4 + $0x1ae0] ss:$8 sps:$4 sm:$0xff]   ;;  %v12116_v20 = vld [vmem:[%s13428_s4 + $0x7f4] ss:$8 sps:$4 sm:$0xff]  }
 0x209   : > { %9239 = vmatprep.mubr.bf16.mxu0 %v14056_v17  ;;  %v12119_v42 = vld [vmem:[%s13428_s4 + $0x1af4] ss:$8 sps:$4 sm:$0xff]  }
 0x20a   : > { %8431 = vmatpush1.bf16.msra.mxu1 %v12030_v24  ;;  %v12114_v24 = vld [vmem:[%s13428_s4 + $0x7f0] ss:$8 sps:$4 sm:$0xff]  }
 0x20b   : > { %9210 = vmatpush1.bf16.msra.mxu0 %v12033_v44  ;;  %8432 = vmatprep.subr.bf16.mxu1 %v12038_v49  ;;  %v12117_v44 = vld [vmem:[%s13428_s4 + $0x1af0] ss:$8 sps:$4 sm:$0xff]   ;;  %v12122_v49 = vld [vmem:[%s13428_s4 + $0x804] ss:$8 sps:$4 sm:$0xff]  }
 0x20c   : > { %9211 = vmatprep.subr.bf16.mxu0 %v12041_v29  ;;  %v12126_v29 = vld [vmem:[%s13428_s4 + $0x1b04] ss:$8 sps:$4 sm:$0xff]  }
 0x20e   : > { %8433 = vmatpush1.bf16.msra.mxu1 %v12036_v45  ;;  %v1633_v45 = vcombine.high %v14113_v38, %v14113_v38 }
 0x20f   : > { %9212 = vmatpush1.bf16.msra.mxu0 %v12039_v46  ;;  %8434 = vmatprep.subr.bf16.mxu1 %v12044_v48  ;;  %v1615_v46 = vcombine.high %v14045_v35, %v14045_v35  ;;  %v14129_v48 = vrot.slane %v14035_v31, %v13501_v52  ;;  %v1862_v35 = vcombine.high %v14056_v17, %v14056_v17  ;;  %v12127_v31 = vld [vmem:[%s13428_s4 + $0x810] ss:$8 sps:$4 sm:$0xff]   ;;  %v12133_v17 = vld [vmem:[%s13428_s4 + $0x820] ss:$8 sps:$4 sm:$0xff]  }
 0x210   : > { %9213 = vmatprep.subr.bf16.mxu0 %v12047_v50  ;;  %v12120_v50 = vld [vmem:[%s13428_s4 + $0x800] ss:$8 sps:$4 sm:$0xff]  }
 0x212   : > { %8435 = vmatpush1.bf16.msra.mxu1 %v12042_v54  ;;  %v12124_v54 = vld [vmem:[%s13428_s4 + $0x1b00] ss:$8 sps:$4 sm:$0xff]  }
 0x213   : > { %9214 = vmatpush1.bf16.msra.mxu0 %v12045_v55  ;;  %8436 = vmatprep.subr.bf16.mxu1 %v12050_v57  ;;  %v12129_v55 = vld [vmem:[%s13428_s4 + $0x814] ss:$8 sps:$4 sm:$0xff]  }
 0x214   : > { %9215 = vmatprep.subr.bf16.mxu0 %v12053_v58  ;;  %v12132_v57 = vld [vmem:[%s13428_s4 + $0x1b14] ss:$8 sps:$4 sm:$0xff]   ;;  %v14136_v58 = vrot.slane %v1633_v45, %v13501_v52  ;;  %v12207_v45 = vld [vmem:[%s13428_s4 + $0x8e4] ss:$8 sps:$4 sm:$0xff]  }
 0x216   : > { %8437 = vmatpush1.bf16.msra.mxu1 %v12048_v37  ;;  %v12130_v37 = vld [vmem:[%s13428_s4 + $0x1b10] ss:$8 sps:$4 sm:$0xff]  }
 0x217   : > { %9216 = vmatpush1.bf16.msra.mxu0 %v12051_v59  ;;  %8438 = vmatprep.subr.bf16.mxu1 %v12056_v60  ;;  %v12135_v59 = vld [vmem:[%s13428_s4 + $0x824] ss:$8 sps:$4 sm:$0xff]  }
 0x218   : > { %9217 = vmatprep.subr.bf16.mxu0 %v12059_v41  ;;  %v12138_v60 = vld [vmem:[%s13428_s4 + $0x1b24] ss:$8 sps:$4 sm:$0xff]   ;;  %v12136_v41 = vld [vmem:[%s13428_s4 + $0x1b20] ss:$8 sps:$4 sm:$0xff]  }
 0x21a   : > { %8439 = vmatpush1.bf16.msra.mxu1 %v12054_v61  ;;  %v12141_v61 = vld [vmem:[%s13428_s4 + $0x834] ss:$8 sps:$4 sm:$0xff]  }
 0x21b   : > { %9218 = vmatpush1.bf16.msra.mxu0 %v12057_v62  ;;  %8440 = vmatprep.subr.bf16.mxu1 %v12062_v0  ;;  %v12144_v62 = vld [vmem:[%s13428_s4 + $0x1b34] ss:$8 sps:$4 sm:$0xff]   ;;  %v12139_v0 = vld [vmem:[%s13428_s4 + $0x830] ss:$8 sps:$4 sm:$0xff]  }
 0x21c   : > { %9219 = vmatprep.subr.bf16.mxu0 %v12065_v2  ;;  %v12142_v2 = vld [vmem:[%s13428_s4 + $0x1b30] ss:$8 sps:$4 sm:$0xff]  }
 0x21e   : > { %8441 = vmatpush1.bf16.msra.mxu1 %v12060_v3  ;;  %v12147_v3 = vld [vmem:[%s13428_s4 + $0x844] ss:$8 sps:$4 sm:$0xff]  }
 0x21f   : > { %9220 = vmatpush1.bf16.msra.mxu0 %v12063_v6  ;;  %8442 = vmatprep.subr.bf16.mxu1 %v12068_v43  ;;  %v12150_v6 = vld [vmem:[%s13428_s4 + $0x1b44] ss:$8 sps:$4 sm:$0xff]   ;;  %v12145_v43 = vld [vmem:[%s13428_s4 + $0x840] ss:$8 sps:$4 sm:$0xff]  }
 0x220   : > { %9221 = vmatprep.subr.bf16.mxu0 %v12071_v51  ;;  %v12148_v51 = vld [vmem:[%s13428_s4 + $0x1b40] ss:$8 sps:$4 sm:$0xff]  }
 0x222   : > { %8443 = vmatpush1.bf16.msra.mxu1 %v12066_v7  ;;  %v12153_v7 = vld [vmem:[%s13428_s4 + $0x854] ss:$8 sps:$4 sm:$0xff]  }
 0x223   : > { %9222 = vmatpush1.bf16.msra.mxu0 %v12069_v8  ;;  %8444 = vmatprep.subr.bf16.mxu1 %v12074_v30  ;;  %v12156_v8 = vld [vmem:[%s13428_s4 + $0x1b54] ss:$8 sps:$4 sm:$0xff]   ;;  %v12151_v30 = vld [vmem:[%s13428_s4 + $0x850] ss:$8 sps:$4 sm:$0xff]  }
 0x224   : > { %9223 = vmatprep.subr.bf16.mxu0 %v12077_v10  ;;  %v12154_v10 = vld [vmem:[%s13428_s4 + $0x1b50] ss:$8 sps:$4 sm:$0xff]  }
 0x226   : > { %8445 = vmatpush1.bf16.msra.mxu1 %v12072_v11  ;;  %v12159_v11 = vld [vmem:[%s13428_s4 + $0x864] ss:$8 sps:$4 sm:$0xff]  }
 0x227   : > { %9224 = vmatpush1.bf16.msra.mxu0 %v12075_v12  ;;  %8446 = vmatprep.subr.bf16.mxu1 %v12080_v13  ;;  %v12162_v12 = vld [vmem:[%s13428_s4 + $0x1b64] ss:$8 sps:$4 sm:$0xff]   ;;  %v12157_v13 = vld [vmem:[%s13428_s4 + $0x860] ss:$8 sps:$4 sm:$0xff]  }
 0x228   : > { %9225 = vmatprep.subr.bf16.mxu0 %v12083_v14  ;;  %v12160_v14 = vld [vmem:[%s13428_s4 + $0x1b60] ss:$8 sps:$4 sm:$0xff]  }
 0x22a   : > { %8447 = vmatpush1.bf16.msra.mxu1 %v12078_v16  ;;  %v12165_v16 = vld [vmem:[%s13428_s4 + $0x874] ss:$8 sps:$4 sm:$0xff]  }
 0x22b   : > { %9226 = vmatpush1.bf16.msra.mxu0 %v12081_v1  ;;  %8448 = vmatprep.subr.bf16.mxu1 %v12086_v18  ;;  %v12168_v1 = vld [vmem:[%s13428_s4 + $0x1b74] ss:$8 sps:$4 sm:$0xff]   ;;  %v12163_v18 = vld [vmem:[%s13428_s4 + $0x870] ss:$8 sps:$4 sm:$0xff]  }
 0x22c   : > { %9227 = vmatprep.subr.bf16.mxu0 %v12089_v4  ;;  %v12166_v4 = vld [vmem:[%s13428_s4 + $0x1b70] ss:$8 sps:$4 sm:$0xff]  }
 0x22e   : > { %8449 = vmatpush1.bf16.msra.mxu1 %v12084_v19  ;;  %v12171_v19 = vld [vmem:[%s13428_s4 + $0x884] ss:$8 sps:$4 sm:$0xff]  }
 0x22f   : > { %9228 = vmatpush1.bf16.msra.mxu0 %v12087_v21  ;;  %8450 = vmatprep.subr.bf16.mxu1 %v12092_v22  ;;  %v12174_v21 = vld [vmem:[%s13428_s4 + $0x1b84] ss:$8 sps:$4 sm:$0xff]   ;;  %v12169_v22 = vld [vmem:[%s13428_s4 + $0x880] ss:$8 sps:$4 sm:$0xff]  }
 0x230   : > { %9229 = vmatprep.subr.bf16.mxu0 %v12095_v23  ;;  %v12172_v23 = vld [vmem:[%s13428_s4 + $0x1b80] ss:$8 sps:$4 sm:$0xff]  }
 0x232   : > { %8451 = vmatpush1.bf16.msra.mxu1 %v12090_v25  ;;  %v12177_v25 = vld [vmem:[%s13428_s4 + $0x894] ss:$8 sps:$4 sm:$0xff]  }
 0x233   : > { %9230 = vmatpush1.bf16.msra.mxu0 %v12093_v26  ;;  %8452 = vmatprep.subr.bf16.mxu1 %v12098_v27  ;;  %v12180_v26 = vld [vmem:[%s13428_s4 + $0x1b94] ss:$8 sps:$4 sm:$0xff]   ;;  %v12175_v27 = vld [vmem:[%s13428_s4 + $0x890] ss:$8 sps:$4 sm:$0xff]  }
 0x234   : > { %9231 = vmatprep.subr.bf16.mxu0 %v12101_v28  ;;  %v12178_v28 = vld [vmem:[%s13428_s4 + $0x1b90] ss:$8 sps:$4 sm:$0xff]  }
 0x236   : > { %8453 = vmatpush1.bf16.msra.mxu1 %v12096_v9  ;;  %v12183_v9 = vld [vmem:[%s13428_s4 + $0x8a4] ss:$8 sps:$4 sm:$0xff]  }
 0x237   : > { %9232 = vmatpush1.bf16.msra.mxu0 %v12099_v63  ;;  %8454 = vmatprep.subr.bf16.mxu1 %v12104_v53  ;;  %v12186_v63 = vld [vmem:[%s13428_s4 + $0x1ba4] ss:$8 sps:$4 sm:$0xff]   ;;  %v12181_v53 = vld [vmem:[%s13428_s4 + $0x8a0] ss:$8 sps:$4 sm:$0xff]  }
 0x238   : > { %9233 = vmatprep.subr.bf16.mxu0 %v12107_v32  ;;  %v12184_v32 = vld [vmem:[%s13428_s4 + $0x1ba0] ss:$8 sps:$4 sm:$0xff]  }
 0x23a   : > { %8455 = vmatpush1.bf16.msra.mxu1 %v12102_v56  ;;  %v12189_v56 = vld [vmem:[%s13428_s4 + $0x8b4] ss:$8 sps:$4 sm:$0xff]  }
 0x23b   : > { %9234 = vmatpush1.bf16.msra.mxu0 %v12105_v33  ;;  %8456 = vmatprep.subr.bf16.mxu1 %v12110_v34  ;;  %v12192_v33 = vld [vmem:[%s13428_s4 + $0x1bb4] ss:$8 sps:$4 sm:$0xff]   ;;  %v12187_v34 = vld [vmem:[%s13428_s4 + $0x8b0] ss:$8 sps:$4 sm:$0xff]  }
 0x23c   : > { %9235 = vmatprep.subr.bf16.mxu0 %v12113_v36  ;;  %v12190_v36 = vld [vmem:[%s13428_s4 + $0x1bb0] ss:$8 sps:$4 sm:$0xff]  }
 0x23e   : > { %8457 = vmatpush1.bf16.msra.mxu1 %v12108_v39  ;;  %v12195_v39 = vld [vmem:[%s13428_s4 + $0x8c4] ss:$8 sps:$4 sm:$0xff]  }
 0x23f   : > { %9236 = vmatpush1.bf16.msra.mxu0 %v12111_v40  ;;  %8458 = vmatprep.subr.bf16.mxu1 %v12116_v20  ;;  %v12198_v40 = vld [vmem:[%s13428_s4 + $0x1bc4] ss:$8 sps:$4 sm:$0xff]   ;;  %v12193_v20 = vld [vmem:[%s13428_s4 + $0x8c0] ss:$8 sps:$4 sm:$0xff]  }
 0x240   : > { %9237 = vmatprep.subr.bf16.mxu0 %v12119_v42  ;;  %v12196_v42 = vld [vmem:[%s13428_s4 + $0x1bc0] ss:$8 sps:$4 sm:$0xff]  }
 0x242   : > { %8459 = vmatpush1.bf16.msra.mxu1 %v12114_v24  ;;  %v12201_v24 = vld [vmem:[%s13428_s4 + $0x8d4] ss:$8 sps:$4 sm:$0xff]  }
 0x243   : > { %9238 = vmatpush1.bf16.msra.mxu0 %v12117_v44  ;;  %8469 = vmatprep.subr.bf16.mxu1 %v12122_v49  ;;  %v12204_v44 = vld [vmem:[%s13428_s4 + $0x1bd4] ss:$8 sps:$4 sm:$0xff]   ;;  %v12199_v49 = vld [vmem:[%s13428_s4 + $0x8d0] ss:$8 sps:$4 sm:$0xff]  }
 0x244   : > { %9248 = vmatprep.subr.bf16.mxu0 %v12126_v29  ;;  %v12202_v29 = vld [vmem:[%s13428_s4 + $0x1bd0] ss:$8 sps:$4 sm:$0xff]  }
 0x245   : > { %8461 = vmatmul.mubr.bf16.vlgmr.msra.gmra.mrb[0].mxu1 %v1615_v46  ;;  %v12210_v46 = vld [vmem:[%s13428_s4 + $0x1be4] ss:$8 sps:$4 sm:$0xff]  }
 0x246   : > { %9240 = vmatmul.mubr.bf16.vlgmr.msra.gmra.mrb[0].mxu0 %v14129_v48  ;;  %8470 = vmatpush1.bf16.msra.mxu1 %v12120_v50  ;;  %v14195_v50 = vld [vmem:[%s13449_s12 + $0x38] sm:$0xff] }
 0x247   : > { %9249 = vmatpush1.bf16.msra.mxu0 %v12124_v54  ;;  %8471 = vmatprep.subr.bf16.mxu1 %v12129_v55  ;;  %v12205_v54 = vld [vmem:[%s13428_s4 + $0x8e0] ss:$8 sps:$4 sm:$0xff]  }
 0x248   : > { %9250 = vmatprep.subr.bf16.mxu0 %v12132_v57  ;;  %8501 = vmatprep.mubr.bf16.mxu1 %v14136_v58  ;;  %v12208_v55 = vld [vmem:[%s13428_s4 + $0x1be0] ss:$8 sps:$4 sm:$0xff]   ;;  %v12213_v57 = vld [vmem:[%s13428_s4 + $0x8f4] ss:$8 sps:$4 sm:$0xff]  }
 0x249   : > { %9280 = vmatprep.mubr.bf16.mxu0 %v1862_v35  ;;  %v12216_v35 = vld [vmem:[%s13428_s4 + $0x1bf4] ss:$8 sps:$4 sm:$0xff]  }
 0x24a   : > { %8472 = vmatpush1.bf16.msra.mxu1 %v12127_v31  ;;  %v14203_v31 = vrot.slane %v14195_v50, %v13501_v52 }
 0x24b   : > { %9251 = vmatpush1.bf16.msra.mxu0 %v12130_v37  ;;  %8473 = vmatprep.subr.bf16.mxu1 %v12135_v59  ;;  %v12211_v37 = vld [vmem:[%s13428_s4 + $0x8f0] ss:$8 sps:$4 sm:$0xff]  }
 0x24c   : > { %9252 = vmatprep.subr.bf16.mxu0 %v12138_v60  ;;  %v12214_v59 = vld [vmem:[%s13428_s4 + $0x1bf0] ss:$8 sps:$4 sm:$0xff]   ;;  %v12219_v60 = vld [vmem:[%s13428_s4 + $0x904] ss:$8 sps:$4 sm:$0xff]  }
 0x24e   : > { %8474 = vmatpush1.bf16.msra.mxu1 %v12133_v17  ;;  %v12222_v17 = vld [vmem:[%s13428_s4 + $0x1c04] ss:$8 sps:$4 sm:$0xff]  }
 0x24f   : > { %9253 = vmatpush1.bf16.msra.mxu0 %v12136_v41  ;;  %8475 = vmatprep.subr.bf16.mxu1 %v12141_v61  ;;  %v1878_v41 = vcombine.high %v14203_v31, %v14203_v31  ;;  %v14213_v61 = vrot.slane %v14113_v38, %v13501_v52 }
 0x250   : > { %9254 = vmatprep.subr.bf16.mxu0 %v12144_v62  ;;  %v1860_v62 = vcombine.high %v14129_v48, %v14129_v48  ;;  %v12223_v48 = vld [vmem:[%s13428_s4 + $0x910] ss:$8 sps:$4 sm:$0xff]  }
 0x251   : > { %v14224_v38 = vrot.slane %v1878_v41, %v13501_v52  ;;  %v12298_v41 = vld [vmem:[%s13428_s4 + $0x1cd0] ss:$8 sps:$4 sm:$0xff]  }
 0x252   : > { %8476 = vmatpush1.bf16.msra.mxu1 %v12139_v0  ;;  %v12217_v0 = vld [vmem:[%s13428_s4 + $0x900] ss:$8 sps:$4 sm:$0xff]  }
 0x253   : > { %9255 = vmatpush1.bf16.msra.mxu0 %v12142_v2  ;;  %8477 = vmatprep.subr.bf16.mxu1 %v12147_v3  ;;  %v12220_v2 = vld [vmem:[%s13428_s4 + $0x1c00] ss:$8 sps:$4 sm:$0xff]   ;;  %v12225_v3 = vld [vmem:[%s13428_s4 + $0x914] ss:$8 sps:$4 sm:$0xff]  }
 0x254   : > { %9256 = vmatprep.subr.bf16.mxu0 %v12150_v6  ;;  %v12228_v6 = vld [vmem:[%s13428_s4 + $0x1c14] ss:$8 sps:$4 sm:$0xff]  }
 0x256   : > { %8478 = vmatpush1.bf16.msra.mxu1 %v12145_v43  ;;  %v1665_v43 = vcombine.high %v14136_v58, %v14136_v58  ;;  %v12234_v58 = vld [vmem:[%s13428_s4 + $0x1c24] ss:$8 sps:$4 sm:$0xff]  }
 0x257   : > { %9257 = vmatpush1.bf16.msra.mxu0 %v12148_v51  ;;  %8479 = vmatprep.subr.bf16.mxu1 %v12153_v7  ;;  %v12226_v51 = vld [vmem:[%s13428_s4 + $0x1c10] ss:$8 sps:$4 sm:$0xff]   ;;  %v12231_v7 = vld [vmem:[%s13428_s4 + $0x924] ss:$8 sps:$4 sm:$0xff]  }
 0x258   : > { %9258 = vmatprep.subr.bf16.mxu0 %v12156_v8  ;;  %v12229_v8 = vld [vmem:[%s13428_s4 + $0x920] ss:$8 sps:$4 sm:$0xff]  }
 0x25a   : > { %8480 = vmatpush1.bf16.msra.mxu1 %v12151_v30  ;;  %v12232_v30 = vld [vmem:[%s13428_s4 + $0x1c20] ss:$8 sps:$4 sm:$0xff]  }
 0x25b   : > { %9259 = vmatpush1.bf16.msra.mxu0 %v12154_v10  ;;  %8481 = vmatprep.subr.bf16.mxu1 %v12159_v11  ;;  %v12237_v10 = vld [vmem:[%s13428_s4 + $0x934] ss:$8 sps:$4 sm:$0xff]  }
 0x25c   : > { %9260 = vmatprep.subr.bf16.mxu0 %v12162_v12  ;;  %v12240_v11 = vld [vmem:[%s13428_s4 + $0x1c34] ss:$8 sps:$4 sm:$0xff]   ;;  %v12235_v12 = vld [vmem:[%s13428_s4 + $0x930] ss:$8 sps:$4 sm:$0xff]  }
 0x25e   : > { %8482 = vmatpush1.bf16.msra.mxu1 %v12157_v13  ;;  %v12238_v13 = vld [vmem:[%s13428_s4 + $0x1c30] ss:$8 sps:$4 sm:$0xff]  }
 0x25f   : > { %9261 = vmatpush1.bf16.msra.mxu0 %v12160_v14  ;;  %8483 = vmatprep.subr.bf16.mxu1 %v12165_v16  ;;  %v12243_v14 = vld [vmem:[%s13428_s4 + $0x944] ss:$8 sps:$4 sm:$0xff]  }
 0x260   : > { %9262 = vmatprep.subr.bf16.mxu0 %v12168_v1  ;;  %v12246_v16 = vld [vmem:[%s13428_s4 + $0x1c44] ss:$8 sps:$4 sm:$0xff]   ;;  %v12241_v1 = vld [vmem:[%s13428_s4 + $0x940] ss:$8 sps:$4 sm:$0xff]  }
 0x262   : > { %8484 = vmatpush1.bf16.msra.mxu1 %v12163_v18  ;;  %v12244_v18 = vld [vmem:[%s13428_s4 + $0x1c40] ss:$8 sps:$4 sm:$0xff]  }
 0x263   : > { %9263 = vmatpush1.bf16.msra.mxu0 %v12166_v4  ;;  %8485 = vmatprep.subr.bf16.mxu1 %v12171_v19  ;;  %v12249_v4 = vld [vmem:[%s13428_s4 + $0x954] ss:$8 sps:$4 sm:$0xff]  }
 0x264   : > { %9264 = vmatprep.subr.bf16.mxu0 %v12174_v21  ;;  %v12252_v19 = vld [vmem:[%s13428_s4 + $0x1c54] ss:$8 sps:$4 sm:$0xff]   ;;  %v12247_v21 = vld [vmem:[%s13428_s4 + $0x950] ss:$8 sps:$4 sm:$0xff]  }
 0x266   : > { %8486 = vmatpush1.bf16.msra.mxu1 %v12169_v22  ;;  %v12250_v22 = vld [vmem:[%s13428_s4 + $0x1c50] ss:$8 sps:$4 sm:$0xff]  }
 0x267   : > { %9265 = vmatpush1.bf16.msra.mxu0 %v12172_v23  ;;  %8487 = vmatprep.subr.bf16.mxu1 %v12177_v25  ;;  %v12255_v23 = vld [vmem:[%s13428_s4 + $0x964] ss:$8 sps:$4 sm:$0xff]  }
 0x268   : > { %9266 = vmatprep.subr.bf16.mxu0 %v12180_v26  ;;  %v12258_v25 = vld [vmem:[%s13428_s4 + $0x1c64] ss:$8 sps:$4 sm:$0xff]   ;;  %v12253_v26 = vld [vmem:[%s13428_s4 + $0x960] ss:$8 sps:$4 sm:$0xff]  }
 0x26a   : > { %8488 = vmatpush1.bf16.msra.mxu1 %v12175_v27  ;;  %v12256_v27 = vld [vmem:[%s13428_s4 + $0x1c60] ss:$8 sps:$4 sm:$0xff]  }
 0x26b   : > { %9267 = vmatpush1.bf16.msra.mxu0 %v12178_v28  ;;  %8489 = vmatprep.subr.bf16.mxu1 %v12183_v9  ;;  %v12261_v28 = vld [vmem:[%s13428_s4 + $0x974] ss:$8 sps:$4 sm:$0xff]  }
 0x26c   : > { %9268 = vmatprep.subr.bf16.mxu0 %v12186_v63  ;;  %v12264_v9 = vld [vmem:[%s13428_s4 + $0x1c74] ss:$8 sps:$4 sm:$0xff]   ;;  %v12259_v63 = vld [vmem:[%s13428_s4 + $0x970] ss:$8 sps:$4 sm:$0xff]  }
 0x26e   : > { %8490 = vmatpush1.bf16.msra.mxu1 %v12181_v53  ;;  %v12262_v53 = vld [vmem:[%s13428_s4 + $0x1c70] ss:$8 sps:$4 sm:$0xff]  }
 0x26f   : > { %9269 = vmatpush1.bf16.msra.mxu0 %v12184_v32  ;;  %8491 = vmatprep.subr.bf16.mxu1 %v12189_v56  ;;  %v12267_v32 = vld [vmem:[%s13428_s4 + $0x984] ss:$8 sps:$4 sm:$0xff]  }
 0x270   : > { %9270 = vmatprep.subr.bf16.mxu0 %v12192_v33  ;;  %v12270_v56 = vld [vmem:[%s13428_s4 + $0x1c84] ss:$8 sps:$4 sm:$0xff]   ;;  %v12265_v33 = vld [vmem:[%s13428_s4 + $0x980] ss:$8 sps:$4 sm:$0xff]  }
 0x272   : > { %8492 = vmatpush1.bf16.msra.mxu1 %v12187_v34  ;;  %v12268_v34 = vld [vmem:[%s13428_s4 + $0x1c80] ss:$8 sps:$4 sm:$0xff]  }
 0x273   : > { %9271 = vmatpush1.bf16.msra.mxu0 %v12190_v36  ;;  %8493 = vmatprep.subr.bf16.mxu1 %v12195_v39  ;;  %v12273_v36 = vld [vmem:[%s13428_s4 + $0x994] ss:$8 sps:$4 sm:$0xff]  }
 0x274   : > { %9272 = vmatprep.subr.bf16.mxu0 %v12198_v40  ;;  %v12276_v39 = vld [vmem:[%s13428_s4 + $0x1c94] ss:$8 sps:$4 sm:$0xff]   ;;  %v12271_v40 = vld [vmem:[%s13428_s4 + $0x990] ss:$8 sps:$4 sm:$0xff]  }
 0x276   : > { %8494 = vmatpush1.bf16.msra.mxu1 %v12193_v20  ;;  %v12274_v20 = vld [vmem:[%s13428_s4 + $0x1c90] ss:$8 sps:$4 sm:$0xff]  }
 0x277   : > { %9273 = vmatpush1.bf16.msra.mxu0 %v12196_v42  ;;  %8495 = vmatprep.subr.bf16.mxu1 %v12201_v24  ;;  %v12279_v42 = vld [vmem:[%s13428_s4 + $0x9a4] ss:$8 sps:$4 sm:$0xff]  }
 0x278   : > { %9274 = vmatprep.subr.bf16.mxu0 %v12204_v44  ;;  %v12282_v24 = vld [vmem:[%s13428_s4 + $0x1ca4] ss:$8 sps:$4 sm:$0xff]   ;;  %v12277_v44 = vld [vmem:[%s13428_s4 + $0x9a0] ss:$8 sps:$4 sm:$0xff]  }
 0x27a   : > { %8496 = vmatpush1.bf16.msra.mxu1 %v12199_v49  ;;  %v12280_v49 = vld [vmem:[%s13428_s4 + $0x1ca0] ss:$8 sps:$4 sm:$0xff]  }
 0x27b   : > { %9275 = vmatpush1.bf16.msra.mxu0 %v12202_v29  ;;  %8497 = vmatprep.subr.bf16.mxu1 %v12207_v45  ;;  %v12285_v29 = vld [vmem:[%s13428_s4 + $0x9b4] ss:$8 sps:$4 sm:$0xff]  }
 0x27c   : > { %9276 = vmatprep.subr.bf16.mxu0 %v12210_v46  ;;  %v12288_v45 = vld [vmem:[%s13428_s4 + $0x1cb4] ss:$8 sps:$4 sm:$0xff]   ;;  %v12283_v46 = vld [vmem:[%s13428_s4 + $0x9b0] ss:$8 sps:$4 sm:$0xff]  }
 0x27e   : > { %8498 = vmatpush1.bf16.msra.mxu1 %v12205_v54  ;;  %v12286_v54 = vld [vmem:[%s13428_s4 + $0x1cb0] ss:$8 sps:$4 sm:$0xff]  }
 0x27f   : > { %9277 = vmatpush1.bf16.msra.mxu0 %v12208_v55  ;;  %8499 = vmatprep.subr.bf16.mxu1 %v12213_v57  ;;  %v12291_v55 = vld [vmem:[%s13428_s4 + $0x9c4] ss:$8 sps:$4 sm:$0xff]  }
 0x280   : > { %9278 = vmatprep.subr.bf16.mxu0 %v12216_v35  ;;  %v12294_v57 = vld [vmem:[%s13428_s4 + $0x1cc4] ss:$8 sps:$4 sm:$0xff]   ;;  %v12289_v35 = vld [vmem:[%s13428_s4 + $0x9c0] ss:$8 sps:$4 sm:$0xff]  }
 0x282   : > { %8500 = vmatpush1.bf16.msra.mxu1 %v12211_v37  ;;  %v12292_v37 = vld [vmem:[%s13428_s4 + $0x1cc0] ss:$8 sps:$4 sm:$0xff]  }
 0x283   : > { %9279 = vmatpush1.bf16.msra.mxu0 %v12214_v59  ;;  %8510 = vmatprep.subr.bf16.mxu1 %v12219_v60  ;;  %v12297_v59 = vld [vmem:[%s13428_s4 + $0x9d4] ss:$8 sps:$4 sm:$0xff]  }
 0x284   : > { %9289 = vmatprep.subr.bf16.mxu0 %v12222_v17  ;;  %v12300_v60 = vld [vmem:[%s13428_s4 + $0x1cd4] ss:$8 sps:$4 sm:$0xff]   ;;  %v12295_v17 = vld [vmem:[%s13428_s4 + $0x9d0] ss:$8 sps:$4 sm:$0xff]  }
 0x285   : > { %8502 = vmatmul.mubr.bf16.vlgmr.msra.gmra.mrb[0].mxu1 %v14213_v61 }
 0x286   : > { %9281 = vmatmul.mubr.bf16.vlgmr.msra.gmra.mrb[0].mxu0 %v1860_v62  ;;  %8511 = vmatpush1.bf16.msra.mxu1 %v12217_v0  ;;  %v12303_v62 = vld [vmem:[%s13428_s4 + $0x9e4] ss:$8 sps:$4 sm:$0xff]  }
 0x287   : > { %9290 = vmatpush1.bf16.msra.mxu0 %v12220_v2  ;;  %8512 = vmatprep.subr.bf16.mxu1 %v12225_v3  ;;  %v12306_v0 = vld [vmem:[%s13428_s4 + $0x1ce4] ss:$8 sps:$4 sm:$0xff]  }
 0x288   : > { %9291 = vmatprep.subr.bf16.mxu0 %v12228_v6  ;;  %8542 = vmatprep.mubr.bf16.mxu1 %v1665_v43  ;;  %v13183_v2 = vld [vmem:[%s13449_s12 + $0x10] sm:$0xff]  ;;  %v12301_v6 = vld [vmem:[%s13428_s4 + $0x9e0] ss:$8 sps:$4 sm:$0xff]  }
 0x289   : > { %9321 = vmatprep.mubr.bf16.mxu0 %v14224_v38  ;;  %v1618_v3 = vcombine.high %v13183_v2, %v13183_v2  ;;  %v12304_v43 = vld [vmem:[%s13428_s4 + $0x1ce0] ss:$8 sps:$4 sm:$0xff]   ;;  %v12384_v2 = vld [vmem:[%s13428_s4 + $0x1db4] ss:$8 sps:$4 sm:$0xff]  }
 0x28a   : > { %8513 = vmatpush1.bf16.msra.mxu1 %v12223_v48  ;;  %v12309_v48 = vld [vmem:[%s13428_s4 + $0x9f4] ss:$8 sps:$4 sm:$0xff]  }
 0x28b   : > { %9292 = vmatpush1.bf16.msra.mxu0 %v12226_v51  ;;  %8514 = vmatprep.subr.bf16.mxu1 %v12231_v7  ;;  %v12312_v51 = vld [vmem:[%s13428_s4 + $0x1cf4] ss:$8 sps:$4 sm:$0xff]   ;;  %v14286_v7 = vrot.slane %v1618_v3, %v13501_v52  ;;  %v12379_v3 = vld [vmem:[%s13428_s4 + $0xab0] ss:$8 sps:$4 sm:$0xff]  }
 0x28c   : > { %9293 = vmatprep.subr.bf16.mxu0 %v12234_v58  ;;  %v12307_v58 = vld [vmem:[%s13428_s4 + $0x9f0] ss:$8 sps:$4 sm:$0xff]  }
 0x28e   : > { %8515 = vmatpush1.bf16.msra.mxu1 %v12229_v8  ;;  %v12310_v8 = vld [vmem:[%s13428_s4 + $0x1cf0] ss:$8 sps:$4 sm:$0xff]  }
 0x28f   : > { %9294 = vmatpush1.bf16.msra.mxu0 %v12232_v30  ;;  %8516 = vmatprep.subr.bf16.mxu1 %v12237_v10  ;;  %v12315_v30 = vld [vmem:[%s13428_s4 + $0xa04] ss:$8 sps:$4 sm:$0xff]  }
 0x290   : > { %9295 = vmatprep.subr.bf16.mxu0 %v12240_v11  ;;  %v12318_v10 = vld [vmem:[%s13428_s4 + $0x1d04] ss:$8 sps:$4 sm:$0xff]   ;;  %v1634_v11 = vcombine.high %v14286_v7, %v14286_v7 }
 0x292   : > { %8517 = vmatpush1.bf16.msra.mxu1 %v12235_v12  ;;  %v1663_v12 = vcombine.high %v14213_v61, %v14213_v61  ;;  %v1910_v61 = vcombine.high %v14224_v38, %v14224_v38  ;;  %v12325_v38 = vld [vmem:[%s13428_s4 + $0xa20] ss:$8 sps:$4 sm:$0xff]  }
 0x293   : > { %9296 = vmatpush1.bf16.msra.mxu0 %v12238_v13  ;;  %8518 = vmatprep.subr.bf16.mxu1 %v12243_v14  ;;  %v14298_v13 = vrot.slane %v14203_v31, %v13501_v52  ;;  %v12313_v14 = vld [vmem:[%s13428_s4 + $0xa00] ss:$8 sps:$4 sm:$0xff]   ;;  %v12319_v31 = vld [vmem:[%s13428_s4 + $0xa10] ss:$8 sps:$4 sm:$0xff]  }
 0x294   : > { %9297 = vmatprep.subr.bf16.mxu0 %v12246_v16  ;;  %v12316_v16 = vld [vmem:[%s13428_s4 + $0x1d00] ss:$8 sps:$4 sm:$0xff]  }
 0x296   : > { %8519 = vmatpush1.bf16.msra.mxu1 %v12241_v1  ;;  %v12321_v1 = vld [vmem:[%s13428_s4 + $0xa14] ss:$8 sps:$4 sm:$0xff]  }
 0x297   : > { %9298 = vmatpush1.bf16.msra.mxu0 %v12244_v18  ;;  %8520 = vmatprep.subr.bf16.mxu1 %v12249_v4  ;;  %v12324_v18 = vld [vmem:[%s13428_s4 + $0x1d14] ss:$8 sps:$4 sm:$0xff]   ;;  %v14305_v4 = vrot.slane %v1634_v11, %v13501_v52  ;;  %v12394_v11 = vld [vmem:[%s13428_s4 + $0x1dd0] ss:$8 sps:$4 sm:$0xff]  }
 0x298   : > { %9299 = vmatprep.subr.bf16.mxu0 %v12252_v19  ;;  %v12322_v19 = vld [vmem:[%s13428_s4 + $0x1d10] ss:$8 sps:$4 sm:$0xff]  }
 0x29a   : > { %8521 = vmatpush1.bf16.msra.mxu1 %v12247_v21  ;;  %v12327_v21 = vld [vmem:[%s13428_s4 + $0xa24] ss:$8 sps:$4 sm:$0xff]  }
 0x29b   : > { %9300 = vmatpush1.bf16.msra.mxu0 %v12250_v22  ;;  %8522 = vmatprep.subr.bf16.mxu1 %v12255_v23  ;;  %v12330_v22 = vld [vmem:[%s13428_s4 + $0x1d24] ss:$8 sps:$4 sm:$0xff]   ;;  %v12328_v23 = vld [vmem:[%s13428_s4 + $0x1d20] ss:$8 sps:$4 sm:$0xff]  }
 0x29c   : > { %9301 = vmatprep.subr.bf16.mxu0 %v12258_v25  ;;  %v12333_v25 = vld [vmem:[%s13428_s4 + $0xa34] ss:$8 sps:$4 sm:$0xff]  }
 0x29e   : > { %8523 = vmatpush1.bf16.msra.mxu1 %v12253_v26  ;;  %v12336_v26 = vld [vmem:[%s13428_s4 + $0x1d34] ss:$8 sps:$4 sm:$0xff]  }
 0x29f   : > { %9302 = vmatpush1.bf16.msra.mxu0 %v12256_v27  ;;  %8524 = vmatprep.subr.bf16.mxu1 %v12261_v28  ;;  %v12331_v27 = vld [vmem:[%s13428_s4 + $0xa30] ss:$8 sps:$4 sm:$0xff]  }
 0x2a0   : > { %9303 = vmatprep.subr.bf16.mxu0 %v12264_v9  ;;  %v12334_v28 = vld [vmem:[%s13428_s4 + $0x1d30] ss:$8 sps:$4 sm:$0xff]   ;;  %v12339_v9 = vld [vmem:[%s13428_s4 + $0xa44] ss:$8 sps:$4 sm:$0xff]  }
 0x2a2   : > { %8525 = vmatpush1.bf16.msra.mxu1 %v12259_v63  ;;  %v12342_v63 = vld [vmem:[%s13428_s4 + $0x1d44] ss:$8 sps:$4 sm:$0xff]  }
 0x2a3   : > { %9304 = vmatpush1.bf16.msra.mxu0 %v12262_v53  ;;  %8526 = vmatprep.subr.bf16.mxu1 %v12267_v32  ;;  %v12337_v53 = vld [vmem:[%s13428_s4 + $0xa40] ss:$8 sps:$4 sm:$0xff]  }
 0x2a4   : > { %9305 = vmatprep.subr.bf16.mxu0 %v12270_v56  ;;  %v12340_v32 = vld [vmem:[%s13428_s4 + $0x1d40] ss:$8 sps:$4 sm:$0xff]   ;;  %v12345_v56 = vld [vmem:[%s13428_s4 + $0xa54] ss:$8 sps:$4 sm:$0xff]  }
 0x2a6   : > { %8527 = vmatpush1.bf16.msra.mxu1 %v12265_v33  ;;  %v12348_v33 = vld [vmem:[%s13428_s4 + $0x1d54] ss:$8 sps:$4 sm:$0xff]  }
 0x2a7   : > { %9306 = vmatpush1.bf16.msra.mxu0 %v12268_v34  ;;  %8528 = vmatprep.subr.bf16.mxu1 %v12273_v36  ;;  %v12343_v34 = vld [vmem:[%s13428_s4 + $0xa50] ss:$8 sps:$4 sm:$0xff]  }
 0x2a8   : > { %9307 = vmatprep.subr.bf16.mxu0 %v12276_v39  ;;  %v12346_v36 = vld [vmem:[%s13428_s4 + $0x1d50] ss:$8 sps:$4 sm:$0xff]   ;;  %v12351_v39 = vld [vmem:[%s13428_s4 + $0xa64] ss:$8 sps:$4 sm:$0xff]  }
 0x2aa   : > { %8529 = vmatpush1.bf16.msra.mxu1 %v12271_v40  ;;  %v12354_v40 = vld [vmem:[%s13428_s4 + $0x1d64] ss:$8 sps:$4 sm:$0xff]  }
 0x2ab   : > { %9308 = vmatpush1.bf16.msra.mxu0 %v12274_v20  ;;  %8530 = vmatprep.subr.bf16.mxu1 %v12279_v42  ;;  %v12349_v20 = vld [vmem:[%s13428_s4 + $0xa60] ss:$8 sps:$4 sm:$0xff]  }
 0x2ac   : > { %9309 = vmatprep.subr.bf16.mxu0 %v12282_v24  ;;  %v12352_v42 = vld [vmem:[%s13428_s4 + $0x1d60] ss:$8 sps:$4 sm:$0xff]   ;;  %v12357_v24 = vld [vmem:[%s13428_s4 + $0xa74] ss:$8 sps:$4 sm:$0xff]  }
 0x2ae   : > { %8531 = vmatpush1.bf16.msra.mxu1 %v12277_v44  ;;  %v12360_v44 = vld [vmem:[%s13428_s4 + $0x1d74] ss:$8 sps:$4 sm:$0xff]  }
 0x2af   : > { %9310 = vmatpush1.bf16.msra.mxu0 %v12280_v49  ;;  %8532 = vmatprep.subr.bf16.mxu1 %v12285_v29  ;;  %v12355_v49 = vld [vmem:[%s13428_s4 + $0xa70] ss:$8 sps:$4 sm:$0xff]  }
 0x2b0   : > { %9311 = vmatprep.subr.bf16.mxu0 %v12288_v45  ;;  %v12358_v29 = vld [vmem:[%s13428_s4 + $0x1d70] ss:$8 sps:$4 sm:$0xff]   ;;  %v12363_v45 = vld [vmem:[%s13428_s4 + $0xa84] ss:$8 sps:$4 sm:$0xff]  }
 0x2b2   : > { %8533 = vmatpush1.bf16.msra.mxu1 %v12283_v46  ;;  %v12366_v46 = vld [vmem:[%s13428_s4 + $0x1d84] ss:$8 sps:$4 sm:$0xff]  }
 0x2b3   : > { %9312 = vmatpush1.bf16.msra.mxu0 %v12286_v54  ;;  %8534 = vmatprep.subr.bf16.mxu1 %v12291_v55  ;;  %v12361_v54 = vld [vmem:[%s13428_s4 + $0xa80] ss:$8 sps:$4 sm:$0xff]  }
 0x2b4   : > { %9313 = vmatprep.subr.bf16.mxu0 %v12294_v57  ;;  %v12364_v55 = vld [vmem:[%s13428_s4 + $0x1d80] ss:$8 sps:$4 sm:$0xff]   ;;  %v12369_v57 = vld [vmem:[%s13428_s4 + $0xa94] ss:$8 sps:$4 sm:$0xff]  }
 0x2b6   : > { %8535 = vmatpush1.bf16.msra.mxu1 %v12289_v35  ;;  %v12372_v35 = vld [vmem:[%s13428_s4 + $0x1d94] ss:$8 sps:$4 sm:$0xff]  }
 0x2b7   : > { %9314 = vmatpush1.bf16.msra.mxu0 %v12292_v37  ;;  %8536 = vmatprep.subr.bf16.mxu1 %v12297_v59  ;;  %v12367_v37 = vld [vmem:[%s13428_s4 + $0xa90] ss:$8 sps:$4 sm:$0xff]  }
 0x2b8   : > { %9315 = vmatprep.subr.bf16.mxu0 %v12300_v60  ;;  %v12370_v59 = vld [vmem:[%s13428_s4 + $0x1d90] ss:$8 sps:$4 sm:$0xff]   ;;  %v12375_v60 = vld [vmem:[%s13428_s4 + $0xaa4] ss:$8 sps:$4 sm:$0xff]  }
 0x2ba   : > { %8537 = vmatpush1.bf16.msra.mxu1 %v12295_v17  ;;  %v12378_v17 = vld [vmem:[%s13428_s4 + $0x1da4] ss:$8 sps:$4 sm:$0xff]  }
 0x2bb   : > { %9316 = vmatpush1.bf16.msra.mxu0 %v12298_v41  ;;  %8538 = vmatprep.subr.bf16.mxu1 %v12303_v62  ;;  %v12373_v41 = vld [vmem:[%s13428_s4 + $0xaa0] ss:$8 sps:$4 sm:$0xff]  }
 0x2bc   : > { %9317 = vmatprep.subr.bf16.mxu0 %v12306_v0  ;;  %v12376_v62 = vld [vmem:[%s13428_s4 + $0x1da0] ss:$8 sps:$4 sm:$0xff]   ;;  %v12381_v0 = vld [vmem:[%s13428_s4 + $0xab4] ss:$8 sps:$4 sm:$0xff]  }
 0x2be   : > { %8539 = vmatpush1.bf16.msra.mxu1 %v12301_v6  ;;  %v12382_v6 = vld [vmem:[%s13428_s4 + $0x1db0] ss:$8 sps:$4 sm:$0xff]  }
 0x2bf   : > { %9318 = vmatpush1.bf16.msra.mxu0 %v12304_v43  ;;  %8540 = vmatprep.subr.bf16.mxu1 %v12309_v48  ;;  %v12387_v43 = vld [vmem:[%s13428_s4 + $0xac4] ss:$8 sps:$4 sm:$0xff]  }
 0x2c0   : > { %9319 = vmatprep.subr.bf16.mxu0 %v12312_v51  ;;  %v12390_v48 = vld [vmem:[%s13428_s4 + $0x1dc4] ss:$8 sps:$4 sm:$0xff]   ;;  %v12385_v51 = vld [vmem:[%s13428_s4 + $0xac0] ss:$8 sps:$4 sm:$0xff]  }
 0x2c2   : > { %8541 = vmatpush1.bf16.msra.mxu1 %v12307_v58  ;;  %v12388_v58 = vld [vmem:[%s13428_s4 + $0x1dc0] ss:$8 sps:$4 sm:$0xff]  }
 0x2c3   : > { %9320 = vmatpush1.bf16.msra.mxu0 %v12310_v8  ;;  %8551 = vmatprep.subr.bf16.mxu1 %v12315_v30  ;;  %v12393_v8 = vld [vmem:[%s13428_s4 + $0xad4] ss:$8 sps:$4 sm:$0xff]  }
 0x2c4   : > { %9330 = vmatprep.subr.bf16.mxu0 %v12318_v10  ;;  %v12396_v30 = vld [vmem:[%s13428_s4 + $0x1dd4] ss:$8 sps:$4 sm:$0xff]   ;;  %v12391_v10 = vld [vmem:[%s13428_s4 + $0xad0] ss:$8 sps:$4 sm:$0xff]  }
 0x2c5   : > { %8543 = vmatmul.mubr.bf16.vlgmr.msra.gmra.mrb[0].mxu1 %v1663_v12  ;;  %v12399_v12 = vld [vmem:[%s13428_s4 + $0xae4] ss:$8 sps:$4 sm:$0xff]  }
 0x2c6   : > { %9322 = vmatmul.mubr.bf16.vlgmr.msra.gmra.mrb[0].mxu0 %v14298_v13  ;;  %8552 = vmatpush1.bf16.msra.mxu1 %v12313_v14  ;;  %v12402_v14 = vld [vmem:[%s13428_s4 + $0x1de4] ss:$8 sps:$4 sm:$0xff]  }
 0x2c7   : > { %9331 = vmatpush1.bf16.msra.mxu0 %v12316_v16  ;;  %8553 = vmatprep.subr.bf16.mxu1 %v12321_v1  ;;  %v1863_v16 = vcombine.high %v14195_v50, %v14195_v50  ;;  %v12397_v1 = vld [vmem:[%s13428_s4 + $0xae0] ss:$8 sps:$4 sm:$0xff]   ;;  %v12406_v50 = vld [vmem:[%s13428_s4 + $0x1df0] ss:$8 sps:$4 sm:$0xff]  }
 0x2c8   : > { %9332 = vmatprep.subr.bf16.mxu0 %v12324_v18  ;;  %8583 = vmatprep.mubr.bf16.mxu1 %v14305_v4  ;;  %v12400_v18 = vld [vmem:[%s13428_s4 + $0x1de0] ss:$8 sps:$4 sm:$0xff]  }
 0x2c9   : > { %9362 = vmatprep.mubr.bf16.mxu0 %v1910_v61  ;;  %v12405_v61 = vld [vmem:[%s13428_s4 + $0xaf4] ss:$8 sps:$4 sm:$0xff]  }
 0x2ca   : > { %8554 = vmatpush1.bf16.msra.mxu1 %v12319_v31  ;;  %v12408_v31 = vld [vmem:[%s13428_s4 + $0x1df4] ss:$8 sps:$4 sm:$0xff]  }
 0x2cb   : > { %9333 = vmatpush1.bf16.msra.mxu0 %v12322_v19  ;;  %8555 = vmatprep.subr.bf16.mxu1 %v12327_v21  ;;  %v14370_v19 = vrot.slane %v1863_v16, %v13501_v52  ;;  %v12403_v21 = vld [vmem:[%s13428_s4 + $0xaf0] ss:$8 sps:$4 sm:$0xff]  }
 0x2cc   : > { %9334 = vmatprep.subr.bf16.mxu0 %v12330_v22  ;;  %v12412_v22 = vld [vmem:[%s13428_s4 + $0xb04] ss:$8 sps:$4 sm:$0xff]   ;;  %v12479_v16 = vld [vmem:[%s13428_s4 + $0x1eb0] ss:$8 sps:$4 sm:$0xff]  }
 0x2ce   : > { %8556 = vmatpush1.bf16.msra.mxu1 %v12325_v38  ;;  %v12415_v38 = vld [vmem:[%s13428_s4 + $0x1e04] ss:$8 sps:$4 sm:$0xff]  }
 0x2cf   : > { %9335 = vmatpush1.bf16.msra.mxu0 %v12328_v23  ;;  %8557 = vmatprep.subr.bf16.mxu1 %v12333_v25  ;;  %v1879_v23 = vcombine.high %v14370_v19, %v14370_v19  ;;  %v14380_v25 = vrot.slane %v14286_v7, %v13501_v52 }
 0x2d0   : > { %9336 = vmatprep.subr.bf16.mxu0 %v12336_v26  ;;  %v1908_v26 = vcombine.high %v14298_v13, %v14298_v13  ;;  %v12416_v13 = vld [vmem:[%s13428_s4 + $0xb10] ss:$8 sps:$4 sm:$0xff]  }
 0x2d1   : > { %v14391_v7 = vrot.slane %v1879_v23, %v13501_v52  ;;  %v12496_v23 = vld [vmem:[%s13428_s4 + $0xbe4] ss:$8 sps:$4 sm:$0xff]  }
 0x2d2   : > { %8558 = vmatpush1.bf16.msra.mxu1 %v12331_v27  ;;  %v12410_v27 = vld [vmem:[%s13428_s4 + $0xb00] ss:$8 sps:$4 sm:$0xff]  }
 0x2d3   : > { %9337 = vmatpush1.bf16.msra.mxu0 %v12334_v28  ;;  %8559 = vmatprep.subr.bf16.mxu1 %v12339_v9  ;;  %v12413_v28 = vld [vmem:[%s13428_s4 + $0x1e00] ss:$8 sps:$4 sm:$0xff]   ;;  %v12418_v9 = vld [vmem:[%s13428_s4 + $0xb14] ss:$8 sps:$4 sm:$0xff]  }
 0x2d4   : > { %9338 = vmatprep.subr.bf16.mxu0 %v12342_v63  ;;  %v12421_v63 = vld [vmem:[%s13428_s4 + $0x1e14] ss:$8 sps:$4 sm:$0xff]  }
 0x2d6   : > { %8560 = vmatpush1.bf16.msra.mxu1 %v12337_v53  ;;  %v1666_v53 = vcombine.high %v14305_v4, %v14305_v4  ;;  %v12427_v4 = vld [vmem:[%s13428_s4 + $0x1e24] ss:$8 sps:$4 sm:$0xff]  }
 0x2d7   : > { %9339 = vmatpush1.bf16.msra.mxu0 %v12340_v32  ;;  %8561 = vmatprep.subr.bf16.mxu1 %v12345_v56  ;;  %v12419_v32 = vld [vmem:[%s13428_s4 + $0x1e10] ss:$8 sps:$4 sm:$0xff]   ;;  %v12424_v56 = vld [vmem:[%s13428_s4 + $0xb24] ss:$8 sps:$4 sm:$0xff]  }
 0x2d8   : > { %9340 = vmatprep.subr.bf16.mxu0 %v12348_v33  ;;  %v12422_v33 = vld [vmem:[%s13428_s4 + $0xb20] ss:$8 sps:$4 sm:$0xff]  }
 0x2da   : > { %8562 = vmatpush1.bf16.msra.mxu1 %v12343_v34  ;;  %v12425_v34 = vld [vmem:[%s13428_s4 + $0x1e20] ss:$8 sps:$4 sm:$0xff]  }
 0x2db   : > { %9341 = vmatpush1.bf16.msra.mxu0 %v12346_v36  ;;  %8563 = vmatprep.subr.bf16.mxu1 %v12351_v39  ;;  %v12430_v36 = vld [vmem:[%s13428_s4 + $0xb34] ss:$8 sps:$4 sm:$0xff]  }
 0x2dc   : > { %9342 = vmatprep.subr.bf16.mxu0 %v12354_v40  ;;  %v12433_v39 = vld [vmem:[%s13428_s4 + $0x1e34] ss:$8 sps:$4 sm:$0xff]   ;;  %v12428_v40 = vld [vmem:[%s13428_s4 + $0xb30] ss:$8 sps:$4 sm:$0xff]  }
 0x2de   : > { %8564 = vmatpush1.bf16.msra.mxu1 %v12349_v20  ;;  %v12431_v20 = vld [vmem:[%s13428_s4 + $0x1e30] ss:$8 sps:$4 sm:$0xff]  }
 0x2df   : > { %9343 = vmatpush1.bf16.msra.mxu0 %v12352_v42  ;;  %8565 = vmatprep.subr.bf16.mxu1 %v12357_v24  ;;  %v12436_v42 = vld [vmem:[%s13428_s4 + $0xb44] ss:$8 sps:$4 sm:$0xff]  }
 0x2e0   : > { %9344 = vmatprep.subr.bf16.mxu0 %v12360_v44  ;;  %v12439_v24 = vld [vmem:[%s13428_s4 + $0x1e44] ss:$8 sps:$4 sm:$0xff]   ;;  %v12434_v44 = vld [vmem:[%s13428_s4 + $0xb40] ss:$8 sps:$4 sm:$0xff]  }
 0x2e2   : > { %8566 = vmatpush1.bf16.msra.mxu1 %v12355_v49  ;;  %v12437_v49 = vld [vmem:[%s13428_s4 + $0x1e40] ss:$8 sps:$4 sm:$0xff]  }
 0x2e3   : > { %9345 = vmatpush1.bf16.msra.mxu0 %v12358_v29  ;;  %8567 = vmatprep.subr.bf16.mxu1 %v12363_v45  ;;  %v12442_v29 = vld [vmem:[%s13428_s4 + $0xb54] ss:$8 sps:$4 sm:$0xff]  }
 0x2e4   : > { %9346 = vmatprep.subr.bf16.mxu0 %v12366_v46  ;;  %v12445_v45 = vld [vmem:[%s13428_s4 + $0x1e54] ss:$8 sps:$4 sm:$0xff]   ;;  %v12440_v46 = vld [vmem:[%s13428_s4 + $0xb50] ss:$8 sps:$4 sm:$0xff]  }
 0x2e6   : > { %8568 = vmatpush1.bf16.msra.mxu1 %v12361_v54  ;;  %v12443_v54 = vld [vmem:[%s13428_s4 + $0x1e50] ss:$8 sps:$4 sm:$0xff]  }
 0x2e7   : > { %9347 = vmatpush1.bf16.msra.mxu0 %v12364_v55  ;;  %8569 = vmatprep.subr.bf16.mxu1 %v12369_v57  ;;  %v12448_v55 = vld [vmem:[%s13428_s4 + $0xb64] ss:$8 sps:$4 sm:$0xff]  }
 0x2e8   : > { %9348 = vmatprep.subr.bf16.mxu0 %v12372_v35  ;;  %v12451_v57 = vld [vmem:[%s13428_s4 + $0x1e64] ss:$8 sps:$4 sm:$0xff]   ;;  %v12446_v35 = vld [vmem:[%s13428_s4 + $0xb60] ss:$8 sps:$4 sm:$0xff]  }
 0x2ea   : > { %8570 = vmatpush1.bf16.msra.mxu1 %v12367_v37  ;;  %v12449_v37 = vld [vmem:[%s13428_s4 + $0x1e60] ss:$8 sps:$4 sm:$0xff]  }
 0x2eb   : > { %9349 = vmatpush1.bf16.msra.mxu0 %v12370_v59  ;;  %8571 = vmatprep.subr.bf16.mxu1 %v12375_v60  ;;  %v12454_v59 = vld [vmem:[%s13428_s4 + $0xb74] ss:$8 sps:$4 sm:$0xff]  }
 0x2ec   : > { %9350 = vmatprep.subr.bf16.mxu0 %v12378_v17  ;;  %v12457_v60 = vld [vmem:[%s13428_s4 + $0x1e74] ss:$8 sps:$4 sm:$0xff]   ;;  %v12452_v17 = vld [vmem:[%s13428_s4 + $0xb70] ss:$8 sps:$4 sm:$0xff]  }
 0x2ee   : > { %8572 = vmatpush1.bf16.msra.mxu1 %v12373_v41  ;;  %v12455_v41 = vld [vmem:[%s13428_s4 + $0x1e70] ss:$8 sps:$4 sm:$0xff]  }
 0x2ef   : > { %9351 = vmatpush1.bf16.msra.mxu0 %v12376_v62  ;;  %8573 = vmatprep.subr.bf16.mxu1 %v12381_v0  ;;  %v12460_v62 = vld [vmem:[%s13428_s4 + $0xb84] ss:$8 sps:$4 sm:$0xff]  }
 0x2f0   : > { %9352 = vmatprep.subr.bf16.mxu0 %v12384_v2  ;;  %v12463_v0 = vld [vmem:[%s13428_s4 + $0x1e84] ss:$8 sps:$4 sm:$0xff]   ;;  %v12458_v2 = vld [vmem:[%s13428_s4 + $0xb80] ss:$8 sps:$4 sm:$0xff]  }
 0x2f2   : > { %8574 = vmatpush1.bf16.msra.mxu1 %v12379_v3  ;;  %v12461_v3 = vld [vmem:[%s13428_s4 + $0x1e80] ss:$8 sps:$4 sm:$0xff]  }
 0x2f3   : > { %9353 = vmatpush1.bf16.msra.mxu0 %v12382_v6  ;;  %8575 = vmatprep.subr.bf16.mxu1 %v12387_v43  ;;  %v12466_v6 = vld [vmem:[%s13428_s4 + $0xb94] ss:$8 sps:$4 sm:$0xff]  }
 0x2f4   : > { %9354 = vmatprep.subr.bf16.mxu0 %v12390_v48  ;;  %v12469_v43 = vld [vmem:[%s13428_s4 + $0x1e94] ss:$8 sps:$4 sm:$0xff]   ;;  %v12464_v48 = vld [vmem:[%s13428_s4 + $0xb90] ss:$8 sps:$4 sm:$0xff]  }
 0x2f6   : > { %8576 = vmatpush1.bf16.msra.mxu1 %v12385_v51  ;;  %v12467_v51 = vld [vmem:[%s13428_s4 + $0x1e90] ss:$8 sps:$4 sm:$0xff]  }
 0x2f7   : > { %9355 = vmatpush1.bf16.msra.mxu0 %v12388_v58  ;;  %8577 = vmatprep.subr.bf16.mxu1 %v12393_v8  ;;  %v12472_v58 = vld [vmem:[%s13428_s4 + $0xba4] ss:$8 sps:$4 sm:$0xff]  }
 0x2f8   : > { %9356 = vmatprep.subr.bf16.mxu0 %v12396_v30  ;;  %v12475_v8 = vld [vmem:[%s13428_s4 + $0x1ea4] ss:$8 sps:$4 sm:$0xff]   ;;  %v12470_v30 = vld [vmem:[%s13428_s4 + $0xba0] ss:$8 sps:$4 sm:$0xff]  }
 0x2fa   : > { %8578 = vmatpush1.bf16.msra.mxu1 %v12391_v10  ;;  %v12473_v10 = vld [vmem:[%s13428_s4 + $0x1ea0] ss:$8 sps:$4 sm:$0xff]  }
 0x2fb   : > { %9357 = vmatpush1.bf16.msra.mxu0 %v12394_v11  ;;  %8579 = vmatprep.subr.bf16.mxu1 %v12399_v12  ;;  %v12478_v11 = vld [vmem:[%s13428_s4 + $0xbb4] ss:$8 sps:$4 sm:$0xff]  }
 0x2fc   : > { %9358 = vmatprep.subr.bf16.mxu0 %v12402_v14  ;;  %v12481_v12 = vld [vmem:[%s13428_s4 + $0x1eb4] ss:$8 sps:$4 sm:$0xff]   ;;  %v12476_v14 = vld [vmem:[%s13428_s4 + $0xbb0] ss:$8 sps:$4 sm:$0xff]  }
 0x2fe   : > { %8580 = vmatpush1.bf16.msra.mxu1 %v12397_v1  ;;  %v12484_v1 = vld [vmem:[%s13428_s4 + $0xbc4] ss:$8 sps:$4 sm:$0xff]  }
 0x2ff   : > { %9359 = vmatpush1.bf16.msra.mxu0 %v12400_v18  ;;  %8581 = vmatprep.subr.bf16.mxu1 %v12405_v61  ;;  %v12487_v18 = vld [vmem:[%s13428_s4 + $0x1ec4] ss:$8 sps:$4 sm:$0xff]   ;;  %v12482_v61 = vld [vmem:[%s13428_s4 + $0xbc0] ss:$8 sps:$4 sm:$0xff]  }
 0x300   : > { %9360 = vmatprep.subr.bf16.mxu0 %v12408_v31  ;;  %v12485_v31 = vld [vmem:[%s13428_s4 + $0x1ec0] ss:$8 sps:$4 sm:$0xff]  }
 0x302   : > { %8582 = vmatpush1.bf16.msra.mxu1 %v12403_v21  ;;  %v12490_v21 = vld [vmem:[%s13428_s4 + $0xbd4] ss:$8 sps:$4 sm:$0xff]  }
 0x303   : > { %9361 = vmatpush1.bf16.msra.mxu0 %v12406_v50  ;;  %8592 = vmatprep.subr.bf16.mxu1 %v12412_v22  ;;  %v12493_v50 = vld [vmem:[%s13428_s4 + $0x1ed4] ss:$8 sps:$4 sm:$0xff]   ;;  %v12488_v22 = vld [vmem:[%s13428_s4 + $0xbd0] ss:$8 sps:$4 sm:$0xff]  }
 0x304   : > { %9371 = vmatprep.subr.bf16.mxu0 %v12415_v38  ;;  %v12491_v38 = vld [vmem:[%s13428_s4 + $0x1ed0] ss:$8 sps:$4 sm:$0xff]  }
 0x305   : > { %8584 = vmatmul.mubr.bf16.vlgmr.msra.gmra.mrb[0].mxu1 %v14380_v25 }
 0x306   : > { %9363 = vmatmul.mubr.bf16.vlgmr.msra.gmra.mrb[0].mxu0 %v1908_v26  ;;  %8593 = vmatpush1.bf16.msra.mxu1 %v12410_v27  ;;  %v12499_v26 = vld [vmem:[%s13428_s4 + $0x1ee4] ss:$8 sps:$4 sm:$0xff]   ;;  %v14448_v27 = vld [vmem:[%s13449_s12 + $0x18] sm:$0xff] }
 0x307   : > { %9372 = vmatpush1.bf16.msra.mxu0 %v12413_v28  ;;  %8594 = vmatprep.subr.bf16.mxu1 %v12418_v9  ;;  %v12494_v28 = vld [vmem:[%s13428_s4 + $0xbe0] ss:$8 sps:$4 sm:$0xff]  }
 0x308   : > { %9373 = vmatprep.subr.bf16.mxu0 %v12421_v63  ;;  %8624 = vmatprep.mubr.bf16.mxu1 %v1666_v53  ;;  %v12497_v9 = vld [vmem:[%s13428_s4 + $0x1ee0] ss:$8 sps:$4 sm:$0xff]   ;;  %v12502_v63 = vld [vmem:[%s13428_s4 + $0xbf4] ss:$8 sps:$4 sm:$0xff]  }
 0x309   : > { %9403 = vmatprep.mubr.bf16.mxu0 %v14391_v7  ;;  %v12505_v53 = vld [vmem:[%s13428_s4 + $0x1ef4] ss:$8 sps:$4 sm:$0xff]  }
 0x30a   : > { %8595 = vmatpush1.bf16.msra.mxu1 %v12416_v13  ;;  %v14456_v13 = vrot.slane %v14448_v27, %v13501_v52 }
 0x30b   : > { %9374 = vmatpush1.bf16.msra.mxu0 %v12419_v32  ;;  %8596 = vmatprep.subr.bf16.mxu1 %v12424_v56  ;;  %v12500_v32 = vld [vmem:[%s13428_s4 + $0xbf0] ss:$8 sps:$4 sm:$0xff]  }
 0x30c   : > { %9375 = vmatprep.subr.bf16.mxu0 %v12427_v4  ;;  %v12503_v56 = vld [vmem:[%s13428_s4 + $0x1ef0] ss:$8 sps:$4 sm:$0xff]   ;;  %v12508_v4 = vld [vmem:[%s13428_s4 + $0xc04] ss:$8 sps:$4 sm:$0xff]  }
 0x30e   : > { %8597 = vmatpush1.bf16.msra.mxu1 %v12422_v33  ;;  %v12512_v33 = vld [vmem:[%s13428_s4 + $0x1f04] ss:$8 sps:$4 sm:$0xff]  }
 0x30f   : > { %9376 = vmatpush1.bf16.msra.mxu0 %v12425_v34  ;;  %8598 = vmatprep.subr.bf16.mxu1 %v12430_v36  ;;  %v1682_v34 = vcombine.high %v14456_v13, %v14456_v13  ;;  %v1664_v36 = vcombine.high %v14380_v25, %v14380_v25  ;;  %v1911_v25 = vcombine.high %v14391_v7, %v14391_v7  ;;  %v12519_v7 = vld [vmem:[%s13428_s4 + $0xc20] ss:$8 sps:$4 sm:$0xff]  }
 0x310   : > { %9377 = vmatprep.subr.bf16.mxu0 %v12433_v39  ;;  %v14468_v39 = vrot.slane %v14370_v19, %v13501_v52  ;;  %v12513_v19 = vld [vmem:[%s13428_s4 + $0xc10] ss:$8 sps:$4 sm:$0xff]  }
 0x312   : > { %8599 = vmatpush1.bf16.msra.mxu1 %v12428_v40  ;;  %v12506_v40 = vld [vmem:[%s13428_s4 + $0xc00] ss:$8 sps:$4 sm:$0xff]  }
 0x313   : > { %9378 = vmatpush1.bf16.msra.mxu0 %v12431_v20  ;;  %8600 = vmatprep.subr.bf16.mxu1 %v12436_v42  ;;  %v12510_v20 = vld [vmem:[%s13428_s4 + $0x1f00] ss:$8 sps:$4 sm:$0xff]   ;;  %v12515_v42 = vld [vmem:[%s13428_s4 + $0xc14] ss:$8 sps:$4 sm:$0xff]  }
 0x314   : > { %9379 = vmatprep.subr.bf16.mxu0 %v12439_v24  ;;  %v12518_v24 = vld [vmem:[%s13428_s4 + $0x1f14] ss:$8 sps:$4 sm:$0xff]  }
 0x316   : > { %8601 = vmatpush1.bf16.msra.mxu1 %v12434_v44  ;;  %v14475_v44 = vrot.slane %v1682_v34, %v13501_v52  ;;  %v12588_v34 = vld [vmem:[%s13428_s4 + $0x1fd0] ss:$8 sps:$4 sm:$0xff]  }
 0x317   : > { %9380 = vmatpush1.bf16.msra.mxu0 %v12437_v49  ;;  %8602 = vmatprep.subr.bf16.mxu1 %v12442_v29  ;;  %v12516_v49 = vld [vmem:[%s13428_s4 + $0x1f10] ss:$8 sps:$4 sm:$0xff]   ;;  %v12521_v29 = vld [vmem:[%s13428_s4 + $0xc24] ss:$8 sps:$4 sm:$0xff]  }
 0x318   : > { %9381 = vmatprep.subr.bf16.mxu0 %v12445_v45  ;;  %v12524_v45 = vld [vmem:[%s13428_s4 + $0x1f24] ss:$8 sps:$4 sm:$0xff]  }
 0x31a   : > { %8603 = vmatpush1.bf16.msra.mxu1 %v12440_v46  ;;  %v12522_v46 = vld [vmem:[%s13428_s4 + $0x1f20] ss:$8 sps:$4 sm:$0xff]  }
 0x31b   : > { %9382 = vmatpush1.bf16.msra.mxu0 %v12443_v54  ;;  %8604 = vmatprep.subr.bf16.mxu1 %v12448_v55  ;;  %v12527_v54 = vld [vmem:[%s13428_s4 + $0xc34] ss:$8 sps:$4 sm:$0xff]  }
 0x31c   : > { %9383 = vmatprep.subr.bf16.mxu0 %v12451_v57  ;;  %v12530_v55 = vld [vmem:[%s13428_s4 + $0x1f34] ss:$8 sps:$4 sm:$0xff]   ;;  %v12525_v57 = vld [vmem:[%s13428_s4 + $0xc30] ss:$8 sps:$4 sm:$0xff]  }
 0x31e   : > { %8605 = vmatpush1.bf16.msra.mxu1 %v12446_v35  ;;  %v12528_v35 = vld [vmem:[%s13428_s4 + $0x1f30] ss:$8 sps:$4 sm:$0xff]  }
 0x31f   : > { %9384 = vmatpush1.bf16.msra.mxu0 %v12449_v37  ;;  %8606 = vmatprep.subr.bf16.mxu1 %v12454_v59  ;;  %v12533_v37 = vld [vmem:[%s13428_s4 + $0xc44] ss:$8 sps:$4 sm:$0xff]  }
 0x320   : > { %9385 = vmatprep.subr.bf16.mxu0 %v12457_v60  ;;  %v12536_v59 = vld [vmem:[%s13428_s4 + $0x1f44] ss:$8 sps:$4 sm:$0xff]   ;;  %v12531_v60 = vld [vmem:[%s13428_s4 + $0xc40] ss:$8 sps:$4 sm:$0xff]  }
 0x322   : > { %8607 = vmatpush1.bf16.msra.mxu1 %v12452_v17  ;;  %v12534_v17 = vld [vmem:[%s13428_s4 + $0x1f40] ss:$8 sps:$4 sm:$0xff]  }
 0x323   : > { %9386 = vmatpush1.bf16.msra.mxu0 %v12455_v41  ;;  %8608 = vmatprep.subr.bf16.mxu1 %v12460_v62  ;;  %v12539_v41 = vld [vmem:[%s13428_s4 + $0xc54] ss:$8 sps:$4 sm:$0xff]  }
 0x324   : > { %9387 = vmatprep.subr.bf16.mxu0 %v12463_v0  ;;  %v12542_v62 = vld [vmem:[%s13428_s4 + $0x1f54] ss:$8 sps:$4 sm:$0xff]   ;;  %v12537_v0 = vld [vmem:[%s13428_s4 + $0xc50] ss:$8 sps:$4 sm:$0xff]  }
 0x326   : > { %8609 = vmatpush1.bf16.msra.mxu1 %v12458_v2  ;;  %v12540_v2 = vld [vmem:[%s13428_s4 + $0x1f50] ss:$8 sps:$4 sm:$0xff]  }
 0x327   : > { %9388 = vmatpush1.bf16.msra.mxu0 %v12461_v3  ;;  %8610 = vmatprep.subr.bf16.mxu1 %v12466_v6  ;;  %v12545_v3 = vld [vmem:[%s13428_s4 + $0xc64] ss:$8 sps:$4 sm:$0xff]  }
 0x328   : > { %9389 = vmatprep.subr.bf16.mxu0 %v12469_v43  ;;  %v12548_v6 = vld [vmem:[%s13428_s4 + $0x1f64] ss:$8 sps:$4 sm:$0xff]   ;;  %v12543_v43 = vld [vmem:[%s13428_s4 + $0xc60] ss:$8 sps:$4 sm:$0xff]  }
 0x32a   : > { %8611 = vmatpush1.bf16.msra.mxu1 %v12464_v48  ;;  %v12546_v48 = vld [vmem:[%s13428_s4 + $0x1f60] ss:$8 sps:$4 sm:$0xff]  }
 0x32b   : > { %9390 = vmatpush1.bf16.msra.mxu0 %v12467_v51  ;;  %8612 = vmatprep.subr.bf16.mxu1 %v12472_v58  ;;  %v12551_v51 = vld [vmem:[%s13428_s4 + $0xc74] ss:$8 sps:$4 sm:$0xff]  }
 0x32c   : > { %9391 = vmatprep.subr.bf16.mxu0 %v12475_v8  ;;  %v12554_v58 = vld [vmem:[%s13428_s4 + $0x1f74] ss:$8 sps:$4 sm:$0xff]   ;;  %v12549_v8 = vld [vmem:[%s13428_s4 + $0xc70] ss:$8 sps:$4 sm:$0xff]  }
 0x32e   : > { %8613 = vmatpush1.bf16.msra.mxu1 %v12470_v30  ;;  %v12552_v30 = vld [vmem:[%s13428_s4 + $0x1f70] ss:$8 sps:$4 sm:$0xff]  }
 0x32f   : > { %9392 = vmatpush1.bf16.msra.mxu0 %v12473_v10  ;;  %8614 = vmatprep.subr.bf16.mxu1 %v12478_v11  ;;  %v12557_v10 = vld [vmem:[%s13428_s4 + $0xc84] ss:$8 sps:$4 sm:$0xff]  }
 0x330   : > { %9393 = vmatprep.subr.bf16.mxu0 %v12481_v12  ;;  %v12560_v11 = vld [vmem:[%s13428_s4 + $0x1f84] ss:$8 sps:$4 sm:$0xff]   ;;  %v12555_v12 = vld [vmem:[%s13428_s4 + $0xc80] ss:$8 sps:$4 sm:$0xff]  }
 0x332   : > { %8615 = vmatpush1.bf16.msra.mxu1 %v12476_v14  ;;  %v12558_v14 = vld [vmem:[%s13428_s4 + $0x1f80] ss:$8 sps:$4 sm:$0xff]  }
 0x333   : > { %9394 = vmatpush1.bf16.msra.mxu0 %v12479_v16  ;;  %8616 = vmatprep.subr.bf16.mxu1 %v12484_v1  ;;  %v12563_v16 = vld [vmem:[%s13428_s4 + $0xc94] ss:$8 sps:$4 sm:$0xff]  }
 0x334   : > { %9395 = vmatprep.subr.bf16.mxu0 %v12487_v18  ;;  %v12566_v1 = vld [vmem:[%s13428_s4 + $0x1f94] ss:$8 sps:$4 sm:$0xff]   ;;  %v12561_v18 = vld [vmem:[%s13428_s4 + $0xc90] ss:$8 sps:$4 sm:$0xff]  }
 0x336   : > { %8617 = vmatpush1.bf16.msra.mxu1 %v12482_v61  ;;  %v12564_v61 = vld [vmem:[%s13428_s4 + $0x1f90] ss:$8 sps:$4 sm:$0xff]  }
 0x337   : > { %9396 = vmatpush1.bf16.msra.mxu0 %v12485_v31  ;;  %8618 = vmatprep.subr.bf16.mxu1 %v12490_v21  ;;  %v12569_v31 = vld [vmem:[%s13428_s4 + $0xca4] ss:$8 sps:$4 sm:$0xff]  }
 0x338   : > { %9397 = vmatprep.subr.bf16.mxu0 %v12493_v50  ;;  %v12572_v21 = vld [vmem:[%s13428_s4 + $0x1fa4] ss:$8 sps:$4 sm:$0xff]   ;;  %v12567_v50 = vld [vmem:[%s13428_s4 + $0xca0] ss:$8 sps:$4 sm:$0xff]  }
 0x33a   : > { %8619 = vmatpush1.bf16.msra.mxu1 %v12488_v22  ;;  %v12570_v22 = vld [vmem:[%s13428_s4 + $0x1fa0] ss:$8 sps:$4 sm:$0xff]  }
 0x33b   : > { %9398 = vmatpush1.bf16.msra.mxu0 %v12491_v38  ;;  %8620 = vmatprep.subr.bf16.mxu1 %v12496_v23  ;;  %v12575_v38 = vld [vmem:[%s13428_s4 + $0xcb4] ss:$8 sps:$4 sm:$0xff]  }
 0x33c   : > { %9399 = vmatprep.subr.bf16.mxu0 %v12499_v26  ;;  %v12578_v23 = vld [vmem:[%s13428_s4 + $0x1fb4] ss:$8 sps:$4 sm:$0xff]   ;;  %v12573_v26 = vld [vmem:[%s13428_s4 + $0xcb0] ss:$8 sps:$4 sm:$0xff]  }
 0x33e   : > { %8621 = vmatpush1.bf16.msra.mxu1 %v12494_v28  ;;  %v12576_v28 = vld [vmem:[%s13428_s4 + $0x1fb0] ss:$8 sps:$4 sm:$0xff]  }
 0x33f   : > { %9400 = vmatpush1.bf16.msra.mxu0 %v12497_v9  ;;  %8622 = vmatprep.subr.bf16.mxu1 %v12502_v63  ;;  %v12581_v9 = vld [vmem:[%s13428_s4 + $0xcc4] ss:$8 sps:$4 sm:$0xff]  }
 0x340   : > { %9401 = vmatprep.subr.bf16.mxu0 %v12505_v53  ;;  %v12584_v63 = vld [vmem:[%s13428_s4 + $0x1fc4] ss:$8 sps:$4 sm:$0xff]   ;;  %v12579_v53 = vld [vmem:[%s13428_s4 + $0xcc0] ss:$8 sps:$4 sm:$0xff]  }
 0x342   : > { %8623 = vmatpush1.bf16.msra.mxu1 %v12500_v32  ;;  %v12582_v32 = vld [vmem:[%s13428_s4 + $0x1fc0] ss:$8 sps:$4 sm:$0xff]  }
 0x343   : > { %9402 = vmatpush1.bf16.msra.mxu0 %v12503_v56  ;;  %8633 = vmatprep.subr.bf16.mxu1 %v12508_v4  ;;  %v12587_v56 = vld [vmem:[%s13428_s4 + $0xcd4] ss:$8 sps:$4 sm:$0xff]  }
 0x344   : > { %9412 = vmatprep.subr.bf16.mxu0 %v12512_v33  ;;  %v12590_v4 = vld [vmem:[%s13428_s4 + $0x1fd4] ss:$8 sps:$4 sm:$0xff]   ;;  %v12585_v33 = vld [vmem:[%s13428_s4 + $0xcd0] ss:$8 sps:$4 sm:$0xff]  }
 0x345   : > { %8625 = vmatmul.mubr.bf16.vlgmr.msra.gmra.mrb[0].mxu1 %v1664_v36  ;;  %v12593_v36 = vld [vmem:[%s13428_s4 + $0xce4] ss:$8 sps:$4 sm:$0xff]  }
 0x346   : > { %9404 = vmatmul.mubr.bf16.vlgmr.msra.gmra.mrb[0].mxu0 %v14468_v39  ;;  %8634 = vmatpush1.bf16.msra.mxu1 %v12506_v40  ;;  %v12596_v40 = vld [vmem:[%s13428_s4 + $0x1fe4] ss:$8 sps:$4 sm:$0xff]  }
 0x347   : > { %9413 = vmatpush1.bf16.msra.mxu0 %v12510_v20  ;;  %8635 = vmatprep.subr.bf16.mxu1 %v12515_v42  ;;  %v14534_v20 = vld [vmem:[%s13449_s12 + $0x40] sm:$0xff] }
 0x348   : > { %9414 = vmatprep.subr.bf16.mxu0 %v12518_v24  ;;  %8665 = vmatprep.mubr.bf16.mxu1 %v14475_v44  ;;  %v12591_v42 = vld [vmem:[%s13428_s4 + $0xce0] ss:$8 sps:$4 sm:$0xff]  }
 0x349   : > { %9444 = vmatprep.mubr.bf16.mxu0 %v1911_v25  ;;  %v12594_v24 = vld [vmem:[%s13428_s4 + $0x1fe0] ss:$8 sps:$4 sm:$0xff]   ;;  %v12599_v25 = vld [vmem:[%s13428_s4 + $0xcf4] ss:$8 sps:$4 sm:$0xff]  }
 0x34a   : > { %8636 = vmatpush1.bf16.msra.mxu1 %v12513_v19  ;;  %v12602_v19 = vld [vmem:[%s13428_s4 + $0x1ff4] ss:$8 sps:$4 sm:$0xff]  }
 0x34b   : > { %9415 = vmatpush1.bf16.msra.mxu0 %v12516_v49  ;;  %8637 = vmatprep.subr.bf16.mxu1 %v12521_v29  ;;  %v14542_v49 = vrot.slane %v14534_v20, %v13501_v52  ;;  %v12597_v29 = vld [vmem:[%s13428_s4 + $0xcf0] ss:$8 sps:$4 sm:$0xff]  }
 0x34c   : > { %9416 = vmatprep.subr.bf16.mxu0 %v12524_v45  ;;  %v12600_v45 = vld [vmem:[%s13428_s4 + $0x1ff0] ss:$8 sps:$4 sm:$0xff]  }
 0x34e   : > { %8638 = vmatpush1.bf16.msra.mxu1 %v12519_v7  ;;  %v12605_v7 = vld [vmem:[%s13428_s4 + $0xd04] ss:$8 sps:$4 sm:$0xff]  }
 0x34f   : > { %9417 = vmatpush1.bf16.msra.mxu0 %v12522_v46  ;;  %8639 = vmatprep.subr.bf16.mxu1 %v12527_v54  ;;  %v12608_v46 = vld [vmem:[%s13428_s4 + $0x2004] ss:$8 sps:$4 sm:$0xff]   ;;  %v1927_v54 = vcombine.high %v14542_v49, %v14542_v49 }
 0x350   : > { %9418 = vmatprep.subr.bf16.mxu0 %v12530_v55  ;;  %v14552_v55 = vrot.slane %v14456_v13, %v13501_v52 }
 0x351   : > { %v14563_v13 = vrot.slane %v1927_v54, %v13501_v52  ;;  %v12681_v54 = vld [vmem:[%s13428_s4 + $0xdd0] ss:$8 sps:$4 sm:$0xff]  }
 0x352   : > { %8640 = vmatpush1.bf16.msra.mxu1 %v12525_v57  ;;  %v1909_v57 = vcombine.high %v14468_v39, %v14468_v39  ;;  %v12609_v39 = vld [vmem:[%s13428_s4 + $0xd10] ss:$8 sps:$4 sm:$0xff]  }
 0x353   : > { %9419 = vmatpush1.bf16.msra.mxu0 %v12528_v35  ;;  %8641 = vmatprep.subr.bf16.mxu1 %v12533_v37  ;;  %v12603_v35 = vld [vmem:[%s13428_s4 + $0xd00] ss:$8 sps:$4 sm:$0xff]  }
 0x354   : > { %9420 = vmatprep.subr.bf16.mxu0 %v12536_v59  ;;  %v12606_v37 = vld [vmem:[%s13428_s4 + $0x2000] ss:$8 sps:$4 sm:$0xff]   ;;  %v12611_v59 = vld [vmem:[%s13428_s4 + $0xd14] ss:$8 sps:$4 sm:$0xff]  }
 0x356   : > { %8642 = vmatpush1.bf16.msra.mxu1 %v12531_v60  ;;  %v12614_v60 = vld [vmem:[%s13428_s4 + $0x2014] ss:$8 sps:$4 sm:$0xff]  }
 0x357   : > { %9421 = vmatpush1.bf16.msra.mxu0 %v12534_v17  ;;  %8643 = vmatprep.subr.bf16.mxu1 %v12539_v41  ;;  %v1714_v17 = vcombine.high %v14475_v44, %v14475_v44  ;;  %v12612_v41 = vld [vmem:[%s13428_s4 + $0x2010] ss:$8 sps:$4 sm:$0xff]   ;;  %v12620_v44 = vld [vmem:[%s13428_s4 + $0x2024] ss:$8 sps:$4 sm:$0xff]  }
 0x358   : > { %9422 = vmatprep.subr.bf16.mxu0 %v12542_v62  ;;  %v12617_v62 = vld [vmem:[%s13428_s4 + $0xd24] ss:$8 sps:$4 sm:$0xff]  }
 0x35a   : > { %8644 = vmatpush1.bf16.msra.mxu1 %v12537_v0  ;;  %v12615_v0 = vld [vmem:[%s13428_s4 + $0xd20] ss:$8 sps:$4 sm:$0xff]  }
 0x35b   : > { %9423 = vmatpush1.bf16.msra.mxu0 %v12540_v2  ;;  %8645 = vmatprep.subr.bf16.mxu1 %v12545_v3  ;;  %v12618_v2 = vld [vmem:[%s13428_s4 + $0x2020] ss:$8 sps:$4 sm:$0xff]   ;;  %v12623_v3 = vld [vmem:[%s13428_s4 + $0xd34] ss:$8 sps:$4 sm:$0xff]  }
 0x35c   : > { %9424 = vmatprep.subr.bf16.mxu0 %v12548_v6  ;;  %v12626_v6 = vld [vmem:[%s13428_s4 + $0x2034] ss:$8 sps:$4 sm:$0xff]  }
 0x35e   : > { %8646 = vmatpush1.bf16.msra.mxu1 %v12543_v43  ;;  %v12621_v43 = vld [vmem:[%s13428_s4 + $0xd30] ss:$8 sps:$4 sm:$0xff]  }
 0x35f   : > { %9425 = vmatpush1.bf16.msra.mxu0 %v12546_v48  ;;  %8647 = vmatprep.subr.bf16.mxu1 %v12551_v51  ;;  %v12624_v48 = vld [vmem:[%s13428_s4 + $0x2030] ss:$8 sps:$4 sm:$0xff]   ;;  %v12629_v51 = vld [vmem:[%s13428_s4 + $0xd44] ss:$8 sps:$4 sm:$0xff]  }
 0x360   : > { %9426 = vmatprep.subr.bf16.mxu0 %v12554_v58  ;;  %v12632_v58 = vld [vmem:[%s13428_s4 + $0x2044] ss:$8 sps:$4 sm:$0xff]  }
 0x362   : > { %8648 = vmatpush1.bf16.msra.mxu1 %v12549_v8  ;;  %v12627_v8 = vld [vmem:[%s13428_s4 + $0xd40] ss:$8 sps:$4 sm:$0xff]  }
 0x363   : > { %9427 = vmatpush1.bf16.msra.mxu0 %v12552_v30  ;;  %8649 = vmatprep.subr.bf16.mxu1 %v12557_v10  ;;  %v12630_v30 = vld [vmem:[%s13428_s4 + $0x2040] ss:$8 sps:$4 sm:$0xff]   ;;  %v12635_v10 = vld [vmem:[%s13428_s4 + $0xd54] ss:$8 sps:$4 sm:$0xff]  }
 0x364   : > { %9428 = vmatprep.subr.bf16.mxu0 %v12560_v11  ;;  %v12638_v11 = vld [vmem:[%s13428_s4 + $0x2054] ss:$8 sps:$4 sm:$0xff]  }
 0x366   : > { %8650 = vmatpush1.bf16.msra.mxu1 %v12555_v12  ;;  %v12633_v12 = vld [vmem:[%s13428_s4 + $0xd50] ss:$8 sps:$4 sm:$0xff]  }
 0x367   : > { %9429 = vmatpush1.bf16.msra.mxu0 %v12558_v14  ;;  %8651 = vmatprep.subr.bf16.mxu1 %v12563_v16  ;;  %v12636_v14 = vld [vmem:[%s13428_s4 + $0x2050] ss:$8 sps:$4 sm:$0xff]   ;;  %v12641_v16 = vld [vmem:[%s13428_s4 + $0xd64] ss:$8 sps:$4 sm:$0xff]  }
 0x368   : > { %9430 = vmatprep.subr.bf16.mxu0 %v12566_v1  ;;  %v12644_v1 = vld [vmem:[%s13428_s4 + $0x2064] ss:$8 sps:$4 sm:$0xff]  }
 0x36a   : > { %8652 = vmatpush1.bf16.msra.mxu1 %v12561_v18  ;;  %v12639_v18 = vld [vmem:[%s13428_s4 + $0xd60] ss:$8 sps:$4 sm:$0xff]  }
 0x36b   : > { %9431 = vmatpush1.bf16.msra.mxu0 %v12564_v61  ;;  %8653 = vmatprep.subr.bf16.mxu1 %v12569_v31  ;;  %v12642_v61 = vld [vmem:[%s13428_s4 + $0x2060] ss:$8 sps:$4 sm:$0xff]   ;;  %v12647_v31 = vld [vmem:[%s13428_s4 + $0xd74] ss:$8 sps:$4 sm:$0xff]  }
 0x36c   : > { %9432 = vmatprep.subr.bf16.mxu0 %v12572_v21  ;;  %v12650_v21 = vld [vmem:[%s13428_s4 + $0x2074] ss:$8 sps:$4 sm:$0xff]  }
 0x36e   : > { %8654 = vmatpush1.bf16.msra.mxu1 %v12567_v50  ;;  %v12645_v50 = vld [vmem:[%s13428_s4 + $0xd70] ss:$8 sps:$4 sm:$0xff]  }
 0x36f   : > { %9433 = vmatpush1.bf16.msra.mxu0 %v12570_v22  ;;  %8655 = vmatprep.subr.bf16.mxu1 %v12575_v38  ;;  %v12648_v22 = vld [vmem:[%s13428_s4 + $0x2070] ss:$8 sps:$4 sm:$0xff]   ;;  %v12653_v38 = vld [vmem:[%s13428_s4 + $0xd84] ss:$8 sps:$4 sm:$0xff]  }
 0x370   : > { %9434 = vmatprep.subr.bf16.mxu0 %v12578_v23  ;;  %v12656_v23 = vld [vmem:[%s13428_s4 + $0x2084] ss:$8 sps:$4 sm:$0xff]  }
 0x372   : > { %8656 = vmatpush1.bf16.msra.mxu1 %v12573_v26  ;;  %v12651_v26 = vld [vmem:[%s13428_s4 + $0xd80] ss:$8 sps:$4 sm:$0xff]  }
 0x373   : > { %9435 = vmatpush1.bf16.msra.mxu0 %v12576_v28  ;;  %8657 = vmatprep.subr.bf16.mxu1 %v12581_v9  ;;  %v12654_v28 = vld [vmem:[%s13428_s4 + $0x2080] ss:$8 sps:$4 sm:$0xff]   ;;  %v12659_v9 = vld [vmem:[%s13428_s4 + $0xd94] ss:$8 sps:$4 sm:$0xff]  }
 0x374   : > { %9436 = vmatprep.subr.bf16.mxu0 %v12584_v63  ;;  %v12662_v63 = vld [vmem:[%s13428_s4 + $0x2094] ss:$8 sps:$4 sm:$0xff]  }
 0x376   : > { %8658 = vmatpush1.bf16.msra.mxu1 %v12579_v53  ;;  %v12657_v53 = vld [vmem:[%s13428_s4 + $0xd90] ss:$8 sps:$4 sm:$0xff]  }
 0x377   : > { %9437 = vmatpush1.bf16.msra.mxu0 %v12582_v32  ;;  %8659 = vmatprep.subr.bf16.mxu1 %v12587_v56  ;;  %v12660_v32 = vld [vmem:[%s13428_s4 + $0x2090] ss:$8 sps:$4 sm:$0xff]   ;;  %v12665_v56 = vld [vmem:[%s13428_s4 + $0xda4] ss:$8 sps:$4 sm:$0xff]  }
 0x378   : > { %9438 = vmatprep.subr.bf16.mxu0 %v12590_v4  ;;  %v12668_v4 = vld [vmem:[%s13428_s4 + $0x20a4] ss:$8 sps:$4 sm:$0xff]  }
 0x37a   : > { %8660 = vmatpush1.bf16.msra.mxu1 %v12585_v33  ;;  %v12663_v33 = vld [vmem:[%s13428_s4 + $0xda0] ss:$8 sps:$4 sm:$0xff]  }
 0x37b   : > { %9439 = vmatpush1.bf16.msra.mxu0 %v12588_v34  ;;  %8661 = vmatprep.subr.bf16.mxu1 %v12593_v36  ;;  %v12666_v34 = vld [vmem:[%s13428_s4 + $0x20a0] ss:$8 sps:$4 sm:$0xff]   ;;  %v12671_v36 = vld [vmem:[%s13428_s4 + $0xdb4] ss:$8 sps:$4 sm:$0xff]  }
 0x37c   : > { %9440 = vmatprep.subr.bf16.mxu0 %v12596_v40  ;;  %v12674_v40 = vld [vmem:[%s13428_s4 + $0x20b4] ss:$8 sps:$4 sm:$0xff]  }
 0x37e   : > { %8662 = vmatpush1.bf16.msra.mxu1 %v12591_v42  ;;  %v12669_v42 = vld [vmem:[%s13428_s4 + $0xdb0] ss:$8 sps:$4 sm:$0xff]  }
 0x37f   : > { %9441 = vmatpush1.bf16.msra.mxu0 %v12594_v24  ;;  %8663 = vmatprep.subr.bf16.mxu1 %v12599_v25  ;;  %v12672_v24 = vld [vmem:[%s13428_s4 + $0x20b0] ss:$8 sps:$4 sm:$0xff]   ;;  %v12677_v25 = vld [vmem:[%s13428_s4 + $0xdc4] ss:$8 sps:$4 sm:$0xff]  }
 0x380   : > { %9442 = vmatprep.subr.bf16.mxu0 %v12602_v19  ;;  %v12680_v19 = vld [vmem:[%s13428_s4 + $0x20c4] ss:$8 sps:$4 sm:$0xff]  }
 0x382   : > { %8664 = vmatpush1.bf16.msra.mxu1 %v12597_v29  ;;  %v12675_v29 = vld [vmem:[%s13428_s4 + $0xdc0] ss:$8 sps:$4 sm:$0xff]  }
 0x383   : > { %9443 = vmatpush1.bf16.msra.mxu0 %v12600_v45  ;;  %8674 = vmatprep.subr.bf16.mxu1 %v12605_v7  ;;  %v12678_v45 = vld [vmem:[%s13428_s4 + $0x20c0] ss:$8 sps:$4 sm:$0xff]   ;;  %v12683_v7 = vld [vmem:[%s13428_s4 + $0xdd4] ss:$8 sps:$4 sm:$0xff]  }
 0x384   : > { %9453 = vmatprep.subr.bf16.mxu0 %v12608_v46  ;;  %v12686_v46 = vld [vmem:[%s13428_s4 + $0x20d4] ss:$8 sps:$4 sm:$0xff]  }
 0x385   : > { %8666 = vmatmul.mubr.bf16.vlgmr.msra.gmra.mrb[0].mxu1 %v14552_v55 }
 0x386   : > { %9445 = vmatmul.mubr.bf16.vlgmr.msra.gmra.mrb[0].mxu0 %v1909_v57  ;;  %8675 = vmatpush1.bf16.msra.mxu1 %v12603_v35  ;;  %v12684_v57 = vld [vmem:[%s13428_s4 + $0x20d0] ss:$8 sps:$4 sm:$0xff]   ;;  %v12689_v35 = vld [vmem:[%s13428_s4 + $0xde4] ss:$8 sps:$4 sm:$0xff]  }
 0x387   : > { %9454 = vmatpush1.bf16.msra.mxu0 %v12606_v37  ;;  %8676 = vmatprep.subr.bf16.mxu1 %v12611_v59  ;;  %v12692_v37 = vld [vmem:[%s13428_s4 + $0x20e4] ss:$8 sps:$4 sm:$0xff]   ;;  %v1667_v59 = vcombine.high %v14448_v27, %v14448_v27  ;;  %v12696_v27 = vld [vmem:[%s13428_s4 + $0x20f0] ss:$8 sps:$4 sm:$0xff]  }
 0x388   : > { %9455 = vmatprep.subr.bf16.mxu0 %v12614_v60  ;;  %8706 = vmatprep.mubr.bf16.mxu1 %v1714_v17  ;;  %v12687_v60 = vld [vmem:[%s13428_s4 + $0xde0] ss:$8 sps:$4 sm:$0xff]  }
 0x389   : > { %9485 = vmatprep.mubr.bf16.mxu0 %v14563_v13  ;;  %v12690_v17 = vld [vmem:[%s13428_s4 + $0x20e0] ss:$8 sps:$4 sm:$0xff]  }
 0x38a   : > { %8677 = vmatpush1.bf16.msra.mxu1 %v12609_v39  ;;  %v12695_v39 = vld [vmem:[%s13428_s4 + $0xdf4] ss:$8 sps:$4 sm:$0xff]  }
 0x38b   : > { %9456 = vmatpush1.bf16.msra.mxu0 %v12612_v41  ;;  %8678 = vmatprep.subr.bf16.mxu1 %v12617_v62  ;;  %v12698_v41 = vld [vmem:[%s13428_s4 + $0x20f4] ss:$8 sps:$4 sm:$0xff]   ;;  %v14626_v62 = vrot.slane %v1667_v59, %v13501_v52  ;;  %v12765_v59 = vld [vmem:[%s13428_s4 + $0xeb0] ss:$8 sps:$4 sm:$0xff]  }
 0x38c   : > { %9457 = vmatprep.subr.bf16.mxu0 %v12620_v44  ;;  %v12693_v44 = vld [vmem:[%s13428_s4 + $0xdf0] ss:$8 sps:$4 sm:$0xff]  }
 0x38e   : > { %8679 = vmatpush1.bf16.msra.mxu1 %v12615_v0  ;;  %v12701_v0 = vld [vmem:[%s13428_s4 + $0xe04] ss:$8 sps:$4 sm:$0xff]  }
 0x38f   : > { %9458 = vmatpush1.bf16.msra.mxu0 %v12618_v2  ;;  %8680 = vmatprep.subr.bf16.mxu1 %v12623_v3  ;;  %v12704_v2 = vld [vmem:[%s13428_s4 + $0x2104] ss:$8 sps:$4 sm:$0xff]   ;;  %v1683_v3 = vcombine.high %v14626_v62, %v14626_v62 }
 0x390   : > { %9459 = vmatprep.subr.bf16.mxu0 %v12626_v6  ;;  %v1712_v6 = vcombine.high %v14552_v55, %v14552_v55  ;;  %v1959_v55 = vcombine.high %v14563_v13, %v14563_v13  ;;  %v12711_v13 = vld [vmem:[%s13428_s4 + $0xe20] ss:$8 sps:$4 sm:$0xff]  }
 0x392   : > { %8681 = vmatpush1.bf16.msra.mxu1 %v12621_v43  ;;  %v14638_v43 = vrot.slane %v14542_v49, %v13501_v52  ;;  %v12705_v49 = vld [vmem:[%s13428_s4 + $0xe10] ss:$8 sps:$4 sm:$0xff]  }
 0x393   : > { %9460 = vmatpush1.bf16.msra.mxu0 %v12624_v48  ;;  %8682 = vmatprep.subr.bf16.mxu1 %v12629_v51  ;;  %v12699_v48 = vld [vmem:[%s13428_s4 + $0xe00] ss:$8 sps:$4 sm:$0xff]  }
 0x394   : > { %9461 = vmatprep.subr.bf16.mxu0 %v12632_v58  ;;  %v12702_v51 = vld [vmem:[%s13428_s4 + $0x2100] ss:$8 sps:$4 sm:$0xff]   ;;  %v12707_v58 = vld [vmem:[%s13428_s4 + $0xe14] ss:$8 sps:$4 sm:$0xff]  }
 0x396   : > { %8683 = vmatpush1.bf16.msra.mxu1 %v12627_v8  ;;  %v12710_v8 = vld [vmem:[%s13428_s4 + $0x2114] ss:$8 sps:$4 sm:$0xff]  }
 0x397   : > { %9462 = vmatpush1.bf16.msra.mxu0 %v12630_v30  ;;  %8684 = vmatprep.subr.bf16.mxu1 %v12635_v10  ;;  %v14645_v30 = vrot.slane %v1683_v3, %v13501_v52  ;;  %v12708_v10 = vld [vmem:[%s13428_s4 + $0x2110] ss:$8 sps:$4 sm:$0xff]  }
 0x398   : > { %9463 = vmatprep.subr.bf16.mxu0 %v12638_v11  ;;  %v12713_v11 = vld [vmem:[%s13428_s4 + $0xe24] ss:$8 sps:$4 sm:$0xff]   ;;  %v12780_v3 = vld [vmem:[%s13428_s4 + $0x21d0] ss:$8 sps:$4 sm:$0xff]  }
 0x39a   : > { %8685 = vmatpush1.bf16.msra.mxu1 %v12633_v12  ;;  %v12716_v12 = vld [vmem:[%s13428_s4 + $0x2124] ss:$8 sps:$4 sm:$0xff]  }
 0x39b   : > { %9464 = vmatpush1.bf16.msra.mxu0 %v12636_v14  ;;  %8686 = vmatprep.subr.bf16.mxu1 %v12641_v16  ;;  %v12714_v14 = vld [vmem:[%s13428_s4 + $0x2120] ss:$8 sps:$4 sm:$0xff]   ;;  %v12719_v16 = vld [vmem:[%s13428_s4 + $0xe34] ss:$8 sps:$4 sm:$0xff]  }
 0x39c   : > { %9465 = vmatprep.subr.bf16.mxu0 %v12644_v1  ;;  %v12722_v1 = vld [vmem:[%s13428_s4 + $0x2134] ss:$8 sps:$4 sm:$0xff]  }
 0x39e   : > { %8687 = vmatpush1.bf16.msra.mxu1 %v12639_v18  ;;  %v12717_v18 = vld [vmem:[%s13428_s4 + $0xe30] ss:$8 sps:$4 sm:$0xff]  }
 0x39f   : > { %9466 = vmatpush1.bf16.msra.mxu0 %v12642_v61  ;;  %8688 = vmatprep.subr.bf16.mxu1 %v12647_v31  ;;  %v12720_v61 = vld [vmem:[%s13428_s4 + $0x2130] ss:$8 sps:$4 sm:$0xff]   ;;  %v12725_v31 = vld [vmem:[%s13428_s4 + $0xe44] ss:$8 sps:$4 sm:$0xff]  }
 0x3a0   : > { %9467 = vmatprep.subr.bf16.mxu0 %v12650_v21  ;;  %v12728_v21 = vld [vmem:[%s13428_s4 + $0x2144] ss:$8 sps:$4 sm:$0xff]  }
 0x3a2   : > { %8689 = vmatpush1.bf16.msra.mxu1 %v12645_v50  ;;  %v12723_v50 = vld [vmem:[%s13428_s4 + $0xe40] ss:$8 sps:$4 sm:$0xff]  }
 0x3a3   : > { %9468 = vmatpush1.bf16.msra.mxu0 %v12648_v22  ;;  %8690 = vmatprep.subr.bf16.mxu1 %v12653_v38  ;;  %v12726_v22 = vld [vmem:[%s13428_s4 + $0x2140] ss:$8 sps:$4 sm:$0xff]   ;;  %v12731_v38 = vld [vmem:[%s13428_s4 + $0xe54] ss:$8 sps:$4 sm:$0xff]  }
 0x3a4   : > { %9469 = vmatprep.subr.bf16.mxu0 %v12656_v23  ;;  %v12734_v23 = vld [vmem:[%s13428_s4 + $0x2154] ss:$8 sps:$4 sm:$0xff]  }
 0x3a6   : > { %8691 = vmatpush1.bf16.msra.mxu1 %v12651_v26  ;;  %v12729_v26 = vld [vmem:[%s13428_s4 + $0xe50] ss:$8 sps:$4 sm:$0xff]  }
 0x3a7   : > { %9470 = vmatpush1.bf16.msra.mxu0 %v12654_v28  ;;  %8692 = vmatprep.subr.bf16.mxu1 %v12659_v9  ;;  %v12732_v28 = vld [vmem:[%s13428_s4 + $0x2150] ss:$8 sps:$4 sm:$0xff]   ;;  %v12737_v9 = vld [vmem:[%s13428_s4 + $0xe64] ss:$8 sps:$4 sm:$0xff]  }
 0x3a8   : > { %9471 = vmatprep.subr.bf16.mxu0 %v12662_v63  ;;  %v12740_v63 = vld [vmem:[%s13428_s4 + $0x2164] ss:$8 sps:$4 sm:$0xff]  }
 0x3aa   : > { %8693 = vmatpush1.bf16.msra.mxu1 %v12657_v53  ;;  %v12735_v53 = vld [vmem:[%s13428_s4 + $0xe60] ss:$8 sps:$4 sm:$0xff]  }
 0x3ab   : > { %9472 = vmatpush1.bf16.msra.mxu0 %v12660_v32  ;;  %8694 = vmatprep.subr.bf16.mxu1 %v12665_v56  ;;  %v12738_v32 = vld [vmem:[%s13428_s4 + $0x2160] ss:$8 sps:$4 sm:$0xff]   ;;  %v12743_v56 = vld [vmem:[%s13428_s4 + $0xe74] ss:$8 sps:$4 sm:$0xff]  }
 0x3ac   : > { %9473 = vmatprep.subr.bf16.mxu0 %v12668_v4  ;;  %v12746_v4 = vld [vmem:[%s13428_s4 + $0x2174] ss:$8 sps:$4 sm:$0xff]  }
 0x3ae   : > { %8695 = vmatpush1.bf16.msra.mxu1 %v12663_v33  ;;  %v12741_v33 = vld [vmem:[%s13428_s4 + $0xe70] ss:$8 sps:$4 sm:$0xff]  }
 0x3af   : > { %9474 = vmatpush1.bf16.msra.mxu0 %v12666_v34  ;;  %8696 = vmatprep.subr.bf16.mxu1 %v12671_v36  ;;  %v12744_v34 = vld [vmem:[%s13428_s4 + $0x2170] ss:$8 sps:$4 sm:$0xff]   ;;  %v12749_v36 = vld [vmem:[%s13428_s4 + $0xe84] ss:$8 sps:$4 sm:$0xff]  }
 0x3b0   : > { %9475 = vmatprep.subr.bf16.mxu0 %v12674_v40  ;;  %v12752_v40 = vld [vmem:[%s13428_s4 + $0x2184] ss:$8 sps:$4 sm:$0xff]  }
 0x3b2   : > { %8697 = vmatpush1.bf16.msra.mxu1 %v12669_v42  ;;  %v12747_v42 = vld [vmem:[%s13428_s4 + $0xe80] ss:$8 sps:$4 sm:$0xff]  }
 0x3b3   : > { %9476 = vmatpush1.bf16.msra.mxu0 %v12672_v24  ;;  %8698 = vmatprep.subr.bf16.mxu1 %v12677_v25  ;;  %v12750_v24 = vld [vmem:[%s13428_s4 + $0x2180] ss:$8 sps:$4 sm:$0xff]   ;;  %v12755_v25 = vld [vmem:[%s13428_s4 + $0xe94] ss:$8 sps:$4 sm:$0xff]  }
 0x3b4   : > { %9477 = vmatprep.subr.bf16.mxu0 %v12680_v19  ;;  %v12758_v19 = vld [vmem:[%s13428_s4 + $0x2194] ss:$8 sps:$4 sm:$0xff]  }
 0x3b6   : > { %8699 = vmatpush1.bf16.msra.mxu1 %v12675_v29  ;;  %v12753_v29 = vld [vmem:[%s13428_s4 + $0xe90] ss:$8 sps:$4 sm:$0xff]  }
 0x3b7   : > { %9478 = vmatpush1.bf16.msra.mxu0 %v12678_v45  ;;  %8700 = vmatprep.subr.bf16.mxu1 %v12683_v7  ;;  %v12756_v45 = vld [vmem:[%s13428_s4 + $0x2190] ss:$8 sps:$4 sm:$0xff]   ;;  %v12761_v7 = vld [vmem:[%s13428_s4 + $0xea4] ss:$8 sps:$4 sm:$0xff]  }
 0x3b8   : > { %9479 = vmatprep.subr.bf16.mxu0 %v12686_v46  ;;  %v12764_v46 = vld [vmem:[%s13428_s4 + $0x21a4] ss:$8 sps:$4 sm:$0xff]  }
 0x3ba   : > { %8701 = vmatpush1.bf16.msra.mxu1 %v12681_v54  ;;  %v12759_v54 = vld [vmem:[%s13428_s4 + $0xea0] ss:$8 sps:$4 sm:$0xff]  }
 0x3bb   : > { %9480 = vmatpush1.bf16.msra.mxu0 %v12684_v57  ;;  %8702 = vmatprep.subr.bf16.mxu1 %v12689_v35  ;;  %v12762_v57 = vld [vmem:[%s13428_s4 + $0x21a0] ss:$8 sps:$4 sm:$0xff]   ;;  %v12767_v35 = vld [vmem:[%s13428_s4 + $0xeb4] ss:$8 sps:$4 sm:$0xff]  }
 0x3bc   : > { %9481 = vmatprep.subr.bf16.mxu0 %v12692_v37  ;;  %v12770_v37 = vld [vmem:[%s13428_s4 + $0x21b4] ss:$8 sps:$4 sm:$0xff]  }
 0x3be   : > { %8703 = vmatpush1.bf16.msra.mxu1 %v12687_v60  ;;  %v12768_v60 = vld [vmem:[%s13428_s4 + $0x21b0] ss:$8 sps:$4 sm:$0xff]  }
 0x3bf   : > { %9482 = vmatpush1.bf16.msra.mxu0 %v12690_v17  ;;  %8704 = vmatprep.subr.bf16.mxu1 %v12695_v39  ;;  %v12773_v17 = vld [vmem:[%s13428_s4 + $0xec4] ss:$8 sps:$4 sm:$0xff]  }
 0x3c0   : > { %9483 = vmatprep.subr.bf16.mxu0 %v12698_v41  ;;  %v12776_v39 = vld [vmem:[%s13428_s4 + $0x21c4] ss:$8 sps:$4 sm:$0xff]   ;;  %v12771_v41 = vld [vmem:[%s13428_s4 + $0xec0] ss:$8 sps:$4 sm:$0xff]  }
 0x3c2   : > { %8705 = vmatpush1.bf16.msra.mxu1 %v12693_v44  ;;  %v12774_v44 = vld [vmem:[%s13428_s4 + $0x21c0] ss:$8 sps:$4 sm:$0xff]  }
 0x3c3   : > { %9484 = vmatpush1.bf16.msra.mxu0 %v12696_v27  ;;  %8715 = vmatprep.subr.bf16.mxu1 %v12701_v0  ;;  %v12779_v27 = vld [vmem:[%s13428_s4 + $0xed4] ss:$8 sps:$4 sm:$0xff]  }
 0x3c4   : > { %9494 = vmatprep.subr.bf16.mxu0 %v12704_v2  ;;  %v12782_v0 = vld [vmem:[%s13428_s4 + $0x21d4] ss:$8 sps:$4 sm:$0xff]   ;;  %v12777_v2 = vld [vmem:[%s13428_s4 + $0xed0] ss:$8 sps:$4 sm:$0xff]  }
 0x3c5   : > { %8707 = vmatmul.mubr.bf16.vlgmr.msra.gmra.mrb[0].mxu1 %v1712_v6  ;;  %v12785_v6 = vld [vmem:[%s13428_s4 + $0xee4] ss:$8 sps:$4 sm:$0xff]  }
 0x3c6   : > { %9486 = vmatmul.mubr.bf16.vlgmr.msra.gmra.mrb[0].mxu0 %v14638_v43  ;;  %8716 = vmatpush1.bf16.msra.mxu1 %v12699_v48  ;;  %v12788_v48 = vld [vmem:[%s13428_s4 + $0x21e4] ss:$8 sps:$4 sm:$0xff]  }
 0x3c7   : > { %9495 = vmatpush1.bf16.msra.mxu0 %v12702_v51  ;;  %8717 = vmatprep.subr.bf16.mxu1 %v12707_v58  ;;  %v1912_v51 = vcombine.high %v14534_v20, %v14534_v20  ;;  %v12783_v58 = vld [vmem:[%s13428_s4 + $0xee0] ss:$8 sps:$4 sm:$0xff]   ;;  %v12792_v20 = vld [vmem:[%s13428_s4 + $0x21f0] ss:$8 sps:$4 sm:$0xff]  }
 0x3c8   : > { %9496 = vmatprep.subr.bf16.mxu0 %v12710_v8  ;;  %8747 = vmatprep.mubr.bf16.mxu1 %v14645_v30  ;;  %v12786_v8 = vld [vmem:[%s13428_s4 + $0x21e0] ss:$8 sps:$4 sm:$0xff]  }
 0x3c9   : > { %9526 = vmatprep.mubr.bf16.mxu0 %v1959_v55  ;;  %v12791_v55 = vld [vmem:[%s13428_s4 + $0xef4] ss:$8 sps:$4 sm:$0xff]  }
 0x3ca   : > { %8718 = vmatpush1.bf16.msra.mxu1 %v12705_v49  ;;  %v12794_v49 = vld [vmem:[%s13428_s4 + $0x21f4] ss:$8 sps:$4 sm:$0xff]  }
 0x3cb   : > { %9497 = vmatpush1.bf16.msra.mxu0 %v12708_v10  ;;  %8719 = vmatprep.subr.bf16.mxu1 %v12713_v11  ;;  %v14710_v10 = vrot.slane %v1912_v51, %v13501_v52  ;;  %v12789_v11 = vld [vmem:[%s13428_s4 + $0xef0] ss:$8 sps:$4 sm:$0xff]  }
 0x3cc   : > { %9498 = vmatprep.subr.bf16.mxu0 %v12716_v12  ;;  %v12798_v12 = vld [vmem:[%s13428_s4 + $0xf04] ss:$8 sps:$4 sm:$0xff]   ;;  %v12865_v51 = vld [vmem:[%s13428_s4 + $0x22b0] ss:$8 sps:$4 sm:$0xff]  }
 0x3ce   : > { %8720 = vmatpush1.bf16.msra.mxu1 %v12711_v13  ;;  %v12801_v13 = vld [vmem:[%s13428_s4 + $0x2204] ss:$8 sps:$4 sm:$0xff]  }
 0x3cf   : > { %9499 = vmatpush1.bf16.msra.mxu0 %v12714_v14  ;;  %8721 = vmatprep.subr.bf16.mxu1 %v12719_v16  ;;  %v1928_v14 = vcombine.high %v14710_v10, %v14710_v10  ;;  %v14720_v16 = vrot.slane %v14626_v62, %v13501_v52 }
 0x3d0   : > { %9500 = vmatprep.subr.bf16.mxu0 %v12722_v1  ;;  %v1957_v1 = vcombine.high %v14638_v43, %v14638_v43  ;;  %v12802_v43 = vld [vmem:[%s13428_s4 + $0xf10] ss:$8 sps:$4 sm:$0xff]  }
 0x3d1   : > { %v14731_v62 = vrot.slane %v1928_v14, %v13501_v52  ;;  %v12882_v14 = vld [vmem:[%s13428_s4 + $0xfe4] ss:$8 sps:$4 sm:$0xff]  }
 0x3d2   : > { %8722 = vmatpush1.bf16.msra.mxu1 %v12717_v18  ;;  %v12796_v18 = vld [vmem:[%s13428_s4 + $0xf00] ss:$8 sps:$4 sm:$0xff]  }
 0x3d3   : > { %9501 = vmatpush1.bf16.msra.mxu0 %v12720_v61  ;;  %8723 = vmatprep.subr.bf16.mxu1 %v12725_v31  ;;  %v12799_v61 = vld [vmem:[%s13428_s4 + $0x2200] ss:$8 sps:$4 sm:$0xff]   ;;  %v12804_v31 = vld [vmem:[%s13428_s4 + $0xf14] ss:$8 sps:$4 sm:$0xff]  }
 0x3d4   : > { %9502 = vmatprep.subr.bf16.mxu0 %v12728_v21  ;;  %v12807_v21 = vld [vmem:[%s13428_s4 + $0x2214] ss:$8 sps:$4 sm:$0xff]  }
 0x3d6   : > { %8724 = vmatpush1.bf16.msra.mxu1 %v12723_v50  ;;  %v1715_v50 = vcombine.high %v14645_v30, %v14645_v30  ;;  %v12813_v30 = vld [vmem:[%s13428_s4 + $0x2224] ss:$8 sps:$4 sm:$0xff]  }
 0x3d7   : > { %9503 = vmatpush1.bf16.msra.mxu0 %v12726_v22  ;;  %8725 = vmatprep.subr.bf16.mxu1 %v12731_v38  ;;  %v12805_v22 = vld [vmem:[%s13428_s4 + $0x2210] ss:$8 sps:$4 sm:$0xff]   ;;  %v12810_v38 = vld [vmem:[%s13428_s4 + $0xf24] ss:$8 sps:$4 sm:$0xff]  }
 0x3d8   : > { %9504 = vmatprep.subr.bf16.mxu0 %v12734_v23  ;;  %v12808_v23 = vld [vmem:[%s13428_s4 + $0xf20] ss:$8 sps:$4 sm:$0xff]  }
 0x3da   : > { %8726 = vmatpush1.bf16.msra.mxu1 %v12729_v26  ;;  %v12811_v26 = vld [vmem:[%s13428_s4 + $0x2220] ss:$8 sps:$4 sm:$0xff]  }
 0x3db   : > { %9505 = vmatpush1.bf16.msra.mxu0 %v12732_v28  ;;  %8727 = vmatprep.subr.bf16.mxu1 %v12737_v9  ;;  %v12816_v28 = vld [vmem:[%s13428_s4 + $0xf34] ss:$8 sps:$4 sm:$0xff]  }
 0x3dc   : > { %9506 = vmatprep.subr.bf16.mxu0 %v12740_v63  ;;  %v12819_v9 = vld [vmem:[%s13428_s4 + $0x2234] ss:$8 sps:$4 sm:$0xff]   ;;  %v12814_v63 = vld [vmem:[%s13428_s4 + $0xf30] ss:$8 sps:$4 sm:$0xff]  }
 0x3de   : > { %8728 = vmatpush1.bf16.msra.mxu1 %v12735_v53  ;;  %v12817_v53 = vld [vmem:[%s13428_s4 + $0x2230] ss:$8 sps:$4 sm:$0xff]  }
 0x3df   : > { %9507 = vmatpush1.bf16.msra.mxu0 %v12738_v32  ;;  %8729 = vmatprep.subr.bf16.mxu1 %v12743_v56  ;;  %v12822_v32 = vld [vmem:[%s13428_s4 + $0xf44] ss:$8 sps:$4 sm:$0xff]  }
 0x3e0   : > { %9508 = vmatprep.subr.bf16.mxu0 %v12746_v4  ;;  %v12825_v56 = vld [vmem:[%s13428_s4 + $0x2244] ss:$8 sps:$4 sm:$0xff]   ;;  %v12820_v4 = vld [vmem:[%s13428_s4 + $0xf40] ss:$8 sps:$4 sm:$0xff]  }
 0x3e2   : > { %8730 = vmatpush1.bf16.msra.mxu1 %v12741_v33  ;;  %v12823_v33 = vld [vmem:[%s13428_s4 + $0x2240] ss:$8 sps:$4 sm:$0xff]  }
 0x3e3   : > { %9509 = vmatpush1.bf16.msra.mxu0 %v12744_v34  ;;  %8731 = vmatprep.subr.bf16.mxu1 %v12749_v36  ;;  %v12828_v34 = vld [vmem:[%s13428_s4 + $0xf54] ss:$8 sps:$4 sm:$0xff]  }
 0x3e4   : > { %9510 = vmatprep.subr.bf16.mxu0 %v12752_v40  ;;  %v12831_v36 = vld [vmem:[%s13428_s4 + $0x2254] ss:$8 sps:$4 sm:$0xff]   ;;  %v12826_v40 = vld [vmem:[%s13428_s4 + $0xf50] ss:$8 sps:$4 sm:$0xff]  }
 0x3e6   : > { %8732 = vmatpush1.bf16.msra.mxu1 %v12747_v42  ;;  %v12829_v42 = vld [vmem:[%s13428_s4 + $0x2250] ss:$8 sps:$4 sm:$0xff]  }
 0x3e7   : > { %9511 = vmatpush1.bf16.msra.mxu0 %v12750_v24  ;;  %8733 = vmatprep.subr.bf16.mxu1 %v12755_v25  ;;  %v12834_v24 = vld [vmem:[%s13428_s4 + $0xf64] ss:$8 sps:$4 sm:$0xff]  }
 0x3e8   : > { %9512 = vmatprep.subr.bf16.mxu0 %v12758_v19  ;;  %v12837_v25 = vld [vmem:[%s13428_s4 + $0x2264] ss:$8 sps:$4 sm:$0xff]   ;;  %v12832_v19 = vld [vmem:[%s13428_s4 + $0xf60] ss:$8 sps:$4 sm:$0xff]  }
 0x3ea   : > { %8734 = vmatpush1.bf16.msra.mxu1 %v12753_v29  ;;  %v12835_v29 = vld [vmem:[%s13428_s4 + $0x2260] ss:$8 sps:$4 sm:$0xff]  }
 0x3eb   : > { %9513 = vmatpush1.bf16.msra.mxu0 %v12756_v45  ;;  %8735 = vmatprep.subr.bf16.mxu1 %v12761_v7  ;;  %v12840_v45 = vld [vmem:[%s13428_s4 + $0xf74] ss:$8 sps:$4 sm:$0xff]  }
 0x3ec   : > { %9514 = vmatprep.subr.bf16.mxu0 %v12764_v46  ;;  %v12843_v7 = vld [vmem:[%s13428_s4 + $0x2274] ss:$8 sps:$4 sm:$0xff]   ;;  %v12838_v46 = vld [vmem:[%s13428_s4 + $0xf70] ss:$8 sps:$4 sm:$0xff]  }
 0x3ee   : > { %8736 = vmatpush1.bf16.msra.mxu1 %v12759_v54  ;;  %v12841_v54 = vld [vmem:[%s13428_s4 + $0x2270] ss:$8 sps:$4 sm:$0xff]  }
 0x3ef   : > { %9515 = vmatpush1.bf16.msra.mxu0 %v12762_v57  ;;  %8737 = vmatprep.subr.bf16.mxu1 %v12767_v35  ;;  %v12846_v57 = vld [vmem:[%s13428_s4 + $0xf84] ss:$8 sps:$4 sm:$0xff]  }
 0x3f0   : > { %9516 = vmatprep.subr.bf16.mxu0 %v12770_v37  ;;  %v12849_v35 = vld [vmem:[%s13428_s4 + $0x2284] ss:$8 sps:$4 sm:$0xff]   ;;  %v12844_v37 = vld [vmem:[%s13428_s4 + $0xf80] ss:$8 sps:$4 sm:$0xff]  }
 0x3f2   : > { %8738 = vmatpush1.bf16.msra.mxu1 %v12765_v59  ;;  %v12847_v59 = vld [vmem:[%s13428_s4 + $0x2280] ss:$8 sps:$4 sm:$0xff]  }
 0x3f3   : > { %9517 = vmatpush1.bf16.msra.mxu0 %v12768_v60  ;;  %8739 = vmatprep.subr.bf16.mxu1 %v12773_v17  ;;  %v12852_v60 = vld [vmem:[%s13428_s4 + $0xf94] ss:$8 sps:$4 sm:$0xff]  }
 0x3f4   : > { %9518 = vmatprep.subr.bf16.mxu0 %v12776_v39  ;;  %v12855_v17 = vld [vmem:[%s13428_s4 + $0x2294] ss:$8 sps:$4 sm:$0xff]   ;;  %v12850_v39 = vld [vmem:[%s13428_s4 + $0xf90] ss:$8 sps:$4 sm:$0xff]  }
 0x3f6   : > { %8740 = vmatpush1.bf16.msra.mxu1 %v12771_v41  ;;  %v12853_v41 = vld [vmem:[%s13428_s4 + $0x2290] ss:$8 sps:$4 sm:$0xff]  }
 0x3f7   : > { %9519 = vmatpush1.bf16.msra.mxu0 %v12774_v44  ;;  %8741 = vmatprep.subr.bf16.mxu1 %v12779_v27  ;;  %v12858_v44 = vld [vmem:[%s13428_s4 + $0xfa4] ss:$8 sps:$4 sm:$0xff]  }
 0x3f8   : > { %9520 = vmatprep.subr.bf16.mxu0 %v12782_v0  ;;  %v12861_v27 = vld [vmem:[%s13428_s4 + $0x22a4] ss:$8 sps:$4 sm:$0xff]   ;;  %v12856_v0 = vld [vmem:[%s13428_s4 + $0xfa0] ss:$8 sps:$4 sm:$0xff]  }
 0x3fa   : > { %8742 = vmatpush1.bf16.msra.mxu1 %v12777_v2  ;;  %v12859_v2 = vld [vmem:[%s13428_s4 + $0x22a0] ss:$8 sps:$4 sm:$0xff]  }
 0x3fb   : > { %9521 = vmatpush1.bf16.msra.mxu0 %v12780_v3  ;;  %8743 = vmatprep.subr.bf16.mxu1 %v12785_v6  ;;  %v12864_v3 = vld [vmem:[%s13428_s4 + $0xfb4] ss:$8 sps:$4 sm:$0xff]  }
 0x3fc   : > { %9522 = vmatprep.subr.bf16.mxu0 %v12788_v48  ;;  %v12867_v6 = vld [vmem:[%s13428_s4 + $0x22b4] ss:$8 sps:$4 sm:$0xff]   ;;  %v12862_v48 = vld [vmem:[%s13428_s4 + $0xfb0] ss:$8 sps:$4 sm:$0xff]  }
 0x3fe   : > { %8744 = vmatpush1.bf16.msra.mxu1 %v12783_v58  ;;  %v12870_v58 = vld [vmem:[%s13428_s4 + $0xfc4] ss:$8 sps:$4 sm:$0xff]  }
 0x3ff   : > { %9523 = vmatpush1.bf16.msra.mxu0 %v12786_v8  ;;  %8745 = vmatprep.subr.bf16.mxu1 %v12791_v55  ;;  %v12873_v8 = vld [vmem:[%s13428_s4 + $0x22c4] ss:$8 sps:$4 sm:$0xff]   ;;  %v12868_v55 = vld [vmem:[%s13428_s4 + $0xfc0] ss:$8 sps:$4 sm:$0xff]  }
 0x400   : > { %9524 = vmatprep.subr.bf16.mxu0 %v12794_v49  ;;  %v12871_v49 = vld [vmem:[%s13428_s4 + $0x22c0] ss:$8 sps:$4 sm:$0xff]  }
 0x402   : > { %8746 = vmatpush1.bf16.msra.mxu1 %v12789_v11  ;;  %v12876_v11 = vld [vmem:[%s13428_s4 + $0xfd4] ss:$8 sps:$4 sm:$0xff]  }
 0x403   : > { %9525 = vmatpush1.bf16.msra.mxu0 %v12792_v20  ;;  %8756 = vmatprep.subr.bf16.mxu1 %v12798_v12  ;;  %v12879_v20 = vld [vmem:[%s13428_s4 + $0x22d4] ss:$8 sps:$4 sm:$0xff]   ;;  %v12874_v12 = vld [vmem:[%s13428_s4 + $0xfd0] ss:$8 sps:$4 sm:$0xff]  }
 0x404   : > { %9535 = vmatprep.subr.bf16.mxu0 %v12801_v13  ;;  %v12877_v13 = vld [vmem:[%s13428_s4 + $0x22d0] ss:$8 sps:$4 sm:$0xff]  }
 0x405   : > { %8748 = vmatmul.mubr.bf16.vlgmr.msra.gmra.mrb[0].mxu1 %v14720_v16 }
 0x406   : > { %9527 = vmatmul.mubr.bf16.vlgmr.msra.gmra.mrb[0].mxu0 %v1957_v1  ;;  %8757 = vmatpush1.bf16.msra.mxu1 %v12796_v18  ;;  %v12885_v1 = vld [vmem:[%s13428_s4 + $0x22e4] ss:$8 sps:$4 sm:$0xff]   ;;  %v12880_v18 = vld [vmem:[%s13428_s4 + $0xfe0] ss:$8 sps:$4 sm:$0xff]  }
 0x407   : > { %9536 = vmatpush1.bf16.msra.mxu0 %v12799_v61  ;;  %8758 = vmatprep.subr.bf16.mxu1 %v12804_v31  ;;  %v12883_v61 = vld [vmem:[%s13428_s4 + $0x22e0] ss:$8 sps:$4 sm:$0xff]   ;;  %v12888_v31 = vld [vmem:[%s13428_s4 + $0xff4] ss:$8 sps:$4 sm:$0xff]  }
 0x408   : > { %9537 = vmatprep.subr.bf16.mxu0 %v12807_v21  ;;  %8788 = vmatprep.mubr.bf16.mxu1 %v1715_v50  ;;  %v12891_v21 = vld [vmem:[%s13428_s4 + $0x22f4] ss:$8 sps:$4 sm:$0xff]  }
 0x409   : > { %9567 = vmatprep.mubr.bf16.mxu0 %v14731_v62  ;;  %v14792_v50 = vld.sshfl [vmem:[%s13449_s12 + $0x20] sm:$0xff pattern:$0x75316420] }
 0x40a   : > { %8759 = vmatpush1.bf16.msra.mxu1 %v12802_v43  ;;  %v12886_v43 = vld [vmem:[%s13428_s4 + $0xff0] ss:$8 sps:$4 sm:$0xff]  }
 0x40b   : > { %9538 = vmatpush1.bf16.msra.mxu0 %v12805_v22  ;;  %8760 = vmatprep.subr.bf16.mxu1 %v12810_v38  ;;  %v12889_v22 = vld [vmem:[%s13428_s4 + $0x22f0] ss:$8 sps:$4 sm:$0xff]   ;;  %v12894_v38 = vld [vmem:[%s13428_s4 + $0x1004] ss:$8 sps:$4 sm:$0xff]  }
 0x40c   : > { %9539 = vmatprep.subr.bf16.mxu0 %v12813_v30  ;;  %v12898_v30 = vld [vmem:[%s13428_s4 + $0x2304] ss:$8 sps:$4 sm:$0xff]  }
 0x40e   : > { %8761 = vmatpush1.bf16.msra.mxu1 %v12808_v23  ;;  %v1731_v23 = vcombine.high %v14792_v50, %v14792_v50 }
 0x40f   : > { %9540 = vmatpush1.bf16.msra.mxu0 %v12811_v26  ;;  %8762 = vmatprep.subr.bf16.mxu1 %v12816_v28  ;;  %v1713_v26 = vcombine.high %v14720_v16, %v14720_v16  ;;  %v14804_v28 = vrot.slane %v14710_v10, %v13501_v52  ;;  %v1960_v16 = vcombine.high %v14731_v62, %v14731_v62  ;;  %v12899_v10 = vld [vmem:[%s13428_s4 + $0x1010] ss:$8 sps:$4 sm:$0xff]   ;;  %v12905_v62 = vld [vmem:[%s13428_s4 + $0x1020] ss:$8 sps:$4 sm:$0xff]  }
 0x410   : > { %9541 = vmatprep.subr.bf16.mxu0 %v12819_v9  ;;  %v12892_v9 = vld [vmem:[%s13428_s4 + $0x1000] ss:$8 sps:$4 sm:$0xff]  }
 0x412   : > { %8763 = vmatpush1.bf16.msra.mxu1 %v12814_v63  ;;  %v12896_v63 = vld [vmem:[%s13428_s4 + $0x2300] ss:$8 sps:$4 sm:$0xff]  }
 0x413   : > { %9542 = vmatpush1.bf16.msra.mxu0 %v12817_v53  ;;  %8764 = vmatprep.subr.bf16.mxu1 %v12822_v32  ;;  %v12901_v53 = vld [vmem:[%s13428_s4 + $0x1014] ss:$8 sps:$4 sm:$0xff]  }
 0x414   : > { %9543 = vmatprep.subr.bf16.mxu0 %v12825_v56  ;;  %v12904_v32 = vld [vmem:[%s13428_s4 + $0x2314] ss:$8 sps:$4 sm:$0xff]   ;;  %v14811_v56 = vrot.slane %v1731_v23, %v13501_v52  ;;  %v12979_v23 = vld [vmem:[%s13428_s4 + $0x10e4] ss:$8 sps:$4 sm:$0xff]  }
 0x416   : > { %8765 = vmatpush1.bf16.msra.mxu1 %v12820_v4  ;;  %v12902_v4 = vld [vmem:[%s13428_s4 + $0x2310] ss:$8 sps:$4 sm:$0xff]  }
 0x417   : > { %9544 = vmatpush1.bf16.msra.mxu0 %v12823_v33  ;;  %8766 = vmatprep.subr.bf16.mxu1 %v12828_v34  ;;  %v12907_v33 = vld [vmem:[%s13428_s4 + $0x1024] ss:$8 sps:$4 sm:$0xff]  }
 0x418   : > { %9545 = vmatprep.subr.bf16.mxu0 %v12831_v36  ;;  %v12910_v34 = vld [vmem:[%s13428_s4 + $0x2324] ss:$8 sps:$4 sm:$0xff]   ;;  %v12908_v36 = vld [vmem:[%s13428_s4 + $0x2320] ss:$8 sps:$4 sm:$0xff]  }
 0x41a   : > { %8767 = vmatpush1.bf16.msra.mxu1 %v12826_v40  ;;  %v12913_v40 = vld [vmem:[%s13428_s4 + $0x1034] ss:$8 sps:$4 sm:$0xff]  }
 0x41b   : > { %9546 = vmatpush1.bf16.msra.mxu0 %v12829_v42  ;;  %8768 = vmatprep.subr.bf16.mxu1 %v12834_v24  ;;  %v12916_v42 = vld [vmem:[%s13428_s4 + $0x2334] ss:$8 sps:$4 sm:$0xff]   ;;  %v12911_v24 = vld [vmem:[%s13428_s4 + $0x1030] ss:$8 sps:$4 sm:$0xff]  }
 0x41c   : > { %9547 = vmatprep.subr.bf16.mxu0 %v12837_v25  ;;  %v12914_v25 = vld [vmem:[%s13428_s4 + $0x2330] ss:$8 sps:$4 sm:$0xff]  }
 0x41e   : > { %8769 = vmatpush1.bf16.msra.mxu1 %v12832_v19  ;;  %v12919_v19 = vld [vmem:[%s13428_s4 + $0x1044] ss:$8 sps:$4 sm:$0xff]  }
 0x41f   : > { %9548 = vmatpush1.bf16.msra.mxu0 %v12835_v29  ;;  %8770 = vmatprep.subr.bf16.mxu1 %v12840_v45  ;;  %v12922_v29 = vld [vmem:[%s13428_s4 + $0x2344] ss:$8 sps:$4 sm:$0xff]   ;;  %v12917_v45 = vld [vmem:[%s13428_s4 + $0x1040] ss:$8 sps:$4 sm:$0xff]  }
 0x420   : > { %9549 = vmatprep.subr.bf16.mxu0 %v12843_v7  ;;  %v12920_v7 = vld [vmem:[%s13428_s4 + $0x2340] ss:$8 sps:$4 sm:$0xff]  }
 0x422   : > { %8771 = vmatpush1.bf16.msra.mxu1 %v12838_v46  ;;  %v12925_v46 = vld [vmem:[%s13428_s4 + $0x1054] ss:$8 sps:$4 sm:$0xff]  }
 0x423   : > { %9550 = vmatpush1.bf16.msra.mxu0 %v12841_v54  ;;  %8772 = vmatprep.subr.bf16.mxu1 %v12846_v57  ;;  %v12928_v54 = vld [vmem:[%s13428_s4 + $0x2354] ss:$8 sps:$4 sm:$0xff]   ;;  %v12923_v57 = vld [vmem:[%s13428_s4 + $0x1050] ss:$8 sps:$4 sm:$0xff]  }
 0x424   : > { %9551 = vmatprep.subr.bf16.mxu0 %v12849_v35  ;;  %v12926_v35 = vld [vmem:[%s13428_s4 + $0x2350] ss:$8 sps:$4 sm:$0xff]  }
 0x426   : > { %8773 = vmatpush1.bf16.msra.mxu1 %v12844_v37  ;;  %v12931_v37 = vld [vmem:[%s13428_s4 + $0x1064] ss:$8 sps:$4 sm:$0xff]  }
 0x427   : > { %9552 = vmatpush1.bf16.msra.mxu0 %v12847_v59  ;;  %8774 = vmatprep.subr.bf16.mxu1 %v12852_v60  ;;  %v12934_v59 = vld [vmem:[%s13428_s4 + $0x2364] ss:$8 sps:$4 sm:$0xff]   ;;  %v12929_v60 = vld [vmem:[%s13428_s4 + $0x1060] ss:$8 sps:$4 sm:$0xff]  }
 0x428   : > { %9553 = vmatprep.subr.bf16.mxu0 %v12855_v17  ;;  %v12932_v17 = vld [vmem:[%s13428_s4 + $0x2360] ss:$8 sps:$4 sm:$0xff]  }
 0x42a   : > { %8775 = vmatpush1.bf16.msra.mxu1 %v12850_v39  ;;  %v12937_v39 = vld [vmem:[%s13428_s4 + $0x1074] ss:$8 sps:$4 sm:$0xff]  }
 0x42b   : > { %9554 = vmatpush1.bf16.msra.mxu0 %v12853_v41  ;;  %8776 = vmatprep.subr.bf16.mxu1 %v12858_v44  ;;  %v12940_v41 = vld [vmem:[%s13428_s4 + $0x2374] ss:$8 sps:$4 sm:$0xff]   ;;  %v12935_v44 = vld [vmem:[%s13428_s4 + $0x1070] ss:$8 sps:$4 sm:$0xff]  }
 0x42c   : > { %9555 = vmatprep.subr.bf16.mxu0 %v12861_v27  ;;  %v12938_v27 = vld [vmem:[%s13428_s4 + $0x2370] ss:$8 sps:$4 sm:$0xff]  }
 0x42e   : > { %8777 = vmatpush1.bf16.msra.mxu1 %v12856_v0  ;;  %v12943_v0 = vld [vmem:[%s13428_s4 + $0x1084] ss:$8 sps:$4 sm:$0xff]  }
 0x42f   : > { %9556 = vmatpush1.bf16.msra.mxu0 %v12859_v2  ;;  %8778 = vmatprep.subr.bf16.mxu1 %v12864_v3  ;;  %v12946_v2 = vld [vmem:[%s13428_s4 + $0x2384] ss:$8 sps:$4 sm:$0xff]   ;;  %v12941_v3 = vld [vmem:[%s13428_s4 + $0x1080] ss:$8 sps:$4 sm:$0xff]  }
 0x430   : > { %9557 = vmatprep.subr.bf16.mxu0 %v12867_v6  ;;  %v12944_v6 = vld [vmem:[%s13428_s4 + $0x2380] ss:$8 sps:$4 sm:$0xff]  }
 0x432   : > { %8779 = vmatpush1.bf16.msra.mxu1 %v12862_v48  ;;  %v12949_v48 = vld [vmem:[%s13428_s4 + $0x1094] ss:$8 sps:$4 sm:$0xff]  }
 0x433   : > { %9558 = vmatpush1.bf16.msra.mxu0 %v12865_v51  ;;  %8780 = vmatprep.subr.bf16.mxu1 %v12870_v58  ;;  %v12952_v51 = vld [vmem:[%s13428_s4 + $0x2394] ss:$8 sps:$4 sm:$0xff]   ;;  %v12947_v58 = vld [vmem:[%s13428_s4 + $0x1090] ss:$8 sps:$4 sm:$0xff]  }
 0x434   : > { %9559 = vmatprep.subr.bf16.mxu0 %v12873_v8  ;;  %v12950_v8 = vld [vmem:[%s13428_s4 + $0x2390] ss:$8 sps:$4 sm:$0xff]  }
 0x436   : > { %8781 = vmatpush1.bf16.msra.mxu1 %v12868_v55  ;;  %v12955_v55 = vld [vmem:[%s13428_s4 + $0x10a4] ss:$8 sps:$4 sm:$0xff]  }
 0x437   : > { %9560 = vmatpush1.bf16.msra.mxu0 %v12871_v49  ;;  %8782 = vmatprep.subr.bf16.mxu1 %v12876_v11  ;;  %v12958_v49 = vld [vmem:[%s13428_s4 + $0x23a4] ss:$8 sps:$4 sm:$0xff]   ;;  %v12953_v11 = vld [vmem:[%s13428_s4 + $0x10a0] ss:$8 sps:$4 sm:$0xff]  }
 0x438   : > { %9561 = vmatprep.subr.bf16.mxu0 %v12879_v20  ;;  %v12956_v20 = vld [vmem:[%s13428_s4 + $0x23a0] ss:$8 sps:$4 sm:$0xff]  }
 0x43a   : > { %8783 = vmatpush1.bf16.msra.mxu1 %v12874_v12  ;;  %v12961_v12 = vld [vmem:[%s13428_s4 + $0x10b4] ss:$8 sps:$4 sm:$0xff]  }
 0x43b   : > { %9562 = vmatpush1.bf16.msra.mxu0 %v12877_v13  ;;  %8784 = vmatprep.subr.bf16.mxu1 %v12882_v14  ;;  %v12964_v13 = vld [vmem:[%s13428_s4 + $0x23b4] ss:$8 sps:$4 sm:$0xff]   ;;  %v12959_v14 = vld [vmem:[%s13428_s4 + $0x10b0] ss:$8 sps:$4 sm:$0xff]  }
 0x43c   : > { %9563 = vmatprep.subr.bf16.mxu0 %v12885_v1  ;;  %v12962_v1 = vld [vmem:[%s13428_s4 + $0x23b0] ss:$8 sps:$4 sm:$0xff]  }
 0x43e   : > { %8785 = vmatpush1.bf16.msra.mxu1 %v12880_v18  ;;  %v12967_v18 = vld [vmem:[%s13428_s4 + $0x10c4] ss:$8 sps:$4 sm:$0xff]  }
 0x43f   : > { %9564 = vmatpush1.bf16.msra.mxu0 %v12883_v61  ;;  %8786 = vmatprep.subr.bf16.mxu1 %v12888_v31  ;;  %v12970_v61 = vld [vmem:[%s13428_s4 + $0x23c4] ss:$8 sps:$4 sm:$0xff]   ;;  %v12965_v31 = vld [vmem:[%s13428_s4 + $0x10c0] ss:$8 sps:$4 sm:$0xff]  }
 0x440   : > { %9565 = vmatprep.subr.bf16.mxu0 %v12891_v21  ;;  %v12968_v21 = vld [vmem:[%s13428_s4 + $0x23c0] ss:$8 sps:$4 sm:$0xff]  }
 0x442   : > { %8787 = vmatpush1.bf16.msra.mxu1 %v12886_v43  ;;  %v12973_v43 = vld [vmem:[%s13428_s4 + $0x10d4] ss:$8 sps:$4 sm:$0xff]  }
 0x443   : > { %9566 = vmatpush1.bf16.msra.mxu0 %v12889_v22  ;;  %8797 = vmatprep.subr.bf16.mxu1 %v12894_v38  ;;  %v12976_v22 = vld [vmem:[%s13428_s4 + $0x23d4] ss:$8 sps:$4 sm:$0xff]   ;;  %v12971_v38 = vld [vmem:[%s13428_s4 + $0x10d0] ss:$8 sps:$4 sm:$0xff]  }
 0x444   : > { %9576 = vmatprep.subr.bf16.mxu0 %v12898_v30  ;;  %v12974_v30 = vld [vmem:[%s13428_s4 + $0x23d0] ss:$8 sps:$4 sm:$0xff]  }
 0x445   : > { %8789 = vmatmul.mubr.bf16.vlgmr.msra.gmra.mrb[0].mxu1 %v1713_v26  ;;  %v12982_v26 = vld [vmem:[%s13428_s4 + $0x23e4] ss:$8 sps:$4 sm:$0xff]  }
 0x446   : > { %9568 = vmatmul.mubr.bf16.vlgmr.msra.gmra.mrb[0].mxu0 %v14804_v28  ;;  %8798 = vmatpush1.bf16.msra.mxu1 %v12892_v9  ;;  %v12977_v9 = vld [vmem:[%s13428_s4 + $0x10e0] ss:$8 sps:$4 sm:$0xff]  }
 0x447   : > { %9577 = vmatpush1.bf16.msra.mxu0 %v12896_v63  ;;  %8799 = vmatprep.subr.bf16.mxu1 %v12901_v53  ;;  %v12980_v63 = vld [vmem:[%s13428_s4 + $0x23e0] ss:$8 sps:$4 sm:$0xff]   ;;  %v12985_v53 = vld [vmem:[%s13428_s4 + $0x10f4] ss:$8 sps:$4 sm:$0xff]  }
 0x448   : > { %9578 = vmatprep.subr.bf16.mxu0 %v12904_v32  ;;  %8829 = vmatprep.mubr.bf16.mxu1 %v14811_v56  ;;  %v12988_v32 = vld [vmem:[%s13428_s4 + $0x23f4] ss:$8 sps:$4 sm:$0xff]  }
 0x449   : > { %9608 = vmatprep.mubr.bf16.mxu0 %v1960_v16  ;;  %v14874_v16 = vld.sshfl [vmem:[%s13449_s12 + $0x48] sm:$0x33 pattern:$0x75316420] }
 0x44a   : > { %8800 = vmatpush1.bf16.msra.mxu1 %v12899_v10  ;;  %v12983_v10 = vld [vmem:[%s13428_s4 + $0x10f0] ss:$8 sps:$4 sm:$0xff]  }
 0x44b   : > { %9579 = vmatpush1.bf16.msra.mxu0 %v12902_v4  ;;  %8801 = vmatprep.subr.bf16.mxu1 %v12907_v33  ;;  %v12986_v4 = vld [vmem:[%s13428_s4 + $0x23f0] ss:$8 sps:$4 sm:$0xff]   ;;  %v12991_v33 = vld [vmem:[%s13428_s4 + $0x1104] ss:$8 sps:$4 sm:$0xff]  }
 0x44c   : > { %9580 = vmatprep.subr.bf16.mxu0 %v12910_v34  ;;  %v12994_v34 = vld [vmem:[%s13428_s4 + $0x2404] ss:$8 sps:$4 sm:$0xff]  }
 0x44e   : > { %8802 = vmatpush1.bf16.msra.mxu1 %v12905_v62  ;;  %v1968_v62 = vcombine.high %v14874_v16, %v14874_v16 }
 0x44f   : > { %9581 = vmatpush1.bf16.msra.mxu0 %v12908_v36  ;;  %8803 = vmatprep.subr.bf16.mxu1 %v12913_v40  ;;  %v14884_v36 = vrot.slane %v14792_v50, %v13501_v52  ;;  %v1958_v40 = vcombine.high %v14804_v28, %v14804_v28  ;;  %v12995_v28 = vld [vmem:[%s13428_s4 + $0x1110] ss:$8 sps:$4 sm:$0xff]  }
 0x450   : > { %9582 = vmatprep.subr.bf16.mxu0 %v12916_v42  ;;  %v12989_v42 = vld [vmem:[%s13428_s4 + $0x1100] ss:$8 sps:$4 sm:$0xff]   ;;  %v14895_v50 = vrot.slane %v1968_v62, %v13501_v52  ;;  %v13075_v62 = vld [vmem:[%s13428_s4 + $0x11e4] ss:$8 sps:$4 sm:$0xff]  }
 0x452   : > { %8804 = vmatpush1.bf16.msra.mxu1 %v12911_v24  ;;  %v12992_v24 = vld [vmem:[%s13428_s4 + $0x2400] ss:$8 sps:$4 sm:$0xff]  }
 0x453   : > { %9583 = vmatpush1.bf16.msra.mxu0 %v12914_v25  ;;  %8805 = vmatprep.subr.bf16.mxu1 %v12919_v19  ;;  %v12997_v25 = vld [vmem:[%s13428_s4 + $0x1114] ss:$8 sps:$4 sm:$0xff]  }
 0x454   : > { %9584 = vmatprep.subr.bf16.mxu0 %v12922_v29  ;;  %v13000_v19 = vld [vmem:[%s13428_s4 + $0x2414] ss:$8 sps:$4 sm:$0xff]   ;;  %v1763_v29 = vcombine.high %v14811_v56, %v14811_v56  ;;  %v13006_v56 = vld [vmem:[%s13428_s4 + $0x2424] ss:$8 sps:$4 sm:$0xff]  }
 0x456   : > { %8806 = vmatpush1.bf16.msra.mxu1 %v12917_v45  ;;  %v12998_v45 = vld [vmem:[%s13428_s4 + $0x2410] ss:$8 sps:$4 sm:$0xff]  }
 0x457   : > { %9585 = vmatpush1.bf16.msra.mxu0 %v12920_v7  ;;  %8807 = vmatprep.subr.bf16.mxu1 %v12925_v46  ;;  %v13003_v7 = vld [vmem:[%s13428_s4 + $0x1124] ss:$8 sps:$4 sm:$0xff]   ;;  %v13001_v46 = vld [vmem:[%s13428_s4 + $0x1120] ss:$8 sps:$4 sm:$0xff]  }
 0x458   : > { %9586 = vmatprep.subr.bf16.mxu0 %v12928_v54  ;;  %v13004_v54 = vld [vmem:[%s13428_s4 + $0x2420] ss:$8 sps:$4 sm:$0xff]  }
 0x45a   : > { %8808 = vmatpush1.bf16.msra.mxu1 %v12923_v57  ;;  %v13009_v57 = vld [vmem:[%s13428_s4 + $0x1134] ss:$8 sps:$4 sm:$0xff]  }
 0x45b   : > { %9587 = vmatpush1.bf16.msra.mxu0 %v12926_v35  ;;  %8809 = vmatprep.subr.bf16.mxu1 %v12931_v37  ;;  %v13012_v35 = vld [vmem:[%s13428_s4 + $0x2434] ss:$8 sps:$4 sm:$0xff]   ;;  %v13007_v37 = vld [vmem:[%s13428_s4 + $0x1130] ss:$8 sps:$4 sm:$0xff]  }
 0x45c   : > { %9588 = vmatprep.subr.bf16.mxu0 %v12934_v59  ;;  %v13010_v59 = vld [vmem:[%s13428_s4 + $0x2430] ss:$8 sps:$4 sm:$0xff]  }
 0x45e   : > { %8810 = vmatpush1.bf16.msra.mxu1 %v12929_v60  ;;  %v13015_v60 = vld [vmem:[%s13428_s4 + $0x1144] ss:$8 sps:$4 sm:$0xff]  }
 0x45f   : > { %9589 = vmatpush1.bf16.msra.mxu0 %v12932_v17  ;;  %8811 = vmatprep.subr.bf16.mxu1 %v12937_v39  ;;  %v13018_v17 = vld [vmem:[%s13428_s4 + $0x2444] ss:$8 sps:$4 sm:$0xff]   ;;  %v13013_v39 = vld [vmem:[%s13428_s4 + $0x1140] ss:$8 sps:$4 sm:$0xff]  }
 0x460   : > { %9590 = vmatprep.subr.bf16.mxu0 %v12940_v41  ;;  %v13016_v41 = vld [vmem:[%s13428_s4 + $0x2440] ss:$8 sps:$4 sm:$0xff]  }
 0x462   : > { %8812 = vmatpush1.bf16.msra.mxu1 %v12935_v44  ;;  %v13021_v44 = vld [vmem:[%s13428_s4 + $0x1154] ss:$8 sps:$4 sm:$0xff]  }
 0x463   : > { %9591 = vmatpush1.bf16.msra.mxu0 %v12938_v27  ;;  %8813 = vmatprep.subr.bf16.mxu1 %v12943_v0  ;;  %v13024_v27 = vld [vmem:[%s13428_s4 + $0x2454] ss:$8 sps:$4 sm:$0xff]   ;;  %v13019_v0 = vld [vmem:[%s13428_s4 + $0x1150] ss:$8 sps:$4 sm:$0xff]  }
 0x464   : > { %9592 = vmatprep.subr.bf16.mxu0 %v12946_v2  ;;  %v13022_v2 = vld [vmem:[%s13428_s4 + $0x2450] ss:$8 sps:$4 sm:$0xff]  }
 0x466   : > { %8814 = vmatpush1.bf16.msra.mxu1 %v12941_v3  ;;  %v13027_v3 = vld [vmem:[%s13428_s4 + $0x1164] ss:$8 sps:$4 sm:$0xff]  }
 0x467   : > { %9593 = vmatpush1.bf16.msra.mxu0 %v12944_v6  ;;  %8815 = vmatprep.subr.bf16.mxu1 %v12949_v48  ;;  %v13030_v6 = vld [vmem:[%s13428_s4 + $0x2464] ss:$8 sps:$4 sm:$0xff]   ;;  %v13025_v48 = vld [vmem:[%s13428_s4 + $0x1160] ss:$8 sps:$4 sm:$0xff]  }
 0x468   : > { %9594 = vmatprep.subr.bf16.mxu0 %v12952_v51  ;;  %v13028_v51 = vld [vmem:[%s13428_s4 + $0x2460] ss:$8 sps:$4 sm:$0xff]  }
 0x46a   : > { %8816 = vmatpush1.bf16.msra.mxu1 %v12947_v58  ;;  %v13033_v58 = vld [vmem:[%s13428_s4 + $0x1174] ss:$8 sps:$4 sm:$0xff]  }
 0x46b   : > { %9595 = vmatpush1.bf16.msra.mxu0 %v12950_v8  ;;  %8817 = vmatprep.subr.bf16.mxu1 %v12955_v55  ;;  %v13036_v8 = vld [vmem:[%s13428_s4 + $0x2474] ss:$8 sps:$4 sm:$0xff]   ;;  %v13031_v55 = vld [vmem:[%s13428_s4 + $0x1170] ss:$8 sps:$4 sm:$0xff]  }
 0x46c   : > { %9596 = vmatprep.subr.bf16.mxu0 %v12958_v49  ;;  %v13034_v49 = vld [vmem:[%s13428_s4 + $0x2470] ss:$8 sps:$4 sm:$0xff]  }
 0x46e   : > { %8818 = vmatpush1.bf16.msra.mxu1 %v12953_v11  ;;  %v13039_v11 = vld [vmem:[%s13428_s4 + $0x1184] ss:$8 sps:$4 sm:$0xff]  }
 0x46f   : > { %9597 = vmatpush1.bf16.msra.mxu0 %v12956_v20  ;;  %8819 = vmatprep.subr.bf16.mxu1 %v12961_v12  ;;  %v13042_v20 = vld [vmem:[%s13428_s4 + $0x2484] ss:$8 sps:$4 sm:$0xff]   ;;  %v13037_v12 = vld [vmem:[%s13428_s4 + $0x1180] ss:$8 sps:$4 sm:$0xff]  }
 0x470   : > { %9598 = vmatprep.subr.bf16.mxu0 %v12964_v13  ;;  %v13040_v13 = vld [vmem:[%s13428_s4 + $0x2480] ss:$8 sps:$4 sm:$0xff]  }
 0x472   : > { %8820 = vmatpush1.bf16.msra.mxu1 %v12959_v14  ;;  %v13045_v14 = vld [vmem:[%s13428_s4 + $0x1194] ss:$8 sps:$4 sm:$0xff]  }
 0x473   : > { %9599 = vmatpush1.bf16.msra.mxu0 %v12962_v1  ;;  %8821 = vmatprep.subr.bf16.mxu1 %v12967_v18  ;;  %v13048_v1 = vld [vmem:[%s13428_s4 + $0x2494] ss:$8 sps:$4 sm:$0xff]   ;;  %v13043_v18 = vld [vmem:[%s13428_s4 + $0x1190] ss:$8 sps:$4 sm:$0xff]  }
 0x474   : > { %9600 = vmatprep.subr.bf16.mxu0 %v12970_v61  ;;  %v13046_v61 = vld [vmem:[%s13428_s4 + $0x2490] ss:$8 sps:$4 sm:$0xff]  }
 0x476   : > { %8822 = vmatpush1.bf16.msra.mxu1 %v12965_v31  ;;  %v13051_v31 = vld [vmem:[%s13428_s4 + $0x11a4] ss:$8 sps:$4 sm:$0xff]  }
 0x477   : > { %9601 = vmatpush1.bf16.msra.mxu0 %v12968_v21  ;;  %8823 = vmatprep.subr.bf16.mxu1 %v12973_v43  ;;  %v13054_v21 = vld [vmem:[%s13428_s4 + $0x24a4] ss:$8 sps:$4 sm:$0xff]   ;;  %v13049_v43 = vld [vmem:[%s13428_s4 + $0x11a0] ss:$8 sps:$4 sm:$0xff]  }
 0x478   : > { %9602 = vmatprep.subr.bf16.mxu0 %v12976_v22  ;;  %v13052_v22 = vld [vmem:[%s13428_s4 + $0x24a0] ss:$8 sps:$4 sm:$0xff]  }
 0x47a   : > { %8824 = vmatpush1.bf16.msra.mxu1 %v12971_v38  ;;  %v13057_v38 = vld [vmem:[%s13428_s4 + $0x11b4] ss:$8 sps:$4 sm:$0xff]  }
 0x47b   : > { %9603 = vmatpush1.bf16.msra.mxu0 %v12974_v30  ;;  %8825 = vmatprep.subr.bf16.mxu1 %v12979_v23  ;;  %v13060_v30 = vld [vmem:[%s13428_s4 + $0x24b4] ss:$8 sps:$4 sm:$0xff]   ;;  %v13055_v23 = vld [vmem:[%s13428_s4 + $0x11b0] ss:$8 sps:$4 sm:$0xff]  }
 0x47c   : > { %9604 = vmatprep.subr.bf16.mxu0 %v12982_v26  ;;  %v13058_v26 = vld [vmem:[%s13428_s4 + $0x24b0] ss:$8 sps:$4 sm:$0xff]  }
 0x47e   : > { %8826 = vmatpush1.bf16.msra.mxu1 %v12977_v9  ;;  %v13063_v9 = vld [vmem:[%s13428_s4 + $0x11c4] ss:$8 sps:$4 sm:$0xff]  }
 0x47f   : > { %9605 = vmatpush1.bf16.msra.mxu0 %v12980_v63  ;;  %8827 = vmatprep.subr.bf16.mxu1 %v12985_v53  ;;  %v13066_v63 = vld [vmem:[%s13428_s4 + $0x24c4] ss:$8 sps:$4 sm:$0xff]   ;;  %v13061_v53 = vld [vmem:[%s13428_s4 + $0x11c0] ss:$8 sps:$4 sm:$0xff]  }
 0x480   : > { %9606 = vmatprep.subr.bf16.mxu0 %v12988_v32  ;;  %v13064_v32 = vld [vmem:[%s13428_s4 + $0x24c0] ss:$8 sps:$4 sm:$0xff]  }
 0x482   : > { %8828 = vmatpush1.bf16.msra.mxu1 %v12983_v10  ;;  %v13069_v10 = vld [vmem:[%s13428_s4 + $0x11d4] ss:$8 sps:$4 sm:$0xff]  }
 0x483   : > { %9607 = vmatpush1.bf16.msra.mxu0 %v12986_v4  ;;  %8838 = vmatprep.subr.bf16.mxu1 %v12991_v33  ;;  %v13072_v4 = vld [vmem:[%s13428_s4 + $0x24d4] ss:$8 sps:$4 sm:$0xff]   ;;  %v13067_v33 = vld [vmem:[%s13428_s4 + $0x11d0] ss:$8 sps:$4 sm:$0xff]  }
 0x484   : > { %9617 = vmatprep.subr.bf16.mxu0 %v12994_v34  ;;  %v13070_v34 = vld [vmem:[%s13428_s4 + $0x24d0] ss:$8 sps:$4 sm:$0xff]  }
 0x485   : > { %8830 = vmatmul.mubr.bf16.vlgmr.msra.gmra.mrb[0].mxu1 %v14884_v36 }
 0x486   : > { %9609 = vmatmul.mubr.bf16.vlgmr.msra.gmra.mrb[0].mxu0 %v1958_v40  ;;  %8839 = vmatpush1.bf16.msra.mxu1 %v12989_v42  ;;  %v13078_v40 = vld [vmem:[%s13428_s4 + $0x24e4] ss:$8 sps:$4 sm:$0xff]   ;;  %v13073_v42 = vld [vmem:[%s13428_s4 + $0x11e0] ss:$8 sps:$4 sm:$0xff]  }
 0x487   : > { %9618 = vmatpush1.bf16.msra.mxu0 %v12992_v24  ;;  %8840 = vmatprep.subr.bf16.mxu1 %v12997_v25  ;;  %v13076_v24 = vld [vmem:[%s13428_s4 + $0x24e0] ss:$8 sps:$4 sm:$0xff]   ;;  %v13081_v25 = vld [vmem:[%s13428_s4 + $0x11f4] ss:$8 sps:$4 sm:$0xff]  }
 0x488   : > { %9619 = vmatprep.subr.bf16.mxu0 %v13000_v19  ;;  %8870 = vmatprep.mubr.bf16.mxu1 %v1763_v29  ;;  %v13084_v19 = vld [vmem:[%s13428_s4 + $0x24f4] ss:$8 sps:$4 sm:$0xff]   ;;  %v13079_v29 = vld [vmem:[%s13428_s4 + $0x11f0] ss:$8 sps:$4 sm:$0xff]  }
 0x489   : > { %9649 = vmatprep.mubr.bf16.mxu0 %v14895_v50 }
 0x48a   : > { %8841 = vmatpush1.bf16.msra.mxu1 %v12995_v28  ;;  %v13082_v28 = vld [vmem:[%s13428_s4 + $0x24f0] ss:$8 sps:$4 sm:$0xff]  }
 0x48b   : > { %9620 = vmatpush1.bf16.msra.mxu0 %v12998_v45  ;;  %8842 = vmatprep.subr.bf16.mxu1 %v13003_v7  ;;  %v13087_v45 = vld [vmem:[%s13428_s4 + $0x1204] ss:$8 sps:$4 sm:$0xff]  }
 0x48c   : > { %9621 = vmatprep.subr.bf16.mxu0 %v13006_v56  ;;  %v13090_v7 = vld [vmem:[%s13428_s4 + $0x2504] ss:$8 sps:$4 sm:$0xff]   ;;  %v1761_v56 = vcombine.high %v14884_v36, %v14884_v36  ;;  %v13094_v36 = vld [vmem:[%s13428_s4 + $0x2510] ss:$8 sps:$4 sm:$0xff]  }
 0x48e   : > { %8843 = vmatpush1.bf16.msra.mxu1 %v13001_v46  ;;  %v14963_v46 = vrot.slane %v14874_v16, %v13501_v52  ;;  %v13091_v16 = vld [vmem:[%s13428_s4 + $0x1210] ss:$8 sps:$4 sm:$0xff]  }
 0x48f   : > { %9622 = vmatpush1.bf16.msra.mxu0 %v13004_v54  ;;  %8844 = vmatprep.subr.bf16.mxu1 %v13009_v57  ;;  %v13085_v54 = vld [vmem:[%s13428_s4 + $0x1200] ss:$8 sps:$4 sm:$0xff]  }
 0x490   : > { %9623 = vmatprep.subr.bf16.mxu0 %v13012_v35  ;;  %v13088_v57 = vld [vmem:[%s13428_s4 + $0x2500] ss:$8 sps:$4 sm:$0xff]   ;;  %v13093_v35 = vld [vmem:[%s13428_s4 + $0x1214] ss:$8 sps:$4 sm:$0xff]  }
 0x492   : > { %8845 = vmatpush1.bf16.msra.mxu1 %v13007_v37  ;;  %v13096_v37 = vld [vmem:[%s13428_s4 + $0x2514] ss:$8 sps:$4 sm:$0xff]  }
 0x493   : > { %9624 = vmatpush1.bf16.msra.mxu0 %v13010_v59  ;;  %8846 = vmatprep.subr.bf16.mxu1 %v13015_v60  ;;  %v1984_v59 = vcombine.high %v14895_v50, %v14895_v50  ;;  %v13099_v60 = vld [vmem:[%s13428_s4 + $0x1224] ss:$8 sps:$4 sm:$0xff]   ;;  %v13097_v50 = vld [vmem:[%s13428_s4 + $0x1220] ss:$8 sps:$4 sm:$0xff]  }
 0x494   : > { %9625 = vmatprep.subr.bf16.mxu0 %v13018_v17  ;;  %v13102_v17 = vld [vmem:[%s13428_s4 + $0x2524] ss:$8 sps:$4 sm:$0xff]  }
 0x496   : > { %8847 = vmatpush1.bf16.msra.mxu1 %v13013_v39  ;;  %v13100_v39 = vld [vmem:[%s13428_s4 + $0x2520] ss:$8 sps:$4 sm:$0xff]  }
 0x497   : > { %9626 = vmatpush1.bf16.msra.mxu0 %v13016_v41  ;;  %8848 = vmatprep.subr.bf16.mxu1 %v13021_v44  ;;  %v13105_v41 = vld [vmem:[%s13428_s4 + $0x1234] ss:$8 sps:$4 sm:$0xff]  }
 0x498   : > { %9627 = vmatprep.subr.bf16.mxu0 %v13024_v27  ;;  %v13108_v44 = vld [vmem:[%s13428_s4 + $0x2534] ss:$8 sps:$4 sm:$0xff]   ;;  %v13103_v27 = vld [vmem:[%s13428_s4 + $0x1230] ss:$8 sps:$4 sm:$0xff]  }
 0x49a   : > { %8849 = vmatpush1.bf16.msra.mxu1 %v13019_v0  ;;  %v13111_v0 = vld [vmem:[%s13428_s4 + $0x1244] ss:$8 sps:$4 sm:$0xff]  }
 0x49b   : > { %9628 = vmatpush1.bf16.msra.mxu0 %v13022_v2  ;;  %8850 = vmatprep.subr.bf16.mxu1 %v13027_v3  ;;  %v13114_v2 = vld [vmem:[%s13428_s4 + $0x2544] ss:$8 sps:$4 sm:$0xff]   ;;  %v13109_v3 = vld [vmem:[%s13428_s4 + $0x1240] ss:$8 sps:$4 sm:$0xff]  }
 0x49c   : > { %9629 = vmatprep.subr.bf16.mxu0 %v13030_v6  ;;  %v13112_v6 = vld [vmem:[%s13428_s4 + $0x2540] ss:$8 sps:$4 sm:$0xff]  }
 0x49e   : > { %8851 = vmatpush1.bf16.msra.mxu1 %v13025_v48  ;;  %v13117_v48 = vld [vmem:[%s13428_s4 + $0x1254] ss:$8 sps:$4 sm:$0xff]  }
 0x49f   : > { %9630 = vmatpush1.bf16.msra.mxu0 %v13028_v51  ;;  %8852 = vmatprep.subr.bf16.mxu1 %v13033_v58  ;;  %v13120_v51 = vld [vmem:[%s13428_s4 + $0x2554] ss:$8 sps:$4 sm:$0xff]   ;;  %v13115_v58 = vld [vmem:[%s13428_s4 + $0x1250] ss:$8 sps:$4 sm:$0xff]  }
 0x4a0   : > { %9631 = vmatprep.subr.bf16.mxu0 %v13036_v8  ;;  %v13118_v8 = vld [vmem:[%s13428_s4 + $0x2550] ss:$8 sps:$4 sm:$0xff]  }
 0x4a2   : > { %8853 = vmatpush1.bf16.msra.mxu1 %v13031_v55  ;;  %v13123_v55 = vld [vmem:[%s13428_s4 + $0x1264] ss:$8 sps:$4 sm:$0xff]  }
 0x4a3   : > { %9632 = vmatpush1.bf16.msra.mxu0 %v13034_v49  ;;  %8854 = vmatprep.subr.bf16.mxu1 %v13039_v11  ;;  %v13126_v49 = vld [vmem:[%s13428_s4 + $0x2564] ss:$8 sps:$4 sm:$0xff]   ;;  %v13121_v11 = vld [vmem:[%s13428_s4 + $0x1260] ss:$8 sps:$4 sm:$0xff]  }
 0x4a4   : > { %9633 = vmatprep.subr.bf16.mxu0 %v13042_v20  ;;  %v13124_v20 = vld [vmem:[%s13428_s4 + $0x2560] ss:$8 sps:$4 sm:$0xff]  }
 0x4a6   : > { %8855 = vmatpush1.bf16.msra.mxu1 %v13037_v12  ;;  %v13129_v12 = vld [vmem:[%s13428_s4 + $0x1274] ss:$8 sps:$4 sm:$0xff]  }
 0x4a7   : > { %9634 = vmatpush1.bf16.msra.mxu0 %v13040_v13  ;;  %8856 = vmatprep.subr.bf16.mxu1 %v13045_v14  ;;  %v13132_v13 = vld [vmem:[%s13428_s4 + $0x2574] ss:$8 sps:$4 sm:$0xff]   ;;  %v13127_v14 = vld [vmem:[%s13428_s4 + $0x1270] ss:$8 sps:$4 sm:$0xff]  }
 0x4a8   : > { %9635 = vmatprep.subr.bf16.mxu0 %v13048_v1  ;;  %v13130_v1 = vld [vmem:[%s13428_s4 + $0x2570] ss:$8 sps:$4 sm:$0xff]  }
 0x4aa   : > { %8857 = vmatpush1.bf16.msra.mxu1 %v13043_v18  ;;  %v13135_v18 = vld [vmem:[%s13428_s4 + $0x1284] ss:$8 sps:$4 sm:$0xff]  }
 0x4ab   : > { %9636 = vmatpush1.bf16.msra.mxu0 %v13046_v61  ;;  %8858 = vmatprep.subr.bf16.mxu1 %v13051_v31  ;;  %v13138_v61 = vld [vmem:[%s13428_s4 + $0x2584] ss:$8 sps:$4 sm:$0xff]   ;;  %v13133_v31 = vld [vmem:[%s13428_s4 + $0x1280] ss:$8 sps:$4 sm:$0xff]  }
 0x4ac   : > { %9637 = vmatprep.subr.bf16.mxu0 %v13054_v21  ;;  %v13136_v21 = vld [vmem:[%s13428_s4 + $0x2580] ss:$8 sps:$4 sm:$0xff]  }
 0x4ae   : > { %8859 = vmatpush1.bf16.msra.mxu1 %v13049_v43  ;;  %v13141_v43 = vld [vmem:[%s13428_s4 + $0x1294] ss:$8 sps:$4 sm:$0xff]  }
 0x4af   : > { %9638 = vmatpush1.bf16.msra.mxu0 %v13052_v22  ;;  %8860 = vmatprep.subr.bf16.mxu1 %v13057_v38  ;;  %v13144_v22 = vld [vmem:[%s13428_s4 + $0x2594] ss:$8 sps:$4 sm:$0xff]   ;;  %v13139_v38 = vld [vmem:[%s13428_s4 + $0x1290] ss:$8 sps:$4 sm:$0xff]  }
 0x4b0   : > { %9639 = vmatprep.subr.bf16.mxu0 %v13060_v30  ;;  %v13142_v30 = vld [vmem:[%s13428_s4 + $0x2590] ss:$8 sps:$4 sm:$0xff]  }
 0x4b2   : > { %8861 = vmatpush1.bf16.msra.mxu1 %v13055_v23  ;;  %v13147_v23 = vld [vmem:[%s13428_s4 + $0x12a4] ss:$8 sps:$4 sm:$0xff]  }
 0x4b3   : > { %9640 = vmatpush1.bf16.msra.mxu0 %v13058_v26  ;;  %8862 = vmatprep.subr.bf16.mxu1 %v13063_v9  ;;  %v13150_v26 = vld [vmem:[%s13428_s4 + $0x25a4] ss:$8 sps:$4 sm:$0xff]   ;;  %v13145_v9 = vld [vmem:[%s13428_s4 + $0x12a0] ss:$8 sps:$4 sm:$0xff]  }
 0x4b4   : > { %9641 = vmatprep.subr.bf16.mxu0 %v13066_v63  ;;  %v13148_v63 = vld [vmem:[%s13428_s4 + $0x25a0] ss:$8 sps:$4 sm:$0xff]  }
 0x4b6   : > { %8863 = vmatpush1.bf16.msra.mxu1 %v13061_v53  ;;  %v13153_v53 = vld [vmem:[%s13428_s4 + $0x12b4] ss:$8 sps:$4 sm:$0xff]  }
 0x4b7   : > { %9642 = vmatpush1.bf16.msra.mxu0 %v13064_v32  ;;  %8864 = vmatprep.subr.bf16.mxu1 %v13069_v10  ;;  %v13156_v32 = vld [vmem:[%s13428_s4 + $0x25b4] ss:$8 sps:$4 sm:$0xff]   ;;  %v13151_v10 = vld [vmem:[%s13428_s4 + $0x12b0] ss:$8 sps:$4 sm:$0xff]  }
 0x4b8   : > { %9643 = vmatprep.subr.bf16.mxu0 %v13072_v4  ;;  %v13154_v4 = vld [vmem:[%s13428_s4 + $0x25b0] ss:$8 sps:$4 sm:$0xff]  }
 0x4ba   : > { %8865 = vmatpush1.bf16.msra.mxu1 %v13067_v33  ;;  %v13159_v33 = vld [vmem:[%s13428_s4 + $0x12c4] ss:$8 sps:$4 sm:$0xff]  }
 0x4bb   : > { %9644 = vmatpush1.bf16.msra.mxu0 %v13070_v34  ;;  %8866 = vmatprep.subr.bf16.mxu1 %v13075_v62  ;;  %v13162_v34 = vld [vmem:[%s13428_s4 + $0x25c4] ss:$8 sps:$4 sm:$0xff]   ;;  %v13157_v62 = vld [vmem:[%s13428_s4 + $0x12c0] ss:$8 sps:$4 sm:$0xff]  }
 0x4bc   : > { %9645 = vmatprep.subr.bf16.mxu0 %v13078_v40  ;;  %v13160_v40 = vld [vmem:[%s13428_s4 + $0x25c0] ss:$8 sps:$4 sm:$0xff]  }
 0x4be   : > { %8867 = vmatpush1.bf16.msra.mxu1 %v13073_v42  ;;  %v13165_v42 = vld [vmem:[%s13428_s4 + $0x12d4] ss:$8 sps:$4 sm:$0xff]  }
 0x4bf   : > { %9646 = vmatpush1.bf16.msra.mxu0 %v13076_v24  ;;  %8868 = vmatprep.subr.bf16.mxu1 %v13081_v25  ;;  %v13168_v24 = vld [vmem:[%s13428_s4 + $0x25d4] ss:$8 sps:$4 sm:$0xff]   ;;  %v13163_v25 = vld [vmem:[%s13428_s4 + $0x12d0] ss:$8 sps:$4 sm:$0xff]  }
 0x4c0   : > { %9647 = vmatprep.subr.bf16.mxu0 %v13084_v19  ;;  %v13166_v19 = vld [vmem:[%s13428_s4 + $0x25d0] ss:$8 sps:$4 sm:$0xff]  }
 0x4c2   : > { %8869 = vmatpush1.bf16.msra.mxu1 %v13079_v29  ;;  %v13171_v29 = vld [vmem:[%s13428_s4 + $0x12e4] ss:$8 sps:$4 sm:$0xff]  }
 0x4c3   : > { %9648 = vmatpush1.bf16.msra.mxu0 %v13082_v28  ;;  %8879 = vmatprep.subr.bf16.mxu1 %v13087_v45  ;;  %v13174_v28 = vld [vmem:[%s13428_s4 + $0x25e4] ss:$8 sps:$4 sm:$0xff]   ;;  %v13169_v45 = vld [vmem:[%s13428_s4 + $0x12e0] ss:$8 sps:$4 sm:$0xff]  }
 0x4c4   : > { %9658 = vmatprep.subr.bf16.mxu0 %v13090_v7  ;;  %v13172_v7 = vld [vmem:[%s13428_s4 + $0x25e0] ss:$8 sps:$4 sm:$0xff]  }
 0x4c5   : > { %8871 = vmatmul.mubr.bf16.vlgmr.msra.gmra.mrb[0].mxu1 %v1761_v56  ;;  %v13177_v56 = vld [vmem:[%s13428_s4 + $0x12f4] ss:$8 sps:$4 sm:$0xff]  }
 0x4c6   : > { %9650 = vmatmul.mubr.bf16.vlgmr.msra.gmra.mrb[0].mxu0 %v14963_v46  ;;  %8880 = vmatpush1.bf16.msra.mxu1 %v13085_v54  ;;  %v13180_v54 = vld [vmem:[%s13428_s4 + $0x25f4] ss:$8 sps:$4 sm:$0xff]  }
 0x4c7   : > { %9659 = vmatpush1.bf16.msra.mxu0 %v13088_v57  ;;  %8881 = vmatprep.subr.bf16.mxu1 %v13093_v35  ;;  %v13175_v57 = vld [vmem:[%s13428_s4 + $0x12f0] ss:$8 sps:$4 sm:$0xff]  }
 0x4c8   : > { %9660 = vmatprep.subr.bf16.mxu0 %v13096_v37  ;;  %8911 = vmatprep.mubr.bf16.mxu1 %v13520_v5  ;;  %v13106_v5 = vld [vmem:[%s13428_s4 + $0x2530] ss:$8 sps:$4 sm:$0xff]   ;;  %v1983_v37 = vcombine.high %v14963_v46, %v14963_v46 }
 0x4c9   : > { %9690 = vmatprep.mubr.bf16.mxu0 %v1984_v59  ;;  %v13178_v35 = vld [vmem:[%s13428_s4 + $0x25f0] ss:$8 sps:$4 sm:$0xff]   ;;  %v13293_v59 = vmov 1983009808  }
 0x4ca   : > { %8882 = vmatpush1.bf16.msra.mxu1 %v13091_v16  ;;  %v9703_v16 = vunpack.c.l.s4 %v13293_v59 }
 0x4cb   : > { %9661 = vmatpush1.bf16.msra.mxu0 %v13094_v36  ;;  %8883 = vmatprep.subr.bf16.mxu1 %v13099_v60 }
 0x4cc   : > { %9662 = vmatprep.subr.bf16.mxu0 %v13102_v17  ;;  %v9704_v36 = vunpack.c.0.s8 %v9703_v16 }
 0x4ce   : > { %8884 = vmatpush1.bf16.msra.mxu1 %v13097_v50 }
 0x4cf   : > { %9663 = vmatpush1.bf16.msra.mxu0 %v13100_v39  ;;  %8885 = vmatprep.subr.bf16.mxu1 %v13105_v41 }
 0x4d0   : > { %9664 = vmatprep.subr.bf16.mxu0 %v13108_v44 }
 0x4d2   : > { %8886 = vmatpush1.bf16.msra.mxu1 %v13103_v27  ;;  %v9707_v27 = vsub.s32 %v9704_v36, %v13494_v47 }
 0x4d3   : > { %9665 = vmatpush1.bf16.msra.mxu0 %v13106_v5  ;;  %8887 = vmatprep.subr.bf16.mxu1 %v13111_v0 }
 0x4d4   : > { %9666 = vmatprep.subr.bf16.mxu0 %v13114_v2 }
 0x4d6   : > { %8888 = vmatpush1.bf16.msra.mxu1 %v13109_v3 }
 0x4d7   : > { %9667 = vmatpush1.bf16.msra.mxu0 %v13112_v6  ;;  %8889 = vmatprep.subr.bf16.mxu1 %v13117_v48  ;;  %v283_v6 = vld [vmem:[#allocation2] sm:$0xf] }
 0x4d8   : > { %9668 = vmatprep.subr.bf16.mxu0 %v13120_v51  ;;  %v9717_v51 = vld [vmem:[%s267_s6] sm:$0x3] (!%p11117_p6) }
 0x4da   : > { %8890 = vmatpush1.bf16.msra.mxu1 %v13115_v58  ;;  %v9721_v58 = vsub.s32 (!%p11117_p6), 0, %v13494_v47 }
 0x4db   : > { %9669 = vmatpush1.bf16.msra.mxu0 %v13118_v8  ;;  %8891 = vmatprep.subr.bf16.mxu1 %v13123_v55  ;;  %v9725_v8 = vsub.s32 (!%p11117_p6), 1, %v13494_v47 }
 0x4dc   : > { %9670 = vmatprep.subr.bf16.mxu0 %v13126_v49  ;;  %v9722_v55 = vrot.slane (!%p11117_p6), %v9717_v51, %v9721_v58 }
 0x4dd   : > { %v9726_v49 = vrot.slane (!%p11117_p6), %v9717_v51, %v9725_v8 }
 0x4de   : > { %8892 = vmatpush1.bf16.msra.mxu1 %v13121_v11 }
 0x4df   : > { %9671 = vmatpush1.bf16.msra.mxu0 %v13124_v20  ;;  %8893 = vmatprep.subr.bf16.mxu1 %v13129_v12  ;;  %v9727_v11 = vcombine.low (!%p11117_p6), %v9722_v55, %v9726_v49 }
 0x4e0   : > { %9672 = vmatprep.subr.bf16.mxu0 %v13132_v13 }
 0x4e1   : > { %v9734_v12 = vrot.slane (!%p11117_p6), %v9727_v11, %v9707_v27 }
 0x4e2   : > { %8894 = vmatpush1.bf16.msra.mxu1 %v13127_v14 }
 0x4e3   : > { %9673 = vmatpush1.bf16.msra.mxu0 %v13130_v1  ;;  %8895 = vmatprep.subr.bf16.mxu1 %v13135_v18 }
 0x4e4   : > { %9674 = vmatprep.subr.bf16.mxu0 %v13138_v61 }
 0x4e6   : > { %8896 = vmatpush1.bf16.msra.mxu1 %v13133_v31 }
 0x4e7   : > { %9675 = vmatpush1.bf16.msra.mxu0 %v13136_v21  ;;  %8897 = vmatprep.subr.bf16.mxu1 %v13141_v43 }
 0x4e8   : > { %9676 = vmatprep.subr.bf16.mxu0 %v13144_v22 }
 0x4ea   : > { %8898 = vmatpush1.bf16.msra.mxu1 %v13139_v38 }
 0x4eb   : > { %9677 = vmatpush1.bf16.msra.mxu0 %v13142_v30  ;;  %8899 = vmatprep.subr.bf16.mxu1 %v13147_v23 }
 0x4ec   : > { %9678 = vmatprep.subr.bf16.mxu0 %v13150_v26 }
 0x4ee   : > { %8900 = vmatpush1.bf16.msra.mxu1 %v13145_v9 }
 0x4ef   : > { %9679 = vmatpush1.bf16.msra.mxu0 %v13148_v63  ;;  %8901 = vmatprep.subr.bf16.mxu1 %v13153_v53 }
 0x4f0   : > { %9680 = vmatprep.subr.bf16.mxu0 %v13156_v32 }
 0x4f2   : > { %8902 = vmatpush1.bf16.msra.mxu1 %v13151_v10 }
 0x4f3   : > { %9681 = vmatpush1.bf16.msra.mxu0 %v13154_v4  ;;  %8903 = vmatprep.subr.bf16.mxu1 %v13159_v33 }
 0x4f4   : > { %9682 = vmatprep.subr.bf16.mxu0 %v13162_v34 }
 0x4f6   : > { %8904 = vmatpush1.bf16.msra.mxu1 %v13157_v62 }
 0x4f7   : > { %9683 = vmatpush1.bf16.msra.mxu0 %v13160_v40  ;;  %8905 = vmatprep.subr.bf16.mxu1 %v13165_v42 }
 0x4f8   : > { %9684 = vmatprep.subr.bf16.mxu0 %v13168_v24 }
 0x4fa   : > { %8906 = vmatpush1.bf16.msra.mxu1 %v13163_v25 }
 0x4fb   : > { %9685 = vmatpush1.bf16.msra.mxu0 %v13166_v19  ;;  %8907 = vmatprep.subr.bf16.mxu1 %v13171_v29 }
 0x4fc   : > { %9686 = vmatprep.subr.bf16.mxu0 %v13174_v28 }
 0x4fe   : > { %8908 = vmatpush1.bf16.msra.mxu1 %v13169_v45 }
 0x4ff   : > { %9687 = vmatpush1.bf16.msra.mxu0 %v13172_v7  ;;  %8909 = vmatprep.subr.bf16.mxu1 %v13177_v56 }
 0x500   : > { %9688 = vmatprep.subr.bf16.mxu0 %v13180_v54 }
 0x502   : > { %8910 = vmatpush1.bf16.msra.mxu1 %v13175_v57 }
 0x503   : > { %9689 = vmatpush1.bf16.msra.mxu0 %v13178_v35 }
 0x505   : > { %8912 = vmatmul.mubr.bf16.vlgmr.msra.gmra.mrb[0].mxu1 %v13533_v15 }
 0x506   : > { %9691 = vmatmul.mubr.bf16.vlgmr.msra.gmra.mrb[0].mxu0 %v1983_v37 }
 0x5d8   : > { %v8913_v60 = vpop.f32.mrb[0].mxu1 }
 0x5d9   : > { %v9692_v17 = vpop.f32.mrb[0].mxu0  ;;  %v8915_v39 = vpop.f32.mrb[1].mxu1 }
 0x5da   : > { %v11123_v50 = vadd.f32 %v9692_v17, %v8913_v60  ;;  %v9694_v41 = vpop.f32.mrb[1].mxu0  ;;  %v8917_v5 = vpop.f32.mrb[2].mxu1 }
 0x5db   : > { %v11124_v44 = vadd.f32 %v9694_v41, %v8915_v39  ;;  %v9696_v0 = vpop.f32.mrb[2].mxu0  ;;  %v8918_v2 = vpop.f32.mrb[3].mxu1 }
 0x5dc   : > { %v9697_v46 = vpop.f32.mrb[3].mxu0 }
 0x5dd   : > { %v9701_v3 = vcombine.low %v11123_v50, %v11124_v44  ;;  %9715 = sbr.rel (%p11117_p6) target bundleno = 1528 (0x5f8), region = 44 }
 0x5df   : > { %v9708_v48 = vrot.slane %v9701_v3, %v9707_v27 }
 0x5e1   : > { %v9710_v15 = vadd.f32 %v9708_v48, %v283_v6 }
 0x5e3   : > { %9711 = vst [vmem:[#allocation2] sm:$0xf] %v9710_v15 }
 0x5ea   : > { %v9716_v20 = vld [vmem:[#allocation2] sm:$0xf] }
 0x5eb   : > { %v9736_v13 = vadd.f32 %v9734_v12, %v9716_v20 }
 0x5ed   : > { %v9737_v14 = vmax.f32 %v9736_v13, 0.0 }
 0x5ef   : > { %v9745_v1 = vrot.slane %v9737_v14, %v9707_v27 }
 0x5f1   : > { %v9746_v18 = vcombine.high %v9745_v1, %v9745_v1 }
 0x5f3   : > { %v11118_v61 = vpack.c.bf16 %v9746_v18, %v9745_v1 }
 0x5f5   : > { %v9760_v31 = vrot.slane %v11118_v61, %v13501_v52 }
 0x5f7   : > { %11119 = vst.sshfl [vmem:[%s276_s26] sm:$0x5 pattern:$0x73625140] %v9760_v31 }
 0x5f8 PF: > { %s16_s19 = sadd.s32 1, %s13285_s19   ;;  %s15080_s12 = smov %s13261_s13 }
 0x5f9   : > { %p13_p8 = scmp.ge.s32.totalorder %s16_s19, 58   ;;  %s15081_s13 = smov %s13265_s14 }
 0x5fa   : > { %s15082_s14 = smov %s13381_s5  ;;  %s15083_s15 = smov %s13277_s17 }
 0x5fb   : > { %s15084_s16 = smov %s13281_s18  ;;  %s15085_s17 = smov %s15088_s21 }
 0x5fc   : > { %s15086_s18 = smov %s15092_s22  ;;  %15 = sbr.rel (!%p13_p8) target bundleno = 5 (0x5), region = 86 }
 0x603   :  { %9798 = vsyncpa [#allocation4], 1 }
 0x604   :  { %9800 = vsyncpa [#allocation4 + $0x1], 1 }

// kernel: cnn_forward.7
= control target key start
LH: loop header
LB: loop body
LE: loop exit
PB: predicated region body
PF: predicated region fallthrough
CT: control target
= control target key end

     0   :  { %v100_v30 = vlaneseq  ;;  %v561_v34 = vmov 1966171168   ;;  %s697_s0 = inlined_call_operand.vmem [shape: bf16[2,512], index: 0, kind: input, shape index: {}]   ;;  %s698_s1 = inlined_call_operand.vmem [shape: bf16[512,128], index: 1, kind: input, shape index: {}]   ;;  %s699_s2 = inlined_call_operand.vmem [shape: f32[1,128], index: 2, kind: input, shape index: {}]   ;;  %s700_s3 = inlined_call_operand.hbm [shape: f32[2,128], index: 3, kind: output, shape index: {}]  }
   0x1   :  { %v501_v0 = vld [vmem:[%s698_s1 + $0x40] sm:$0xff]   ;;  %v505_v4 = vld [vmem:[%s698_s1 + $0x48] sm:$0xff]   ;;  %v509_v8 = vld [vmem:[%s698_s1 + $0x50] sm:$0xff]   ;;  %v98_v35 = vunpack.c.l.s4 %v561_v34 }
   0x2   :  { %v502_v1 = vld [vmem:[%s698_s1 + $0xc0] sm:$0xff]   ;;  %455 = vmatprep.subr.bf16.mxu0 %v501_v0  ;;  %v506_v5 = vld [vmem:[%s698_s1 + $0xc8] sm:$0xff]   ;;  %v510_v9 = vld [vmem:[%s698_s1 + $0xd0] sm:$0xff]   ;;  %v101_v36 = vshrl.u32 %v100_v30, 7 }
   0x3   :  { %v503_v2 = vld [vmem:[%s698_s1] sm:$0xff]   ;;  %477 = vmatprep.subr.bf16.mxu1 %v502_v1  ;;  %v507_v6 = vld [vmem:[%s698_s1 + $0x8] sm:$0xff]   ;;  %v511_v10 = vld [vmem:[%s698_s1 + $0x10] sm:$0xff]  }
   0x4   :  { %v504_v3 = vld [vmem:[%s698_s1 + $0x80] sm:$0xff]   ;;  %456 = vmatpush3.bf16.msra.mxu0 %v503_v2  ;;  %v508_v7 = vld [vmem:[%s698_s1 + $0x88] sm:$0xff]   ;;  %v512_v11 = vld [vmem:[%s698_s1 + $0x90] sm:$0xff]  }
   0x5   :  { %478 = vmatpush3.bf16.msra.mxu1 %v504_v3  ;;  %457 = vmatprep.subr.bf16.mxu0 %v505_v4  ;;  %v513_v12 = vld [vmem:[%s698_s1 + $0x58] sm:$0xff]   ;;  %v517_v16 = vld [vmem:[%s698_s1 + $0x60] sm:$0xff]   ;;  %v521_v20 = vld [vmem:[%s698_s1 + $0x68] sm:$0xff]  }
   0x6   :  { %479 = vmatprep.subr.bf16.mxu1 %v506_v5  ;;  %v514_v13 = vld [vmem:[%s698_s1 + $0xd8] sm:$0xff]   ;;  %v518_v17 = vld [vmem:[%s698_s1 + $0xe0] sm:$0xff]   ;;  %v522_v21 = vld [vmem:[%s698_s1 + $0xe8] sm:$0xff]  }
   0x7   :  { %v515_v14 = vld [vmem:[%s698_s1 + $0x18] sm:$0xff]   ;;  %v519_v18 = vld [vmem:[%s698_s1 + $0x20] sm:$0xff]   ;;  %v523_v22 = vld [vmem:[%s698_s1 + $0x28] sm:$0xff]  }
   0x8   :  { %458 = vmatpush3.bf16.msra.mxu0 %v507_v6  ;;  %v516_v15 = vld [vmem:[%s698_s1 + $0x98] sm:$0xff]   ;;  %v520_v19 = vld [vmem:[%s698_s1 + $0xa0] sm:$0xff]   ;;  %v524_v23 = vld [vmem:[%s698_s1 + $0xa8] sm:$0xff]  }
   0x9   :  { %480 = vmatpush3.bf16.msra.mxu1 %v508_v7  ;;  %459 = vmatprep.subr.bf16.mxu0 %v509_v8  ;;  %v525_v24 = vld [vmem:[%s698_s1 + $0x70] sm:$0xff]   ;;  %v529_v28 = vld [vmem:[%s698_s1 + $0x78] sm:$0xff]   ;;  %v422_v33 = vld.sshfl [vmem:[%s697_s0] sm:$0x33 pattern:$0x75316420] }
   0xa   :  { %481 = vmatprep.subr.bf16.mxu1 %v510_v9  ;;  %v526_v25 = vld [vmem:[%s698_s1 + $0xf0] sm:$0xff]   ;;  %v530_v29 = vld [vmem:[%s698_s1 + $0xf8] sm:$0xff]  }
   0xb   :  { %v527_v26 = vld [vmem:[%s698_s1 + $0x30] sm:$0xff]   ;;  %v531_v31 = vld [vmem:[%s698_s1 + $0x38] sm:$0xff]  }
   0xc   :  { %460 = vmatpush3.bf16.msra.mxu0 %v511_v10  ;;  %v528_v27 = vld [vmem:[%s698_s1 + $0xb0] sm:$0xff]   ;;  %v532_v32 = vld [vmem:[%s698_s1 + $0xb8] sm:$0xff]  }
   0xd   :  { %482 = vmatpush3.bf16.msra.mxu1 %v512_v11  ;;  %461 = vmatprep.subr.bf16.mxu0 %v513_v12 }
   0xe   :  { %483 = vmatprep.subr.bf16.mxu1 %v514_v13 }
  0x10   :  { %462 = vmatpush3.bf16.msra.mxu0 %v515_v14 }
  0x11   :  { %484 = vmatpush3.bf16.msra.mxu1 %v516_v15  ;;  %463 = vmatprep.subr.bf16.mxu0 %v517_v16 }
  0x12   :  { %485 = vmatprep.subr.bf16.mxu1 %v518_v17 }
  0x14   :  { %464 = vmatpush3.bf16.msra.mxu0 %v519_v18 }
  0x15   :  { %486 = vmatpush3.bf16.msra.mxu1 %v520_v19  ;;  %465 = vmatprep.subr.bf16.mxu0 %v521_v20 }
  0x16   :  { %487 = vmatprep.subr.bf16.mxu1 %v522_v21 }
  0x18   :  { %466 = vmatpush3.bf16.msra.mxu0 %v523_v22 }
  0x19   :  { %488 = vmatpush3.bf16.msra.mxu1 %v524_v23  ;;  %467 = vmatprep.subr.bf16.mxu0 %v525_v24 }
  0x1a   :  { %489 = vmatprep.subr.bf16.mxu1 %v526_v25 }
  0x1c   :  { %468 = vmatpush3.bf16.msra.mxu0 %v527_v26 }
  0x1d   :  { %490 = vmatpush3.bf16.msra.mxu1 %v528_v27  ;;  %469 = vmatprep.subr.bf16.mxu0 %v529_v28 }
  0x1e   :  { %491 = vmatprep.subr.bf16.mxu1 %v530_v29 }
  0x20   :  { %470 = vmatpush3.bf16.msra.mxu0 %v531_v31 }
  0x21   :  { %492 = vmatpush3.bf16.msra.mxu1 %v532_v32 }
  0x22   :  { %8 = vsyncpa [#allocation3], 0  ;;  %v96_v37 = vcombine.high %v422_v33, %v422_v33  ;;  %v99_v38 = vunpack.c.0.s8 %v98_v35  ;;  %v421_v45 = vld [vmem:[%s699_s2] ss:$0 sm:$0xff]  ;;  %v391_v52 = vand.u32 127, %v100_v30  ;;  %vm394_vm1 = vcmask 1041408  }
  0x23   :  { %s562_s0 = smov [#allocation2]  }
  0x24   :  { %v102_v39 = vsub.s32 %v99_v38, %v101_v36  ;;  %vm392_vm0 = vcmp.lt.s32.totalorder %v391_v52, 13  ;;  %s413_s2 = sshll.u32 %s562_s0, 4  ;;  %s414_s2 = int_to_ptr.vmem [resolvable:$true] %s413_s2 }
  0x25   :  { %s537_s25 = scalar_lea.vmem %s414_s2, 32  ;;  %p542_p1 = scmp.lt.s32.totalorder %s414_s2, %s414_s2 }
  0x26   :  { %v110_v40 = vrot.slane %v96_v37, %v102_v39  ;;  %v103_v41 = vrot.slane %v422_v33, %v102_v39  ;;  %p538_p0 = scmp.ne.s32.totalorder %s414_s2, %s537_s25  ;;  %p543_p2 = scmp.lt.s32.totalorder %s537_s25, %s537_s25 }
  0x28   :  { %341 = vmatprep.mubr.bf16.mxu0 %v110_v40  ;;  %v112_v42 = vcombine.high %v110_v40, %v110_v40  ;;  %v111_v43 = vcombine.high %v103_v41, %v103_v41  ;;  %p544_p3 = por %p543_p2, %p542_p1 }
  0x29   :  { %342 = vmatmul.mubr.bf16.vlgmr.msra.gmra.mrb[0].mxu0 %v103_v41 }
  0x2a   :  { %381 = vmatprep.mubr.bf16.mxu1 %v112_v42  ;;  %p545_p4 = pnand %p544_p3, %p538_p0 }
  0x2b   :  { %382 = vmatmul.mubr.bf16.vlgmr.msra.gmra.mrb[0].mxu1 %v111_v43 }
  0xfc   :  { %v471_v44 = vpop.f32.mrb[0].mxu0 }
  0xfd   :  { %v472_v46 = vpop.f32.mrb[1].mxu0 }
  0xfe   :  { %v493_v47 = vpop.f32.mrb[0].mxu1  ;;  %v473_v48 = vadd.f32 %v472_v46, %v471_v44  ;;  %v474_v49 = vpop.f32.mrb[2].mxu0 }
  0xff   :  { %v494_v50 = vpop.f32.mrb[1].mxu1  ;;  %v475_v51 = vpop.f32.mrb[3].mxu0 }
 0x100   :  { %v344_v53 = vadd.f32 %v473_v48, %v421_v45  ;;  %v495_v54 = vadd.f32 %v494_v50, %v493_v47  ;;  %v496_v55 = vpop.f32.mrb[2].mxu1 }
 0x101   :  { %v497_v56 = vpop.f32.mrb[3].mxu1 }
 0x102   :  { %v384_v57 = vadd.f32 %v495_v54, %v344_v53 }
 0x104   :  { %v389_v58 = vmax.f32 %v384_v57, 0.0 }
 0x106   :  { %v393_v59 = vsel %vm392_vm0, %v389_v58, -inf }
 0x107   :  { %v395_v60 = vsel %vm394_vm1, %v393_v59, -inf }
 0x108   :  { %396 = vmax.xlane.f32.xlu0 %v395_v60 }
 0x195   :  { %v397_v61 = vpop.xlane.xlu0 %396 }
 0x196   :  { %v398_v62 = vsub.f32 %v393_v59, %v397_v61 }
 0x198   :  { %v399_v63 = vmul.f32 1.442695, %v398_v62 }
 0x19a   :  { %533 = vpow2.f32 %v399_v63 }
 0x1a4   :  { %v534_v0 = vpop.eup %533 }
 0x1a5   :  { %v401_v1 = vsel %vm394_vm1, %v534_v0, 0.0 }
 0x1a6   :  { %402 = vadd.xlane.f32.xlu0 %v401_v1 }
 0x233   :  { %v403_v2 = vpop.xlane.xlu0 %402 }
 0x234   :  { %535 = vrcp.f32 %v403_v2 }
 0x23e   :  { %v536_v3 = vpop.eup %535 }
 0x23f   :  { %v405_v4 = vmul.f32 %v536_v3, %v534_v0 }
 0x241   :  { %406 = vst [vmem:[#allocation2] sm:$0x3] %v405_v4 }
 0x242   :  { %548 = shalt.err (!%p545_p4)
}
 0x243   :  { %s549_s28 = scalar_lea.hbm %s700_s3, 32 }
 0x244   :  { %p550_p5 = scmp.ne.s32.totalorder %s700_s3, %s549_s28  ;;  %p553_p6 = scmp.lt.u32.totalorder %s549_s28, %s700_s3 }
 0x246   :  { %p555_p7 = pnand %p553_p6, %p550_p5 }
 0x248   :  { %558 = shalt.err (!%p555_p7)
}
 0x249   :  { %416 = dma.vmem_to_hbm [thread:$0]  %s414_s2, 32, %s700_s3, [#allocation3]  }
 0x24a   :  { %559 = dma.done.wait [#allocation3], 32  }
 0x24b   :  { %560 = vsyncadd [#allocation3], 4294967264 }
 0x24c   :  { %420 = vsyncpa [#allocation3], 1 }

</bundles_post_ra>
